<compile_context>
chip_gen: v6e
topology: v6e:2x2x1
jax: 0.10.0
libtpu: 0.0.40
codegen_flags: <defaults>
</compile_context>

<pallas_src>
import jax
import jax.numpy as jnp
from jax.experimental import pallas as pl
from jax.experimental.pallas import tpu as pltpu


_VMEM_LIMIT = 32 * 1024 * 1024   # need <~8 MiB/step; safe on v5e/v6e/v7x
_BATCH_TILE = 8                  # samples per grid step
_HEAD_PAD = 128                  # lane-dense output columns for the tiny head


def _round_up(x, m):
    return (x + m - 1) // m * m


def _wspec(arr):
    """Full-array BlockSpec (weight stays VMEM resident across grid steps)."""
    return pl.BlockSpec(arr.shape, lambda b: (0,) * arr.ndim)


# ---------------------------------------------------------------------------
# Kernel 1: fused conv stack (conv1+ReLU, conv2+ReLU, conv3+ReLU)
#   Input tile: (tb, 11, 11, 64*C) bf16  = space-to-depth(8) packed 88x88 frame
#   Output    : (tb*49, 64) bf16         = conv3 activations, rows (b, h, w)
# ---------------------------------------------------------------------------
def _conv_stack_kernel(x_ref, c1w_ref, c1b_ref, c2w_ref, c2b_ref,
                       c3w_ref, c3b_ref, o_ref):
    tb = x_ref.shape[0]
    x = x_ref[...]                                        # (tb, 11, 11, 64C)

    # conv1: 8x8 stride 4.  A 2x2 window over 8x8 input blocks; the packed
    # (256C, 128) weight emits all four output-pixel phases (r, c) x 32 ch.
    p1 = jnp.concatenate(
        [x[:, bi:bi + 10, bj:bj + 10, :] for bi in (0, 1) for bj in (0, 1)],
        axis=-1)                                          # (tb, 10, 10, 256C)
    p1 = p1.reshape(tb * 100, p1.shape[-1])
    h1 = jnp.dot(p1, c1w_ref[...], preferred_element_type=jnp.float32)
    h1 = jnp.maximum(h1 + c1b_ref[...], 0.0).astype(jnp.bfloat16)
    h1 = h1.reshape(tb, 10, 10, 128)                      # 2x2-blocked 20x20x32

    # conv2: 4x4 stride 2 == 2x2 window over the 2x2-blocked conv1 output.
    p2 = jnp.concatenate(
        [h1[:, bi:bi + 9, bj:bj + 9, :] for bi in (0, 1) for bj in (0, 1)],
        axis=-1)                                          # (tb, 9, 9, 512)
    p2 = p2.reshape(tb * 81, 512)
    h2 = jnp.dot(p2, c2w_ref[...], preferred_element_type=jnp.float32)
    h2 = jnp.maximum(h2 + c2b_ref[...], 0.0).astype(jnp.bfloat16)
    h2 = h2.reshape(tb, 9, 9, 64)

    # conv3: 3x3 stride 1.
    p3 = jnp.concatenate(
        [h2[:, i:i + 7, j:j + 7, :] for i in range(3) for j in range(3)],
        axis=-1)                                          # (tb, 7, 7, 576)
    p3 = p3.reshape(tb * 49, 576)
    h3 = jnp.dot(p3, c3w_ref[...], preferred_element_type=jnp.float32)
    h3 = jnp.maximum(h3 + c3b_ref[...], 0.0)
    o_ref[...] = h3.astype(o_ref.dtype)                   # (tb*49, 64)


# ---------------------------------------------------------------------------
# Kernel 2: fused MLP head  relu(X @ W1 + b1) @ W2 + b2   (full-K, no scratch)
# ---------------------------------------------------------------------------
def _mlp_head_kernel(x_ref, w1_ref, b1_ref, w2_ref, b2_ref, o_ref):
    h = jnp.dot(x_ref[...], w1_ref[...], preferred_element_type=jnp.float32)
    h = jnp.maximum(h + b1_ref[...], 0.0).astype(jnp.bfloat16)      # (tb, 512)
    out = jnp.dot(h, w2_ref[...], preferred_element_type=jnp.float32)
    o_ref[...] = out + b2_ref[...]                                   # (tb, 128)


# ---------------------------------------------------------------------------
# Parameters: PyTorch-style init + one-time packing into GEMM matrices
# ---------------------------------------------------------------------------
def init_qnetwork_params(key, in_channels, actions_size):
    ks = jax.random.split(key, 10)

    def u(k, shape, fan_in):
        bound = 1.0 / jnp.sqrt(jnp.float32(fan_in))
        return jax.random.uniform(k, shape, jnp.float32, -bound, bound)

    p = {}
    p["c1_w"] = u(ks[0], (32, in_channels, 8, 8), in_channels * 64)
    p["c1_b"] = u(ks[1], (32,), in_channels * 64)
    p["c2_w"] = u(ks[2], (64, 32, 4, 4), 32 * 16)
    p["c2_b"] = u(ks[3], (64,), 32 * 16)
    p["c3_w"] = u(ks[4], (64, 64, 3, 3), 64 * 9)
    p["c3_b"] = u(ks[5], (64,), 64 * 9)
    p["l1_w"] = u(ks[6], (512, 3136), 3136)
    p["l1_b"] = u(ks[7], (512,), 3136)
    p["l2_w"] = u(ks[8], (actions_size, 512), 512)
    p["l2_b"] = u(ks[9], (actions_size,), 512)
    return p


def prepare_params(params, actions_size):
    """One-time weight packing (run once, outside the per-step forward)."""

    def conv_bias(b):
        return b.reshape(1, -1).astype(jnp.float32)

    packed = {}

    # conv1 (8x8/s4): pack as a (256C, 128) GEMM weight acting on a 2x2 window
    # of space-to-depth(8) input blocks.  Columns are (r, c, o): the 2x2 output
    # -pixel phases times 32 channels.  For phase (r, c), input block position
    # (bi, rr) maps to kernel row kh = 8*bi + rr - 4*r (zero outside [0, 8)).
    w = params["c1_w"]                                    # (32, C, 8, 8)
    O1, C = int(w.shape[0]), int(w.shape[1])
    w_hwio = jnp.transpose(w, (2, 3, 1, 0))               # (8, 8, C, 32)
    phase_blocks = []
    for r in (0, 1):
        for c in (0, 1):
            wp = jnp.pad(w_hwio, ((4 * r, 8 - 4 * r), (4 * c, 8 - 4 * c),
                                  (0, 0), (0, 0)))        # (16, 16, C, 32)
            wp = wp.reshape(2, 8, 2, 8, C, O1)            # (bi, rr, bj, cc, C, O)
            phase_blocks.append(wp.transpose(0, 2, 1, 3, 4, 5))
    ws = jnp.stack(phase_blocks, axis=-2)                 # (2,2,8,8,C,4,32)
    packed["c1_w"] = ws.reshape(256 * C, 4 * O1).astype(jnp.bfloat16)
    packed["c1_b"] = conv_bias(jnp.tile(params["c1_b"], 4))          # (1, 128)

    # conv2 (4x4/s2): im2col rows ordered (bi, bj, r, c, cin) to match conv1's
    # phase-packed output channels; kh = 2*bi + r, kw = 2*bj + c.
    w = jnp.transpose(params["c2_w"], (2, 3, 1, 0))       # (4, 4, 32, 64)
    w = w.reshape(2, 2, 2, 2, 32, 64).transpose(0, 2, 1, 3, 4, 5)
    packed["c2_w"] = w.reshape(512, 64).astype(jnp.bfloat16)
    packed["c2_b"] = conv_bias(params["c2_b"])

    # conv3 (3x3/s1): standard (kh, kw, cin) im2col rows.
    w = jnp.transpose(params["c3_w"], (2, 3, 1, 0)).reshape(576, 64)
    packed["c3_w"] = w.astype(jnp.bfloat16)
    packed["c3_b"] = conv_bias(params["c3_b"])

    # Linear1: permute PyTorch's NCHW-flatten columns to NHWC-flatten order so
    # the conv kernel's (h, w, c) output feeds it directly; no K padding.
    w1 = params["l1_w"].reshape(512, 64, 7, 7)
    w1 = jnp.transpose(w1, (0, 2, 3, 1)).reshape(512, 3136).T
    packed["l1_w"] = w1.astype(jnp.bfloat16)
    packed["l1_b"] = params["l1_b"].reshape(1, 512).astype(jnp.float32)

    # Linear2: transpose to (512, A) and zero-pad output lanes to 128 so the
    # head's HBM store is lane-dense; the wrapper slices back to A.
    w2 = jnp.pad(params["l2_w"].T, ((0, 0), (0, _HEAD_PAD - actions_size)))
    packed["l2_w"] = w2.astype(jnp.bfloat16)
    b2 = jnp.pad(params["l2_b"], (0, _HEAD_PAD - actions_size))
    packed["l2_b"] = b2.reshape(1, _HEAD_PAD).astype(jnp.float32)
    return packed


# ---------------------------------------------------------------------------
# Forward pass (inference)
# ---------------------------------------------------------------------------
def qnetwork_forward(packed, x_nchw, *, actions_size):
    """x_nchw: (N, C, 84, 84) float32 -> (N, actions_size) float32."""
    N, C, H, W = x_nchw.shape
    assert H == 84 and W == 84, "QNetwork requires 84x84 inputs (Linear(3136, 512))"

    # Input prep (read-once tensor): NCHW->NHWC, zero-pad 84->88, pack into
    # 8x8 spatial blocks with features ordered (row, col, cin), cast to bf16.
    x = jnp.transpose(x_nchw, (0, 2, 3, 1))
    x = jnp.pad(x, ((0, 0), (0, 4), (0, 4), (0, 0)))
    x = x.reshape(N, 11, 8, 11, 8, C).transpose(0, 1, 3, 2, 4, 5)
    x = x.reshape(N, 11, 11, 64 * C).astype(jnp.bfloat16)

    tb = min(_BATCH_TILE, N)
    Np = _round_up(N, tb)
    if Np != N:
        x = jnp.pad(x, ((0, Np - N), (0, 0), (0, 0), (0, 0)))
    nb = Np // tb

    cparams = pltpu.CompilerParams(
        dimension_semantics=("parallel",),
        vmem_limit_bytes=_VMEM_LIMIT,
    )

    conv_out = pl.pallas_call(
        _conv_stack_kernel,
        out_shape=jax.ShapeDtypeStruct((Np * 49, 64), jnp.bfloat16),
        grid=(nb,),
        in_specs=[
            pl.BlockSpec((tb, 11, 11, 64 * C), lambda b: (b, 0, 0, 0)),
            _wspec(packed["c1_w"]), _wspec(packed["c1_b"]),
            _wspec(packed["c2_w"]), _wspec(packed["c2_b"]),
            _wspec(packed["c3_w"]), _wspec(packed["c3_b"]),
        ],
        out_specs=pl.BlockSpec((tb * 49, 64), lambda b: (b, 0)),
        compiler_params=cparams,
    )(x, packed["c1_w"], packed["c1_b"], packed["c2_w"], packed["c2_b"],
      packed["c3_w"], packed["c3_b"])

    # Flatten boundary kept in XLA: (Np*49, 64) -> (Np, 3136), ~6 KB/sample.
    flat = conv_out.reshape(Np, 3136)

    out = pl.pallas_call(
        _mlp_head_kernel,
        out_shape=jax.ShapeDtypeStruct((Np, _HEAD_PAD), jnp.float32),
        grid=(nb,),
        in_specs=[
            pl.BlockSpec((tb, 3136), lambda b: (b, 0)),
            _wspec(packed["l1_w"]), _wspec(packed["l1_b"]),
            _wspec(packed["l2_w"]), _wspec(packed["l2_b"]),
        ],
        out_specs=pl.BlockSpec((tb, _HEAD_PAD), lambda b: (b, 0)),
        compiler_params=cparams,
    )(flat, packed["l1_w"], packed["l1_b"], packed["l2_w"], packed["l2_b"])

    return out[:N, :actions_size]
    # TODO(synk): NoisyLinear (noise=True branch) and the aSGLD optimizer are
    # training-time constructs, not part of the default inference forward.


if __name__ == "__main__":
    key = jax.random.PRNGKey(0)
    k_param, k_x = jax.random.split(key)

    batch, in_channels, actions_size = 2, 4, 6
    # Spatial must be 84x84 so the hard-coded Linear(3136, 512) matches
    # (64 * 7 * 7 = 3136), exactly as in the PyTorch module.
    x = jax.random.normal(k_x, (batch, in_channels, 84, 84), jnp.float32)

    params = init_qnetwork_params(k_param, in_channels, actions_size)
    packed = prepare_params(params, actions_size)     # one-time weight packing
    packed = jax.tree_util.tree_map(jnp.asarray, packed)
    jax.block_until_ready(packed)

    fwd = jax.jit(qnetwork_forward, static_argnames="actions_size")
    out = fwd(packed, x, actions_size=actions_size)
    jax.block_until_ready(out)

    assert out.shape == (batch, actions_size)
    assert out.dtype == jnp.float32
    print("KERNEL_OK")
</pallas_src>

<mosaic_0001>
module attributes {stable_mosaic.version = 11 : i64} {
  func.func @_conv_stack_kernel(%arg0: i32, %arg1: memref<2x11x11x256xbf16, #tpu.memory_space<vmem>>, %arg2: memref<1024x128xbf16, #tpu.memory_space<vmem>>, %arg3: memref<1x128xf32, #tpu.memory_space<vmem>>, %arg4: memref<512x64xbf16, #tpu.memory_space<vmem>>, %arg5: memref<1x64xf32, #tpu.memory_space<vmem>>, %arg6: memref<576x64xbf16, #tpu.memory_space<vmem>>, %arg7: memref<1x64xf32, #tpu.memory_space<vmem>>, %arg8: memref<98x64xbf16, #tpu.memory_space<vmem>>) attributes {dimension_semantics = [#tpu.dimension_semantics<parallel>], iteration_bounds = array<i64: 1>, scalar_prefetch = 0 : i64, scratch_operands = 0 : i64, tpu.core_type = #tpu.core_type<tc>, window_params = [{transform_indices = @transform_0, window_bounds = array<i64: 2, 11, 11, 256>}, {pipeline_mode = #tpu.pipeline_mode<synchronous>, transform_indices = @transform_1, window_bounds = array<i64: 1024, 128>}, {pipeline_mode = #tpu.pipeline_mode<synchronous>, transform_indices = @transform_2, window_bounds = array<i64: 1, 128>}, {pipeline_mode = #tpu.pipeline_mode<synchronous>, transform_indices = @transform_3, window_bounds = array<i64: 512, 64>}, {pipeline_mode = #tpu.pipeline_mode<synchronous>, transform_indices = @transform_4, window_bounds = array<i64: 1, 64>}, {pipeline_mode = #tpu.pipeline_mode<synchronous>, transform_indices = @transform_5, window_bounds = array<i64: 576, 64>}, {pipeline_mode = #tpu.pipeline_mode<synchronous>, transform_indices = @transform_6, window_bounds = array<i64: 1, 64>}, {transform_indices = @transform_7, window_bounds = array<i64: 98, 64>}]} {
    %c0 = arith.constant 0 : index
    %c0_0 = arith.constant 0 : index
    %c0_1 = arith.constant 0 : index
    %c0_2 = arith.constant 0 : index
    %0 = vector.load %arg1[%c0, %c0_0, %c0_1, %c0_2] : memref<2x11x11x256xbf16, #tpu.memory_space<vmem>>, vector<2x11x11x256xbf16>
    %1 = vector.extract_strided_slice %0 {offsets = [0, 0, 0, 0], sizes = [2, 10, 10, 256], strides = [1, 1, 1, 1]} : vector<2x11x11x256xbf16> to vector<2x10x10x256xbf16>
    %2 = vector.extract_strided_slice %0 {offsets = [0, 0, 1, 0], sizes = [2, 10, 10, 256], strides = [1, 1, 1, 1]} : vector<2x11x11x256xbf16> to vector<2x10x10x256xbf16>
    %3 = vector.extract_strided_slice %0 {offsets = [0, 1, 0, 0], sizes = [2, 10, 10, 256], strides = [1, 1, 1, 1]} : vector<2x11x11x256xbf16> to vector<2x10x10x256xbf16>
    %4 = vector.extract_strided_slice %0 {offsets = [0, 1, 1, 0], sizes = [2, 10, 10, 256], strides = [1, 1, 1, 1]} : vector<2x11x11x256xbf16> to vector<2x10x10x256xbf16>
    %5 = tpu.concatenate %1, %2, %3, %4 in 3 : vector<2x10x10x256xbf16>, vector<2x10x10x256xbf16>, vector<2x10x10x256xbf16>, vector<2x10x10x256xbf16> -> vector<2x10x10x1024xbf16>
    %6 = vector.shape_cast %5 : vector<2x10x10x1024xbf16> to vector<200x1024xbf16>
    %c0_3 = arith.constant 0 : index
    %c0_4 = arith.constant 0 : index
    %7 = vector.load %arg2[%c0_3, %c0_4] : memref<1024x128xbf16, #tpu.memory_space<vmem>>, vector<1024x128xbf16>
    %cst = arith.constant dense<0.000000e+00> : vector<200x128xf32>
    %8 = tpu.matmul %6, %7, %cst {dimension_numbers = #tpu.dot_dimension_numbers<[1], [0], [0], [1], [0, 0, 1, 1], [], []>} : vector<200x1024xbf16>, vector<1024x128xbf16>, vector<200x128xf32> -> vector<200x128xf32>
    %c0_5 = arith.constant 0 : index
    %c0_6 = arith.constant 0 : index
    %9 = vector.load %arg3[%c0_5, %c0_6] : memref<1x128xf32, #tpu.memory_space<vmem>>, vector<1x128xf32>
    %10 = vector.broadcast %9 : vector<1x128xf32> to vector<200x128xf32>
    %11 = arith.addf %8, %10 : vector<200x128xf32>
    %cst_7 = arith.constant 0.000000e+00 : f32
    %12 = vector.broadcast %cst_7 : f32 to vector<200x128xf32>
    %13 = arith.maximumf %11, %12 : vector<200x128xf32>
    %14 = arith.truncf %13 : vector<200x128xf32> to vector<200x128xbf16>
    %15 = vector.shape_cast %14 : vector<200x128xbf16> to vector<2x10x10x128xbf16>
    %16 = vector.extract_strided_slice %15 {offsets = [0, 0, 0, 0], sizes = [2, 9, 9, 128], strides = [1, 1, 1, 1]} : vector<2x10x10x128xbf16> to vector<2x9x9x128xbf16>
    %17 = vector.extract_strided_slice %15 {offsets = [0, 0, 1, 0], sizes = [2, 9, 9, 128], strides = [1, 1, 1, 1]} : vector<2x10x10x128xbf16> to vector<2x9x9x128xbf16>
    %18 = vector.extract_strided_slice %15 {offsets = [0, 1, 0, 0], sizes = [2, 9, 9, 128], strides = [1, 1, 1, 1]} : vector<2x10x10x128xbf16> to vector<2x9x9x128xbf16>
    %19 = vector.extract_strided_slice %15 {offsets = [0, 1, 1, 0], sizes = [2, 9, 9, 128], strides = [1, 1, 1, 1]} : vector<2x10x10x128xbf16> to vector<2x9x9x128xbf16>
    %20 = tpu.concatenate %16, %17, %18, %19 in 3 : vector<2x9x9x128xbf16>, vector<2x9x9x128xbf16>, vector<2x9x9x128xbf16>, vector<2x9x9x128xbf16> -> vector<2x9x9x512xbf16>
    %21 = vector.shape_cast %20 : vector<2x9x9x512xbf16> to vector<162x512xbf16>
    %c0_8 = arith.constant 0 : index
    %c0_9 = arith.constant 0 : index
    %22 = vector.load %arg4[%c0_8, %c0_9] : memref<512x64xbf16, #tpu.memory_space<vmem>>, vector<512x64xbf16>
    %cst_10 = arith.constant dense<0.000000e+00> : vector<162x64xf32>
    %23 = tpu.matmul %21, %22, %cst_10 {dimension_numbers = #tpu.dot_dimension_numbers<[1], [0], [0], [1], [0, 0, 1, 1], [], []>} : vector<162x512xbf16>, vector<512x64xbf16>, vector<162x64xf32> -> vector<162x64xf32>
    %c0_11 = arith.constant 0 : index
    %c0_12 = arith.constant 0 : index
    %24 = vector.load %arg5[%c0_11, %c0_12] : memref<1x64xf32, #tpu.memory_space<vmem>>, vector<1x64xf32>
    %25 = vector.broadcast %24 : vector<1x64xf32> to vector<162x64xf32>
    %26 = arith.addf %23, %25 : vector<162x64xf32>
    %cst_13 = arith.constant 0.000000e+00 : f32
    %27 = vector.broadcast %cst_13 : f32 to vector<162x64xf32>
    %28 = arith.maximumf %26, %27 : vector<162x64xf32>
    %29 = arith.truncf %28 : vector<162x64xf32> to vector<162x64xbf16>
    %30 = vector.shape_cast %29 : vector<162x64xbf16> to vector<2x9x9x64xbf16>
    %31 = vector.extract_strided_slice %30 {offsets = [0, 0, 0, 0], sizes = [2, 7, 7, 64], strides = [1, 1, 1, 1]} : vector<2x9x9x64xbf16> to vector<2x7x7x64xbf16>
    %32 = vector.extract_strided_slice %30 {offsets = [0, 0, 1, 0], sizes = [2, 7, 7, 64], strides = [1, 1, 1, 1]} : vector<2x9x9x64xbf16> to vector<2x7x7x64xbf16>
    %33 = vector.extract_strided_slice %30 {offsets = [0, 0, 2, 0], sizes = [2, 7, 7, 64], strides = [1, 1, 1, 1]} : vector<2x9x9x64xbf16> to vector<2x7x7x64xbf16>
    %34 = vector.extract_strided_slice %30 {offsets = [0, 1, 0, 0], sizes = [2, 7, 7, 64], strides = [1, 1, 1, 1]} : vector<2x9x9x64xbf16> to vector<2x7x7x64xbf16>
    %35 = vector.extract_strided_slice %30 {offsets = [0, 1, 1, 0], sizes = [2, 7, 7, 64], strides = [1, 1, 1, 1]} : vector<2x9x9x64xbf16> to vector<2x7x7x64xbf16>
    %36 = vector.extract_strided_slice %30 {offsets = [0, 1, 2, 0], sizes = [2, 7, 7, 64], strides = [1, 1, 1, 1]} : vector<2x9x9x64xbf16> to vector<2x7x7x64xbf16>
    %37 = vector.extract_strided_slice %30 {offsets = [0, 2, 0, 0], sizes = [2, 7, 7, 64], strides = [1, 1, 1, 1]} : vector<2x9x9x64xbf16> to vector<2x7x7x64xbf16>
    %38 = vector.extract_strided_slice %30 {offsets = [0, 2, 1, 0], sizes = [2, 7, 7, 64], strides = [1, 1, 1, 1]} : vector<2x9x9x64xbf16> to vector<2x7x7x64xbf16>
    %39 = vector.extract_strided_slice %30 {offsets = [0, 2, 2, 0], sizes = [2, 7, 7, 64], strides = [1, 1, 1, 1]} : vector<2x9x9x64xbf16> to vector<2x7x7x64xbf16>
    %40 = tpu.concatenate %31, %32, %33, %34, %35, %36, %37, %38, %39 in 3 : vector<2x7x7x64xbf16>, vector<2x7x7x64xbf16>, vector<2x7x7x64xbf16>, vector<2x7x7x64xbf16>, vector<2x7x7x64xbf16>, vector<2x7x7x64xbf16>, vector<2x7x7x64xbf16>, vector<2x7x7x64xbf16>, vector<2x7x7x64xbf16> -> vector<2x7x7x576xbf16>
    %41 = vector.shape_cast %40 : vector<2x7x7x576xbf16> to vector<98x576xbf16>
    %c0_14 = arith.constant 0 : index
    %c0_15 = arith.constant 0 : index
    %42 = vector.load %arg6[%c0_14, %c0_15] : memref<576x64xbf16, #tpu.memory_space<vmem>>, vector<576x64xbf16>
    %cst_16 = arith.constant dense<0.000000e+00> : vector<98x64xf32>
    %43 = tpu.matmul %41, %42, %cst_16 {dimension_numbers = #tpu.dot_dimension_numbers<[1], [0], [0], [1], [0, 0, 1, 1], [], []>} : vector<98x576xbf16>, vector<576x64xbf16>, vector<98x64xf32> -> vector<98x64xf32>
    %c0_17 = arith.constant 0 : index
    %c0_18 = arith.constant 0 : index
    %44 = vector.load %arg7[%c0_17, %c0_18] : memref<1x64xf32, #tpu.memory_space<vmem>>, vector<1x64xf32>
    %45 = vector.broadcast %44 : vector<1x64xf32> to vector<98x64xf32>
    %46 = arith.addf %43, %45 : vector<98x64xf32>
    %cst_19 = arith.constant 0.000000e+00 : f32
    %47 = vector.broadcast %cst_19 : f32 to vector<98x64xf32>
    %48 = arith.maximumf %46, %47 : vector<98x64xf32>
    %49 = arith.truncf %48 : vector<98x64xf32> to vector<98x64xbf16>
    %c0_20 = arith.constant 0 : index
    %c0_21 = arith.constant 0 : index
    %50 = vector.load %arg8[%c0_20, %c0_21] : memref<98x64xbf16, #tpu.memory_space<vmem>>, vector<98x64xbf16>
    tpu.vector_store %arg8[%c0_20, %c0_21], %49 {strides = array<i32>} : memref<98x64xbf16, #tpu.memory_space<vmem>>, vector<98x64xbf16>,
    return
  }
  func.func @transform_0(%arg0: i32) -> (i32, i32, i32, i32) {
    %c0_i32 = arith.constant 0 : i32
    %c0_i32_0 = arith.constant 0 : i32
    %c0_i32_1 = arith.constant 0 : i32
    %c0_i32_2 = arith.constant 0 : i32
    return %arg0, %c0_i32, %c0_i32_0, %c0_i32_1 : i32, i32, i32, i32
  }
  func.func @transform_1(%arg0: i32) -> (i32, i32) {
    %c0_i32 = arith.constant 0 : i32
    %c0_i32_0 = arith.constant 0 : i32
    %c0_i32_1 = arith.constant 0 : i32
    return %c0_i32, %c0_i32_0 : i32, i32
  }
  func.func @transform_2(%arg0: i32) -> (i32, i32) {
    %c0_i32 = arith.constant 0 : i32
    %c0_i32_0 = arith.constant 0 : i32
    %c0_i32_1 = arith.constant 0 : i32
    return %c0_i32, %c0_i32_0 : i32, i32
  }
  func.func @transform_3(%arg0: i32) -> (i32, i32) {
    %c0_i32 = arith.constant 0 : i32
    %c0_i32_0 = arith.constant 0 : i32
    %c0_i32_1 = arith.constant 0 : i32
    return %c0_i32, %c0_i32_0 : i32, i32
  }
  func.func @transform_4(%arg0: i32) -> (i32, i32) {
    %c0_i32 = arith.constant 0 : i32
    %c0_i32_0 = arith.constant 0 : i32
    %c0_i32_1 = arith.constant 0 : i32
    return %c0_i32, %c0_i32_0 : i32, i32
  }
  func.func @transform_5(%arg0: i32) -> (i32, i32) {
    %c0_i32 = arith.constant 0 : i32
    %c0_i32_0 = arith.constant 0 : i32
    %c0_i32_1 = arith.constant 0 : i32
    return %c0_i32, %c0_i32_0 : i32, i32
  }
  func.func @transform_6(%arg0: i32) -> (i32, i32) {
    %c0_i32 = arith.constant 0 : i32
    %c0_i32_0 = arith.constant 0 : i32
    %c0_i32_1 = arith.constant 0 : i32
    return %c0_i32, %c0_i32_0 : i32, i32
  }
  func.func @transform_7(%arg0: i32) -> (i32, i32) {
    %c0_i32 = arith.constant 0 : i32
    %c0_i32_0 = arith.constant 0 : i32
    return %arg0, %c0_i32 : i32, i32
  }
}

module attributes {stable_mosaic.version = 11 : i64} {
  func.func @_mlp_head_kernel(%arg0: i32, %arg1: memref<2x3136xbf16, #tpu.memory_space<vmem>>, %arg2: memref<3136x512xbf16, #tpu.memory_space<vmem>>, %arg3: memref<1x512xf32, #tpu.memory_space<vmem>>, %arg4: memref<512x128xbf16, #tpu.memory_space<vmem>>, %arg5: memref<1x128xf32, #tpu.memory_space<vmem>>, %arg6: memref<2x128xf32, #tpu.memory_space<vmem>>) attributes {dimension_semantics = [#tpu.dimension_semantics<parallel>], iteration_bounds = array<i64: 1>, scalar_prefetch = 0 : i64, scratch_operands = 0 : i64, tpu.core_type = #tpu.core_type<tc>, window_params = [{transform_indices = @transform_0, window_bounds = array<i64: 2, 3136>}, {pipeline_mode = #tpu.pipeline_mode<synchronous>, transform_indices = @transform_1, window_bounds = array<i64: 3136, 512>}, {pipeline_mode = #tpu.pipeline_mode<synchronous>, transform_indices = @transform_2, window_bounds = array<i64: 1, 512>}, {pipeline_mode = #tpu.pipeline_mode<synchronous>, transform_indices = @transform_3, window_bounds = array<i64: 512, 128>}, {pipeline_mode = #tpu.pipeline_mode<synchronous>, transform_indices = @transform_4, window_bounds = array<i64: 1, 128>}, {transform_indices = @transform_5, window_bounds = array<i64: 2, 128>}]} {
    %c0 = arith.constant 0 : index
    %c0_0 = arith.constant 0 : index
    %0 = vector.load %arg1[%c0, %c0_0] : memref<2x3136xbf16, #tpu.memory_space<vmem>>, vector<2x3136xbf16>
    %c0_1 = arith.constant 0 : index
    %c0_2 = arith.constant 0 : index
    %1 = vector.load %arg2[%c0_1, %c0_2] : memref<3136x512xbf16, #tpu.memory_space<vmem>>, vector<3136x512xbf16>
    %cst = arith.constant dense<0.000000e+00> : vector<2x512xf32>
    %2 = tpu.matmul %0, %1, %cst {dimension_numbers = #tpu.dot_dimension_numbers<[1], [0], [0], [1], [0, 0, 1, 1], [], []>} : vector<2x3136xbf16>, vector<3136x512xbf16>, vector<2x512xf32> -> vector<2x512xf32>
    %c0_3 = arith.constant 0 : index
    %c0_4 = arith.constant 0 : index
    %3 = vector.load %arg3[%c0_3, %c0_4] : memref<1x512xf32, #tpu.memory_space<vmem>>, vector<1x512xf32>
    %4 = vector.broadcast %3 : vector<1x512xf32> to vector<2x512xf32>
    %5 = arith.addf %2, %4 : vector<2x512xf32>
    %cst_5 = arith.constant 0.000000e+00 : f32
    %6 = vector.broadcast %cst_5 : f32 to vector<2x512xf32>
    %7 = arith.maximumf %5, %6 : vector<2x512xf32>
    %8 = arith.truncf %7 : vector<2x512xf32> to vector<2x512xbf16>
    %c0_6 = arith.constant 0 : index
    %c0_7 = arith.constant 0 : index
    %9 = vector.load %arg4[%c0_6, %c0_7] : memref<512x128xbf16, #tpu.memory_space<vmem>>, vector<512x128xbf16>
    %cst_8 = arith.constant dense<0.000000e+00> : vector<2x128xf32>
    %10 = tpu.matmul %8, %9, %cst_8 {dimension_numbers = #tpu.dot_dimension_numbers<[1], [0], [0], [1], [0, 0, 1, 1], [], []>} : vector<2x512xbf16>, vector<512x128xbf16>, vector<2x128xf32> -> vector<2x128xf32>
    %c0_9 = arith.constant 0 : index
    %c0_10 = arith.constant 0 : index
    %11 = vector.load %arg5[%c0_9, %c0_10] : memref<1x128xf32, #tpu.memory_space<vmem>>, vector<1x128xf32>
    %12 = vector.broadcast %11 : vector<1x128xf32> to vector<2x128xf32>
    %13 = arith.addf %10, %12 : vector<2x128xf32>
    %c0_11 = arith.constant 0 : index
    %c0_12 = arith.constant 0 : index
    %14 = vector.load %arg6[%c0_11, %c0_12] : memref<2x128xf32, #tpu.memory_space<vmem>>, vector<2x128xf32>
    tpu.vector_store %arg6[%c0_11, %c0_12], %13 {strides = array<i32>} : memref<2x128xf32, #tpu.memory_space<vmem>>, vector<2x128xf32>,
    return
  }
  func.func @transform_0(%arg0: i32) -> (i32, i32) {
    %c0_i32 = arith.constant 0 : i32
    %c0_i32_0 = arith.constant 0 : i32
    return %arg0, %c0_i32 : i32, i32
  }
  func.func @transform_1(%arg0: i32) -> (i32, i32) {
    %c0_i32 = arith.constant 0 : i32
    %c0_i32_0 = arith.constant 0 : i32
    %c0_i32_1 = arith.constant 0 : i32
    return %c0_i32, %c0_i32_0 : i32, i32
  }
  func.func @transform_2(%arg0: i32) -> (i32, i32) {
    %c0_i32 = arith.constant 0 : i32
    %c0_i32_0 = arith.constant 0 : i32
    %c0_i32_1 = arith.constant 0 : i32
    return %c0_i32, %c0_i32_0 : i32, i32
  }
  func.func @transform_3(%arg0: i32) -> (i32, i32) {
    %c0_i32 = arith.constant 0 : i32
    %c0_i32_0 = arith.constant 0 : i32
    %c0_i32_1 = arith.constant 0 : i32
    return %c0_i32, %c0_i32_0 : i32, i32
  }
  func.func @transform_4(%arg0: i32) -> (i32, i32) {
    %c0_i32 = arith.constant 0 : i32
    %c0_i32_0 = arith.constant 0 : i32
    %c0_i32_1 = arith.constant 0 : i32
    return %c0_i32, %c0_i32_0 : i32, i32
  }
  func.func @transform_5(%arg0: i32) -> (i32, i32) {
    %c0_i32 = arith.constant 0 : i32
    %c0_i32_0 = arith.constant 0 : i32
    return %arg0, %c0_i32 : i32, i32
  }
}

</mosaic_0001>

<bundles_post_ra>
// kernel: qnetwork_forward.3
= control target key start
LH: loop header
LB: loop body
LE: loop exit
PB: predicated region body
PF: predicated region fallthrough
CT: control target
= control target key end

     0   :  { %v812_v36 = vlaneseq  ;;  %v8478_v37 = vmov 1966171168   ;;  %vm4941_vm0 = vcmask 523264   ;;  %s11222_s0 = inlined_call_operand.vmem [shape: bf16[2,3136], index: 0, kind: input, shape index: {}]   ;;  %s11223_s1 = inlined_call_operand.vmem [shape: bf16[3136,512], index: 1, kind: input, shape index: {}]   ;;  %s11224_s2 = inlined_call_operand.vmem [shape: f32[1,512], index: 2, kind: input, shape index: {}]   ;;  %s11225_s3 = inlined_call_operand.vmem [shape: bf16[512,128], index: 3, kind: input, shape index: {}]   ;;  %s11226_s4 = inlined_call_operand.vmem [shape: f32[1,128], index: 4, kind: input, shape index: {}]   ;;  %s11227_s5 = inlined_call_operand.hbm [shape: f32[2,128], index: 5, kind: output, shape index: {}]  }
   0x1   :  { %v7244_v0 = vld [vmem:[%s11223_s1 + $0xe4] ss:$16 sps:$4 sm:$0xff]   ;;  %v7248_v2 = vld [vmem:[%s11223_s1 + $0xe0] ss:$16 sps:$4 sm:$0xff]   ;;  %v838_v38 = vunpack.c.l.s4 %v8478_v37 }
   0x2   :  { %v7246_v1 = vld [vmem:[%s11223_s1 + $0x2e4] ss:$16 sps:$4 sm:$0xff]   ;;  %4945 = vmatprep.subr.bf16.mxu0 %v7244_v0  ;;  %v7249_v3 = vld [vmem:[%s11223_s1 + $0x2e0] ss:$16 sps:$4 sm:$0xff]   ;;  %v8628_v42 = vshrl.u32 %v812_v36, 7 }
   0x3   :  { %4986 = vmatprep.subr.bf16.mxu1 %v7246_v1  ;;  %v7250_v4 = vld [vmem:[%s11223_s1 + $0xc4] ss:$16 sps:$4 sm:$0xff]   ;;  %4946 = vmatpush1.bf16.msra.mxu0 %v7248_v2  ;;  %v7254_v6 = vld [vmem:[%s11223_s1 + $0xc0] ss:$16 sps:$4 sm:$0xff]   ;;  %v839_v43 = vunpack.c.0.s8 %v838_v38 }
   0x4   :  { %4987 = vmatpush1.bf16.msra.mxu1 %v7249_v3  ;;  %v7252_v5 = vld [vmem:[%s11223_s1 + $0x2c4] ss:$16 sps:$4 sm:$0xff]   ;;  %4947 = vmatprep.subr.bf16.mxu0 %v7250_v4  ;;  %v7255_v7 = vld [vmem:[%s11223_s1 + $0x2c0] ss:$16 sps:$4 sm:$0xff]  }
   0x5   :  { %4988 = vmatprep.subr.bf16.mxu1 %v7252_v5  ;;  %v7256_v8 = vld [vmem:[%s11223_s1 + $0xa4] ss:$16 sps:$4 sm:$0xff]   ;;  %v7260_v10 = vld [vmem:[%s11223_s1 + $0xa0] ss:$16 sps:$4 sm:$0xff]   ;;  %v8646_v49 = vsub.s32 %v839_v43, %v8628_v42 }
   0x6   :  { %v7258_v9 = vld [vmem:[%s11223_s1 + $0x2a4] ss:$16 sps:$4 sm:$0xff]   ;;  %v7261_v11 = vld [vmem:[%s11223_s1 + $0x2a0] ss:$16 sps:$4 sm:$0xff]  }
   0x7   :  { %4948 = vmatpush1.bf16.msra.mxu0 %v7254_v6  ;;  %v7262_v12 = vld [vmem:[%s11223_s1 + $0x84] ss:$16 sps:$4 sm:$0xff]   ;;  %v7266_v14 = vld [vmem:[%s11223_s1 + $0x80] ss:$16 sps:$4 sm:$0xff]  }
   0x8   :  { %4989 = vmatpush1.bf16.msra.mxu1 %v7255_v7  ;;  %4949 = vmatprep.subr.bf16.mxu0 %v7256_v8  ;;  %v7264_v13 = vld [vmem:[%s11223_s1 + $0x284] ss:$16 sps:$4 sm:$0xff]   ;;  %v7267_v15 = vld [vmem:[%s11223_s1 + $0x280] ss:$16 sps:$4 sm:$0xff]  }
   0x9   :  { %4990 = vmatprep.subr.bf16.mxu1 %v7258_v9  ;;  %v7268_v16 = vld [vmem:[%s11223_s1 + $0x64] ss:$16 sps:$4 sm:$0xff]   ;;  %v7272_v18 = vld [vmem:[%s11223_s1 + $0x60] ss:$16 sps:$4 sm:$0xff]  }
   0xa   :  { %v7270_v17 = vld [vmem:[%s11223_s1 + $0x264] ss:$16 sps:$4 sm:$0xff]   ;;  %v7273_v19 = vld [vmem:[%s11223_s1 + $0x260] ss:$16 sps:$4 sm:$0xff]  }
   0xb   :  { %4950 = vmatpush1.bf16.msra.mxu0 %v7260_v10  ;;  %v7274_v20 = vld [vmem:[%s11223_s1 + $0x44] ss:$16 sps:$4 sm:$0xff]   ;;  %v7278_v22 = vld [vmem:[%s11223_s1 + $0x40] ss:$16 sps:$4 sm:$0xff]  }
   0xc   :  { %4991 = vmatpush1.bf16.msra.mxu1 %v7261_v11  ;;  %4951 = vmatprep.subr.bf16.mxu0 %v7262_v12  ;;  %v7276_v21 = vld [vmem:[%s11223_s1 + $0x244] ss:$16 sps:$4 sm:$0xff]   ;;  %v7279_v23 = vld [vmem:[%s11223_s1 + $0x240] ss:$16 sps:$4 sm:$0xff]  }
   0xd   :  { %4992 = vmatprep.subr.bf16.mxu1 %v7264_v13  ;;  %v7280_v24 = vld [vmem:[%s11223_s1 + $0x24] ss:$16 sps:$4 sm:$0xff]   ;;  %v7284_v26 = vld [vmem:[%s11223_s1 + $0x20] ss:$16 sps:$4 sm:$0xff]  }
   0xe   :  { %v7282_v25 = vld [vmem:[%s11223_s1 + $0x224] ss:$16 sps:$4 sm:$0xff]   ;;  %v7285_v27 = vld [vmem:[%s11223_s1 + $0x220] ss:$16 sps:$4 sm:$0xff]  }
   0xf   :  { %4952 = vmatpush1.bf16.msra.mxu0 %v7266_v14  ;;  %v7286_v28 = vld [vmem:[%s11223_s1 + $0x4] ss:$16 sps:$4 sm:$0xff]   ;;  %v7290_v30 = vld [vmem:[%s11223_s1] ss:$16 sps:$4 sm:$0xff]  }
  0x10   :  { %4993 = vmatpush1.bf16.msra.mxu1 %v7267_v15  ;;  %4953 = vmatprep.subr.bf16.mxu0 %v7268_v16  ;;  %v7288_v29 = vld [vmem:[%s11223_s1 + $0x204] ss:$16 sps:$4 sm:$0xff]   ;;  %v7291_v31 = vld [vmem:[%s11223_s1 + $0x200] ss:$16 sps:$4 sm:$0xff]  }
  0x11   :  { %4994 = vmatprep.subr.bf16.mxu1 %v7270_v17  ;;  %v7292_v32 = vld [vmem:[%s11223_s1 + $0x1e4] ss:$16 sps:$4 sm:$0xff]   ;;  %v7296_v34 = vld [vmem:[%s11223_s1 + $0x1e0] ss:$16 sps:$4 sm:$0xff]  }
  0x12   :  { %v7294_v33 = vld [vmem:[%s11223_s1 + $0x3e4] ss:$16 sps:$4 sm:$0xff]   ;;  %v7297_v35 = vld [vmem:[%s11223_s1 + $0x3e0] ss:$16 sps:$4 sm:$0xff]  }
  0x13   :  { %4954 = vmatpush1.bf16.msra.mxu0 %v7272_v18  ;;  %v7298_v39 = vld [vmem:[%s11223_s1 + $0x1c4] ss:$16 sps:$4 sm:$0xff]   ;;  %v7302_v41 = vld [vmem:[%s11223_s1 + $0x1c0] ss:$16 sps:$4 sm:$0xff]  }
  0x14   :  { %4995 = vmatpush1.bf16.msra.mxu1 %v7273_v19  ;;  %4955 = vmatprep.subr.bf16.mxu0 %v7274_v20  ;;  %v7300_v40 = vld [vmem:[%s11223_s1 + $0x3c4] ss:$16 sps:$4 sm:$0xff]   ;;  %v7303_v44 = vld [vmem:[%s11223_s1 + $0x3c0] ss:$16 sps:$4 sm:$0xff]  }
  0x15   :  { %4996 = vmatprep.subr.bf16.mxu1 %v7276_v21  ;;  %v7304_v45 = vld [vmem:[%s11223_s1 + $0x1a4] ss:$16 sps:$4 sm:$0xff]   ;;  %v7308_v47 = vld [vmem:[%s11223_s1 + $0x1a0] ss:$16 sps:$4 sm:$0xff]  }
  0x16   :  { %v7306_v46 = vld [vmem:[%s11223_s1 + $0x3a4] ss:$16 sps:$4 sm:$0xff]   ;;  %v7309_v48 = vld [vmem:[%s11223_s1 + $0x3a0] ss:$16 sps:$4 sm:$0xff]  }
  0x17   :  { %4956 = vmatpush1.bf16.msra.mxu0 %v7278_v22  ;;  %v7310_v50 = vld [vmem:[%s11223_s1 + $0x184] ss:$16 sps:$4 sm:$0xff]   ;;  %v7314_v53 = vld [vmem:[%s11223_s1 + $0x180] ss:$16 sps:$4 sm:$0xff]  }
  0x18   :  { %4997 = vmatpush1.bf16.msra.mxu1 %v7279_v23  ;;  %4957 = vmatprep.subr.bf16.mxu0 %v7280_v24  ;;  %v7312_v51 = vld [vmem:[%s11223_s1 + $0x384] ss:$16 sps:$4 sm:$0xff]   ;;  %v7315_v55 = vld [vmem:[%s11223_s1 + $0x380] ss:$16 sps:$4 sm:$0xff]  }
  0x19   :  { %4998 = vmatprep.subr.bf16.mxu1 %v7282_v25  ;;  %v22_v52 = vld [vmem:[%s11222_s0] sm:$0xff] }
  0x1a   :  { %v843_v54 = vrot.slane %v22_v52, %v8646_v49  ;;  %v7316_v56 = vld [vmem:[%s11223_s1 + $0x164] ss:$16 sps:$4 sm:$0xff]   ;;  %v7320_v59 = vld [vmem:[%s11223_s1 + $0x160] ss:$16 sps:$4 sm:$0xff]   ;;  %v836_v1 = vcombine.high %v22_v52, %v22_v52 }
  0x1b   :  { %4958 = vmatpush1.bf16.msra.mxu0 %v7284_v26  ;;  %v7318_v57 = vld [vmem:[%s11223_s1 + $0x364] ss:$16 sps:$4 sm:$0xff]   ;;  %v7321_v61 = vld [vmem:[%s11223_s1 + $0x360] ss:$16 sps:$4 sm:$0xff]  }
  0x1c   :  { %4999 = vmatpush1.bf16.msra.mxu1 %v7285_v27  ;;  %4959 = vmatprep.subr.bf16.mxu0 %v7286_v28  ;;  %v851_v58 = vcombine.high %v843_v54, %v843_v54  ;;  %v7322_v62 = vld [vmem:[%s11223_s1 + $0x144] ss:$16 sps:$4 sm:$0xff]   ;;  %v7326_v2 = vld [vmem:[%s11223_s1 + $0x140] ss:$16 sps:$4 sm:$0xff]   ;;  %v8704_v6 = vrot.slane %v836_v1, %v8646_v49  ;;  %v8724_v13 = vrot.slane %v843_v54, %v8646_v49 }
  0x1d   :  { %5000 = vmatprep.subr.bf16.mxu1 %v7288_v29  ;;  %v7324_v63 = vld [vmem:[%s11223_s1 + $0x344] ss:$16 sps:$4 sm:$0xff]   ;;  %v7327_v3 = vld [vmem:[%s11223_s1 + $0x340] ss:$16 sps:$4 sm:$0xff]  }
  0x1e   :  { %v8674_v60 = vrot.slane %v851_v58, %v8646_v49  ;;  %v7328_v4 = vld [vmem:[%s11223_s1 + $0x124] ss:$16 sps:$4 sm:$0xff]   ;;  %v7332_v7 = vld [vmem:[%s11223_s1 + $0x120] ss:$16 sps:$4 sm:$0xff]   ;;  %v852_v11 = vcombine.high %v8704_v6, %v8704_v6  ;;  %v8740_v18 = vcombine.high %v8724_v13, %v8724_v13 }
  0x1f   :  { %4960 = vmatpush1.bf16.msra.mxu0 %v7290_v30  ;;  %v7330_v5 = vld [vmem:[%s11223_s1 + $0x324] ss:$16 sps:$4 sm:$0xff]   ;;  %v7333_v8 = vld [vmem:[%s11223_s1 + $0x320] ss:$16 sps:$4 sm:$0xff]  }
  0x20   :  { %5001 = vmatpush1.bf16.msra.mxu1 %v7291_v31  ;;  %4961 = vmatprep.subr.bf16.mxu0 %v7292_v32  ;;  %v8687_v0 = vcombine.high %v8674_v60, %v8674_v60  ;;  %v7334_v9 = vld [vmem:[%s11223_s1 + $0x104] ss:$16 sps:$4 sm:$0xff]   ;;  %v7338_v12 = vld [vmem:[%s11223_s1 + $0x100] ss:$16 sps:$4 sm:$0xff]   ;;  %v8736_v17 = vrot.slane %v852_v11, %v8646_v49 }
  0x21   :  { %5002 = vmatprep.subr.bf16.mxu1 %v7294_v33  ;;  %4977 = vmatprep.mubr.bf16.mxu0 %v8674_v60  ;;  %v7336_v10 = vld [vmem:[%s11223_s1 + $0x304] ss:$16 sps:$4 sm:$0xff]   ;;  %v7339_v14 = vld [vmem:[%s11223_s1 + $0x300] ss:$16 sps:$4 sm:$0xff]  }
  0x22   :  { %5018 = vmatprep.mubr.bf16.mxu1 %v8687_v0  ;;  %v7342_v15 = vld [vmem:[%s11223_s1 + $0x4e4] ss:$16 sps:$4 sm:$0xff]   ;;  %v7340_v19 = vld [vmem:[%s11223_s1 + $0x4e0] ss:$16 sps:$4 sm:$0xff]   ;;  %v8756_v23 = vcombine.high %v8736_v17, %v8736_v17 }
  0x23   :  { %4962 = vmatpush2.bf16.msra.mxu0 %v7296_v34  ;;  %v7345_v16 = vld [vmem:[%s11223_s1 + $0x6e4] ss:$16 sps:$4 sm:$0xff]   ;;  %v7343_v20 = vld [vmem:[%s11223_s1 + $0x6e0] ss:$16 sps:$4 sm:$0xff]  }
  0x24   :  { %5003 = vmatpush2.bf16.msra.mxu1 %v7297_v35  ;;  %4963 = vmatprep.subr.bf16.mxu0 %v7298_v39  ;;  %v7348_v21 = vld [vmem:[%s11223_s1 + $0x4c4] ss:$16 sps:$4 sm:$0xff]   ;;  %v7346_v24 = vld [vmem:[%s11223_s1 + $0x4c0] ss:$16 sps:$4 sm:$0xff]  }
  0x25   :  { %5004 = vmatprep.subr.bf16.mxu1 %v7300_v40  ;;  %v7351_v22 = vld [vmem:[%s11223_s1 + $0x6c4] ss:$16 sps:$4 sm:$0xff]   ;;  %v7349_v25 = vld [vmem:[%s11223_s1 + $0x6c0] ss:$16 sps:$4 sm:$0xff]  }
  0x26   :  { %v7354_v26 = vld [vmem:[%s11223_s1 + $0x4a4] ss:$16 sps:$4 sm:$0xff]   ;;  %v7352_v28 = vld [vmem:[%s11223_s1 + $0x4a0] ss:$16 sps:$4 sm:$0xff]  }
  0x27   :  { %4964 = vmatpush2.bf16.msra.mxu0 %v7302_v41  ;;  %v7357_v27 = vld [vmem:[%s11223_s1 + $0x6a4] ss:$16 sps:$4 sm:$0xff]   ;;  %v7355_v29 = vld [vmem:[%s11223_s1 + $0x6a0] ss:$16 sps:$4 sm:$0xff]  }
  0x28   :  { %5005 = vmatpush2.bf16.msra.mxu1 %v7303_v44  ;;  %4965 = vmatprep.subr.bf16.mxu0 %v7304_v45  ;;  %v7360_v30 = vld [vmem:[%s11223_s1 + $0x484] ss:$16 sps:$4 sm:$0xff]   ;;  %v7358_v32 = vld [vmem:[%s11223_s1 + $0x480] ss:$16 sps:$4 sm:$0xff]  }
  0x29   :  { %5006 = vmatprep.subr.bf16.mxu1 %v7306_v46  ;;  %v7363_v31 = vld [vmem:[%s11223_s1 + $0x684] ss:$16 sps:$4 sm:$0xff]   ;;  %v7361_v33 = vld [vmem:[%s11223_s1 + $0x680] ss:$16 sps:$4 sm:$0xff]  }
  0x2a   :  { %v7366_v34 = vld [vmem:[%s11223_s1 + $0x464] ss:$16 sps:$4 sm:$0xff]   ;;  %v7364_v36 = vld [vmem:[%s11223_s1 + $0x460] ss:$16 sps:$4 sm:$0xff]  }
  0x2b   :  { %4966 = vmatpush2.bf16.msra.mxu0 %v7308_v47  ;;  %v7369_v35 = vld [vmem:[%s11223_s1 + $0x664] ss:$16 sps:$4 sm:$0xff]   ;;  %v7367_v37 = vld [vmem:[%s11223_s1 + $0x660] ss:$16 sps:$4 sm:$0xff]  }
  0x2c   :  { %5007 = vmatpush2.bf16.msra.mxu1 %v7309_v48  ;;  %4967 = vmatprep.subr.bf16.mxu0 %v7310_v50  ;;  %v7372_v38 = vld [vmem:[%s11223_s1 + $0x444] ss:$16 sps:$4 sm:$0xff]   ;;  %v7370_v40 = vld [vmem:[%s11223_s1 + $0x440] ss:$16 sps:$4 sm:$0xff]  }
  0x2d   :  { %5008 = vmatprep.subr.bf16.mxu1 %v7312_v51  ;;  %v7375_v39 = vld [vmem:[%s11223_s1 + $0x644] ss:$16 sps:$4 sm:$0xff]   ;;  %v7373_v41 = vld [vmem:[%s11223_s1 + $0x640] ss:$16 sps:$4 sm:$0xff]  }
  0x2e   :  { %v7378_v43 = vld [vmem:[%s11223_s1 + $0x424] ss:$16 sps:$4 sm:$0xff]   ;;  %v7376_v45 = vld [vmem:[%s11223_s1 + $0x420] ss:$16 sps:$4 sm:$0xff]  }
  0x2f   :  { %4968 = vmatpush2.bf16.msra.mxu0 %v7314_v53  ;;  %v7381_v44 = vld [vmem:[%s11223_s1 + $0x624] ss:$16 sps:$4 sm:$0xff]   ;;  %v7379_v46 = vld [vmem:[%s11223_s1 + $0x620] ss:$16 sps:$4 sm:$0xff]  }
  0x30   :  { %5009 = vmatpush2.bf16.msra.mxu1 %v7315_v55  ;;  %4969 = vmatprep.subr.bf16.mxu0 %v7316_v56  ;;  %v7384_v47 = vld [vmem:[%s11223_s1 + $0x404] ss:$16 sps:$4 sm:$0xff]   ;;  %v7382_v50 = vld [vmem:[%s11223_s1 + $0x400] ss:$16 sps:$4 sm:$0xff]  }
  0x31   :  { %5010 = vmatprep.subr.bf16.mxu1 %v7318_v57  ;;  %v7387_v48 = vld [vmem:[%s11223_s1 + $0x604] ss:$16 sps:$4 sm:$0xff]   ;;  %v7385_v51 = vld [vmem:[%s11223_s1 + $0x600] ss:$16 sps:$4 sm:$0xff]  }
  0x32   :  { %v7390_v52 = vld [vmem:[%s11223_s1 + $0x5e4] ss:$16 sps:$4 sm:$0xff]   ;;  %v7388_v54 = vld [vmem:[%s11223_s1 + $0x5e0] ss:$16 sps:$4 sm:$0xff]  }
  0x33   :  { %4970 = vmatpush2.bf16.msra.mxu0 %v7320_v59  ;;  %v7393_v53 = vld [vmem:[%s11223_s1 + $0x7e4] ss:$16 sps:$4 sm:$0xff]   ;;  %v7391_v55 = vld [vmem:[%s11223_s1 + $0x7e0] ss:$16 sps:$4 sm:$0xff]  }
  0x34   :  { %5011 = vmatpush2.bf16.msra.mxu1 %v7321_v61  ;;  %4971 = vmatprep.subr.bf16.mxu0 %v7322_v62  ;;  %v7396_v56 = vld [vmem:[%s11223_s1 + $0x5c4] ss:$16 sps:$4 sm:$0xff]   ;;  %v7394_v58 = vld [vmem:[%s11223_s1 + $0x5c0] ss:$16 sps:$4 sm:$0xff]  }
  0x35   :  { %5012 = vmatprep.subr.bf16.mxu1 %v7324_v63  ;;  %v7399_v57 = vld [vmem:[%s11223_s1 + $0x7c4] ss:$16 sps:$4 sm:$0xff]   ;;  %v7397_v59 = vld [vmem:[%s11223_s1 + $0x7c0] ss:$16 sps:$4 sm:$0xff]  }
  0x36   :  { %v7402_v61 = vld [vmem:[%s11223_s1 + $0x5a4] ss:$16 sps:$4 sm:$0xff]   ;;  %v7400_v63 = vld [vmem:[%s11223_s1 + $0x5a0] ss:$16 sps:$4 sm:$0xff]  }
  0x37   :  { %4972 = vmatpush2.bf16.msra.mxu0 %v7326_v2  ;;  %v7405_v62 = vld [vmem:[%s11223_s1 + $0x7a4] ss:$16 sps:$4 sm:$0xff]   ;;  %v7403_v1 = vld [vmem:[%s11223_s1 + $0x7a0] ss:$16 sps:$4 sm:$0xff]  }
  0x38   :  { %5013 = vmatpush2.bf16.msra.mxu1 %v7327_v3  ;;  %4973 = vmatprep.subr.bf16.mxu0 %v7328_v4  ;;  %v7408_v2 = vld [vmem:[%s11223_s1 + $0x584] ss:$16 sps:$4 sm:$0xff]   ;;  %v7406_v4 = vld [vmem:[%s11223_s1 + $0x580] ss:$16 sps:$4 sm:$0xff]  }
  0x39   :  { %5014 = vmatprep.subr.bf16.mxu1 %v7330_v5  ;;  %v7411_v3 = vld [vmem:[%s11223_s1 + $0x784] ss:$16 sps:$4 sm:$0xff]   ;;  %v7409_v5 = vld [vmem:[%s11223_s1 + $0x780] ss:$16 sps:$4 sm:$0xff]  }
  0x3a   :  { %v7420_v11 = vld [vmem:[%s11223_s1 + $0x544] ss:$16 sps:$4 sm:$0xff]  }
  0x3b   :  { %4974 = vmatpush2.bf16.msra.mxu0 %v7332_v7  ;;  %v7414_v7 = vld [vmem:[%s11223_s1 + $0x564] ss:$16 sps:$4 sm:$0xff]  }
  0x3c   :  { %5015 = vmatpush2.bf16.msra.mxu1 %v7333_v8  ;;  %4975 = vmatprep.subr.bf16.mxu0 %v7334_v9  ;;  %v7417_v8 = vld [vmem:[%s11223_s1 + $0x764] ss:$16 sps:$4 sm:$0xff]   ;;  %v7412_v9 = vld [vmem:[%s11223_s1 + $0x560] ss:$16 sps:$4 sm:$0xff]  }
  0x3d   :  { %5016 = vmatprep.subr.bf16.mxu1 %v7336_v10  ;;  %v7415_v10 = vld [vmem:[%s11223_s1 + $0x760] ss:$16 sps:$4 sm:$0xff]  }
  0x3f   :  { %4976 = vmatpush2.bf16.msra.mxu0 %v7338_v12  ;;  %v7423_v12 = vld [vmem:[%s11223_s1 + $0x744] ss:$16 sps:$4 sm:$0xff]  }
  0x40   :  { %5017 = vmatpush2.bf16.msra.mxu1 %v7339_v14  ;;  %5027 = vmatprep.subr.bf16.mxu0 %v7342_v15  ;;  %v7418_v14 = vld [vmem:[%s11223_s1 + $0x540] ss:$16 sps:$4 sm:$0xff]  }
  0x41   :  { %5068 = vmatprep.subr.bf16.mxu1 %v7345_v16  ;;  %v7421_v15 = vld [vmem:[%s11223_s1 + $0x740] ss:$16 sps:$4 sm:$0xff]   ;;  %v7426_v16 = vld [vmem:[%s11223_s1 + $0x524] ss:$16 sps:$4 sm:$0xff]  }
  0x42   :  { %4978 = vmatmul.mubr.bf16.vlgmr.msra.gmra.mxu0 %v8724_v13 }
  0x43   :  { %5019 = vmatmul.mubr.bf16.vlgmr.msra.gmra.mxu1 %v8740_v18  ;;  %5028 = vmatpush1.bf16.msra.mxu0 %v7340_v19  ;;  %v7429_v19 = vld [vmem:[%s11223_s1 + $0x724] ss:$16 sps:$4 sm:$0xff]  }
  0x44   :  { %5069 = vmatpush1.bf16.msra.mxu1 %v7343_v20  ;;  %5029 = vmatprep.subr.bf16.mxu0 %v7348_v21  ;;  %v7424_v20 = vld [vmem:[%s11223_s1 + $0x520] ss:$16 sps:$4 sm:$0xff]  }
  0x45   :  { %5070 = vmatprep.subr.bf16.mxu1 %v7351_v22  ;;  %5059 = vmatprep.mubr.bf16.mxu0 %v8736_v17  ;;  %v7427_v21 = vld [vmem:[%s11223_s1 + $0x720] ss:$16 sps:$4 sm:$0xff]   ;;  %v7432_v22 = vld [vmem:[%s11223_s1 + $0x504] ss:$16 sps:$4 sm:$0xff]  }
  0x46   :  { %5100 = vmatprep.mubr.bf16.mxu1 %v8756_v23 }
  0x47   :  { %5030 = vmatpush1.bf16.msra.mxu0 %v7346_v24  ;;  %v7435_v24 = vld [vmem:[%s11223_s1 + $0x704] ss:$16 sps:$4 sm:$0xff]  }
  0x48   :  { %5071 = vmatpush1.bf16.msra.mxu1 %v7349_v25  ;;  %5031 = vmatprep.subr.bf16.mxu0 %v7354_v26  ;;  %v7430_v25 = vld [vmem:[%s11223_s1 + $0x500] ss:$16 sps:$4 sm:$0xff]   ;;  %v8935_v26 = vrot.slane %v8704_v6, %v8646_v49 }
  0x49   :  { %5072 = vmatprep.subr.bf16.mxu1 %v7357_v27  ;;  %v7433_v27 = vld [vmem:[%s11223_s1 + $0x700] ss:$16 sps:$4 sm:$0xff]  }
  0x4a   :  { %v8948_v6 = vcombine.high %v8935_v26, %v8935_v26 }
  0x4b   :  { %5032 = vmatpush1.bf16.msra.mxu0 %v7352_v28  ;;  %v7439_v28 = vld [vmem:[%s11223_s1 + $0x8e4] ss:$16 sps:$4 sm:$0xff]  }
  0x4c   :  { %5073 = vmatpush1.bf16.msra.mxu1 %v7355_v29  ;;  %5033 = vmatprep.subr.bf16.mxu0 %v7360_v30  ;;  %v7442_v29 = vld [vmem:[%s11223_s1 + $0xae4] ss:$16 sps:$4 sm:$0xff]   ;;  %v7437_v30 = vld [vmem:[%s11223_s1 + $0x8e0] ss:$16 sps:$4 sm:$0xff]  }
  0x4d   :  { %5074 = vmatprep.subr.bf16.mxu1 %v7363_v31  ;;  %v7440_v31 = vld [vmem:[%s11223_s1 + $0xae0] ss:$16 sps:$4 sm:$0xff]  }
  0x4f   :  { %5034 = vmatpush1.bf16.msra.mxu0 %v7358_v32  ;;  %v8959_v32 = vld [vmem:[%s11222_s0 + $0x8] sm:$0xff] }
  0x50   :  { %5075 = vmatpush1.bf16.msra.mxu1 %v7361_v33  ;;  %5035 = vmatprep.subr.bf16.mxu0 %v7366_v34  ;;  %v7445_v33 = vld [vmem:[%s11223_s1 + $0x8c4] ss:$16 sps:$4 sm:$0xff]  }
  0x51   :  { %5076 = vmatprep.subr.bf16.mxu1 %v7369_v35  ;;  %v7448_v34 = vld [vmem:[%s11223_s1 + $0xac4] ss:$16 sps:$4 sm:$0xff]   ;;  %v8969_v35 = vrot.slane %v8959_v32, %v8646_v49 }
  0x53   :  { %5036 = vmatpush1.bf16.msra.mxu0 %v7364_v36  ;;  %v900_v36 = vcombine.high %v8969_v35, %v8969_v35 }
  0x54   :  { %5077 = vmatpush1.bf16.msra.mxu1 %v7367_v37  ;;  %5037 = vmatprep.subr.bf16.mxu0 %v7372_v38  ;;  %v7443_v37 = vld [vmem:[%s11223_s1 + $0x8c0] ss:$16 sps:$4 sm:$0xff]  }
  0x55   :  { %5078 = vmatprep.subr.bf16.mxu1 %v7375_v39  ;;  %v7446_v38 = vld [vmem:[%s11223_s1 + $0xac0] ss:$16 sps:$4 sm:$0xff]   ;;  %v7451_v39 = vld [vmem:[%s11223_s1 + $0x8a4] ss:$16 sps:$4 sm:$0xff]  }
  0x57   :  { %5038 = vmatpush1.bf16.msra.mxu0 %v7370_v40  ;;  %v7454_v40 = vld [vmem:[%s11223_s1 + $0xaa4] ss:$16 sps:$4 sm:$0xff]  }
  0x58   :  { %5079 = vmatpush1.bf16.msra.mxu1 %v7373_v41  ;;  %5039 = vmatprep.subr.bf16.mxu0 %v7378_v43  ;;  %v8988_v41 = vrot.slane %v900_v36, %v8646_v49  ;;  %v7515_v36 = vld [vmem:[%s11223_s1 + $0x940] ss:$16 sps:$4 sm:$0xff]  }
  0x59   :  { %5080 = vmatprep.subr.bf16.mxu1 %v7381_v44  ;;  %v7449_v44 = vld [vmem:[%s11223_s1 + $0x8a0] ss:$16 sps:$4 sm:$0xff]  }
  0x5a   :  { %v8993_v43 = vcombine.high %v8988_v41, %v8988_v41 }
  0x5b   :  { %5040 = vmatpush1.bf16.msra.mxu0 %v7376_v45  ;;  %v7452_v45 = vld [vmem:[%s11223_s1 + $0xaa0] ss:$16 sps:$4 sm:$0xff]  }
  0x5c   :  { %5081 = vmatpush1.bf16.msra.mxu1 %v7379_v46  ;;  %5041 = vmatprep.subr.bf16.mxu0 %v7384_v47  ;;  %v7457_v46 = vld [vmem:[%s11223_s1 + $0x884] ss:$16 sps:$4 sm:$0xff]  }
  0x5d   :  { %5082 = vmatprep.subr.bf16.mxu1 %v7387_v48  ;;  %v7460_v47 = vld [vmem:[%s11223_s1 + $0xa84] ss:$16 sps:$4 sm:$0xff]   ;;  %v7455_v48 = vld [vmem:[%s11223_s1 + $0x880] ss:$16 sps:$4 sm:$0xff]  }
  0x5f   :  { %5042 = vmatpush1.bf16.msra.mxu0 %v7382_v50  ;;  %v7458_v50 = vld [vmem:[%s11223_s1 + $0xa80] ss:$16 sps:$4 sm:$0xff]  }
  0x60   :  { %5083 = vmatpush1.bf16.msra.mxu1 %v7385_v51  ;;  %5043 = vmatprep.subr.bf16.mxu0 %v7390_v52  ;;  %v7463_v51 = vld [vmem:[%s11223_s1 + $0x864] ss:$16 sps:$4 sm:$0xff]  }
  0x61   :  { %5084 = vmatprep.subr.bf16.mxu1 %v7393_v53  ;;  %v7466_v52 = vld [vmem:[%s11223_s1 + $0xa64] ss:$16 sps:$4 sm:$0xff]   ;;  %v7461_v53 = vld [vmem:[%s11223_s1 + $0x860] ss:$16 sps:$4 sm:$0xff]  }
  0x63   :  { %5044 = vmatpush2.bf16.msra.mxu0 %v7388_v54  ;;  %v7464_v54 = vld [vmem:[%s11223_s1 + $0xa60] ss:$16 sps:$4 sm:$0xff]  }
  0x64   :  { %5085 = vmatpush2.bf16.msra.mxu1 %v7391_v55  ;;  %5045 = vmatprep.subr.bf16.mxu0 %v7396_v56  ;;  %v7469_v55 = vld [vmem:[%s11223_s1 + $0x844] ss:$16 sps:$4 sm:$0xff]  }
  0x65   :  { %5086 = vmatprep.subr.bf16.mxu1 %v7399_v57  ;;  %v7472_v56 = vld [vmem:[%s11223_s1 + $0xa44] ss:$16 sps:$4 sm:$0xff]   ;;  %v7467_v57 = vld [vmem:[%s11223_s1 + $0x840] ss:$16 sps:$4 sm:$0xff]  }
  0x67   :  { %5046 = vmatpush2.bf16.msra.mxu0 %v7394_v58  ;;  %v7470_v58 = vld [vmem:[%s11223_s1 + $0xa40] ss:$16 sps:$4 sm:$0xff]  }
  0x68   :  { %5087 = vmatpush2.bf16.msra.mxu1 %v7397_v59  ;;  %5047 = vmatprep.subr.bf16.mxu0 %v7402_v61  ;;  %v7475_v59 = vld [vmem:[%s11223_s1 + $0x824] ss:$16 sps:$4 sm:$0xff]  }
  0x69   :  { %5088 = vmatprep.subr.bf16.mxu1 %v7405_v62  ;;  %v7478_v61 = vld [vmem:[%s11223_s1 + $0xa24] ss:$16 sps:$4 sm:$0xff]   ;;  %v7473_v62 = vld [vmem:[%s11223_s1 + $0x820] ss:$16 sps:$4 sm:$0xff]  }
  0x6b   :  { %5048 = vmatpush2.bf16.msra.mxu0 %v7400_v63  ;;  %v7476_v63 = vld [vmem:[%s11223_s1 + $0xa20] ss:$16 sps:$4 sm:$0xff]  }
  0x6c   :  { %5089 = vmatpush2.bf16.msra.mxu1 %v7403_v1  ;;  %5049 = vmatprep.subr.bf16.mxu0 %v7408_v2  ;;  %v7481_v1 = vld [vmem:[%s11223_s1 + $0x804] ss:$16 sps:$4 sm:$0xff]  }
  0x6d   :  { %5090 = vmatprep.subr.bf16.mxu1 %v7411_v3  ;;  %v7484_v2 = vld [vmem:[%s11223_s1 + $0xa04] ss:$16 sps:$4 sm:$0xff]   ;;  %v7479_v3 = vld [vmem:[%s11223_s1 + $0x800] ss:$16 sps:$4 sm:$0xff]  }
  0x6f   :  { %5050 = vmatpush2.bf16.msra.mxu0 %v7406_v4  ;;  %v7482_v4 = vld [vmem:[%s11223_s1 + $0xa00] ss:$16 sps:$4 sm:$0xff]  }
  0x70   :  { %5091 = vmatpush2.bf16.msra.mxu1 %v7409_v5  ;;  %5051 = vmatprep.subr.bf16.mxu0 %v7414_v7  ;;  %v7487_v5 = vld [vmem:[%s11223_s1 + $0x9e4] ss:$16 sps:$4 sm:$0xff]  }
  0x71   :  { %5092 = vmatprep.subr.bf16.mxu1 %v7417_v8  ;;  %v7490_v7 = vld [vmem:[%s11223_s1 + $0xbe4] ss:$16 sps:$4 sm:$0xff]   ;;  %v7485_v8 = vld [vmem:[%s11223_s1 + $0x9e0] ss:$16 sps:$4 sm:$0xff]  }
  0x73   :  { %5052 = vmatpush2.bf16.msra.mxu0 %v7412_v9  ;;  %v7488_v9 = vld [vmem:[%s11223_s1 + $0xbe0] ss:$16 sps:$4 sm:$0xff]  }
  0x74   :  { %5093 = vmatpush2.bf16.msra.mxu1 %v7415_v10  ;;  %5053 = vmatprep.subr.bf16.mxu0 %v7420_v11  ;;  %v7493_v10 = vld [vmem:[%s11223_s1 + $0x9c4] ss:$16 sps:$4 sm:$0xff]  }
  0x75   :  { %5094 = vmatprep.subr.bf16.mxu1 %v7423_v12  ;;  %v7496_v11 = vld [vmem:[%s11223_s1 + $0xbc4] ss:$16 sps:$4 sm:$0xff]   ;;  %v7491_v12 = vld [vmem:[%s11223_s1 + $0x9c0] ss:$16 sps:$4 sm:$0xff]  }
  0x77   :  { %5054 = vmatpush2.bf16.msra.mxu0 %v7418_v14  ;;  %v7494_v14 = vld [vmem:[%s11223_s1 + $0xbc0] ss:$16 sps:$4 sm:$0xff]  }
  0x78   :  { %5095 = vmatpush2.bf16.msra.mxu1 %v7421_v15  ;;  %5055 = vmatprep.subr.bf16.mxu0 %v7426_v16  ;;  %v7499_v15 = vld [vmem:[%s11223_s1 + $0x9a4] ss:$16 sps:$4 sm:$0xff]  }
  0x79   :  { %5096 = vmatprep.subr.bf16.mxu1 %v7429_v19  ;;  %v7502_v16 = vld [vmem:[%s11223_s1 + $0xba4] ss:$16 sps:$4 sm:$0xff]   ;;  %v7497_v19 = vld [vmem:[%s11223_s1 + $0x9a0] ss:$16 sps:$4 sm:$0xff]  }
  0x7b   :  { %5056 = vmatpush2.bf16.msra.mxu0 %v7424_v20  ;;  %v7500_v20 = vld [vmem:[%s11223_s1 + $0xba0] ss:$16 sps:$4 sm:$0xff]  }
  0x7c   :  { %5097 = vmatpush2.bf16.msra.mxu1 %v7427_v21  ;;  %5057 = vmatprep.subr.bf16.mxu0 %v7432_v22  ;;  %v7505_v21 = vld [vmem:[%s11223_s1 + $0x984] ss:$16 sps:$4 sm:$0xff]  }
  0x7d   :  { %5098 = vmatprep.subr.bf16.mxu1 %v7435_v24  ;;  %v7508_v22 = vld [vmem:[%s11223_s1 + $0xb84] ss:$16 sps:$4 sm:$0xff]   ;;  %v7503_v24 = vld [vmem:[%s11223_s1 + $0x980] ss:$16 sps:$4 sm:$0xff]  }
  0x7f   :  { %5058 = vmatpush2.bf16.msra.mxu0 %v7430_v25  ;;  %v7506_v25 = vld [vmem:[%s11223_s1 + $0xb80] ss:$16 sps:$4 sm:$0xff]  }
  0x80   :  { %5099 = vmatpush2.bf16.msra.mxu1 %v7433_v27  ;;  %5109 = vmatprep.subr.bf16.mxu0 %v7439_v28  ;;  %v7511_v27 = vld [vmem:[%s11223_s1 + $0x964] ss:$16 sps:$4 sm:$0xff]  }
  0x81   :  { %5150 = vmatprep.subr.bf16.mxu1 %v7442_v29  ;;  %v7514_v28 = vld [vmem:[%s11223_s1 + $0xb64] ss:$16 sps:$4 sm:$0xff]   ;;  %v7509_v29 = vld [vmem:[%s11223_s1 + $0x960] ss:$16 sps:$4 sm:$0xff]  }
  0x82   :  { %5060 = vmatmul.mubr.bf16.vlgmr.msra.gmra.mxu0 %v8935_v26 }
  0x83   :  { %5101 = vmatmul.mubr.bf16.vlgmr.msra.gmra.mxu1 %v8948_v6  ;;  %5110 = vmatpush1.bf16.msra.mxu0 %v7437_v30  ;;  %v7512_v30 = vld [vmem:[%s11223_s1 + $0xb60] ss:$16 sps:$4 sm:$0xff]  }
  0x84   :  { %5151 = vmatpush1.bf16.msra.mxu1 %v7440_v31  ;;  %5111 = vmatprep.subr.bf16.mxu0 %v7445_v33  ;;  %v7517_v31 = vld [vmem:[%s11223_s1 + $0x944] ss:$16 sps:$4 sm:$0xff]  }
  0x85   :  { %5152 = vmatprep.subr.bf16.mxu1 %v7448_v34  ;;  %5141 = vmatprep.mubr.bf16.mxu0 %v8988_v41  ;;  %v7520_v33 = vld [vmem:[%s11223_s1 + $0xb44] ss:$16 sps:$4 sm:$0xff]   ;;  %v885_v34 = vcombine.high %v8959_v32, %v8959_v32 }
  0x86   :  { %5182 = vmatprep.mubr.bf16.mxu1 %v8993_v43  ;;  %v7526_v32 = vld [vmem:[%s11223_s1 + $0xb24] ss:$16 sps:$4 sm:$0xff]  }
  0x87   :  { %5112 = vmatpush1.bf16.msra.mxu0 %v7443_v37  ;;  %v7518_v37 = vld [vmem:[%s11223_s1 + $0xb40] ss:$16 sps:$4 sm:$0xff]  }
  0x88   :  { %5153 = vmatpush1.bf16.msra.mxu1 %v7446_v38  ;;  %5113 = vmatprep.subr.bf16.mxu0 %v7451_v39  ;;  %v7523_v38 = vld [vmem:[%s11223_s1 + $0x924] ss:$16 sps:$4 sm:$0xff]   ;;  %v9143_v39 = vrot.slane %v885_v34, %v8646_v49  ;;  %v7584_v34 = vld [vmem:[%s11223_s1 + $0xfe0] ss:$16 sps:$4 sm:$0xff]  }
  0x89   :  { %5154 = vmatprep.subr.bf16.mxu1 %v7454_v40  ;;  %v7521_v40 = vld [vmem:[%s11223_s1 + $0x920] ss:$16 sps:$4 sm:$0xff]  }
  0x8b   :  { %5114 = vmatpush1.bf16.msra.mxu0 %v7449_v44  ;;  %v7524_v44 = vld [vmem:[%s11223_s1 + $0xb20] ss:$16 sps:$4 sm:$0xff]  }
  0x8c   :  { %5155 = vmatpush1.bf16.msra.mxu1 %v7452_v45  ;;  %5115 = vmatprep.subr.bf16.mxu0 %v7457_v46  ;;  %v7529_v45 = vld [vmem:[%s11223_s1 + $0x904] ss:$16 sps:$4 sm:$0xff]  }
  0x8d   :  { %5156 = vmatprep.subr.bf16.mxu1 %v7460_v47  ;;  %v7532_v46 = vld [vmem:[%s11223_s1 + $0xb04] ss:$16 sps:$4 sm:$0xff]   ;;  %v901_v47 = vcombine.high %v9143_v39, %v9143_v39 }
  0x8f   :  { %5116 = vmatpush1.bf16.msra.mxu0 %v7455_v48  ;;  %v7527_v48 = vld [vmem:[%s11223_s1 + $0x900] ss:$16 sps:$4 sm:$0xff]  }
  0x90   :  { %5157 = vmatpush1.bf16.msra.mxu1 %v7458_v50  ;;  %5117 = vmatprep.subr.bf16.mxu0 %v7463_v51  ;;  %v9164_v50 = vrot.slane %v8969_v35, %v8646_v49  ;;  %v7530_v51 = vld [vmem:[%s11223_s1 + $0xb00] ss:$16 sps:$4 sm:$0xff]  }
  0x91   :  { %5158 = vmatprep.subr.bf16.mxu1 %v7466_v52  ;;  %v7535_v52 = vld [vmem:[%s11223_s1 + $0xce4] ss:$16 sps:$4 sm:$0xff]  }
  0x92   :  { %v9180_v35 = vcombine.high %v9164_v50, %v9164_v50 }
  0x93   :  { %5118 = vmatpush1.bf16.msra.mxu0 %v7461_v53  ;;  %v7538_v53 = vld [vmem:[%s11223_s1 + $0xee4] ss:$16 sps:$4 sm:$0xff]  }
  0x94   :  { %5159 = vmatpush1.bf16.msra.mxu1 %v7464_v54  ;;  %5119 = vmatprep.subr.bf16.mxu0 %v7469_v55  ;;  %v9176_v54 = vrot.slane %v901_v47, %v8646_v49  ;;  %v7533_v55 = vld [vmem:[%s11223_s1 + $0xce0] ss:$16 sps:$4 sm:$0xff]   ;;  %v7601_v47 = vld [vmem:[%s11223_s1 + $0xd84] ss:$16 sps:$4 sm:$0xff]  }
  0x95   :  { %5160 = vmatprep.subr.bf16.mxu1 %v7472_v56  ;;  %v7536_v56 = vld [vmem:[%s11223_s1 + $0xee0] ss:$16 sps:$4 sm:$0xff]  }
  0x97   :  { %5120 = vmatpush1.bf16.msra.mxu0 %v7467_v57  ;;  %v7541_v57 = vld [vmem:[%s11223_s1 + $0xcc4] ss:$16 sps:$4 sm:$0xff]  }
  0x98   :  { %5161 = vmatpush1.bf16.msra.mxu1 %v7470_v58  ;;  %5121 = vmatprep.subr.bf16.mxu0 %v7475_v59  ;;  %v7544_v58 = vld [vmem:[%s11223_s1 + $0xec4] ss:$16 sps:$4 sm:$0xff]   ;;  %v9196_v59 = vcombine.high %v9176_v54, %v9176_v54 }
  0x99   :  { %5162 = vmatprep.subr.bf16.mxu1 %v7478_v61  ;;  %v7539_v61 = vld [vmem:[%s11223_s1 + $0xcc0] ss:$16 sps:$4 sm:$0xff]  }
  0x9b   :  { %5122 = vmatpush1.bf16.msra.mxu0 %v7473_v62  ;;  %v7542_v62 = vld [vmem:[%s11223_s1 + $0xec0] ss:$16 sps:$4 sm:$0xff]  }
  0x9c   :  { %5163 = vmatpush1.bf16.msra.mxu1 %v7476_v63  ;;  %5123 = vmatprep.subr.bf16.mxu0 %v7481_v1  ;;  %v7547_v63 = vld [vmem:[%s11223_s1 + $0xca4] ss:$16 sps:$4 sm:$0xff]  }
  0x9d   :  { %5164 = vmatprep.subr.bf16.mxu1 %v7484_v2  ;;  %v7550_v1 = vld [vmem:[%s11223_s1 + $0xea4] ss:$16 sps:$4 sm:$0xff]   ;;  %v7545_v2 = vld [vmem:[%s11223_s1 + $0xca0] ss:$16 sps:$4 sm:$0xff]  }
  0x9f   :  { %5124 = vmatpush1.bf16.msra.mxu0 %v7479_v3  ;;  %v7548_v3 = vld [vmem:[%s11223_s1 + $0xea0] ss:$16 sps:$4 sm:$0xff]  }
  0xa0   :  { %5165 = vmatpush1.bf16.msra.mxu1 %v7482_v4  ;;  %5125 = vmatprep.subr.bf16.mxu0 %v7487_v5  ;;  %v7553_v4 = vld [vmem:[%s11223_s1 + $0xc84] ss:$16 sps:$4 sm:$0xff]  }
  0xa1   :  { %5166 = vmatprep.subr.bf16.mxu1 %v7490_v7  ;;  %v7556_v5 = vld [vmem:[%s11223_s1 + $0xe84] ss:$16 sps:$4 sm:$0xff]   ;;  %v7551_v7 = vld [vmem:[%s11223_s1 + $0xc80] ss:$16 sps:$4 sm:$0xff]  }
  0xa3   :  { %5126 = vmatpush2.bf16.msra.mxu0 %v7485_v8  ;;  %v7554_v8 = vld [vmem:[%s11223_s1 + $0xe80] ss:$16 sps:$4 sm:$0xff]  }
  0xa4   :  { %5167 = vmatpush2.bf16.msra.mxu1 %v7488_v9  ;;  %5127 = vmatprep.subr.bf16.mxu0 %v7493_v10  ;;  %v7559_v9 = vld [vmem:[%s11223_s1 + $0xc64] ss:$16 sps:$4 sm:$0xff]  }
  0xa5   :  { %5168 = vmatprep.subr.bf16.mxu1 %v7496_v11  ;;  %v7562_v10 = vld [vmem:[%s11223_s1 + $0xe64] ss:$16 sps:$4 sm:$0xff]   ;;  %v7557_v11 = vld [vmem:[%s11223_s1 + $0xc60] ss:$16 sps:$4 sm:$0xff]  }
  0xa7   :  { %5128 = vmatpush2.bf16.msra.mxu0 %v7491_v12  ;;  %v7560_v12 = vld [vmem:[%s11223_s1 + $0xe60] ss:$16 sps:$4 sm:$0xff]  }
  0xa8   :  { %5169 = vmatpush2.bf16.msra.mxu1 %v7494_v14  ;;  %5129 = vmatprep.subr.bf16.mxu0 %v7499_v15  ;;  %v7565_v14 = vld [vmem:[%s11223_s1 + $0xc44] ss:$16 sps:$4 sm:$0xff]  }
  0xa9   :  { %5170 = vmatprep.subr.bf16.mxu1 %v7502_v16  ;;  %v7568_v15 = vld [vmem:[%s11223_s1 + $0xe44] ss:$16 sps:$4 sm:$0xff]   ;;  %v7563_v16 = vld [vmem:[%s11223_s1 + $0xc40] ss:$16 sps:$4 sm:$0xff]  }
  0xab   :  { %5130 = vmatpush2.bf16.msra.mxu0 %v7497_v19  ;;  %v7566_v19 = vld [vmem:[%s11223_s1 + $0xe40] ss:$16 sps:$4 sm:$0xff]  }
  0xac   :  { %5171 = vmatpush2.bf16.msra.mxu1 %v7500_v20  ;;  %5131 = vmatprep.subr.bf16.mxu0 %v7505_v21  ;;  %v7571_v20 = vld [vmem:[%s11223_s1 + $0xc24] ss:$16 sps:$4 sm:$0xff]  }
  0xad   :  { %5172 = vmatprep.subr.bf16.mxu1 %v7508_v22  ;;  %v7574_v21 = vld [vmem:[%s11223_s1 + $0xe24] ss:$16 sps:$4 sm:$0xff]   ;;  %v7569_v22 = vld [vmem:[%s11223_s1 + $0xc20] ss:$16 sps:$4 sm:$0xff]  }
  0xaf   :  { %5132 = vmatpush2.bf16.msra.mxu0 %v7503_v24  ;;  %v7572_v24 = vld [vmem:[%s11223_s1 + $0xe20] ss:$16 sps:$4 sm:$0xff]  }
  0xb0   :  { %5173 = vmatpush2.bf16.msra.mxu1 %v7506_v25  ;;  %5133 = vmatprep.subr.bf16.mxu0 %v7511_v27  ;;  %v7577_v25 = vld [vmem:[%s11223_s1 + $0xc04] ss:$16 sps:$4 sm:$0xff]  }
  0xb1   :  { %5174 = vmatprep.subr.bf16.mxu1 %v7514_v28  ;;  %v7580_v27 = vld [vmem:[%s11223_s1 + $0xe04] ss:$16 sps:$4 sm:$0xff]   ;;  %v7575_v28 = vld [vmem:[%s11223_s1 + $0xc00] ss:$16 sps:$4 sm:$0xff]  }
  0xb3   :  { %5134 = vmatpush2.bf16.msra.mxu0 %v7509_v29  ;;  %v7578_v29 = vld [vmem:[%s11223_s1 + $0xe00] ss:$16 sps:$4 sm:$0xff]  }
  0xb4   :  { %5175 = vmatpush2.bf16.msra.mxu1 %v7512_v30  ;;  %5135 = vmatprep.subr.bf16.mxu0 %v7517_v31  ;;  %v7583_v30 = vld [vmem:[%s11223_s1 + $0xde4] ss:$16 sps:$4 sm:$0xff]  }
  0xb5   :  { %5176 = vmatprep.subr.bf16.mxu1 %v7520_v33  ;;  %v7586_v31 = vld [vmem:[%s11223_s1 + $0xfe4] ss:$16 sps:$4 sm:$0xff]   ;;  %v7581_v33 = vld [vmem:[%s11223_s1 + $0xde0] ss:$16 sps:$4 sm:$0xff]  }
  0xb7   :  { %5136 = vmatpush2.bf16.msra.mxu0 %v7515_v36  ;;  %v7589_v36 = vld [vmem:[%s11223_s1 + $0xdc4] ss:$16 sps:$4 sm:$0xff]  }
  0xb8   :  { %5177 = vmatpush2.bf16.msra.mxu1 %v7518_v37  ;;  %5137 = vmatprep.subr.bf16.mxu0 %v7523_v38  ;;  %v7592_v37 = vld [vmem:[%s11223_s1 + $0xfc4] ss:$16 sps:$4 sm:$0xff]   ;;  %v7587_v38 = vld [vmem:[%s11223_s1 + $0xdc0] ss:$16 sps:$4 sm:$0xff]  }
  0xb9   :  { %5178 = vmatprep.subr.bf16.mxu1 %v7526_v32  ;;  %v7590_v32 = vld [vmem:[%s11223_s1 + $0xfc0] ss:$16 sps:$4 sm:$0xff]  }
  0xbb   :  { %5138 = vmatpush2.bf16.msra.mxu0 %v7521_v40  ;;  %v7595_v40 = vld [vmem:[%s11223_s1 + $0xda4] ss:$16 sps:$4 sm:$0xff]  }
  0xbc   :  { %5179 = vmatpush2.bf16.msra.mxu1 %v7524_v44  ;;  %5139 = vmatprep.subr.bf16.mxu0 %v7529_v45  ;;  %v7598_v44 = vld [vmem:[%s11223_s1 + $0xfa4] ss:$16 sps:$4 sm:$0xff]   ;;  %v7593_v45 = vld [vmem:[%s11223_s1 + $0xda0] ss:$16 sps:$4 sm:$0xff]  }
  0xbd   :  { %5180 = vmatprep.subr.bf16.mxu1 %v7532_v46  ;;  %v7596_v46 = vld [vmem:[%s11223_s1 + $0xfa0] ss:$16 sps:$4 sm:$0xff]  }
  0xbf   :  { %5140 = vmatpush2.bf16.msra.mxu0 %v7527_v48  ;;  %v7604_v48 = vld [vmem:[%s11223_s1 + $0xf84] ss:$16 sps:$4 sm:$0xff]  }
  0xc0   :  { %5181 = vmatpush2.bf16.msra.mxu1 %v7530_v51  ;;  %5191 = vmatprep.subr.bf16.mxu0 %v7535_v52  ;;  %v7599_v51 = vld [vmem:[%s11223_s1 + $0xd80] ss:$16 sps:$4 sm:$0xff]  }
  0xc1   :  { %5232 = vmatprep.subr.bf16.mxu1 %v7538_v53  ;;  %v7602_v52 = vld [vmem:[%s11223_s1 + $0xf80] ss:$16 sps:$4 sm:$0xff]   ;;  %v7607_v53 = vld [vmem:[%s11223_s1 + $0xd64] ss:$16 sps:$4 sm:$0xff]  }
  0xc2   :  { %5142 = vmatmul.mubr.bf16.vlgmr.msra.gmra.mxu0 %v9164_v50 }
  0xc3   :  { %5183 = vmatmul.mubr.bf16.vlgmr.msra.gmra.mxu1 %v9180_v35  ;;  %5192 = vmatpush1.bf16.msra.mxu0 %v7533_v55  ;;  %v7610_v55 = vld [vmem:[%s11223_s1 + $0xf64] ss:$16 sps:$4 sm:$0xff]  }
  0xc4   :  { %5233 = vmatpush1.bf16.msra.mxu1 %v7536_v56  ;;  %5193 = vmatprep.subr.bf16.mxu0 %v7541_v57  ;;  %v7605_v56 = vld [vmem:[%s11223_s1 + $0xd60] ss:$16 sps:$4 sm:$0xff]  }
  0xc5   :  { %5234 = vmatprep.subr.bf16.mxu1 %v7544_v58  ;;  %5223 = vmatprep.mubr.bf16.mxu0 %v9176_v54  ;;  %v7608_v57 = vld [vmem:[%s11223_s1 + $0xf60] ss:$16 sps:$4 sm:$0xff]   ;;  %v7613_v58 = vld [vmem:[%s11223_s1 + $0xd44] ss:$16 sps:$4 sm:$0xff]  }
  0xc6   :  { %5264 = vmatprep.mubr.bf16.mxu1 %v9196_v59 }
  0xc7   :  { %5194 = vmatpush1.bf16.msra.mxu0 %v7539_v61  ;;  %v7616_v61 = vld [vmem:[%s11223_s1 + $0xf44] ss:$16 sps:$4 sm:$0xff]  }
  0xc8   :  { %5235 = vmatpush1.bf16.msra.mxu1 %v7542_v62  ;;  %5195 = vmatprep.subr.bf16.mxu0 %v7547_v63  ;;  %v7611_v62 = vld [vmem:[%s11223_s1 + $0xd40] ss:$16 sps:$4 sm:$0xff]  }
  0xc9   :  { %5236 = vmatprep.subr.bf16.mxu1 %v7550_v1  ;;  %v7614_v63 = vld [vmem:[%s11223_s1 + $0xf40] ss:$16 sps:$4 sm:$0xff]  }
  0xca   :  { %v9355_v1 = vld [vmem:[%s11222_s0 + $0x10] sm:$0xff] }
  0xcb   :  { %5196 = vmatpush1.bf16.msra.mxu0 %v7545_v2  ;;  %v7619_v2 = vld [vmem:[%s11223_s1 + $0xd24] ss:$16 sps:$4 sm:$0xff]  }
  0xcc   :  { %5237 = vmatpush1.bf16.msra.mxu1 %v7548_v3  ;;  %5197 = vmatprep.subr.bf16.mxu0 %v7553_v4  ;;  %v7622_v3 = vld [vmem:[%s11223_s1 + $0xf24] ss:$16 sps:$4 sm:$0xff]   ;;  %v9365_v4 = vrot.slane %v9355_v1, %v8646_v49 }
  0xcd   :  { %5238 = vmatprep.subr.bf16.mxu1 %v7556_v5  ;;  %v7617_v5 = vld [vmem:[%s11223_s1 + $0xd20] ss:$16 sps:$4 sm:$0xff]  }
  0xcf   :  { %5198 = vmatpush1.bf16.msra.mxu0 %v7551_v7  ;;  %v7620_v7 = vld [vmem:[%s11223_s1 + $0xf20] ss:$16 sps:$4 sm:$0xff]  }
  0xd0   :  { %5239 = vmatpush1.bf16.msra.mxu1 %v7554_v8  ;;  %5199 = vmatprep.subr.bf16.mxu0 %v7559_v9  ;;  %v7625_v8 = vld [vmem:[%s11223_s1 + $0xd04] ss:$16 sps:$4 sm:$0xff]  }
  0xd1   :  { %5240 = vmatprep.subr.bf16.mxu1 %v7562_v10  ;;  %v7628_v9 = vld [vmem:[%s11223_s1 + $0xf04] ss:$16 sps:$4 sm:$0xff]   ;;  %v7623_v10 = vld [vmem:[%s11223_s1 + $0xd00] ss:$16 sps:$4 sm:$0xff]  }
  0xd3   :  { %5200 = vmatpush1.bf16.msra.mxu0 %v7557_v11  ;;  %v949_v11 = vcombine.high %v9365_v4, %v9365_v4 }
  0xd4   :  { %5241 = vmatpush1.bf16.msra.mxu1 %v7560_v12  ;;  %5201 = vmatprep.subr.bf16.mxu0 %v7565_v14  ;;  %v7626_v12 = vld [vmem:[%s11223_s1 + $0xf00] ss:$16 sps:$4 sm:$0xff]  }
  0xd5   :  { %5242 = vmatprep.subr.bf16.mxu1 %v7568_v15  ;;  %v810_v14 = vld [vmem:[%s11224_s2] sm:$0xf]  ;;  %v9392_v15 = vrot.slane %v9143_v39, %v8646_v49 }
  0xd7   :  { %5202 = vmatpush1.bf16.msra.mxu0 %v7563_v16  ;;  %v814_v16 = vsub.s32 0, %v8628_v42  ;;  %v9407_v39 = vcombine.high %v9392_v15, %v9392_v15 }
  0xd8   :  { %5243 = vmatpush1.bf16.msra.mxu1 %v7566_v19  ;;  %5203 = vmatprep.subr.bf16.mxu0 %v7571_v20  ;;  %v7632_v19 = vld [vmem:[%s11223_s1 + $0x10e4] ss:$16 sps:$4 sm:$0xff]  }
  0xd9   :  { %5244 = vmatprep.subr.bf16.mxu1 %v7574_v21  ;;  %v7635_v20 = vld [vmem:[%s11223_s1 + $0x12e4] ss:$16 sps:$4 sm:$0xff]   ;;  %v818_v21 = vsub.s32 1, %v8628_v42 }
  0xdb   :  { %5204 = vmatpush1.bf16.msra.mxu0 %v7569_v22  ;;  %v9403_v22 = vrot.slane %v949_v11, %v8646_v49  ;;  %v7663_v11 = vld [vmem:[%s11223_s1 + $0x1240] ss:$16 sps:$4 sm:$0xff]  }
  0xdc   :  { %5245 = vmatpush1.bf16.msra.mxu1 %v7572_v24  ;;  %5205 = vmatprep.subr.bf16.mxu0 %v7577_v25  ;;  %v7630_v24 = vld [vmem:[%s11223_s1 + $0x10e0] ss:$16 sps:$4 sm:$0xff]  }
  0xdd   :  { %5246 = vmatprep.subr.bf16.mxu1 %v7580_v27  ;;  %v7633_v25 = vld [vmem:[%s11223_s1 + $0x12e0] ss:$16 sps:$4 sm:$0xff]   ;;  %v815_v27 = vrot.slane %v810_v14, %v814_v16 }
  0xde   :  { %v7666_v16 = vld [vmem:[%s11223_s1 + $0x1020] ss:$16 sps:$4 sm:$0xff]  }
  0xdf   :  { %5206 = vmatpush1.bf16.msra.mxu0 %v7575_v28  ;;  %v7638_v28 = vld [vmem:[%s11223_s1 + $0x10c4] ss:$16 sps:$4 sm:$0xff]  }
  0xe0   :  { %5247 = vmatpush1.bf16.msra.mxu1 %v7578_v29  ;;  %5207 = vmatprep.subr.bf16.mxu0 %v7583_v30  ;;  %v7641_v29 = vld [vmem:[%s11223_s1 + $0x12c4] ss:$16 sps:$4 sm:$0xff]   ;;  %v819_v30 = vrot.slane %v810_v14, %v818_v21 }
  0xe1   :  { %5248 = vmatprep.subr.bf16.mxu1 %v7586_v31  ;;  %v9423_v31 = vcombine.high %v9403_v22, %v9403_v22  ;;  %v7671_v14 = vld [vmem:[%s11223_s1 + $0x1224] ss:$16 sps:$4 sm:$0xff]  }
  0xe2   :  { %v7677_v21 = vld [vmem:[%s11223_s1 + $0x1204] ss:$16 sps:$4 sm:$0xff]  }
  0xe3   :  { %5208 = vmatpush2.bf16.msra.mxu0 %v7581_v33 }
  0xe4   :  { %5249 = vmatpush2.bf16.msra.mxu1 %v7584_v34  ;;  %5209 = vmatprep.subr.bf16.mxu0 %v7589_v36  ;;  %v7636_v36 = vld [vmem:[%s11223_s1 + $0x10c0] ss:$16 sps:$4 sm:$0xff]  }
  0xe5   :  { %5250 = vmatprep.subr.bf16.mxu1 %v7592_v37  ;;  %v7639_v37 = vld [vmem:[%s11223_s1 + $0x12c0] ss:$16 sps:$4 sm:$0xff]  }
  0xe7   :  { %5210 = vmatpush2.bf16.msra.mxu0 %v7587_v38 }
  0xe8   :  { %5251 = vmatpush2.bf16.msra.mxu1 %v7590_v32  ;;  %5211 = vmatprep.subr.bf16.mxu0 %v7595_v40 }
  0xe9   :  { %5252 = vmatprep.subr.bf16.mxu1 %v7598_v44  ;;  %v7644_v44 = vld [vmem:[%s11223_s1 + $0x10a4] ss:$16 sps:$4 sm:$0xff]  }
  0xeb   :  { %5212 = vmatpush2.bf16.msra.mxu0 %v7593_v45  ;;  %v7647_v45 = vld [vmem:[%s11223_s1 + $0x12a4] ss:$16 sps:$4 sm:$0xff]  }
  0xec   :  { %5253 = vmatpush2.bf16.msra.mxu1 %v7596_v46  ;;  %5213 = vmatprep.subr.bf16.mxu0 %v7601_v47 }
  0xed   :  { %5254 = vmatprep.subr.bf16.mxu1 %v7604_v48  ;;  %v7642_v48 = vld [vmem:[%s11223_s1 + $0x10a0] ss:$16 sps:$4 sm:$0xff]  }
  0xef   :  { %5214 = vmatpush2.bf16.msra.mxu0 %v7599_v51  ;;  %v7645_v51 = vld [vmem:[%s11223_s1 + $0x12a0] ss:$16 sps:$4 sm:$0xff]  }
  0xf0   :  { %5255 = vmatpush2.bf16.msra.mxu1 %v7602_v52  ;;  %5215 = vmatprep.subr.bf16.mxu0 %v7607_v53 }
  0xf1   :  { %5256 = vmatprep.subr.bf16.mxu1 %v7610_v55 }
  0xf3   :  { %5216 = vmatpush2.bf16.msra.mxu0 %v7605_v56 }
  0xf4   :  { %5257 = vmatpush2.bf16.msra.mxu1 %v7608_v57  ;;  %5217 = vmatprep.subr.bf16.mxu0 %v7613_v58  ;;  %v7650_v58 = vld [vmem:[%s11223_s1 + $0x1084] ss:$16 sps:$4 sm:$0xff]  }
  0xf5   :  { %5258 = vmatprep.subr.bf16.mxu1 %v7616_v61  ;;  %v7653_v61 = vld [vmem:[%s11223_s1 + $0x1284] ss:$16 sps:$4 sm:$0xff]  }
  0xf7   :  { %5218 = vmatpush2.bf16.msra.mxu0 %v7611_v62  ;;  %v7648_v62 = vld [vmem:[%s11223_s1 + $0x1080] ss:$16 sps:$4 sm:$0xff]  }
  0xf8   :  { %5259 = vmatpush2.bf16.msra.mxu1 %v7614_v63  ;;  %5219 = vmatprep.subr.bf16.mxu0 %v7619_v2  ;;  %v7651_v63 = vld [vmem:[%s11223_s1 + $0x1280] ss:$16 sps:$4 sm:$0xff]   ;;  %v7656_v2 = vld [vmem:[%s11223_s1 + $0x1064] ss:$16 sps:$4 sm:$0xff]  }
  0xf9   :  { %5260 = vmatprep.subr.bf16.mxu1 %v7622_v3  ;;  %v7659_v3 = vld [vmem:[%s11223_s1 + $0x1264] ss:$16 sps:$4 sm:$0xff]  }
  0xfb   :  { %5220 = vmatpush2.bf16.msra.mxu0 %v7617_v5  ;;  %v7654_v5 = vld [vmem:[%s11223_s1 + $0x1060] ss:$16 sps:$4 sm:$0xff]  }
  0xfc   :  { %5261 = vmatpush2.bf16.msra.mxu1 %v7620_v7  ;;  %5221 = vmatprep.subr.bf16.mxu0 %v7625_v8  ;;  %v7657_v7 = vld [vmem:[%s11223_s1 + $0x1260] ss:$16 sps:$4 sm:$0xff]   ;;  %v7662_v8 = vld [vmem:[%s11223_s1 + $0x1044] ss:$16 sps:$4 sm:$0xff]  }
  0xfd   :  { %5262 = vmatprep.subr.bf16.mxu1 %v7628_v9  ;;  %v7665_v9 = vld [vmem:[%s11223_s1 + $0x1244] ss:$16 sps:$4 sm:$0xff]  }
  0xff   :  { %5222 = vmatpush2.bf16.msra.mxu0 %v7623_v10  ;;  %v7660_v10 = vld [vmem:[%s11223_s1 + $0x1040] ss:$16 sps:$4 sm:$0xff]  }
 0x100   :  { %5263 = vmatpush2.bf16.msra.mxu1 %v7626_v12  ;;  %5273 = vmatprep.subr.bf16.mxu0 %v7632_v19  ;;  %v7668_v12 = vld [vmem:[%s11223_s1 + $0x1024] ss:$16 sps:$4 sm:$0xff]   ;;  %v7669_v19 = vld [vmem:[%s11223_s1 + $0x1220] ss:$16 sps:$4 sm:$0xff]  }
 0x101   :  { %5314 = vmatprep.subr.bf16.mxu1 %v7635_v20  ;;  %v7674_v20 = vld [vmem:[%s11223_s1 + $0x1004] ss:$16 sps:$4 sm:$0xff]  }
 0x102   :  { %v4979_v33 = vpop.f32.mrf.mxu0  ;;  %5224 = vmatmul.mubr.bf16.vlgmr.msra.gmra.mxu0 %v9392_v15 }
 0x103   :  { %v5020_v34 = vpop.f32.mrf.mxu1  ;;  %5265 = vmatmul.mubr.bf16.vlgmr.msra.gmra.mxu1 %v9407_v39  ;;  %v4980_v38 = vadd.f32 %v4979_v33, %v815_v27  ;;  %5274 = vmatpush1.bf16.msra.mxu0 %v7630_v24  ;;  %v7672_v24 = vld [vmem:[%s11223_s1 + $0x1000] ss:$16 sps:$4 sm:$0xff]   ;;  %v7680_v27 = vld [vmem:[%s11223_s1 + $0x11e4] ss:$16 sps:$4 sm:$0xff]  }
 0x104   :  { %5315 = vmatpush1.bf16.msra.mxu1 %v7633_v25  ;;  %v4981_v32 = vpop.f32.mrf.mxu0  ;;  %5275 = vmatprep.subr.bf16.mxu0 %v7638_v28  ;;  %v7675_v25 = vld [vmem:[%s11223_s1 + $0x1200] ss:$16 sps:$4 sm:$0xff]   ;;  %v7683_v28 = vld [vmem:[%s11223_s1 + $0x13e4] ss:$16 sps:$4 sm:$0xff]  }
 0x105   :  { %v5022_v40 = vpop.f32.mrf.mxu1  ;;  %5316 = vmatprep.subr.bf16.mxu1 %v7641_v29  ;;  %v9439_v46 = vadd.f32 %v5020_v34, %v4980_v38  ;;  %v4982_v47 = vadd.f32 %v4981_v32, %v819_v30  ;;  %5305 = vmatprep.mubr.bf16.mxu0 %v9403_v22  ;;  %v7678_v29 = vld [vmem:[%s11223_s1 + $0x11e0] ss:$16 sps:$4 sm:$0xff]   ;;  %v7686_v33 = vld [vmem:[%s11223_s1 + $0x11c4] ss:$16 sps:$4 sm:$0xff]  }
 0x106   :  { %5346 = vmatprep.mubr.bf16.mxu1 %v9423_v31  ;;  %v4983_v52 = vpop.f32.mrf.mxu0  ;;  %v7681_v30 = vld [vmem:[%s11223_s1 + $0x13e0] ss:$16 sps:$4 sm:$0xff]   ;;  %v7689_v34 = vld [vmem:[%s11223_s1 + $0x13c4] ss:$16 sps:$4 sm:$0xff]  }
 0x107   :  { %v5024_v53 = vpop.f32.mrf.mxu1  ;;  %v9449_v55 = vadd.f32 %v5022_v40, %v4982_v47  ;;  %5276 = vmatpush1.bf16.msra.mxu0 %v7636_v36  ;;  %v7684_v36 = vld [vmem:[%s11223_s1 + $0x11c0] ss:$16 sps:$4 sm:$0xff]   ;;  %v7692_v38 = vld [vmem:[%s11223_s1 + $0x11a4] ss:$16 sps:$4 sm:$0xff]  }
 0x108   :  { %5317 = vmatpush1.bf16.msra.mxu1 %v7639_v37  ;;  %v4984_v56 = vpop.f32.mrf.mxu0  ;;  %5277 = vmatprep.subr.bf16.mxu0 %v7644_v44  ;;  %v7687_v37 = vld [vmem:[%s11223_s1 + $0x13c0] ss:$16 sps:$4 sm:$0xff]   ;;  %v7695_v32 = vld [vmem:[%s11223_s1 + $0x13a4] ss:$16 sps:$4 sm:$0xff]  }
 0x109   :  { %v5025_v57 = vpop.f32.mrf.mxu1  ;;  %5318 = vmatprep.subr.bf16.mxu1 %v7647_v45  ;;  %v7690_v40 = vld [vmem:[%s11223_s1 + $0x11a0] ss:$16 sps:$4 sm:$0xff]   ;;  %v7698_v45 = vld [vmem:[%s11223_s1 + $0x1184] ss:$16 sps:$4 sm:$0xff]  }
 0x10a   :  { %v7693_v44 = vld [vmem:[%s11223_s1 + $0x13a0] ss:$16 sps:$4 sm:$0xff]   ;;  %v7701_v47 = vld [vmem:[%s11223_s1 + $0x1384] ss:$16 sps:$4 sm:$0xff]  }
 0x10b   :  { %5278 = vmatpush1.bf16.msra.mxu0 %v7642_v48  ;;  %v7696_v48 = vld [vmem:[%s11223_s1 + $0x1180] ss:$16 sps:$4 sm:$0xff]   ;;  %v7704_v52 = vld [vmem:[%s11223_s1 + $0x1164] ss:$16 sps:$4 sm:$0xff]  }
 0x10c   :  { %5319 = vmatpush1.bf16.msra.mxu1 %v7645_v51  ;;  %5279 = vmatprep.subr.bf16.mxu0 %v7650_v58  ;;  %v7699_v51 = vld [vmem:[%s11223_s1 + $0x1380] ss:$16 sps:$4 sm:$0xff]   ;;  %v7707_v53 = vld [vmem:[%s11223_s1 + $0x1364] ss:$16 sps:$4 sm:$0xff]  }
 0x10d   :  { %5320 = vmatprep.subr.bf16.mxu1 %v7653_v61  ;;  %v7702_v56 = vld [vmem:[%s11223_s1 + $0x1160] ss:$16 sps:$4 sm:$0xff]   ;;  %v7710_v58 = vld [vmem:[%s11223_s1 + $0x1144] ss:$16 sps:$4 sm:$0xff]  }
 0x10e   :  { %v7705_v57 = vld [vmem:[%s11223_s1 + $0x1360] ss:$16 sps:$4 sm:$0xff]   ;;  %v7713_v61 = vld [vmem:[%s11223_s1 + $0x1344] ss:$16 sps:$4 sm:$0xff]  }
 0x10f   :  { %5280 = vmatpush1.bf16.msra.mxu0 %v7648_v62  ;;  %v934_v62 = vcombine.high %v9355_v1, %v9355_v1  ;;  %v7719_v1 = vld [vmem:[%s11223_s1 + $0x1324] ss:$16 sps:$4 sm:$0xff]  }
 0x110   :  { %5321 = vmatpush1.bf16.msra.mxu1 %v7651_v63  ;;  %5281 = vmatprep.subr.bf16.mxu0 %v7656_v2  ;;  %v7708_v63 = vld [vmem:[%s11223_s1 + $0x1140] ss:$16 sps:$4 sm:$0xff]  }
 0x111   :  { %5322 = vmatprep.subr.bf16.mxu1 %v7659_v3  ;;  %v7711_v2 = vld [vmem:[%s11223_s1 + $0x1340] ss:$16 sps:$4 sm:$0xff]   ;;  %v7716_v3 = vld [vmem:[%s11223_s1 + $0x1124] ss:$16 sps:$4 sm:$0xff]  }
 0x113   :  { %5282 = vmatpush1.bf16.msra.mxu0 %v7654_v5  ;;  %v9592_v5 = vrot.slane %v934_v62, %v8646_v49  ;;  %v7747_v62 = vld [vmem:[%s11223_s1 + $0x1680] ss:$16 sps:$4 sm:$0xff]  }
 0x114   :  { %5323 = vmatpush1.bf16.msra.mxu1 %v7657_v7  ;;  %5283 = vmatprep.subr.bf16.mxu0 %v7662_v8  ;;  %v7714_v7 = vld [vmem:[%s11223_s1 + $0x1120] ss:$16 sps:$4 sm:$0xff]  }
 0x115   :  { %5324 = vmatprep.subr.bf16.mxu1 %v7665_v9  ;;  %v7717_v8 = vld [vmem:[%s11223_s1 + $0x1320] ss:$16 sps:$4 sm:$0xff]   ;;  %v7722_v9 = vld [vmem:[%s11223_s1 + $0x1104] ss:$16 sps:$4 sm:$0xff]  }
 0x117   :  { %5284 = vmatpush1.bf16.msra.mxu0 %v7660_v10  ;;  %v7725_v10 = vld [vmem:[%s11223_s1 + $0x1304] ss:$16 sps:$4 sm:$0xff]  }
 0x118   :  { %5325 = vmatpush1.bf16.msra.mxu1 %v7663_v11  ;;  %5285 = vmatprep.subr.bf16.mxu0 %v7668_v12  ;;  %v950_v11 = vcombine.high %v9592_v5, %v9592_v5  ;;  %v9610_v12 = vrot.slane %v9365_v4, %v8646_v49  ;;  %v7731_v4 = vld [vmem:[%s11223_s1 + $0x16e4] ss:$16 sps:$4 sm:$0xff]  }
 0x119   :  { %5326 = vmatprep.subr.bf16.mxu1 %v7671_v14  ;;  %v7720_v14 = vld [vmem:[%s11223_s1 + $0x1100] ss:$16 sps:$4 sm:$0xff]  }
 0x11b   :  { %5286 = vmatpush1.bf16.msra.mxu0 %v7666_v16  ;;  %v7723_v16 = vld [vmem:[%s11223_s1 + $0x1300] ss:$16 sps:$4 sm:$0xff]  }
 0x11c   :  { %5327 = vmatpush1.bf16.msra.mxu1 %v7669_v19  ;;  %5287 = vmatprep.subr.bf16.mxu0 %v7674_v20  ;;  %v7728_v19 = vld [vmem:[%s11223_s1 + $0x14e4] ss:$16 sps:$4 sm:$0xff]   ;;  %v7726_v20 = vld [vmem:[%s11223_s1 + $0x14e0] ss:$16 sps:$4 sm:$0xff]  }
 0x11d   :  { %5328 = vmatprep.subr.bf16.mxu1 %v7677_v21  ;;  %v7729_v21 = vld [vmem:[%s11223_s1 + $0x16e0] ss:$16 sps:$4 sm:$0xff]  }
 0x11f   :  { %5288 = vmatpush1.bf16.msra.mxu0 %v7672_v24  ;;  %v9631_v24 = vrot.slane %v950_v11, %v8646_v49  ;;  %v7764_v11 = vld [vmem:[%s11223_s1 + $0x1424] ss:$16 sps:$4 sm:$0xff]  }
 0x120   :  { %5329 = vmatpush1.bf16.msra.mxu1 %v7675_v25  ;;  %5289 = vmatprep.subr.bf16.mxu0 %v7680_v27  ;;  %v9635_v25 = vcombine.high %v9610_v12, %v9610_v12  ;;  %v7734_v27 = vld [vmem:[%s11223_s1 + $0x14c4] ss:$16 sps:$4 sm:$0xff]  }
 0x121   :  { %5330 = vmatprep.subr.bf16.mxu1 %v7683_v28  ;;  %v7737_v28 = vld [vmem:[%s11223_s1 + $0x16c4] ss:$16 sps:$4 sm:$0xff]  }
 0x123   :  { %5290 = vmatpush2.bf16.msra.mxu0 %v7678_v29  ;;  %v7732_v29 = vld [vmem:[%s11223_s1 + $0x14c0] ss:$16 sps:$4 sm:$0xff]  }
 0x124   :  { %5331 = vmatpush2.bf16.msra.mxu1 %v7681_v30  ;;  %5291 = vmatprep.subr.bf16.mxu0 %v7686_v33  ;;  %v7735_v30 = vld [vmem:[%s11223_s1 + $0x16c0] ss:$16 sps:$4 sm:$0xff]   ;;  %v9651_v33 = vcombine.high %v9631_v24, %v9631_v24 }
 0x125   :  { %5332 = vmatprep.subr.bf16.mxu1 %v7689_v34 }
 0x127   :  { %5292 = vmatpush2.bf16.msra.mxu0 %v7684_v36 }
 0x128   :  { %5333 = vmatpush2.bf16.msra.mxu1 %v7687_v37  ;;  %5293 = vmatprep.subr.bf16.mxu0 %v7692_v38 }
 0x129   :  { %5334 = vmatprep.subr.bf16.mxu1 %v7695_v32 }
 0x12b   :  { %5294 = vmatpush2.bf16.msra.mxu0 %v7690_v40  ;;  %v7740_v40 = vld [vmem:[%s11223_s1 + $0x14a4] ss:$16 sps:$4 sm:$0xff]  }
 0x12c   :  { %5335 = vmatpush2.bf16.msra.mxu1 %v7693_v44  ;;  %5295 = vmatprep.subr.bf16.mxu0 %v7698_v45  ;;  %v7743_v44 = vld [vmem:[%s11223_s1 + $0x16a4] ss:$16 sps:$4 sm:$0xff]  }
 0x12d   :  { %5336 = vmatprep.subr.bf16.mxu1 %v7701_v47 }
 0x12f   :  { %5296 = vmatpush2.bf16.msra.mxu0 %v7696_v48  ;;  %v7741_v48 = vld [vmem:[%s11223_s1 + $0x16a0] ss:$16 sps:$4 sm:$0xff]  }
 0x130   :  { %5337 = vmatpush2.bf16.msra.mxu1 %v7699_v51  ;;  %5297 = vmatprep.subr.bf16.mxu0 %v7704_v52 }
 0x131   :  { %5338 = vmatprep.subr.bf16.mxu1 %v7707_v53 }
 0x133   :  { %5298 = vmatpush2.bf16.msra.mxu0 %v7702_v56 }
 0x134   :  { %5339 = vmatpush2.bf16.msra.mxu1 %v7705_v57  ;;  %5299 = vmatprep.subr.bf16.mxu0 %v7710_v58  ;;  %v7746_v57 = vld [vmem:[%s11223_s1 + $0x1484] ss:$16 sps:$4 sm:$0xff]  }
 0x135   :  { %5340 = vmatprep.subr.bf16.mxu1 %v7713_v61  ;;  %v7749_v58 = vld [vmem:[%s11223_s1 + $0x1684] ss:$16 sps:$4 sm:$0xff]   ;;  %v7744_v61 = vld [vmem:[%s11223_s1 + $0x1480] ss:$16 sps:$4 sm:$0xff]  }
 0x137   :  { %5300 = vmatpush2.bf16.msra.mxu0 %v7708_v63  ;;  %v7752_v63 = vld [vmem:[%s11223_s1 + $0x1464] ss:$16 sps:$4 sm:$0xff]  }
 0x138   :  { %5341 = vmatpush2.bf16.msra.mxu1 %v7711_v2  ;;  %5301 = vmatprep.subr.bf16.mxu0 %v7716_v3  ;;  %v7755_v2 = vld [vmem:[%s11223_s1 + $0x1664] ss:$16 sps:$4 sm:$0xff]   ;;  %v7750_v3 = vld [vmem:[%s11223_s1 + $0x1460] ss:$16 sps:$4 sm:$0xff]  }
 0x139   :  { %5342 = vmatprep.subr.bf16.mxu1 %v7719_v1  ;;  %v7753_v1 = vld [vmem:[%s11223_s1 + $0x1660] ss:$16 sps:$4 sm:$0xff]  }
 0x13b   :  { %5302 = vmatpush2.bf16.msra.mxu0 %v7714_v7  ;;  %v7758_v7 = vld [vmem:[%s11223_s1 + $0x1444] ss:$16 sps:$4 sm:$0xff]  }
 0x13c   :  { %5343 = vmatpush2.bf16.msra.mxu1 %v7717_v8  ;;  %5303 = vmatprep.subr.bf16.mxu0 %v7722_v9  ;;  %v7761_v8 = vld [vmem:[%s11223_s1 + $0x1644] ss:$16 sps:$4 sm:$0xff]   ;;  %v7756_v9 = vld [vmem:[%s11223_s1 + $0x1440] ss:$16 sps:$4 sm:$0xff]  }
 0x13d   :  { %5344 = vmatprep.subr.bf16.mxu1 %v7725_v10  ;;  %v7759_v10 = vld [vmem:[%s11223_s1 + $0x1640] ss:$16 sps:$4 sm:$0xff]  }
 0x13f   :  { %5304 = vmatpush2.bf16.msra.mxu0 %v7720_v14  ;;  %v7767_v14 = vld [vmem:[%s11223_s1 + $0x1624] ss:$16 sps:$4 sm:$0xff]  }
 0x140   :  { %5345 = vmatpush2.bf16.msra.mxu1 %v7723_v16  ;;  %5355 = vmatprep.subr.bf16.mxu0 %v7728_v19  ;;  %v7762_v16 = vld [vmem:[%s11223_s1 + $0x1420] ss:$16 sps:$4 sm:$0xff]  }
 0x141   :  { %5396 = vmatprep.subr.bf16.mxu1 %v7731_v4  ;;  %v7765_v19 = vld [vmem:[%s11223_s1 + $0x1620] ss:$16 sps:$4 sm:$0xff]   ;;  %v7770_v4 = vld [vmem:[%s11223_s1 + $0x1404] ss:$16 sps:$4 sm:$0xff]  }
 0x142   :  { %v5061_v34 = vpop.f32.mrf.mxu0  ;;  %5306 = vmatmul.mubr.bf16.vlgmr.msra.gmra.mxu0 %v9610_v12 }
 0x143   :  { %v5102_v36 = vpop.f32.mrf.mxu1  ;;  %5347 = vmatmul.mubr.bf16.vlgmr.msra.gmra.mxu1 %v9635_v25  ;;  %v5062_v37 = vadd.f32 %v5061_v34, %v9439_v46  ;;  %5356 = vmatpush1.bf16.msra.mxu0 %v7726_v20  ;;  %v7738_v46 = vld [vmem:[%s11223_s1 + $0x14a0] ss:$16 sps:$4 sm:$0xff]   ;;  %v7773_v20 = vld [vmem:[%s11223_s1 + $0x1604] ss:$16 sps:$4 sm:$0xff]  }
 0x144   :  { %5397 = vmatpush1.bf16.msra.mxu1 %v7729_v21  ;;  %v5063_v38 = vpop.f32.mrf.mxu0  ;;  %5357 = vmatprep.subr.bf16.mxu0 %v7734_v27  ;;  %v7768_v21 = vld [vmem:[%s11223_s1 + $0x1400] ss:$16 sps:$4 sm:$0xff]  }
 0x145   :  { %v5104_v32 = vpop.f32.mrf.mxu1  ;;  %5398 = vmatprep.subr.bf16.mxu1 %v7737_v28  ;;  %v9662_v45 = vadd.f32 %v5102_v36, %v5062_v37  ;;  %v5064_v47 = vadd.f32 %v5063_v38, %v9449_v55  ;;  %5387 = vmatprep.mubr.bf16.mxu0 %v9631_v24  ;;  %v7771_v27 = vld [vmem:[%s11223_s1 + $0x1600] ss:$16 sps:$4 sm:$0xff]   ;;  %v7776_v28 = vld [vmem:[%s11223_s1 + $0x15e4] ss:$16 sps:$4 sm:$0xff]  }
 0x146   :  { %5428 = vmatprep.mubr.bf16.mxu1 %v9651_v33  ;;  %v5065_v51 = vpop.f32.mrf.mxu0  ;;  %v7777_v34 = vld [vmem:[%s11223_s1 + $0x17e0] ss:$16 sps:$4 sm:$0xff]   ;;  %v7782_v36 = vld [vmem:[%s11223_s1 + $0x15c4] ss:$16 sps:$4 sm:$0xff]  }
 0x147   :  { %v5106_v52 = vpop.f32.mrf.mxu1  ;;  %v9673_v53 = vadd.f32 %v5104_v32, %v5064_v47  ;;  %5358 = vmatpush1.bf16.msra.mxu0 %v7732_v29  ;;  %v7779_v29 = vld [vmem:[%s11223_s1 + $0x17e4] ss:$16 sps:$4 sm:$0xff]   ;;  %v7780_v38 = vld [vmem:[%s11223_s1 + $0x15c0] ss:$16 sps:$4 sm:$0xff]  }
 0x148   :  { %5399 = vmatpush1.bf16.msra.mxu1 %v7735_v30  ;;  %v5066_v56 = vpop.f32.mrf.mxu0  ;;  %5359 = vmatprep.subr.bf16.mxu0 %v7740_v40  ;;  %v7774_v30 = vld [vmem:[%s11223_s1 + $0x15e0] ss:$16 sps:$4 sm:$0xff]   ;;  %v7785_v37 = vld [vmem:[%s11223_s1 + $0x17c4] ss:$16 sps:$4 sm:$0xff]  }
 0x149   :  { %v5107_v55 = vpop.f32.mrf.mxu1  ;;  %5400 = vmatprep.subr.bf16.mxu1 %v7743_v44  ;;  %v7783_v32 = vld [vmem:[%s11223_s1 + $0x17c0] ss:$16 sps:$4 sm:$0xff]   ;;  %v7788_v40 = vld [vmem:[%s11223_s1 + $0x15a4] ss:$16 sps:$4 sm:$0xff]  }
 0x14a   :  { %v7791_v44 = vld [vmem:[%s11223_s1 + $0x17a4] ss:$16 sps:$4 sm:$0xff]   ;;  %v7786_v47 = vld [vmem:[%s11223_s1 + $0x15a0] ss:$16 sps:$4 sm:$0xff]  }
 0x14b   :  { %5360 = vmatpush1.bf16.msra.mxu0 %v7738_v46  ;;  %v7789_v46 = vld [vmem:[%s11223_s1 + $0x17a0] ss:$16 sps:$4 sm:$0xff]   ;;  %v7797_v51 = vld [vmem:[%s11223_s1 + $0x1784] ss:$16 sps:$4 sm:$0xff]  }
 0x14c   :  { %5401 = vmatpush1.bf16.msra.mxu1 %v7741_v48  ;;  %5361 = vmatprep.subr.bf16.mxu0 %v7746_v57  ;;  %v7794_v48 = vld [vmem:[%s11223_s1 + $0x1584] ss:$16 sps:$4 sm:$0xff]   ;;  %v7792_v52 = vld [vmem:[%s11223_s1 + $0x1580] ss:$16 sps:$4 sm:$0xff]  }
 0x14d   :  { %5402 = vmatprep.subr.bf16.mxu1 %v7749_v58  ;;  %v7795_v56 = vld [vmem:[%s11223_s1 + $0x1780] ss:$16 sps:$4 sm:$0xff]   ;;  %v7800_v55 = vld [vmem:[%s11223_s1 + $0x1564] ss:$16 sps:$4 sm:$0xff]  }
 0x14e   :  { %v7803_v57 = vld [vmem:[%s11223_s1 + $0x1764] ss:$16 sps:$4 sm:$0xff]   ;;  %v7798_v58 = vld [vmem:[%s11223_s1 + $0x1560] ss:$16 sps:$4 sm:$0xff]  }
 0x14f   :  { %5362 = vmatpush1.bf16.msra.mxu0 %v7744_v61  ;;  %v7801_v61 = vld [vmem:[%s11223_s1 + $0x1760] ss:$16 sps:$4 sm:$0xff]  }
 0x150   :  { %5403 = vmatpush1.bf16.msra.mxu1 %v7747_v62  ;;  %5363 = vmatprep.subr.bf16.mxu0 %v7752_v63  ;;  %v7806_v62 = vld [vmem:[%s11223_s1 + $0x1544] ss:$16 sps:$4 sm:$0xff]  }
 0x151   :  { %5404 = vmatprep.subr.bf16.mxu1 %v7755_v2  ;;  %v7809_v63 = vld [vmem:[%s11223_s1 + $0x1744] ss:$16 sps:$4 sm:$0xff]   ;;  %v7804_v2 = vld [vmem:[%s11223_s1 + $0x1540] ss:$16 sps:$4 sm:$0xff]  }
 0x153   :  { %5364 = vmatpush1.bf16.msra.mxu0 %v7750_v3  ;;  %v7807_v3 = vld [vmem:[%s11223_s1 + $0x1740] ss:$16 sps:$4 sm:$0xff]  }
 0x154   :  { %5405 = vmatpush1.bf16.msra.mxu1 %v7753_v1  ;;  %5365 = vmatprep.subr.bf16.mxu0 %v7758_v7  ;;  %v7812_v1 = vld [vmem:[%s11223_s1 + $0x1524] ss:$16 sps:$4 sm:$0xff]  }
 0x155   :  { %5406 = vmatprep.subr.bf16.mxu1 %v7761_v8  ;;  %v7815_v7 = vld [vmem:[%s11223_s1 + $0x1724] ss:$16 sps:$4 sm:$0xff]   ;;  %v7810_v8 = vld [vmem:[%s11223_s1 + $0x1520] ss:$16 sps:$4 sm:$0xff]  }
 0x157   :  { %5366 = vmatpush1.bf16.msra.mxu0 %v7756_v9  ;;  %v7813_v9 = vld [vmem:[%s11223_s1 + $0x1720] ss:$16 sps:$4 sm:$0xff]  }
 0x158   :  { %5407 = vmatpush1.bf16.msra.mxu1 %v7759_v10  ;;  %5367 = vmatprep.subr.bf16.mxu0 %v7764_v11  ;;  %v7818_v10 = vld [vmem:[%s11223_s1 + $0x1504] ss:$16 sps:$4 sm:$0xff]  }
 0x159   :  { %5408 = vmatprep.subr.bf16.mxu1 %v7767_v14  ;;  %v7821_v11 = vld [vmem:[%s11223_s1 + $0x1704] ss:$16 sps:$4 sm:$0xff]   ;;  %v9827_v14 = vrot.slane %v9592_v5, %v8646_v49  ;;  %v7828_v5 = vld [vmem:[%s11223_s1 + $0xec] ss:$16 sps:$4 sm:$0xff]  }
 0x15b   :  { %5368 = vmatpush1.bf16.msra.mxu0 %v7762_v16  ;;  %v7816_v16 = vld [vmem:[%s11223_s1 + $0x1500] ss:$16 sps:$4 sm:$0xff]  }
 0x15c   :  { %5409 = vmatpush1.bf16.msra.mxu1 %v7765_v19  ;;  %5369 = vmatprep.subr.bf16.mxu0 %v7770_v4  ;;  %v7819_v19 = vld [vmem:[%s11223_s1 + $0x1700] ss:$16 sps:$4 sm:$0xff]   ;;  %v7825_v4 = vld [vmem:[%s11223_s1 + $0x1864] ss:$16 sps:$4 sm:$0xff]  }
 0x15d   :  { %5410 = vmatprep.subr.bf16.mxu1 %v7773_v20  ;;  %v7823_v20 = vld [vmem:[%s11223_s1 + $0x1860] ss:$16 sps:$4 sm:$0xff]  }
 0x15f   :  { %5370 = vmatpush1.bf16.msra.mxu0 %v7768_v21  ;;  %v7826_v21 = vld [vmem:[%s11223_s1 + $0xe8] ss:$16 sps:$4 sm:$0xff]  }
 0x160   :  { %5411 = vmatpush1.bf16.msra.mxu1 %v7771_v27  ;;  %5371 = vmatprep.subr.bf16.mxu0 %v7776_v28  ;;  %v9849_v27 = vcombine.high %v9827_v14, %v9827_v14  ;;  %v7831_v28 = vld [vmem:[%s11223_s1 + $0x1844] ss:$16 sps:$4 sm:$0xff]  }
 0x161   :  { %5412 = vmatprep.subr.bf16.mxu1 %v7779_v29  ;;  %v7834_v29 = vld [vmem:[%s11223_s1 + $0xcc] ss:$16 sps:$4 sm:$0xff]  }
 0x163   :  { %5372 = vmatpush2.bf16.msra.mxu0 %v7774_v30  ;;  %v7829_v30 = vld [vmem:[%s11223_s1 + $0x1840] ss:$16 sps:$4 sm:$0xff]  }
 0x164   :  { %5413 = vmatpush2.bf16.msra.mxu1 %v7777_v34  ;;  %5373 = vmatprep.subr.bf16.mxu0 %v7782_v36  ;;  %v7832_v34 = vld [vmem:[%s11223_s1 + $0xc8] ss:$16 sps:$4 sm:$0xff]  }
 0x165   :  { %5414 = vmatprep.subr.bf16.mxu1 %v7785_v37 }
 0x167   :  { %5374 = vmatpush2.bf16.msra.mxu0 %v7780_v38 }
 0x168   :  { %5415 = vmatpush2.bf16.msra.mxu1 %v7783_v32  ;;  %5375 = vmatprep.subr.bf16.mxu0 %v7788_v40 }
 0x169   :  { %5416 = vmatprep.subr.bf16.mxu1 %v7791_v44  ;;  %v7837_v44 = vld [vmem:[%s11223_s1 + $0x1824] ss:$16 sps:$4 sm:$0xff]  }
 0x16b   :  { %5376 = vmatpush2.bf16.msra.mxu0 %v7786_v47  ;;  %v7840_v47 = vld [vmem:[%s11223_s1 + $0xac] ss:$16 sps:$4 sm:$0xff]  }
 0x16c   :  { %5417 = vmatpush2.bf16.msra.mxu1 %v7789_v46  ;;  %5377 = vmatprep.subr.bf16.mxu0 %v7794_v48 }
 0x16d   :  { %5418 = vmatprep.subr.bf16.mxu1 %v7797_v51  ;;  %v7838_v51 = vld [vmem:[%s11223_s1 + $0xa8] ss:$16 sps:$4 sm:$0xff]  }
 0x16f   :  { %5378 = vmatpush2.bf16.msra.mxu0 %v7792_v52  ;;  %v8479_v52 = vmov 0  }
 0x170   :  { %5419 = vmatpush2.bf16.msra.mxu1 %v7795_v56  ;;  %5379 = vmatprep.subr.bf16.mxu0 %v7800_v55 }
 0x171   :  { %5420 = vmatprep.subr.bf16.mxu1 %v7803_v57 }
 0x173   :  { %5380 = vmatpush2.bf16.msra.mxu0 %v7798_v58 }
 0x174   :  { %5421 = vmatpush2.bf16.msra.mxu1 %v7801_v61  ;;  %5381 = vmatprep.subr.bf16.mxu0 %v7806_v62  ;;  %v7843_v61 = vld [vmem:[%s11223_s1 + $0x1804] ss:$16 sps:$4 sm:$0xff]   ;;  %v7846_v62 = vld [vmem:[%s11223_s1 + $0x8c] ss:$16 sps:$4 sm:$0xff]  }
 0x175   :  { %5422 = vmatprep.subr.bf16.mxu1 %v7809_v63  ;;  %v7844_v63 = vld [vmem:[%s11223_s1 + $0x88] ss:$16 sps:$4 sm:$0xff]  }
 0x177   :  { %5382 = vmatpush2.bf16.msra.mxu0 %v7804_v2  ;;  %v6377_v2 = vld.sshfl [vmem:[%s11222_s0 + $0x18] sm:$0x1 pattern:$0x75316420] }
 0x178   :  { %5423 = vmatpush2.bf16.msra.mxu1 %v7807_v3  ;;  %5383 = vmatprep.subr.bf16.mxu0 %v7812_v1  ;;  %v7849_v3 = vld [vmem:[%s11223_s1 + $0x6c] ss:$16 sps:$4 sm:$0xff]  }
 0x179   :  { %5424 = vmatprep.subr.bf16.mxu1 %v7815_v7  ;;  %v7852_v1 = vld [vmem:[%s11223_s1 + $0x2ec] ss:$16 sps:$4 sm:$0xff]   ;;  %v7847_v7 = vld [vmem:[%s11223_s1 + $0x68] ss:$16 sps:$4 sm:$0xff]  }
 0x17b   :  { %5384 = vmatpush2.bf16.msra.mxu0 %v7810_v8  ;;  %v7850_v8 = vld [vmem:[%s11223_s1 + $0x2e8] ss:$16 sps:$4 sm:$0xff]  }
 0x17c   :  { %5425 = vmatpush2.bf16.msra.mxu1 %v7813_v9  ;;  %5385 = vmatprep.subr.bf16.mxu0 %v7818_v10  ;;  %v9913_v9 = vrot.slane %v6377_v2, %v8646_v49  ;;  %v7855_v10 = vld [vmem:[%s11223_s1 + $0x4c] ss:$16 sps:$4 sm:$0xff]   ;;  %v7853_v49 = vld [vmem:[%s11223_s1 + $0x48] ss:$16 sps:$4 sm:$0xff]  }
 0x17d   :  { %5426 = vmatprep.subr.bf16.mxu1 %v7821_v11  ;;  %v7858_v11 = vld [vmem:[%s11223_s1 + $0x2cc] ss:$16 sps:$4 sm:$0xff]  }
 0x17e   :  { %v7903_v2 = vld [vmem:[%s11223_s1 + $0x14c] ss:$16 sps:$4 sm:$0xff]  }
 0x17f   :  { %5386 = vmatpush2.bf16.msra.mxu0 %v7816_v16  ;;  %v7856_v16 = vld [vmem:[%s11223_s1 + $0x2c8] ss:$16 sps:$4 sm:$0xff]  }
 0x180   :  { %5427 = vmatpush2.bf16.msra.mxu1 %v7819_v19  ;;  %5445 = vmatprep.subr.bf16.mxu0 %v7825_v4  ;;  %v7861_v19 = vld [vmem:[%s11223_s1 + $0x2c] ss:$16 sps:$4 sm:$0xff]  }
 0x181   :  { %5478 = vmatprep.subr.bf16.mxu1 %v7828_v5  ;;  %v7864_v4 = vld [vmem:[%s11223_s1 + $0x2ac] ss:$16 sps:$4 sm:$0xff]   ;;  %v7859_v5 = vld [vmem:[%s11223_s1 + $0x28] ss:$16 sps:$4 sm:$0xff]  }
 0x182   :  { %v5143_v36 = vpop.f32.mrf.mxu0  ;;  %5388 = vmatmul.mubr.bf16.vlgmr.msra.gmra.mxu0 %v9827_v14 }
 0x183   :  { %v5184_v37 = vpop.f32.mrf.mxu1  ;;  %5429 = vmatmul.mubr.bf16.vlgmr.msra.gmra.mxu1 %v9849_v27  ;;  %v5144_v38 = vadd.f32 %v5143_v36, %v9662_v45  ;;  %5446 = vmatpush1.bf16.msra.mxu0 %v7823_v20  ;;  %v7835_v45 = vld [vmem:[%s11223_s1 + $0x1820] ss:$16 sps:$4 sm:$0xff]   ;;  %v7862_v20 = vld [vmem:[%s11223_s1 + $0x2a8] ss:$16 sps:$4 sm:$0xff]  }
 0x184   :  { %5479 = vmatpush1.bf16.msra.mxu1 %v7826_v21  ;;  %v5145_v32 = vpop.f32.mrf.mxu0  ;;  %5447 = vmatprep.subr.bf16.mxu0 %v7831_v28  ;;  %v7867_v21 = vld [vmem:[%s11223_s1 + $0xc] ss:$16 sps:$4 sm:$0xff]   ;;  %v7865_v28 = vld [vmem:[%s11223_s1 + $0x8] ss:$16 sps:$4 sm:$0xff]  }
 0x185   :  { %v5186_v40 = vpop.f32.mrf.mxu1  ;;  %5480 = vmatprep.subr.bf16.mxu1 %v7834_v29  ;;  %v9872_v46 = vadd.f32 %v5184_v37, %v5144_v38  ;;  %v5146_v48 = vadd.f32 %v5145_v32, %v9673_v53  ;;  %5469 = vmatprep.mubr.bf16.mxu0 %v8479_v52  ;;  %v7868_v29 = vld [vmem:[%s11223_s1 + $0x288] ss:$16 sps:$4 sm:$0xff]   ;;  %v7879_v38 = vld [vmem:[%s11223_s1 + $0x1cc] ss:$16 sps:$4 sm:$0xff]  }
 0x186   :  { %5510 = vmatprep.mubr.bf16.mxu1 %v8674_v60  ;;  %v5147_v56 = vpop.f32.mrf.mxu0  ;;  %v7841_v60 = vld [vmem:[%s11223_s1 + $0x1800] ss:$16 sps:$4 sm:$0xff]   ;;  %v7871_v36 = vld [vmem:[%s11223_s1 + $0x1e8] ss:$16 sps:$4 sm:$0xff]   ;;  %v7882_v32 = vld [vmem:[%s11223_s1 + $0x24c] ss:$16 sps:$4 sm:$0xff]  }
 0x187   :  { %v5188_v55 = vpop.f32.mrf.mxu1  ;;  %v9883_v57 = vadd.f32 %v5186_v40, %v5146_v48  ;;  %5448 = vmatpush1.bf16.msra.mxu0 %v7829_v30  ;;  %v7873_v30 = vld [vmem:[%s11223_s1 + $0x1ec] ss:$16 sps:$4 sm:$0xff]   ;;  %v7874_v37 = vld [vmem:[%s11223_s1 + $0x268] ss:$16 sps:$4 sm:$0xff]  }
 0x188   :  { %5481 = vmatpush1.bf16.msra.mxu1 %v7832_v34  ;;  %v5148_v53 = vpop.f32.mrf.mxu0  ;;  %5449 = vmatprep.subr.bf16.mxu0 %v7837_v44  ;;  %v7876_v34 = vld [vmem:[%s11223_s1 + $0x26c] ss:$16 sps:$4 sm:$0xff]   ;;  %v7877_v40 = vld [vmem:[%s11223_s1 + $0x1c8] ss:$16 sps:$4 sm:$0xff]  }
 0x189   :  { %v5189_v58 = vpop.f32.mrf.mxu1  ;;  %5482 = vmatprep.subr.bf16.mxu1 %v7840_v47  ;;  %v7880_v44 = vld [vmem:[%s11223_s1 + $0x248] ss:$16 sps:$4 sm:$0xff]   ;;  %v7885_v47 = vld [vmem:[%s11223_s1 + $0x1ac] ss:$16 sps:$4 sm:$0xff]  }
 0x18a   :  { %v7888_v48 = vld [vmem:[%s11223_s1 + $0x22c] ss:$16 sps:$4 sm:$0xff]   ;;  %v7889_v53 = vld [vmem:[%s11223_s1 + $0x188] ss:$16 sps:$4 sm:$0xff]  }
 0x18b   :  { %5450 = vmatpush1.bf16.msra.mxu0 %v7835_v45  ;;  %v7883_v45 = vld [vmem:[%s11223_s1 + $0x1a8] ss:$16 sps:$4 sm:$0xff]   ;;  %v7891_v56 = vld [vmem:[%s11223_s1 + $0x18c] ss:$16 sps:$4 sm:$0xff]  }
 0x18c   :  { %5483 = vmatpush1.bf16.msra.mxu1 %v7838_v51  ;;  %5451 = vmatprep.subr.bf16.mxu0 %v7843_v61  ;;  %v7886_v51 = vld [vmem:[%s11223_s1 + $0x228] ss:$16 sps:$4 sm:$0xff]   ;;  %v7894_v55 = vld [vmem:[%s11223_s1 + $0x20c] ss:$16 sps:$4 sm:$0xff]  }
 0x18d   :  { %5484 = vmatprep.subr.bf16.mxu1 %v7846_v62  ;;  %v7892_v58 = vld [vmem:[%s11223_s1 + $0x208] ss:$16 sps:$4 sm:$0xff]   ;;  %v7897_v61 = vld [vmem:[%s11223_s1 + $0x16c] ss:$16 sps:$4 sm:$0xff]  }
 0x18e   :  { %v7900_v62 = vld [vmem:[%s11223_s1 + $0x3ec] ss:$16 sps:$4 sm:$0xff]  }
 0x18f   :  { %5452 = vmatpush1.bf16.msra.mxu0 %v7841_v60  ;;  %v7895_v60 = vld [vmem:[%s11223_s1 + $0x168] ss:$16 sps:$4 sm:$0xff]  }
 0x190   :  { %5485 = vmatpush1.bf16.msra.mxu1 %v7844_v63  ;;  %5519 = vmatprep.subr.bf16.mxu0 %v7852_v1  ;;  %v7898_v63 = vld [vmem:[%s11223_s1 + $0x3e8] ss:$16 sps:$4 sm:$0xff]  }
 0x191   :  { %5486 = vmatprep.subr.bf16.mxu1 %v7849_v3  ;;  %v7906_v3 = vld [vmem:[%s11223_s1 + $0x3cc] ss:$16 sps:$4 sm:$0xff]   ;;  %v7901_v1 = vld [vmem:[%s11223_s1 + $0x148] ss:$16 sps:$4 sm:$0xff]  }
 0x192   :  { %7162 = vmatmul.mubr.msk.bf16.vlgmr.msra.gmra.mxu0 %vm4941_vm0, %v9913_v9 }
 0x193   :  { %5520 = vmatpush1.bf16.msra.mxu0 %v7850_v8  ;;  %5551 = vmatprep.mubr.bf16.mxu0 %v8687_v0  ;;  %v7870_v0 = vld [vmem:[%s11223_s1 + $0x28c] ss:$16 sps:$4 sm:$0xff]  }
 0x194   :  { %5487 = vmatpush1.bf16.msra.mxu1 %v7847_v7  ;;  %5521 = vmatprep.subr.bf16.mxu0 %v7858_v11  ;;  %v7904_v7 = vld [vmem:[%s11223_s1 + $0x3c8] ss:$16 sps:$4 sm:$0xff]   ;;  %v7909_v8 = vld [vmem:[%s11223_s1 + $0x12c] ss:$16 sps:$4 sm:$0xff]  }
 0x195   :  { %5488 = vmatprep.subr.bf16.mxu1 %v7855_v10  ;;  %v7912_v10 = vld [vmem:[%s11223_s1 + $0x3ac] ss:$16 sps:$4 sm:$0xff]   ;;  %v7907_v11 = vld [vmem:[%s11223_s1 + $0x128] ss:$16 sps:$4 sm:$0xff]  }
 0x197   :  { %5522 = vmatpush1.bf16.msra.mxu0 %v7856_v16  ;;  %v7915_v16 = vld [vmem:[%s11223_s1 + $0x10c] ss:$16 sps:$4 sm:$0xff]  }
 0x198   :  { %5489 = vmatpush1.bf16.msra.mxu1 %v7853_v49  ;;  %5523 = vmatprep.subr.bf16.mxu0 %v7864_v4  ;;  %v7910_v49 = vld [vmem:[%s11223_s1 + $0x3a8] ss:$16 sps:$4 sm:$0xff]  }
 0x199   :  { %5490 = vmatprep.subr.bf16.mxu1 %v7861_v19  ;;  %v7918_v19 = vld [vmem:[%s11223_s1 + $0x38c] ss:$16 sps:$4 sm:$0xff]   ;;  %v7913_v4 = vld [vmem:[%s11223_s1 + $0x108] ss:$16 sps:$4 sm:$0xff]  }
 0x19b   :  { %5524 = vmatpush1.bf16.msra.mxu0 %v7862_v20  ;;  %v7921_v20 = vld [vmem:[%s11223_s1 + $0x36c] ss:$16 sps:$4 sm:$0xff]  }
 0x19c   :  { %5491 = vmatpush1.bf16.msra.mxu1 %v7859_v5  ;;  %5525 = vmatprep.subr.bf16.mxu0 %v7870_v0  ;;  %v7916_v5 = vld [vmem:[%s11223_s1 + $0x388] ss:$16 sps:$4 sm:$0xff]  }
 0x19d   :  { %5492 = vmatprep.subr.bf16.mxu1 %v7867_v21  ;;  %v7924_v21 = vld [vmem:[%s11223_s1 + $0x4ec] ss:$16 sps:$4 sm:$0xff]   ;;  %v7919_v0 = vld [vmem:[%s11223_s1 + $0x368] ss:$16 sps:$4 sm:$0xff]  }
 0x19f   :  { %5526 = vmatpush1.bf16.msra.mxu0 %v7868_v29  ;;  %v7927_v29 = vld [vmem:[%s11223_s1 + $0x34c] ss:$16 sps:$4 sm:$0xff]  }
 0x1a0   :  { %5493 = vmatpush1.bf16.msra.mxu1 %v7865_v28  ;;  %5527 = vmatprep.subr.bf16.mxu0 %v7876_v34  ;;  %v7922_v28 = vld [vmem:[%s11223_s1 + $0x4e8] ss:$16 sps:$4 sm:$0xff]  }
 0x1a1   :  { %5494 = vmatprep.subr.bf16.mxu1 %v7873_v30  ;;  %v7930_v30 = vld [vmem:[%s11223_s1 + $0x4cc] ss:$16 sps:$4 sm:$0xff]   ;;  %v7925_v34 = vld [vmem:[%s11223_s1 + $0x348] ss:$16 sps:$4 sm:$0xff]  }
 0x1a3   :  { %5528 = vmatpush1.bf16.msra.mxu0 %v7874_v37 }
 0x1a4   :  { %5495 = vmatpush2.bf16.msra.mxu1 %v7871_v36  ;;  %5529 = vmatprep.subr.bf16.mxu0 %v7882_v32  ;;  %v7928_v36 = vld [vmem:[%s11223_s1 + $0x4c8] ss:$16 sps:$4 sm:$0xff]  }
 0x1a5   :  { %5496 = vmatprep.subr.bf16.mxu1 %v7879_v38 }
 0x1a7   :  { %5530 = vmatpush1.bf16.msra.mxu0 %v7880_v44 }
 0x1a8   :  { %5497 = vmatpush2.bf16.msra.mxu1 %v7877_v40  ;;  %5531 = vmatprep.subr.bf16.mxu0 %v7888_v48  ;;  %v7936_v48 = vld [vmem:[%s11223_s1 + $0x4ac] ss:$16 sps:$4 sm:$0xff]  }
 0x1a9   :  { %5498 = vmatprep.subr.bf16.mxu1 %v7885_v47  ;;  %v7933_v47 = vld [vmem:[%s11223_s1 + $0x32c] ss:$16 sps:$4 sm:$0xff]  }
 0x1ab   :  { %5532 = vmatpush1.bf16.msra.mxu0 %v7886_v51  ;;  %v7934_v51 = vld [vmem:[%s11223_s1 + $0x4a8] ss:$16 sps:$4 sm:$0xff]  }
 0x1ac   :  { %5499 = vmatpush2.bf16.msra.mxu1 %v7883_v45  ;;  %5533 = vmatprep.subr.bf16.mxu0 %v7894_v55 }
 0x1ad   :  { %5500 = vmatprep.subr.bf16.mxu1 %v7891_v56 }
 0x1af   :  { %5534 = vmatpush1.bf16.msra.mxu0 %v7892_v58 }
 0x1b0   :  { %5501 = vmatpush2.bf16.msra.mxu1 %v7889_v53  ;;  %5535 = vmatprep.subr.bf16.mxu0 %v7900_v62  ;;  %v7942_v62 = vld [vmem:[%s11223_s1 + $0x48c] ss:$16 sps:$4 sm:$0xff]  }
 0x1b1   :  { %5502 = vmatprep.subr.bf16.mxu1 %v7897_v61 }
 0x1b3   :  { %5536 = vmatpush2.bf16.msra.mxu0 %v7898_v63  ;;  %v7945_v63 = vld [vmem:[%s11223_s1 + $0x46c] ss:$16 sps:$4 sm:$0xff]  }
 0x1b4   :  { %5503 = vmatpush2.bf16.msra.mxu1 %v7895_v60  ;;  %5537 = vmatprep.subr.bf16.mxu0 %v7906_v3  ;;  %v7940_v60 = vld [vmem:[%s11223_s1 + $0x488] ss:$16 sps:$4 sm:$0xff]  }
 0x1b5   :  { %5504 = vmatprep.subr.bf16.mxu1 %v7903_v2  ;;  %v7948_v2 = vld [vmem:[%s11223_s1 + $0x6ec] ss:$16 sps:$4 sm:$0xff]   ;;  %v7943_v3 = vld [vmem:[%s11223_s1 + $0x468] ss:$16 sps:$4 sm:$0xff]  }
 0x1b7   :  { %5538 = vmatpush2.bf16.msra.mxu0 %v7904_v7  ;;  %v7951_v7 = vld [vmem:[%s11223_s1 + $0x44c] ss:$16 sps:$4 sm:$0xff]  }
 0x1b8   :  { %5505 = vmatpush2.bf16.msra.mxu1 %v7901_v1  ;;  %5539 = vmatprep.subr.bf16.mxu0 %v7912_v10  ;;  %v7946_v1 = vld [vmem:[%s11223_s1 + $0x6e8] ss:$16 sps:$4 sm:$0xff]  }
 0x1b9   :  { %5506 = vmatprep.subr.bf16.mxu1 %v7909_v8  ;;  %v7954_v8 = vld [vmem:[%s11223_s1 + $0x6cc] ss:$16 sps:$4 sm:$0xff]   ;;  %v7949_v10 = vld [vmem:[%s11223_s1 + $0x448] ss:$16 sps:$4 sm:$0xff]  }
 0x1bb   :  { %5540 = vmatpush2.bf16.msra.mxu0 %v7910_v49  ;;  %v7957_v49 = vld [vmem:[%s11223_s1 + $0x42c] ss:$16 sps:$4 sm:$0xff]  }
 0x1bc   :  { %5507 = vmatpush2.bf16.msra.mxu1 %v7907_v11  ;;  %5541 = vmatprep.subr.bf16.mxu0 %v7918_v19  ;;  %v7952_v11 = vld [vmem:[%s11223_s1 + $0x6c8] ss:$16 sps:$4 sm:$0xff]  }
 0x1bd   :  { %5508 = vmatprep.subr.bf16.mxu1 %v7915_v16  ;;  %v7960_v16 = vld [vmem:[%s11223_s1 + $0x6ac] ss:$16 sps:$4 sm:$0xff]   ;;  %v7955_v19 = vld [vmem:[%s11223_s1 + $0x428] ss:$16 sps:$4 sm:$0xff]  }
 0x1bf   :  { %5542 = vmatpush2.bf16.msra.mxu0 %v7916_v5  ;;  %v7966_v5 = vld [vmem:[%s11223_s1 + $0x68c] ss:$16 sps:$4 sm:$0xff]  }
 0x1c0   :  { %5509 = vmatpush2.bf16.msra.mxu1 %v7913_v4  ;;  %5543 = vmatprep.subr.bf16.mxu0 %v7921_v20  ;;  %v7963_v4 = vld [vmem:[%s11223_s1 + $0x40c] ss:$16 sps:$4 sm:$0xff]   ;;  %v7961_v20 = vld [vmem:[%s11223_s1 + $0x408] ss:$16 sps:$4 sm:$0xff]  }
 0x1c1   :  { %5560 = vmatprep.subr.bf16.mxu1 %v7924_v21  ;;  %v7969_v21 = vld [vmem:[%s11223_s1 + $0x5ec] ss:$16 sps:$4 sm:$0xff]  }
 0x1c2   :  { %v5225_v37 = vpop.f32.mrf.mxu0 }
 0x1c3   :  { %v5266_v38 = vpop.f32.mrf.mxu1  ;;  %5511 = vmatmul.mubr.bf16.vlgmr.msra.gmra.mxu1 %v8724_v13  ;;  %v5226_v32 = vadd.f32 %v5225_v37, %v9872_v46  ;;  %5544 = vmatpush2.bf16.msra.mxu0 %v7919_v0  ;;  %v7931_v46 = vld [vmem:[%s11223_s1 + $0x328] ss:$16 sps:$4 sm:$0xff]   ;;  %v7972_v0 = vld [vmem:[%s11223_s1 + $0x66c] ss:$16 sps:$4 sm:$0xff]  }
 0x1c4   :  { %5561 = vmatpush1.bf16.msra.mxu1 %v7922_v28  ;;  %v5227_v40 = vpop.f32.mrf.mxu0  ;;  %5545 = vmatprep.subr.bf16.mxu0 %v7927_v29  ;;  %v7967_v28 = vld [vmem:[%s11223_s1 + $0x5e8] ss:$16 sps:$4 sm:$0xff]  }
 0x1c5   :  { %v5268_v44 = vpop.f32.mrf.mxu1  ;;  %5562 = vmatprep.subr.bf16.mxu1 %v7930_v30  ;;  %v10082_v45 = vadd.f32 %v5266_v38, %v5226_v32  ;;  %v5228_v13 = vadd.f32 %v5227_v40, %v9883_v57  ;;  %5592 = vmatprep.mubr.bf16.mxu1 %v8736_v17  ;;  %v7939_v57 = vld [vmem:[%s11223_s1 + $0x30c] ss:$16 sps:$4 sm:$0xff]   ;;  %v7937_v17 = vld [vmem:[%s11223_s1 + $0x308] ss:$16 sps:$4 sm:$0xff]  }
 0x1c6   :  { %v5229_v56 = vpop.f32.mrf.mxu0  ;;  %v7970_v29 = vld [vmem:[%s11223_s1 + $0x668] ss:$16 sps:$4 sm:$0xff]   ;;  %v7975_v30 = vld [vmem:[%s11223_s1 + $0x5cc] ss:$16 sps:$4 sm:$0xff]  }
 0x1c7   :  { %v5270_v55 = vpop.f32.mrf.mxu1  ;;  %v10092_v53 = vadd.f32 %v5268_v44, %v5228_v13  ;;  %5546 = vmatpush2.bf16.msra.mxu0 %v7925_v34  ;;  %v7978_v34 = vld [vmem:[%s11223_s1 + $0x64c] ss:$16 sps:$4 sm:$0xff]   ;;  %v7976_v37 = vld [vmem:[%s11223_s1 + $0x648] ss:$16 sps:$4 sm:$0xff]  }
 0x1c8   :  { %5563 = vmatpush1.bf16.msra.mxu1 %v7928_v36  ;;  %v5230_v58 = vpop.f32.mrf.mxu0  ;;  %5547 = vmatprep.subr.bf16.mxu0 %v7933_v47  ;;  %v7973_v36 = vld [vmem:[%s11223_s1 + $0x5c8] ss:$16 sps:$4 sm:$0xff]   ;;  %v7981_v38 = vld [vmem:[%s11223_s1 + $0x5ac] ss:$16 sps:$4 sm:$0xff]  }
 0x1c9   :  { %v5271_v61 = vpop.f32.mrf.mxu1  ;;  %5564 = vmatprep.subr.bf16.mxu1 %v7936_v48  ;;  %v7984_v32 = vld [vmem:[%s11223_s1 + $0x62c] ss:$16 sps:$4 sm:$0xff]   ;;  %v7979_v40 = vld [vmem:[%s11223_s1 + $0x5a8] ss:$16 sps:$4 sm:$0xff]  }
 0x1ca   :  { %v7982_v44 = vld [vmem:[%s11223_s1 + $0x628] ss:$16 sps:$4 sm:$0xff]   ;;  %v7987_v47 = vld [vmem:[%s11223_s1 + $0x58c] ss:$16 sps:$4 sm:$0xff]  }
 0x1cb   :  { %5548 = vmatpush2.bf16.msra.mxu0 %v7931_v46  ;;  %v7990_v48 = vld [vmem:[%s11223_s1 + $0x60c] ss:$16 sps:$4 sm:$0xff]  }
 0x1cc   :  { %5565 = vmatpush1.bf16.msra.mxu1 %v7934_v51  ;;  %5549 = vmatprep.subr.bf16.mxu0 %v7939_v57 }
 0x1cd   :  { %5566 = vmatprep.subr.bf16.mxu1 %v7942_v62 }
 0x1cf   :  { %5550 = vmatpush2.bf16.msra.mxu0 %v7937_v17 }
 0x1d0   :  { %5567 = vmatpush1.bf16.msra.mxu1 %v7940_v60  ;;  %5601 = vmatprep.subr.bf16.mxu0 %v7948_v2 }
 0x1d1   :  { %5568 = vmatprep.subr.bf16.mxu1 %v7945_v63 }
 0x1d2   :  { %5552 = vmatmul.mubr.bf16.vlgmr.msra.gmra.mxu0 %v8740_v18  ;;  %v7958_v18 = vld [vmem:[%s11223_s1 + $0x6a8] ss:$16 sps:$4 sm:$0xff]  }
 0x1d3   :  { %5602 = vmatpush1.bf16.msra.mxu0 %v7946_v1  ;;  %5633 = vmatprep.mubr.bf16.mxu0 %v8756_v23  ;;  %v7964_v23 = vld [vmem:[%s11223_s1 + $0x688] ss:$16 sps:$4 sm:$0xff]  }
 0x1d4   :  { %5569 = vmatpush1.bf16.msra.mxu1 %v7943_v3  ;;  %5603 = vmatprep.subr.bf16.mxu0 %v7954_v8 }
 0x1d5   :  { %5570 = vmatprep.subr.bf16.mxu1 %v7951_v7 }
 0x1d7   :  { %5604 = vmatpush1.bf16.msra.mxu0 %v7952_v11 }
 0x1d8   :  { %5571 = vmatpush1.bf16.msra.mxu1 %v7949_v10  ;;  %5605 = vmatprep.subr.bf16.mxu0 %v7960_v16 }
 0x1d9   :  { %5572 = vmatprep.subr.bf16.mxu1 %v7957_v49 }
 0x1db   :  { %5606 = vmatpush1.bf16.msra.mxu0 %v7958_v18 }
 0x1dc   :  { %5573 = vmatpush1.bf16.msra.mxu1 %v7955_v19  ;;  %5607 = vmatprep.subr.bf16.mxu0 %v7966_v5 }
 0x1dd   :  { %5574 = vmatprep.subr.bf16.mxu1 %v7963_v4 }
 0x1df   :  { %5608 = vmatpush1.bf16.msra.mxu0 %v7964_v23 }
 0x1e0   :  { %5575 = vmatpush1.bf16.msra.mxu1 %v7961_v20  ;;  %5609 = vmatprep.subr.bf16.mxu0 %v7972_v0 }
 0x1e1   :  { %5576 = vmatprep.subr.bf16.mxu1 %v7969_v21 }
 0x1e3   :  { %5610 = vmatpush1.bf16.msra.mxu0 %v7970_v29 }
 0x1e4   :  { %5577 = vmatpush2.bf16.msra.mxu1 %v7967_v28  ;;  %5611 = vmatprep.subr.bf16.mxu0 %v7978_v34 }
 0x1e5   :  { %5578 = vmatprep.subr.bf16.mxu1 %v7975_v30 }
 0x1e7   :  { %5612 = vmatpush1.bf16.msra.mxu0 %v7976_v37 }
 0x1e8   :  { %5579 = vmatpush2.bf16.msra.mxu1 %v7973_v36  ;;  %5613 = vmatprep.subr.bf16.mxu0 %v7984_v32 }
 0x1e9   :  { %5580 = vmatprep.subr.bf16.mxu1 %v7981_v38 }
 0x1ea   :  { %10 = vsyncpa [#allocation3], 0  ;;  %v7985_v13 = vld [vmem:[%s11223_s1 + $0x588] ss:$16 sps:$4 sm:$0xff]   ;;  %v7993_v51 = vld [vmem:[%s11223_s1 + $0x56c] ss:$16 sps:$4 sm:$0xff]  }
 0x1eb   :  { %5614 = vmatpush1.bf16.msra.mxu0 %v7982_v44  ;;  %v7988_v46 = vld [vmem:[%s11223_s1 + $0x608] ss:$16 sps:$4 sm:$0xff]   ;;  %v7996_v56 = vld [vmem:[%s11223_s1 + $0x7ec] ss:$16 sps:$4 sm:$0xff]   ;;  %s8480_s16 = smov [#allocation2]  }
 0x1ec   :  { %5581 = vmatpush2.bf16.msra.mxu1 %v7979_v40  ;;  %5615 = vmatprep.subr.bf16.mxu0 %v7990_v48  ;;  %v7991_v55 = vld [vmem:[%s11223_s1 + $0x568] ss:$16 sps:$4 sm:$0xff]   ;;  %v7999_v61 = vld [vmem:[%s11223_s1 + $0x54c] ss:$16 sps:$4 sm:$0xff]   ;;  %s6369_s17 = sshll.u32 %s8480_s16, 4  ;;  %s6370_s17 = int_to_ptr.vmem [resolvable:$true] %s6369_s17 }
 0x1ed   :  { %5582 = vmatprep.subr.bf16.mxu1 %v7987_v47  ;;  %v7994_v58 = vld [vmem:[%s11223_s1 + $0x7e8] ss:$16 sps:$4 sm:$0xff]   ;;  %v8002_v57 = vld [vmem:[%s11223_s1 + $0x7cc] ss:$16 sps:$4 sm:$0xff]   ;;  %s8456_s18 = scalar_lea.vmem %s6370_s17, 32  ;;  %p8461_p1 = scmp.lt.s32.totalorder %s6370_s17, %s6370_s17 }
 0x1ee   :  { %v7997_v62 = vld [vmem:[%s11223_s1 + $0x548] ss:$16 sps:$4 sm:$0xff]   ;;  %v8005_v60 = vld [vmem:[%s11223_s1 + $0x52c] ss:$16 sps:$4 sm:$0xff]   ;;  %p8457_p0 = scmp.ne.s32.totalorder %s6370_s17, %s8456_s18  ;;  %p8462_p2 = scmp.lt.s32.totalorder %s8456_s18, %s8456_s18 }
 0x1ef   :  { %5616 = vmatpush1.bf16.msra.mxu0 %v7988_v46  ;;  %v8000_v17 = vld [vmem:[%s11223_s1 + $0x7c8] ss:$16 sps:$4 sm:$0xff]   ;;  %v8008_v63 = vld [vmem:[%s11223_s1 + $0x7ac] ss:$16 sps:$4 sm:$0xff]  }
 0x1f0   :  { %5583 = vmatpush2.bf16.msra.mxu1 %v7985_v13  ;;  %5617 = vmatprep.subr.bf16.mxu0 %v7996_v56  ;;  %v8003_v2 = vld [vmem:[%s11223_s1 + $0x528] ss:$16 sps:$4 sm:$0xff]   ;;  %v8011_v1 = vld [vmem:[%s11223_s1 + $0x50c] ss:$16 sps:$4 sm:$0xff]   ;;  %p8463_p3 = por %p8462_p2, %p8461_p1 }
 0x1f1   :  { %5584 = vmatprep.subr.bf16.mxu1 %v7993_v51  ;;  %v8006_v3 = vld [vmem:[%s11223_s1 + $0x7a8] ss:$16 sps:$4 sm:$0xff]   ;;  %v8014_v7 = vld [vmem:[%s11223_s1 + $0x78c] ss:$16 sps:$4 sm:$0xff]  }
 0x1f2   :  { %v8009_v8 = vld [vmem:[%s11223_s1 + $0x508] ss:$16 sps:$4 sm:$0xff]   ;;  %v8017_v11 = vld [vmem:[%s11223_s1 + $0x76c] ss:$16 sps:$4 sm:$0xff]   ;;  %p8464_p4 = pnand %p8463_p3, %p8457_p0 }
 0x1f3   :  { %5618 = vmatpush2.bf16.msra.mxu0 %v7994_v58  ;;  %v8012_v10 = vld [vmem:[%s11223_s1 + $0x788] ss:$16 sps:$4 sm:$0xff]   ;;  %v8020_v49 = vld [vmem:[%s11223_s1 + $0x8ec] ss:$16 sps:$4 sm:$0xff]  }
 0x1f4   :  { %5585 = vmatpush2.bf16.msra.mxu1 %v7991_v55  ;;  %5619 = vmatprep.subr.bf16.mxu0 %v8002_v57  ;;  %v8015_v16 = vld [vmem:[%s11223_s1 + $0x768] ss:$16 sps:$4 sm:$0xff]   ;;  %v8023_v18 = vld [vmem:[%s11223_s1 + $0x74c] ss:$16 sps:$4 sm:$0xff]  }
 0x1f5   :  { %5586 = vmatprep.subr.bf16.mxu1 %v7999_v61  ;;  %v8018_v19 = vld [vmem:[%s11223_s1 + $0x8e8] ss:$16 sps:$4 sm:$0xff]   ;;  %v8026_v4 = vld [vmem:[%s11223_s1 + $0x8cc] ss:$16 sps:$4 sm:$0xff]  }
 0x1f6   :  { %v8021_v21 = vld [vmem:[%s11223_s1 + $0x748] ss:$16 sps:$4 sm:$0xff]   ;;  %v8041_v46 = vld [vmem:[%s11223_s1 + $0x86c] ss:$16 sps:$4 sm:$0xff]  }
 0x1f7   :  { %5620 = vmatpush2.bf16.msra.mxu0 %v8000_v17  ;;  %v8024_v0 = vld [vmem:[%s11223_s1 + $0x8c8] ss:$16 sps:$4 sm:$0xff]   ;;  %v8044_v51 = vld [vmem:[%s11223_s1 + $0xaec] ss:$16 sps:$4 sm:$0xff]  }
 0x1f8   :  { %5587 = vmatpush2.bf16.msra.mxu1 %v7997_v62  ;;  %5621 = vmatprep.subr.bf16.mxu0 %v8008_v63  ;;  %v8027_v32 = vld [vmem:[%s11223_s1 + $0x728] ss:$16 sps:$4 sm:$0xff]   ;;  %v8047_v58 = vld [vmem:[%s11223_s1 + $0x84c] ss:$16 sps:$4 sm:$0xff]  }
 0x1f9   :  { %5588 = vmatprep.subr.bf16.mxu1 %v8005_v60  ;;  %v8030_v40 = vld [vmem:[%s11223_s1 + $0x8a8] ss:$16 sps:$4 sm:$0xff]   ;;  %v8050_v61 = vld [vmem:[%s11223_s1 + $0xacc] ss:$16 sps:$4 sm:$0xff]  }
 0x1fa   :  { %v8033_v48 = vld [vmem:[%s11223_s1 + $0x708] ss:$16 sps:$4 sm:$0xff]   ;;  %v8053_v17 = vld [vmem:[%s11223_s1 + $0x82c] ss:$16 sps:$4 sm:$0xff]  }
 0x1fb   :  { %5622 = vmatpush2.bf16.msra.mxu0 %v8006_v3  ;;  %v8036_v13 = vld [vmem:[%s11223_s1 + $0x888] ss:$16 sps:$4 sm:$0xff]  }
 0x1fc   :  { %5589 = vmatpush2.bf16.msra.mxu1 %v8003_v2  ;;  %5623 = vmatprep.subr.bf16.mxu0 %v8014_v7  ;;  %v8039_v56 = vld [vmem:[%s11223_s1 + $0x868] ss:$16 sps:$4 sm:$0xff]   ;;  %v8059_v2 = vld [vmem:[%s11223_s1 + $0x80c] ss:$16 sps:$4 sm:$0xff]  }
 0x1fd   :  { %5590 = vmatprep.subr.bf16.mxu1 %v8011_v1  ;;  %v8042_v55 = vld [vmem:[%s11223_s1 + $0xae8] ss:$16 sps:$4 sm:$0xff]   ;;  %v8065_v7 = vld [vmem:[%s11223_s1 + $0x9ec] ss:$16 sps:$4 sm:$0xff]  }
 0x1fe   :  { %v8045_v57 = vld [vmem:[%s11223_s1 + $0x848] ss:$16 sps:$4 sm:$0xff]  }
 0x1ff   :  { %5624 = vmatpush2.bf16.msra.mxu0 %v8012_v10  ;;  %v8048_v62 = vld [vmem:[%s11223_s1 + $0xac8] ss:$16 sps:$4 sm:$0xff]  }
 0x200   :  { %5591 = vmatpush2.bf16.msra.mxu1 %v8009_v8  ;;  %5625 = vmatprep.subr.bf16.mxu0 %v8017_v11  ;;  %v8051_v60 = vld [vmem:[%s11223_s1 + $0x828] ss:$16 sps:$4 sm:$0xff]   ;;  %v8068_v8 = vld [vmem:[%s11223_s1 + $0xa6c] ss:$16 sps:$4 sm:$0xff]  }
 0x201   :  { %5642 = vmatprep.subr.bf16.mxu1 %v8020_v49  ;;  %v8054_v63 = vld [vmem:[%s11223_s1 + $0xaa8] ss:$16 sps:$4 sm:$0xff]   ;;  %v8071_v49 = vld [vmem:[%s11223_s1 + $0x9cc] ss:$16 sps:$4 sm:$0xff]  }
 0x202   :  { %v5307_v5 = vpop.f32.mrf.mxu0  ;;  %v8057_v3 = vld [vmem:[%s11223_s1 + $0x808] ss:$16 sps:$4 sm:$0xff]  }
 0x203   :  { %v5348_v20 = vpop.f32.mrf.mxu1  ;;  %5593 = vmatmul.mubr.bf16.vlgmr.msra.gmra.mxu1 %v8935_v26  ;;  %v5308_v23 = vadd.f32 %v5307_v5, %v10082_v45  ;;  %5626 = vmatpush2.bf16.msra.mxu0 %v8015_v16  ;;  %v8029_v26 = vld [vmem:[%s11223_s1 + $0x72c] ss:$16 sps:$4 sm:$0xff]   ;;  %v8060_v1 = vld [vmem:[%s11223_s1 + $0xa88] ss:$16 sps:$4 sm:$0xff]  }
 0x204   :  { %5643 = vmatpush1.bf16.msra.mxu1 %v8018_v19  ;;  %v5309_v28 = vpop.f32.mrf.mxu0  ;;  %5627 = vmatprep.subr.bf16.mxu0 %v8023_v18  ;;  %v8032_v45 = vld [vmem:[%s11223_s1 + $0x8ac] ss:$16 sps:$4 sm:$0xff]   ;;  %v8063_v10 = vld [vmem:[%s11223_s1 + $0x9e8] ss:$16 sps:$4 sm:$0xff]  }
 0x205   :  { %v5350_v29 = vpop.f32.mrf.mxu1  ;;  %5644 = vmatprep.subr.bf16.mxu1 %v8026_v4  ;;  %v10284_v30 = vadd.f32 %v5348_v20, %v5308_v23  ;;  %v5310_v34 = vadd.f32 %v5309_v28, %v10092_v53  ;;  %5674 = vmatprep.mubr.bf16.mxu1 %v8988_v41  ;;  %v8035_v41 = vld [vmem:[%s11223_s1 + $0x70c] ss:$16 sps:$4 sm:$0xff]   ;;  %v8066_v11 = vld [vmem:[%s11223_s1 + $0xa68] ss:$16 sps:$4 sm:$0xff]  }
 0x206   :  { %v5311_v36 = vpop.f32.mrf.mxu0  ;;  %v8038_v53 = vld [vmem:[%s11223_s1 + $0x88c] ss:$16 sps:$4 sm:$0xff]   ;;  %v8069_v19 = vld [vmem:[%s11223_s1 + $0x9c8] ss:$16 sps:$4 sm:$0xff]  }
 0x207   :  { %v5352_v37 = vpop.f32.mrf.mxu1  ;;  %v10288_v38 = vadd.f32 %v5350_v29, %v5310_v34  ;;  %5628 = vmatpush2.bf16.msra.mxu0 %v8021_v21  ;;  %v8074_v16 = vld [vmem:[%s11223_s1 + $0xa4c] ss:$16 sps:$4 sm:$0xff]   ;;  %v8072_v18 = vld [vmem:[%s11223_s1 + $0xa48] ss:$16 sps:$4 sm:$0xff]  }
 0x208   :  { %5645 = vmatpush1.bf16.msra.mxu1 %v8024_v0  ;;  %v5312_v44 = vpop.f32.mrf.mxu0  ;;  %5629 = vmatprep.subr.bf16.mxu0 %v8029_v26  ;;  %v8077_v4 = vld [vmem:[%s11223_s1 + $0x9ac] ss:$16 sps:$4 sm:$0xff]   ;;  %v8075_v20 = vld [vmem:[%s11223_s1 + $0x9a8] ss:$16 sps:$4 sm:$0xff]  }
 0x209   :  { %v5353_v47 = vpop.f32.mrf.mxu1  ;;  %5646 = vmatprep.subr.bf16.mxu1 %v8032_v45  ;;  %v8080_v5 = vld [vmem:[%s11223_s1 + $0xa2c] ss:$16 sps:$4 sm:$0xff]   ;;  %v8078_v23 = vld [vmem:[%s11223_s1 + $0xa28] ss:$16 sps:$4 sm:$0xff]  }
 0x20a   :  { %v8083_v21 = vld [vmem:[%s11223_s1 + $0x98c] ss:$16 sps:$4 sm:$0xff]   ;;  %v8081_v28 = vld [vmem:[%s11223_s1 + $0x988] ss:$16 sps:$4 sm:$0xff]  }
 0x20b   :  { %5630 = vmatpush2.bf16.msra.mxu0 %v8027_v32  ;;  %v8086_v0 = vld [vmem:[%s11223_s1 + $0xa0c] ss:$16 sps:$4 sm:$0xff]   ;;  %v8084_v29 = vld [vmem:[%s11223_s1 + $0xa08] ss:$16 sps:$4 sm:$0xff]  }
 0x20c   :  { %5647 = vmatpush1.bf16.msra.mxu1 %v8030_v40  ;;  %5631 = vmatprep.subr.bf16.mxu0 %v8035_v41  ;;  %v8089_v26 = vld [vmem:[%s11223_s1 + $0x96c] ss:$16 sps:$4 sm:$0xff]   ;;  %v8087_v34 = vld [vmem:[%s11223_s1 + $0x968] ss:$16 sps:$4 sm:$0xff]  }
 0x20d   :  { %5648 = vmatprep.subr.bf16.mxu1 %v8038_v53  ;;  %v8092_v45 = vld [vmem:[%s11223_s1 + $0xbec] ss:$16 sps:$4 sm:$0xff]   ;;  %v8090_v36 = vld [vmem:[%s11223_s1 + $0xbe8] ss:$16 sps:$4 sm:$0xff]  }
 0x20e   :  { %v8095_v37 = vld [vmem:[%s11223_s1 + $0x94c] ss:$16 sps:$4 sm:$0xff]   ;;  %v8093_v40 = vld [vmem:[%s11223_s1 + $0x948] ss:$16 sps:$4 sm:$0xff]  }
 0x20f   :  { %5632 = vmatpush2.bf16.msra.mxu0 %v8033_v48  ;;  %v8098_v32 = vld [vmem:[%s11223_s1 + $0xbcc] ss:$16 sps:$4 sm:$0xff]   ;;  %v8096_v44 = vld [vmem:[%s11223_s1 + $0xbc8] ss:$16 sps:$4 sm:$0xff]  }
 0x210   :  { %5649 = vmatpush1.bf16.msra.mxu1 %v8036_v13  ;;  %5683 = vmatprep.subr.bf16.mxu0 %v8044_v51  ;;  %v8101_v47 = vld [vmem:[%s11223_s1 + $0x92c] ss:$16 sps:$4 sm:$0xff]   ;;  %v8099_v53 = vld [vmem:[%s11223_s1 + $0x928] ss:$16 sps:$4 sm:$0xff]  }
 0x211   :  { %5650 = vmatprep.subr.bf16.mxu1 %v8041_v46  ;;  %v8104_v41 = vld [vmem:[%s11223_s1 + $0xbac] ss:$16 sps:$4 sm:$0xff]   ;;  %v8102_v48 = vld [vmem:[%s11223_s1 + $0xba8] ss:$16 sps:$4 sm:$0xff]  }
 0x212   :  { %5634 = vmatmul.mubr.bf16.vlgmr.msra.gmra.mxu0 %v8948_v6  ;;  %v8056_v6 = vld [vmem:[%s11223_s1 + $0xaac] ss:$16 sps:$4 sm:$0xff]   ;;  %v8105_v51 = vld [vmem:[%s11223_s1 + $0x908] ss:$16 sps:$4 sm:$0xff]  }
 0x213   :  { %5684 = vmatpush1.bf16.msra.mxu0 %v8042_v55  ;;  %5715 = vmatprep.mubr.bf16.mxu0 %v8993_v43  ;;  %v8062_v43 = vld [vmem:[%s11223_s1 + $0xa8c] ss:$16 sps:$4 sm:$0xff]  }
 0x214   :  { %5651 = vmatpush1.bf16.msra.mxu1 %v8039_v56  ;;  %5685 = vmatprep.subr.bf16.mxu0 %v8050_v61  ;;  %v8107_v13 = vld [vmem:[%s11223_s1 + $0x90c] ss:$16 sps:$4 sm:$0xff]   ;;  %v8108_v56 = vld [vmem:[%s11223_s1 + $0xb88] ss:$16 sps:$4 sm:$0xff]  }
 0x215   :  { %5652 = vmatprep.subr.bf16.mxu1 %v8047_v58  ;;  %v8110_v46 = vld [vmem:[%s11223_s1 + $0xb8c] ss:$16 sps:$4 sm:$0xff]   ;;  %v8111_v61 = vld [vmem:[%s11223_s1 + $0xb68] ss:$16 sps:$4 sm:$0xff]  }
 0x216   :  { %v8113_v55 = vld [vmem:[%s11223_s1 + $0xb6c] ss:$16 sps:$4 sm:$0xff]  }
 0x217   :  { %5686 = vmatpush1.bf16.msra.mxu0 %v8048_v62  ;;  %v8116_v58 = vld [vmem:[%s11223_s1 + $0xcec] ss:$16 sps:$4 sm:$0xff]  }
 0x218   :  { %5653 = vmatpush1.bf16.msra.mxu1 %v8045_v57  ;;  %5687 = vmatprep.subr.bf16.mxu0 %v8056_v6  ;;  %v8114_v57 = vld [vmem:[%s11223_s1 + $0xce8] ss:$16 sps:$4 sm:$0xff]   ;;  %v8119_v62 = vld [vmem:[%s11223_s1 + $0xb4c] ss:$16 sps:$4 sm:$0xff]  }
 0x219   :  { %5654 = vmatprep.subr.bf16.mxu1 %v8053_v17  ;;  %v8122_v17 = vld [vmem:[%s11223_s1 + $0xccc] ss:$16 sps:$4 sm:$0xff]  }
 0x21b   :  { %5688 = vmatpush1.bf16.msra.mxu0 %v8054_v63 }
 0x21c   :  { %5655 = vmatpush1.bf16.msra.mxu1 %v8051_v60  ;;  %5689 = vmatprep.subr.bf16.mxu0 %v8062_v43  ;;  %v8120_v43 = vld [vmem:[%s11223_s1 + $0xcc8] ss:$16 sps:$4 sm:$0xff]  }
 0x21d   :  { %5656 = vmatprep.subr.bf16.mxu1 %v8059_v2  ;;  %v8117_v2 = vld [vmem:[%s11223_s1 + $0xb48] ss:$16 sps:$4 sm:$0xff]  }
 0x21f   :  { %5690 = vmatpush1.bf16.msra.mxu0 %v8060_v1 }
 0x220   :  { %5657 = vmatpush1.bf16.msra.mxu1 %v8057_v3  ;;  %5691 = vmatprep.subr.bf16.mxu0 %v8068_v8 }
 0x221   :  { %5658 = vmatprep.subr.bf16.mxu1 %v8065_v7 }
 0x223   :  { %5692 = vmatpush1.bf16.msra.mxu0 %v8066_v11 }
 0x224   :  { %5659 = vmatpush2.bf16.msra.mxu1 %v8063_v10  ;;  %5693 = vmatprep.subr.bf16.mxu0 %v8074_v16  ;;  %v8123_v16 = vld [vmem:[%s11223_s1 + $0xb28] ss:$16 sps:$4 sm:$0xff]  }
 0x225   :  { %5660 = vmatprep.subr.bf16.mxu1 %v8071_v49 }
 0x227   :  { %5694 = vmatpush1.bf16.msra.mxu0 %v8072_v18 }
 0x228   :  { %5661 = vmatpush2.bf16.msra.mxu1 %v8069_v19  ;;  %5695 = vmatprep.subr.bf16.mxu0 %v8080_v5  ;;  %v8126_v19 = vld [vmem:[%s11223_s1 + $0xca8] ss:$16 sps:$4 sm:$0xff]  }
 0x229   :  { %5662 = vmatprep.subr.bf16.mxu1 %v8077_v4  ;;  %v8129_v5 = vld [vmem:[%s11223_s1 + $0xb08] ss:$16 sps:$4 sm:$0xff]  }
 0x22b   :  { %5696 = vmatpush1.bf16.msra.mxu0 %v8078_v23  ;;  %v8137_v23 = vld [vmem:[%s11223_s1 + $0xc6c] ss:$16 sps:$4 sm:$0xff]  }
 0x22c   :  { %5663 = vmatpush2.bf16.msra.mxu1 %v8075_v20  ;;  %5697 = vmatprep.subr.bf16.mxu0 %v8086_v0  ;;  %v8132_v20 = vld [vmem:[%s11223_s1 + $0xc88] ss:$16 sps:$4 sm:$0xff]  }
 0x22d   :  { %5664 = vmatprep.subr.bf16.mxu1 %v8083_v21  ;;  %v8140_v21 = vld [vmem:[%s11223_s1 + $0xeec] ss:$16 sps:$4 sm:$0xff]   ;;  %v8135_v0 = vld [vmem:[%s11223_s1 + $0xc68] ss:$16 sps:$4 sm:$0xff]  }
 0x22f   :  { %5698 = vmatpush1.bf16.msra.mxu0 %v8084_v29  ;;  %v8143_v29 = vld [vmem:[%s11223_s1 + $0xc4c] ss:$16 sps:$4 sm:$0xff]  }
 0x230   :  { %5665 = vmatpush2.bf16.msra.mxu1 %v8081_v28  ;;  %5699 = vmatprep.subr.bf16.mxu0 %v8092_v45  ;;  %v8138_v28 = vld [vmem:[%s11223_s1 + $0xee8] ss:$16 sps:$4 sm:$0xff]  }
 0x231   :  { %5666 = vmatprep.subr.bf16.mxu1 %v8089_v26  ;;  %v8146_v26 = vld [vmem:[%s11223_s1 + $0xecc] ss:$16 sps:$4 sm:$0xff]  }
 0x233   :  { %5700 = vmatpush2.bf16.msra.mxu0 %v8090_v36  ;;  %v8141_v36 = vld [vmem:[%s11223_s1 + $0xc48] ss:$16 sps:$4 sm:$0xff]  }
 0x234   :  { %5667 = vmatpush2.bf16.msra.mxu1 %v8087_v34  ;;  %5701 = vmatprep.subr.bf16.mxu0 %v8098_v32 }
 0x235   :  { %5668 = vmatprep.subr.bf16.mxu1 %v8095_v37  ;;  %v8144_v37 = vld [vmem:[%s11223_s1 + $0xec8] ss:$16 sps:$4 sm:$0xff]  }
 0x237   :  { %5702 = vmatpush2.bf16.msra.mxu0 %v8096_v44 }
 0x238   :  { %5669 = vmatpush2.bf16.msra.mxu1 %v8093_v40  ;;  %5703 = vmatprep.subr.bf16.mxu0 %v8104_v41  ;;  %v8149_v40 = vld [vmem:[%s11223_s1 + $0xc2c] ss:$16 sps:$4 sm:$0xff]   ;;  %v8147_v41 = vld [vmem:[%s11223_s1 + $0xc28] ss:$16 sps:$4 sm:$0xff]  }
 0x239   :  { %5670 = vmatprep.subr.bf16.mxu1 %v8101_v47 }
 0x23b   :  { %5704 = vmatpush2.bf16.msra.mxu0 %v8102_v48 }
 0x23c   :  { %5671 = vmatpush2.bf16.msra.mxu1 %v8099_v53  ;;  %5705 = vmatprep.subr.bf16.mxu0 %v8110_v46  ;;  %v8150_v53 = vld [vmem:[%s11223_s1 + $0xea8] ss:$16 sps:$4 sm:$0xff]  }
 0x23d   :  { %5672 = vmatprep.subr.bf16.mxu1 %v8107_v13  ;;  %v8155_v13 = vld [vmem:[%s11223_s1 + $0xc0c] ss:$16 sps:$4 sm:$0xff]   ;;  %v8153_v46 = vld [vmem:[%s11223_s1 + $0xc08] ss:$16 sps:$4 sm:$0xff]  }
 0x23f   :  { %5706 = vmatpush2.bf16.msra.mxu0 %v8108_v56  ;;  %v8161_v56 = vld [vmem:[%s11223_s1 + $0xdec] ss:$16 sps:$4 sm:$0xff]  }
 0x240   :  { %5673 = vmatpush2.bf16.msra.mxu1 %v8105_v51  ;;  %5707 = vmatprep.subr.bf16.mxu0 %v8113_v55  ;;  %v8156_v51 = vld [vmem:[%s11223_s1 + $0xe88] ss:$16 sps:$4 sm:$0xff]   ;;  %v8164_v55 = vld [vmem:[%s11223_s1 + $0xe6c] ss:$16 sps:$4 sm:$0xff]  }
 0x241   :  { %5724 = vmatprep.subr.bf16.mxu1 %v8116_v58  ;;  %v8159_v58 = vld [vmem:[%s11223_s1 + $0xde8] ss:$16 sps:$4 sm:$0xff]  }
 0x242   :  { %v5389_v6 = vpop.f32.mrf.mxu0 }
 0x243   :  { %v5430_v60 = vpop.f32.mrf.mxu1  ;;  %5675 = vmatmul.mubr.bf16.vlgmr.msra.gmra.mxu1 %v9164_v50  ;;  %v5390_v63 = vadd.f32 %v5389_v6, %v10284_v30  ;;  %5708 = vmatpush2.bf16.msra.mxu0 %v8111_v61  ;;  %v8125_v50 = vld [vmem:[%s11223_s1 + $0xb2c] ss:$16 sps:$4 sm:$0xff]   ;;  %v8162_v61 = vld [vmem:[%s11223_s1 + $0xe68] ss:$16 sps:$4 sm:$0xff]  }
 0x244   :  { %5725 = vmatpush1.bf16.msra.mxu1 %v8114_v57  ;;  %v5391_v3 = vpop.f32.mrf.mxu0  ;;  %5709 = vmatprep.subr.bf16.mxu0 %v8119_v62  ;;  %v8128_v30 = vld [vmem:[%s11223_s1 + $0xcac] ss:$16 sps:$4 sm:$0xff]   ;;  %v8168_v6 = vld [vmem:[%s11223_s1 + $0xe48] ss:$16 sps:$4 sm:$0xff]  }
 0x245   :  { %v5432_v1 = vpop.f32.mrf.mxu1  ;;  %5726 = vmatprep.subr.bf16.mxu1 %v8122_v17  ;;  %v5431_v7 = vadd.f32 %v5430_v60, %v5390_v63  ;;  %v5392_v8 = vadd.f32 %v5391_v3, %v10288_v38  ;;  %5756 = vmatprep.mubr.bf16.mxu1 %v9176_v54  ;;  %v8131_v54 = vld [vmem:[%s11223_s1 + $0xb0c] ss:$16 sps:$4 sm:$0xff]   ;;  %v8165_v17 = vld [vmem:[%s11223_s1 + $0xdc8] ss:$16 sps:$4 sm:$0xff]  }
 0x246   :  { %v5393_v10 = vpop.f32.mrf.mxu0  ;;  %v8134_v38 = vld [vmem:[%s11223_s1 + $0xc8c] ss:$16 sps:$4 sm:$0xff]  }
 0x247   :  { %v5434_v11 = vpop.f32.mrf.mxu1  ;;  %v5433_v49 = vadd.f32 %v5432_v1, %v5392_v8  ;;  %5710 = vmatpush2.bf16.msra.mxu0 %v8117_v2  ;;  %v8167_v57 = vld [vmem:[%s11223_s1 + $0xdcc] ss:$16 sps:$4 sm:$0xff]   ;;  %v8171_v2 = vld [vmem:[%s11223_s1 + $0xda8] ss:$16 sps:$4 sm:$0xff]  }
 0x248   :  { %5727 = vmatpush1.bf16.msra.mxu1 %v8120_v43  ;;  %v5394_v18 = vpop.f32.mrf.mxu0  ;;  %5711 = vmatprep.subr.bf16.mxu0 %v8125_v50  ;;  %v8170_v62 = vld [vmem:[%s11223_s1 + $0xe4c] ss:$16 sps:$4 sm:$0xff]   ;;  %v8174_v43 = vld [vmem:[%s11223_s1 + $0xe28] ss:$16 sps:$4 sm:$0xff]  }
 0x249   :  { %v5435_v4 = vpop.f32.mrf.mxu1  ;;  %5728 = vmatprep.subr.bf16.mxu1 %v8128_v30  ;;  %v8173_v60 = vld [vmem:[%s11223_s1 + $0xdac] ss:$16 sps:$4 sm:$0xff]   ;;  %v8177_v50 = vld [vmem:[%s11223_s1 + $0xd88] ss:$16 sps:$4 sm:$0xff]  }
 0x24a   :  { %v8176_v63 = vld [vmem:[%s11223_s1 + $0xe2c] ss:$16 sps:$4 sm:$0xff]   ;;  %v8180_v30 = vld [vmem:[%s11223_s1 + $0xe08] ss:$16 sps:$4 sm:$0xff]  }
 0x24b   :  { %5712 = vmatpush2.bf16.msra.mxu0 %v8123_v16  ;;  %v8179_v3 = vld [vmem:[%s11223_s1 + $0xd8c] ss:$16 sps:$4 sm:$0xff]   ;;  %v8183_v10 = vld [vmem:[%s11223_s1 + $0xd68] ss:$16 sps:$4 sm:$0xff]  }
 0x24c   :  { %5729 = vmatpush1.bf16.msra.mxu1 %v8126_v19  ;;  %5713 = vmatprep.subr.bf16.mxu0 %v8131_v54  ;;  %v8182_v1 = vld [vmem:[%s11223_s1 + $0xe0c] ss:$16 sps:$4 sm:$0xff]   ;;  %v8186_v11 = vld [vmem:[%s11223_s1 + $0xfe8] ss:$16 sps:$4 sm:$0xff]  }
 0x24d   :  { %5730 = vmatprep.subr.bf16.mxu1 %v8134_v38  ;;  %v8188_v8 = vld [vmem:[%s11223_s1 + $0xfec] ss:$16 sps:$4 sm:$0xff]   ;;  %v8189_v19 = vld [vmem:[%s11223_s1 + $0xd48] ss:$16 sps:$4 sm:$0xff]  }
 0x24e   :  { %v8194_v16 = vld [vmem:[%s11223_s1 + $0xfcc] ss:$16 sps:$4 sm:$0xff]   ;;  %v8192_v18 = vld [vmem:[%s11223_s1 + $0xfc8] ss:$16 sps:$4 sm:$0xff]  }
 0x24f   :  { %5714 = vmatpush2.bf16.msra.mxu0 %v8129_v5  ;;  %v8197_v4 = vld [vmem:[%s11223_s1 + $0xd2c] ss:$16 sps:$4 sm:$0xff]   ;;  %v8195_v38 = vld [vmem:[%s11223_s1 + $0xd28] ss:$16 sps:$4 sm:$0xff]  }
 0x250   :  { %5731 = vmatpush1.bf16.msra.mxu1 %v8132_v20  ;;  %5765 = vmatprep.subr.bf16.mxu0 %v8140_v21  ;;  %v8200_v54 = vld [vmem:[%s11223_s1 + $0xfac] ss:$16 sps:$4 sm:$0xff]   ;;  %v8198_v5 = vld [vmem:[%s11223_s1 + $0xfa8] ss:$16 sps:$4 sm:$0xff]  }
 0x251   :  { %5732 = vmatprep.subr.bf16.mxu1 %v8137_v23  ;;  %v8203_v20 = vld [vmem:[%s11223_s1 + $0xd0c] ss:$16 sps:$4 sm:$0xff]   ;;  %v8201_v21 = vld [vmem:[%s11223_s1 + $0xd08] ss:$16 sps:$4 sm:$0xff]  }
 0x252   :  { %v5471_v45 = vpop.f32.mrf.mxu0  ;;  %5716 = vmatmul.mubr.bf16.vlgmr.msra.gmra.mxu0 %v9180_v35  ;;  %v8152_v35 = vld [vmem:[%s11223_s1 + $0xeac] ss:$16 sps:$4 sm:$0xff]  }
 0x253   :  { %v10525_v34 = vadd.f32 %v5471_v45, %v5431_v7  ;;  %5766 = vmatpush1.bf16.msra.mxu0 %v8138_v28  ;;  %5797 = vmatprep.mubr.bf16.mxu0 %v9196_v59  ;;  %v8158_v59 = vld [vmem:[%s11223_s1 + $0xe8c] ss:$16 sps:$4 sm:$0xff]   ;;  %v8210_v45 = vld [vmem:[%s11223_s1 + $0x10e8] ss:$16 sps:$4 sm:$0xff]  }
 0x254   :  { %5733 = vmatpush1.bf16.msra.mxu1 %v8135_v0  ;;  %v5473_v32 = vpop.f32.mrf.mxu0  ;;  %5767 = vmatprep.subr.bf16.mxu0 %v8146_v26  ;;  %v8185_v7 = vld [vmem:[%s11223_s1 + $0xd6c] ss:$16 sps:$4 sm:$0xff]   ;;  %v8204_v0 = vld [vmem:[%s11223_s1 + $0xf88] ss:$16 sps:$4 sm:$0xff]  }
 0x255   :  { %5734 = vmatprep.subr.bf16.mxu1 %v8143_v29  ;;  %v10539_v44 = vadd.f32 %v5473_v32, %v5433_v49  ;;  %v8191_v49 = vld [vmem:[%s11223_s1 + $0xd4c] ss:$16 sps:$4 sm:$0xff]   ;;  %v8207_v26 = vld [vmem:[%s11223_s1 + $0xf68] ss:$16 sps:$4 sm:$0xff]  }
 0x256   :  { %v5475_v47 = vpop.f32.mrf.mxu0  ;;  %v8206_v23 = vld [vmem:[%s11223_s1 + $0xf8c] ss:$16 sps:$4 sm:$0xff]  }
 0x257   :  { %5768 = vmatpush1.bf16.msra.mxu0 %v8144_v37  ;;  %v8209_v28 = vld [vmem:[%s11223_s1 + $0xf6c] ss:$16 sps:$4 sm:$0xff]  }
 0x258   :  { %5735 = vmatpush1.bf16.msra.mxu1 %v8141_v36  ;;  %v5476_v48 = vpop.f32.mrf.mxu0  ;;  %5769 = vmatprep.subr.bf16.mxu0 %v8152_v35  ;;  %v8212_v29 = vld [vmem:[%s11223_s1 + $0x10ec] ss:$16 sps:$4 sm:$0xff]   ;;  %v8216_v35 = vld [vmem:[%s11223_s1 + $0x10c8] ss:$16 sps:$4 sm:$0xff]  }
 0x259   :  { %5736 = vmatprep.subr.bf16.mxu1 %v8149_v40  ;;  %v8215_v36 = vld [vmem:[%s11223_s1 + $0xf4c] ss:$16 sps:$4 sm:$0xff]   ;;  %v8213_v40 = vld [vmem:[%s11223_s1 + $0xf48] ss:$16 sps:$4 sm:$0xff]  }
 0x25a   :  { %v8218_v37 = vld [vmem:[%s11223_s1 + $0x10cc] ss:$16 sps:$4 sm:$0xff]   ;;  %v8219_v48 = vld [vmem:[%s11223_s1 + $0xf28] ss:$16 sps:$4 sm:$0xff]  }
 0x25b   :  { %5770 = vmatpush1.bf16.msra.mxu0 %v8150_v53 }
 0x25c   :  { %5737 = vmatpush1.bf16.msra.mxu1 %v8147_v41  ;;  %5771 = vmatprep.subr.bf16.mxu0 %v8158_v59  ;;  %v8221_v41 = vld [vmem:[%s11223_s1 + $0xf2c] ss:$16 sps:$4 sm:$0xff]  }
 0x25d   :  { %5738 = vmatprep.subr.bf16.mxu1 %v8155_v13  ;;  %v8222_v13 = vld [vmem:[%s11223_s1 + $0x10a8] ss:$16 sps:$4 sm:$0xff]  }
 0x25f   :  { %5772 = vmatpush1.bf16.msra.mxu0 %v8156_v51  ;;  %v822_v51 = vsub.s32 2, %v8628_v42 }
 0x260   :  { %5739 = vmatpush1.bf16.msra.mxu1 %v8153_v46  ;;  %5773 = vmatprep.subr.bf16.mxu0 %v8164_v55  ;;  %v8227_v46 = vld [vmem:[%s11223_s1 + $0xf0c] ss:$16 sps:$4 sm:$0xff]   ;;  %v8225_v55 = vld [vmem:[%s11223_s1 + $0xf08] ss:$16 sps:$4 sm:$0xff]  }
 0x261   :  { %5740 = vmatprep.subr.bf16.mxu1 %v8161_v56  ;;  %v826_v56 = vsub.s32 3, %v8628_v42  ;;  %v8236_v42 = vld [vmem:[%s11223_s1 + $0x12ec] ss:$16 sps:$4 sm:$0xff]  }
 0x263   :  { %5774 = vmatpush1.bf16.msra.mxu0 %v8162_v61  ;;  %v8233_v61 = vld [vmem:[%s11223_s1 + $0x106c] ss:$16 sps:$4 sm:$0xff]  }
 0x264   :  { %5741 = vmatpush2.bf16.msra.mxu1 %v8159_v58  ;;  %5775 = vmatprep.subr.bf16.mxu0 %v8170_v62  ;;  %v8228_v58 = vld [vmem:[%s11223_s1 + $0x1088] ss:$16 sps:$4 sm:$0xff]  }
 0x265   :  { %5742 = vmatprep.subr.bf16.mxu1 %v8167_v57  ;;  %v8455_v57 = vld [vmem:[%s11224_s2] sm:$0xf] }
 0x266   :  { %v823_v62 = vrot.slane %v8455_v57, %v822_v51  ;;  %v8288_v51 = vld [vmem:[%s11223_s1 + $0x13c8] ss:$16 sps:$4 sm:$0xff]  }
 0x267   :  { %5776 = vmatpush1.bf16.msra.mxu0 %v8168_v6  ;;  %v8231_v6 = vld [vmem:[%s11223_s1 + $0x1068] ss:$16 sps:$4 sm:$0xff]  }
 0x268   :  { %5743 = vmatpush2.bf16.msra.mxu1 %v8165_v17  ;;  %5777 = vmatprep.subr.bf16.mxu0 %v8176_v63  ;;  %v827_v17 = vrot.slane %v8455_v57, %v826_v56  ;;  %v8239_v63 = vld [vmem:[%s11223_s1 + $0x104c] ss:$16 sps:$4 sm:$0xff]  }
 0x269   :  { %5744 = vmatprep.subr.bf16.mxu1 %v8173_v60  ;;  %v8234_v60 = vld [vmem:[%s11223_s1 + $0x12e8] ss:$16 sps:$4 sm:$0xff]   ;;  %v8293_v56 = vld [vmem:[%s11223_s1 + $0x112c] ss:$16 sps:$4 sm:$0xff]  }
 0x26a   :  { %v8302_v57 = vld [vmem:[%s11223_s1 + $0x138c] ss:$16 sps:$4 sm:$0xff]  }
 0x26b   :  { %5778 = vmatpush1.bf16.msra.mxu0 %v8174_v43 }
 0x26c   :  { %5745 = vmatpush2.bf16.msra.mxu1 %v8171_v2  ;;  %5779 = vmatprep.subr.bf16.mxu0 %v8182_v1  ;;  %v8242_v2 = vld [vmem:[%s11223_s1 + $0x12cc] ss:$16 sps:$4 sm:$0xff]  }
 0x26d   :  { %5746 = vmatprep.subr.bf16.mxu1 %v8179_v3 }
 0x26f   :  { %5780 = vmatpush1.bf16.msra.mxu0 %v8180_v30  ;;  %v8237_v30 = vld [vmem:[%s11223_s1 + $0x1048] ss:$16 sps:$4 sm:$0xff]  }
 0x270   :  { %5747 = vmatpush2.bf16.msra.mxu1 %v8177_v50  ;;  %5781 = vmatprep.subr.bf16.mxu0 %v8188_v8 }
 0x271   :  { %5748 = vmatprep.subr.bf16.mxu1 %v8185_v7  ;;  %v8240_v7 = vld [vmem:[%s11223_s1 + $0x12c8] ss:$16 sps:$4 sm:$0xff]  }
 0x273   :  { %5782 = vmatpush2.bf16.msra.mxu0 %v8186_v11 }
 0x274   :  { %5749 = vmatpush2.bf16.msra.mxu1 %v8183_v10  ;;  %5783 = vmatprep.subr.bf16.mxu0 %v8194_v16  ;;  %v8248_v10 = vld [vmem:[%s11223_s1 + $0x12ac] ss:$16 sps:$4 sm:$0xff]   ;;  %v8243_v16 = vld [vmem:[%s11223_s1 + $0x1028] ss:$16 sps:$4 sm:$0xff]  }
 0x275   :  { %5750 = vmatprep.subr.bf16.mxu1 %v8191_v49 }
 0x277   :  { %5784 = vmatpush2.bf16.msra.mxu0 %v8192_v18 }
 0x278   :  { %5751 = vmatpush2.bf16.msra.mxu1 %v8189_v19  ;;  %5785 = vmatprep.subr.bf16.mxu0 %v8200_v54  ;;  %v8246_v19 = vld [vmem:[%s11223_s1 + $0x12a8] ss:$16 sps:$4 sm:$0xff]  }
 0x279   :  { %5752 = vmatprep.subr.bf16.mxu1 %v8197_v4  ;;  %v8251_v4 = vld [vmem:[%s11223_s1 + $0x100c] ss:$16 sps:$4 sm:$0xff]   ;;  %v8249_v54 = vld [vmem:[%s11223_s1 + $0x1008] ss:$16 sps:$4 sm:$0xff]  }
 0x27b   :  { %5786 = vmatpush2.bf16.msra.mxu0 %v8198_v5  ;;  %v8257_v5 = vld [vmem:[%s11223_s1 + $0x11ec] ss:$16 sps:$4 sm:$0xff]  }
 0x27c   :  { %5753 = vmatpush2.bf16.msra.mxu1 %v8195_v38  ;;  %5787 = vmatprep.subr.bf16.mxu0 %v8206_v23  ;;  %v8252_v38 = vld [vmem:[%s11223_s1 + $0x1288] ss:$16 sps:$4 sm:$0xff]  }
 0x27d   :  { %5754 = vmatprep.subr.bf16.mxu1 %v8203_v20  ;;  %v8260_v20 = vld [vmem:[%s11223_s1 + $0x126c] ss:$16 sps:$4 sm:$0xff]   ;;  %v8255_v23 = vld [vmem:[%s11223_s1 + $0x11e8] ss:$16 sps:$4 sm:$0xff]  }
 0x27f   :  { %5788 = vmatpush2.bf16.msra.mxu0 %v8204_v0  ;;  %v8263_v0 = vld [vmem:[%s11223_s1 + $0x11cc] ss:$16 sps:$4 sm:$0xff]  }
 0x280   :  { %5755 = vmatpush2.bf16.msra.mxu1 %v8201_v21  ;;  %5789 = vmatprep.subr.bf16.mxu0 %v8209_v28  ;;  %v8258_v21 = vld [vmem:[%s11223_s1 + $0x1268] ss:$16 sps:$4 sm:$0xff]   ;;  %v8266_v28 = vld [vmem:[%s11223_s1 + $0x124c] ss:$16 sps:$4 sm:$0xff]  }
 0x281   :  { %5806 = vmatprep.subr.bf16.mxu1 %v8212_v29  ;;  %v8261_v29 = vld [vmem:[%s11223_s1 + $0x11c8] ss:$16 sps:$4 sm:$0xff]  }
 0x283   :  { %v5512_v32 = vpop.f32.mrf.mxu1  ;;  %5757 = vmatmul.mubr.bf16.vlgmr.msra.gmra.mxu1 %v9392_v15  ;;  %5790 = vmatpush2.bf16.msra.mxu0 %v8207_v26  ;;  %v8224_v15 = vld [vmem:[%s11223_s1 + $0x10ac] ss:$16 sps:$4 sm:$0xff]   ;;  %v8264_v26 = vld [vmem:[%s11223_s1 + $0x1248] ss:$16 sps:$4 sm:$0xff]  }
 0x284   :  { %5807 = vmatpush1.bf16.msra.mxu1 %v8210_v45  ;;  %5791 = vmatprep.subr.bf16.mxu0 %v8215_v36  ;;  %v5513_v43 = vadd.f32 %v5512_v32, %v823_v62  ;;  %v8269_v45 = vld [vmem:[%s11223_s1 + $0x11ac] ss:$16 sps:$4 sm:$0xff]   ;;  %v8270_v32 = vld [vmem:[%s11223_s1 + $0x1228] ss:$16 sps:$4 sm:$0xff]  }
 0x285   :  { %v5514_v47 = vpop.f32.mrf.mxu1  ;;  %5808 = vmatprep.subr.bf16.mxu1 %v8218_v37  ;;  %5838 = vmatprep.mubr.bf16.mxu1 %v9403_v22  ;;  %v8230_v22 = vld [vmem:[%s11223_s1 + $0x108c] ss:$16 sps:$4 sm:$0xff]   ;;  %v8267_v37 = vld [vmem:[%s11223_s1 + $0x11a8] ss:$16 sps:$4 sm:$0xff]  }
 0x286   :  { %v5515_v1 = vadd.f32 %v5514_v47, %v827_v17  ;;  %v8272_v36 = vld [vmem:[%s11223_s1 + $0x122c] ss:$16 sps:$4 sm:$0xff]   ;;  %v8273_v47 = vld [vmem:[%s11223_s1 + $0x1188] ss:$16 sps:$4 sm:$0xff]  }
 0x287   :  { %v5516_v53 = vpop.f32.mrf.mxu1  ;;  %5792 = vmatpush2.bf16.msra.mxu0 %v8213_v40  ;;  %v8275_v40 = vld [vmem:[%s11223_s1 + $0x118c] ss:$16 sps:$4 sm:$0xff]   ;;  %v8297_v62 = vld [vmem:[%s11223_s1 + $0x1108] ss:$16 sps:$4 sm:$0xff]  }
 0x288   :  { %5809 = vmatpush1.bf16.msra.mxu1 %v8216_v35  ;;  %5793 = vmatprep.subr.bf16.mxu0 %v8221_v41  ;;  %v8278_v35 = vld [vmem:[%s11223_s1 + $0x120c] ss:$16 sps:$4 sm:$0xff]   ;;  %v8276_v41 = vld [vmem:[%s11223_s1 + $0x1208] ss:$16 sps:$4 sm:$0xff]  }
 0x289   :  { %v5517_v59 = vpop.f32.mrf.mxu1  ;;  %5810 = vmatprep.subr.bf16.mxu1 %v8224_v15  ;;  %v8281_v15 = vld [vmem:[%s11223_s1 + $0x116c] ss:$16 sps:$4 sm:$0xff]   ;;  %v8300_v17 = vld [vmem:[%s11223_s1 + $0x1388] ss:$16 sps:$4 sm:$0xff]  }
 0x28a   :  { %v8284_v53 = vld [vmem:[%s11223_s1 + $0x13ec] ss:$16 sps:$4 sm:$0xff]  }
 0x28b   :  { %5794 = vmatpush2.bf16.msra.mxu0 %v8219_v48  ;;  %v8279_v48 = vld [vmem:[%s11223_s1 + $0x1168] ss:$16 sps:$4 sm:$0xff]   ;;  %v8287_v59 = vld [vmem:[%s11223_s1 + $0x114c] ss:$16 sps:$4 sm:$0xff]  }
 0x28c   :  { %5811 = vmatpush1.bf16.msra.mxu1 %v8222_v13  ;;  %5795 = vmatprep.subr.bf16.mxu0 %v8227_v46  ;;  %v8282_v13 = vld [vmem:[%s11223_s1 + $0x13e8] ss:$16 sps:$4 sm:$0xff]   ;;  %v8290_v46 = vld [vmem:[%s11223_s1 + $0x13cc] ss:$16 sps:$4 sm:$0xff]  }
 0x28d   :  { %5812 = vmatprep.subr.bf16.mxu1 %v8230_v22  ;;  %v8285_v22 = vld [vmem:[%s11223_s1 + $0x1148] ss:$16 sps:$4 sm:$0xff]  }
 0x28f   :  { %5796 = vmatpush2.bf16.msra.mxu0 %v8225_v55  ;;  %v8296_v55 = vld [vmem:[%s11223_s1 + $0x13ac] ss:$16 sps:$4 sm:$0xff]  }
 0x290   :  { %5813 = vmatpush1.bf16.msra.mxu1 %v8228_v58  ;;  %5847 = vmatprep.subr.bf16.mxu0 %v8236_v42  ;;  %v8291_v58 = vld [vmem:[%s11223_s1 + $0x1128] ss:$16 sps:$4 sm:$0xff]   ;;  %v8299_v42 = vld [vmem:[%s11223_s1 + $0x110c] ss:$16 sps:$4 sm:$0xff]  }
 0x291   :  { %5814 = vmatprep.subr.bf16.mxu1 %v8233_v61  ;;  %v8294_v61 = vld [vmem:[%s11223_s1 + $0x13a8] ss:$16 sps:$4 sm:$0xff]  }
 0x292   :  { %v5553_v3 = vpop.f32.mrf.mxu0  ;;  %5798 = vmatmul.mubr.bf16.vlgmr.msra.gmra.mxu0 %v9407_v39  ;;  %v8245_v39 = vld [vmem:[%s11223_s1 + $0x102c] ss:$16 sps:$4 sm:$0xff]  }
 0x293   :  { %v10730_v50 = vadd.f32 %v5553_v3, %v5513_v43  ;;  %5848 = vmatpush1.bf16.msra.mxu0 %v8234_v60  ;;  %5879 = vmatprep.mubr.bf16.mxu0 %v9423_v31  ;;  %v8254_v31 = vld [vmem:[%s11223_s1 + $0x128c] ss:$16 sps:$4 sm:$0xff]  }
 0x294   :  { %5815 = vmatpush1.bf16.msra.mxu1 %v8231_v6  ;;  %v5555_v8 = vpop.f32.mrf.mxu0  ;;  %5849 = vmatprep.subr.bf16.mxu0 %v8242_v2  ;;  %v8305_v6 = vld [vmem:[%s11223_s1 + $0x136c] ss:$16 sps:$4 sm:$0xff]   ;;  %v8306_v2 = vld [vmem:[%s11223_s1 + $0x14e8] ss:$16 sps:$4 sm:$0xff]  }
 0x295   :  { %5816 = vmatprep.subr.bf16.mxu1 %v8239_v63  ;;  %v10744_v11 = vadd.f32 %v5555_v8, %v5515_v1  ;;  %v8308_v60 = vld [vmem:[%s11223_s1 + $0x14ec] ss:$16 sps:$4 sm:$0xff]   ;;  %v8303_v63 = vld [vmem:[%s11223_s1 + $0x1368] ss:$16 sps:$4 sm:$0xff]  }
 0x296   :  { %v5557_v49 = vpop.f32.mrf.mxu0  ;;  %v8311_v43 = vld [vmem:[%s11223_s1 + $0x134c] ss:$16 sps:$4 sm:$0xff]   ;;  %v8312_v8 = vld [vmem:[%s11223_s1 + $0x14c8] ss:$16 sps:$4 sm:$0xff]  }
 0x297   :  { %5850 = vmatpush1.bf16.msra.mxu0 %v8240_v7  ;;  %v8314_v3 = vld [vmem:[%s11223_s1 + $0x14cc] ss:$16 sps:$4 sm:$0xff]   ;;  %v8309_v7 = vld [vmem:[%s11223_s1 + $0x1348] ss:$16 sps:$4 sm:$0xff]  }
 0x298   :  { %5817 = vmatpush1.bf16.msra.mxu1 %v8237_v30  ;;  %v5558_v18 = vpop.f32.mrf.mxu0  ;;  %5851 = vmatprep.subr.bf16.mxu0 %v8248_v10  ;;  %v8317_v10 = vld [vmem:[%s11223_s1 + $0x132c] ss:$16 sps:$4 sm:$0xff]  }
 0x299   :  { %5818 = vmatprep.subr.bf16.mxu1 %v8245_v39 }
 0x29b   :  { %5852 = vmatpush1.bf16.msra.mxu0 %v8246_v19  ;;  %v8318_v19 = vld [vmem:[%s11223_s1 + $0x14a8] ss:$16 sps:$4 sm:$0xff]  }
 0x29c   :  { %5819 = vmatpush1.bf16.msra.mxu1 %v8243_v16  ;;  %5853 = vmatprep.subr.bf16.mxu0 %v8254_v31  ;;  %v8315_v16 = vld [vmem:[%s11223_s1 + $0x1328] ss:$16 sps:$4 sm:$0xff]  }
 0x29d   :  { %5820 = vmatprep.subr.bf16.mxu1 %v8251_v4  ;;  %v8321_v4 = vld [vmem:[%s11223_s1 + $0x1308] ss:$16 sps:$4 sm:$0xff]  }
 0x29e   :  { %v8324_v31 = vld [vmem:[%s11223_s1 + $0x1488] ss:$16 sps:$4 sm:$0xff]  }
 0x29f   :  { %5854 = vmatpush1.bf16.msra.mxu0 %v8252_v38  ;;  %v8332_v38 = vld [vmem:[%s11223_s1 + $0x16ec] ss:$16 sps:$4 sm:$0xff]  }
 0x2a0   :  { %5821 = vmatpush1.bf16.msra.mxu1 %v8249_v54  ;;  %5855 = vmatprep.subr.bf16.mxu0 %v8260_v20  ;;  %v8329_v54 = vld [vmem:[%s11223_s1 + $0x146c] ss:$16 sps:$4 sm:$0xff]   ;;  %v8330_v20 = vld [vmem:[%s11223_s1 + $0x16e8] ss:$16 sps:$4 sm:$0xff]  }
 0x2a1   :  { %5822 = vmatprep.subr.bf16.mxu1 %v8257_v5  ;;  %v8327_v5 = vld [vmem:[%s11223_s1 + $0x1468] ss:$16 sps:$4 sm:$0xff]  }
 0x2a3   :  { %5856 = vmatpush1.bf16.msra.mxu0 %v8258_v21  ;;  %v8338_v21 = vld [vmem:[%s11223_s1 + $0x16cc] ss:$16 sps:$4 sm:$0xff]  }
 0x2a4   :  { %5823 = vmatpush2.bf16.msra.mxu1 %v8255_v23  ;;  %5857 = vmatprep.subr.bf16.mxu0 %v8266_v28  ;;  %v8335_v23 = vld [vmem:[%s11223_s1 + $0x144c] ss:$16 sps:$4 sm:$0xff]  }
 0x2a5   :  { %5824 = vmatprep.subr.bf16.mxu1 %v8263_v0 }
 0x2a7   :  { %5858 = vmatpush1.bf16.msra.mxu0 %v8264_v26  ;;  %v8336_v26 = vld [vmem:[%s11223_s1 + $0x16c8] ss:$16 sps:$4 sm:$0xff]  }
 0x2a8   :  { %5825 = vmatpush2.bf16.msra.mxu1 %v8261_v29  ;;  %5859 = vmatprep.subr.bf16.mxu0 %v8272_v36  ;;  %v8333_v29 = vld [vmem:[%s11223_s1 + $0x1448] ss:$16 sps:$4 sm:$0xff]   ;;  %v8341_v36 = vld [vmem:[%s11223_s1 + $0x142c] ss:$16 sps:$4 sm:$0xff]  }
 0x2a9   :  { %5826 = vmatprep.subr.bf16.mxu1 %v8269_v45 }
 0x2ab   :  { %5860 = vmatpush1.bf16.msra.mxu0 %v8270_v32 }
 0x2ac   :  { %5827 = vmatpush2.bf16.msra.mxu1 %v8267_v37  ;;  %5861 = vmatprep.subr.bf16.mxu0 %v8278_v35  ;;  %v8342_v35 = vld [vmem:[%s11223_s1 + $0x16a8] ss:$16 sps:$4 sm:$0xff]  }
 0x2ad   :  { %5828 = vmatprep.subr.bf16.mxu1 %v8275_v40  ;;  %v8339_v40 = vld [vmem:[%s11223_s1 + $0x1428] ss:$16 sps:$4 sm:$0xff]  }
 0x2af   :  { %5862 = vmatpush1.bf16.msra.mxu0 %v8276_v41  ;;  %v8347_v41 = vld [vmem:[%s11223_s1 + $0x140c] ss:$16 sps:$4 sm:$0xff]  }
 0x2b0   :  { %5829 = vmatpush2.bf16.msra.mxu1 %v8273_v47  ;;  %5863 = vmatprep.subr.bf16.mxu0 %v8284_v53  ;;  %v8348_v53 = vld [vmem:[%s11223_s1 + $0x1688] ss:$16 sps:$4 sm:$0xff]  }
 0x2b1   :  { %5830 = vmatprep.subr.bf16.mxu1 %v8281_v15  ;;  %v8345_v15 = vld [vmem:[%s11223_s1 + $0x1408] ss:$16 sps:$4 sm:$0xff]  }
 0x2b3   :  { %5864 = vmatpush2.bf16.msra.mxu0 %v8282_v13  ;;  %v8356_v13 = vld [vmem:[%s11223_s1 + $0x166c] ss:$16 sps:$4 sm:$0xff]  }
 0x2b4   :  { %5831 = vmatpush2.bf16.msra.mxu1 %v8279_v48  ;;  %5865 = vmatprep.subr.bf16.mxu0 %v8290_v46  ;;  %v8353_v48 = vld [vmem:[%s11223_s1 + $0x15ec] ss:$16 sps:$4 sm:$0xff]   ;;  %v8354_v46 = vld [vmem:[%s11223_s1 + $0x1668] ss:$16 sps:$4 sm:$0xff]  }
 0x2b5   :  { %5832 = vmatprep.subr.bf16.mxu1 %v8287_v59  ;;  %v8351_v59 = vld [vmem:[%s11223_s1 + $0x15e8] ss:$16 sps:$4 sm:$0xff]  }
 0x2b7   :  { %5866 = vmatpush2.bf16.msra.mxu0 %v8288_v51  ;;  %v8362_v51 = vld [vmem:[%s11223_s1 + $0x164c] ss:$16 sps:$4 sm:$0xff]  }
 0x2b8   :  { %5833 = vmatpush2.bf16.msra.mxu1 %v8285_v22  ;;  %5867 = vmatprep.subr.bf16.mxu0 %v8296_v55  ;;  %v8359_v22 = vld [vmem:[%s11223_s1 + $0x15cc] ss:$16 sps:$4 sm:$0xff]   ;;  %v8360_v55 = vld [vmem:[%s11223_s1 + $0x1648] ss:$16 sps:$4 sm:$0xff]  }
 0x2b9   :  { %5834 = vmatprep.subr.bf16.mxu1 %v8293_v56  ;;  %v8357_v56 = vld [vmem:[%s11223_s1 + $0x15c8] ss:$16 sps:$4 sm:$0xff]  }
 0x2bb   :  { %5868 = vmatpush2.bf16.msra.mxu0 %v8294_v61  ;;  %v8368_v61 = vld [vmem:[%s11223_s1 + $0x162c] ss:$16 sps:$4 sm:$0xff]  }
 0x2bc   :  { %5835 = vmatpush2.bf16.msra.mxu1 %v8291_v58  ;;  %5869 = vmatprep.subr.bf16.mxu0 %v8302_v57  ;;  %v8365_v58 = vld [vmem:[%s11223_s1 + $0x15ac] ss:$16 sps:$4 sm:$0xff]   ;;  %v8366_v57 = vld [vmem:[%s11223_s1 + $0x1628] ss:$16 sps:$4 sm:$0xff]  }
 0x2bd   :  { %5836 = vmatprep.subr.bf16.mxu1 %v8299_v42  ;;  %v8363_v42 = vld [vmem:[%s11223_s1 + $0x15a8] ss:$16 sps:$4 sm:$0xff]  }
 0x2bf   :  { %5870 = vmatpush2.bf16.msra.mxu0 %v8300_v17  ;;  %v8374_v17 = vld [vmem:[%s11223_s1 + $0x160c] ss:$16 sps:$4 sm:$0xff]  }
 0x2c0   :  { %5837 = vmatpush2.bf16.msra.mxu1 %v8297_v62  ;;  %5871 = vmatprep.subr.bf16.mxu0 %v8305_v6  ;;  %v8371_v62 = vld [vmem:[%s11223_s1 + $0x158c] ss:$16 sps:$4 sm:$0xff]   ;;  %v8369_v6 = vld [vmem:[%s11223_s1 + $0x1588] ss:$16 sps:$4 sm:$0xff]  }
 0x2c1   :  { %5888 = vmatprep.subr.bf16.mxu1 %v8308_v60  ;;  %v8372_v60 = vld [vmem:[%s11223_s1 + $0x1608] ss:$16 sps:$4 sm:$0xff]  }
 0x2c3   :  { %v5594_v1 = vpop.f32.mrf.mxu1  ;;  %5839 = vmatmul.mubr.bf16.vlgmr.msra.gmra.mxu1 %v9610_v12  ;;  %5872 = vmatpush2.bf16.msra.mxu0 %v8303_v63  ;;  %v8320_v12 = vld [vmem:[%s11223_s1 + $0x14ac] ss:$16 sps:$4 sm:$0xff]  }
 0x2c4   :  { %v5595_v30 = vadd.f32 %v5594_v1, %v10730_v50  ;;  %5889 = vmatpush1.bf16.msra.mxu1 %v8306_v2  ;;  %5873 = vmatprep.subr.bf16.mxu0 %v8311_v43  ;;  %v8377_v63 = vld [vmem:[%s11223_s1 + $0x156c] ss:$16 sps:$4 sm:$0xff]   ;;  %v8375_v43 = vld [vmem:[%s11223_s1 + $0x1568] ss:$16 sps:$4 sm:$0xff]  }
 0x2c5   :  { %v5596_v39 = vpop.f32.mrf.mxu1  ;;  %5890 = vmatprep.subr.bf16.mxu1 %v8314_v3  ;;  %5920 = vmatprep.mubr.bf16.mxu1 %v9631_v24  ;;  %v8326_v24 = vld [vmem:[%s11223_s1 + $0x148c] ss:$16 sps:$4 sm:$0xff]   ;;  %v8378_v3 = vld [vmem:[%s11223_s1 + $0x17e8] ss:$16 sps:$4 sm:$0xff]  }
 0x2c6   :  { %v5597_v50 = vadd.f32 %v5596_v39, %v10744_v11  ;;  %v8323_v11 = vld [vmem:[%s11223_s1 + $0x130c] ss:$16 sps:$4 sm:$0xff]  }
 0x2c7   :  { %v5598_v49 = vpop.f32.mrf.mxu1  ;;  %5874 = vmatpush2.bf16.msra.mxu0 %v8309_v7  ;;  %v8380_v2 = vld [vmem:[%s11223_s1 + $0x17ec] ss:$16 sps:$4 sm:$0xff]   ;;  %v8381_v7 = vld [vmem:[%s11223_s1 + $0x1548] ss:$16 sps:$4 sm:$0xff]  }
 0x2c8   :  { %5891 = vmatpush1.bf16.msra.mxu1 %v8312_v8  ;;  %5875 = vmatprep.subr.bf16.mxu0 %v8317_v10  ;;  %v8383_v1 = vld [vmem:[%s11223_s1 + $0x154c] ss:$16 sps:$4 sm:$0xff]   ;;  %v8384_v8 = vld [vmem:[%s11223_s1 + $0x17c8] ss:$16 sps:$4 sm:$0xff]  }
 0x2c9   :  { %v5599_v18 = vpop.f32.mrf.mxu1  ;;  %5892 = vmatprep.subr.bf16.mxu1 %v8320_v12  ;;  %v8389_v39 = vld [vmem:[%s11223_s1 + $0x152c] ss:$16 sps:$4 sm:$0xff]   ;;  %v8387_v12 = vld [vmem:[%s11223_s1 + $0x1528] ss:$16 sps:$4 sm:$0xff]  }
 0x2ca   :  { %v8392_v10 = vld [vmem:[%s11223_s1 + $0x17ac] ss:$16 sps:$4 sm:$0xff]   ;;  %v8396_v18 = vld [vmem:[%s11223_s1 + $0x1788] ss:$16 sps:$4 sm:$0xff]  }
 0x2cb   :  { %5876 = vmatpush2.bf16.msra.mxu0 %v8315_v16  ;;  %v8395_v49 = vld [vmem:[%s11223_s1 + $0x150c] ss:$16 sps:$4 sm:$0xff]  }
 0x2cc   :  { %5893 = vmatpush1.bf16.msra.mxu1 %v8318_v19  ;;  %5877 = vmatprep.subr.bf16.mxu0 %v8323_v11  ;;  %v8398_v16 = vld [vmem:[%s11223_s1 + $0x178c] ss:$16 sps:$4 sm:$0xff]   ;;  %v8393_v19 = vld [vmem:[%s11223_s1 + $0x1508] ss:$16 sps:$4 sm:$0xff]  }
 0x2cd   :  { %5894 = vmatprep.subr.bf16.mxu1 %v8326_v24  ;;  %v8401_v11 = vld [vmem:[%s11223_s1 + $0x176c] ss:$16 sps:$4 sm:$0xff]  }
 0x2ce   :  { %v8404_v24 = vld [vmem:[%s11223_s1 + $0x186c] ss:$16 sps:$4 sm:$0xff]  }
 0x2cf   :  { %5878 = vmatpush2.bf16.msra.mxu0 %v8321_v4  ;;  %v8399_v4 = vld [vmem:[%s11223_s1 + $0x1768] ss:$16 sps:$4 sm:$0xff]  }
 0x2d0   :  { %5895 = vmatpush1.bf16.msra.mxu1 %v8324_v31  ;;  %5929 = vmatprep.subr.bf16.mxu0 %v8332_v38  ;;  %v8402_v31 = vld [vmem:[%s11223_s1 + $0x1868] ss:$16 sps:$4 sm:$0xff]   ;;  %v8410_v38 = vld [vmem:[%s11223_s1 + $0x184c] ss:$16 sps:$4 sm:$0xff]  }
 0x2d1   :  { %5896 = vmatprep.subr.bf16.mxu1 %v8329_v54  ;;  %v8407_v54 = vld [vmem:[%s11223_s1 + $0x174c] ss:$16 sps:$4 sm:$0xff]  }
 0x2d2   :  { %v5635_v0 = vpop.f32.mrf.mxu0  ;;  %5880 = vmatmul.mubr.bf16.vlgmr.msra.gmra.mxu0 %v9635_v25  ;;  %v8344_v25 = vld [vmem:[%s11223_s1 + $0x16ac] ss:$16 sps:$4 sm:$0xff]  }
 0x2d3   :  { %v10932_v28 = vadd.f32 %v5635_v0, %v5595_v30  ;;  %5930 = vmatpush1.bf16.msra.mxu0 %v8330_v20  ;;  %5961 = vmatprep.mubr.bf16.mxu0 %v9651_v33  ;;  %v8350_v33 = vld [vmem:[%s11223_s1 + $0x168c] ss:$16 sps:$4 sm:$0xff]  }
 0x2d4   :  { %5897 = vmatpush1.bf16.msra.mxu1 %v8327_v5  ;;  %v5637_v45 = vpop.f32.mrf.mxu0  ;;  %5931 = vmatprep.subr.bf16.mxu0 %v8338_v21  ;;  %v8386_v30 = vld [vmem:[%s11223_s1 + $0x17cc] ss:$16 sps:$4 sm:$0xff]   ;;  %v8408_v21 = vld [vmem:[%s11223_s1 + $0x1848] ss:$16 sps:$4 sm:$0xff]  }
 0x2d5   :  { %5898 = vmatprep.subr.bf16.mxu1 %v8335_v23  ;;  %v10946_v37 = vadd.f32 %v5637_v45, %v5597_v50  ;;  %v8390_v50 = vld [vmem:[%s11223_s1 + $0x17a8] ss:$16 sps:$4 sm:$0xff]  }
 0x2d6   :  { %v5639_v32 = vpop.f32.mrf.mxu0  ;;  %v8405_v23 = vld [vmem:[%s11223_s1 + $0x1748] ss:$16 sps:$4 sm:$0xff]  }
 0x2d7   :  { %5932 = vmatpush1.bf16.msra.mxu0 %v8336_v26  ;;  %v8411_v45 = vld [vmem:[%s11223_s1 + $0x1728] ss:$16 sps:$4 sm:$0xff]  }
 0x2d8   :  { %5899 = vmatpush1.bf16.msra.mxu1 %v8333_v29  ;;  %v5640_v47 = vpop.f32.mrf.mxu0  ;;  %5933 = vmatprep.subr.bf16.mxu0 %v8344_v25  ;;  %v8413_v29 = vld [vmem:[%s11223_s1 + $0x172c] ss:$16 sps:$4 sm:$0xff]   ;;  %v8417_v32 = vld [vmem:[%s11223_s1 + $0x1708] ss:$16 sps:$4 sm:$0xff]  }
 0x2d9   :  { %5900 = vmatprep.subr.bf16.mxu1 %v8341_v36  ;;  %v8414_v36 = vld [vmem:[%s11223_s1 + $0x1828] ss:$16 sps:$4 sm:$0xff]   ;;  %v6012_v47 = vmax.f32 %v10539_v44, 0.0  ;;  %v8426_v44 = vld [vmem:[%s11225_s3 + $0x30] sm:$0xff]  }
 0x2db   :  { %5934 = vmatpush1.bf16.msra.mxu0 %v8342_v35  ;;  %v8423_v35 = vld [vmem:[%s11225_s3 + $0x78] sm:$0xff]  }
 0x2dc   :  { %5901 = vmatpush1.bf16.msra.mxu1 %v8339_v40  ;;  %5935 = vmatprep.subr.bf16.mxu0 %v8350_v33  ;;  %v8420_v40 = vld [vmem:[%s11223_s1 + $0x1808] ss:$16 sps:$4 sm:$0xff]   ;;  %v8425_v33 = vld [vmem:[%s11225_s3 + $0x70] sm:$0xff]  }
 0x2dd   :  { %5902 = vmatprep.subr.bf16.mxu1 %v8347_v41  ;;  %v8424_v41 = vld [vmem:[%s11225_s3 + $0x38] sm:$0xff]  }
 0x2df   :  { %5936 = vmatpush1.bf16.msra.mxu0 %v8348_v53 }
 0x2e0   :  { %5903 = vmatpush1.bf16.msra.mxu1 %v8345_v15  ;;  %5937 = vmatprep.subr.bf16.mxu0 %v8356_v13  ;;  %v6016_v15 = vpack.c.bf16 %v6012_v47, %v6012_v47 }
 0x2e1   :  { %5904 = vmatprep.subr.bf16.mxu1 %v8353_v48 }
 0x2e3   :  { %5938 = vmatpush1.bf16.msra.mxu0 %v8354_v46 }
 0x2e4   :  { %5905 = vmatpush2.bf16.msra.mxu1 %v8351_v59  ;;  %5939 = vmatprep.subr.bf16.mxu0 %v8362_v51  ;;  %v8427_v59 = vld [vmem:[%s11225_s3 + $0x68] sm:$0xff]   ;;  %v8429_v51 = vld [vmem:[%s11225_s3 + $0x60] sm:$0xff]  }
 0x2e5   :  { %5906 = vmatprep.subr.bf16.mxu1 %v8359_v22 }
 0x2e7   :  { %5940 = vmatpush1.bf16.msra.mxu0 %v8360_v55  ;;  %v8440_v55 = vld [vmem:[%s11225_s3 + $0xb8] sm:$0xff]  }
 0x2e8   :  { %5907 = vmatpush2.bf16.msra.mxu1 %v8357_v56  ;;  %5941 = vmatprep.subr.bf16.mxu0 %v8368_v61  ;;  %v8439_v56 = vld [vmem:[%s11225_s3 + $0xf8] sm:$0xff]  }
 0x2e9   :  { %5908 = vmatprep.subr.bf16.mxu1 %v8365_v58  ;;  %v8430_v58 = vld [vmem:[%s11225_s3 + $0x20] sm:$0xff]   ;;  %v8431_v61 = vld [vmem:[%s11225_s3 + $0x58] sm:$0xff]  }
 0x2eb   :  { %5942 = vmatpush1.bf16.msra.mxu0 %v8366_v57  ;;  %v8433_v57 = vld [vmem:[%s11225_s3 + $0x50] sm:$0xff]  }
 0x2ec   :  { %5909 = vmatpush2.bf16.msra.mxu1 %v8363_v42  ;;  %5943 = vmatprep.subr.bf16.mxu0 %v8374_v17  ;;  %v8432_v42 = vld [vmem:[%s11225_s3 + $0x18] sm:$0xff]   ;;  %v8435_v17 = vld [vmem:[%s11225_s3 + $0x48] sm:$0xff]  }
 0x2ed   :  { %5910 = vmatprep.subr.bf16.mxu1 %v8371_v62  ;;  %v8434_v62 = vld [vmem:[%s11225_s3 + $0x10] sm:$0xff]  }
 0x2ef   :  { %5944 = vmatpush1.bf16.msra.mxu0 %v8372_v60  ;;  %v8437_v60 = vld [vmem:[%s11225_s3 + $0x40] sm:$0xff]  }
 0x2f0   :  { %5911 = vmatpush2.bf16.msra.mxu1 %v8369_v6  ;;  %5945 = vmatprep.subr.bf16.mxu0 %v8380_v2  ;;  %v8436_v6 = vld [vmem:[%s11225_s3 + $0x8] sm:$0xff]   ;;  %v6011_v2 = vmax.f32 %v10525_v34, 0.0 }
 0x2f1   :  { %5912 = vmatprep.subr.bf16.mxu1 %v8377_v63  ;;  %v8438_v63 = vld [vmem:[%s11225_s3] sm:$0xff]   ;;  %v8443_v34 = vld [vmem:[%s11225_s3 + $0xe8] sm:$0xff]  }
 0x2f3   :  { %5946 = vmatpush2.bf16.msra.mxu0 %v8378_v3  ;;  %v8441_v3 = vld [vmem:[%s11225_s3 + $0xf0] sm:$0xff]  }
 0x2f4   :  { %5913 = vmatpush2.bf16.msra.mxu1 %v8375_v43  ;;  %5947 = vmatprep.subr.bf16.mxu0 %v8386_v30  ;;  %v6015_v43 = vpack.c.bf16 %v6011_v2, %v6011_v2 }
 0x2f5   :  { %5914 = vmatprep.subr.bf16.mxu1 %v8383_v1  ;;  %v8442_v1 = vld [vmem:[%s11225_s3 + $0xb0] sm:$0xff]  }
 0x2f7   :  { %5948 = vmatpush2.bf16.msra.mxu0 %v8384_v8 }
 0x2f8   :  { %5915 = vmatpush2.bf16.msra.mxu1 %v8381_v7  ;;  %5949 = vmatprep.subr.bf16.mxu0 %v8392_v10  ;;  %v8444_v10 = vld [vmem:[%s11225_s3 + $0xa8] sm:$0xff]  }
 0x2f9   :  { %5916 = vmatprep.subr.bf16.mxu1 %v8389_v39 }
 0x2fb   :  { %5950 = vmatpush2.bf16.msra.mxu0 %v8390_v50 }
 0x2fc   :  { %5917 = vmatpush2.bf16.msra.mxu1 %v8387_v12  ;;  %5951 = vmatprep.subr.bf16.mxu0 %v8398_v16  ;;  %v8446_v16 = vld [vmem:[%s11225_s3 + $0xa0] sm:$0xff]  }
 0x2fd   :  { %5918 = vmatprep.subr.bf16.mxu1 %v8395_v49  ;;  %v8445_v49 = vld [vmem:[%s11225_s3 + $0xe0] sm:$0xff]  }
 0x2ff   :  { %5952 = vmatpush2.bf16.msra.mxu0 %v8396_v18  ;;  %v8448_v18 = vld [vmem:[%s11225_s3 + $0x98] sm:$0xff]  }
 0x300   :  { %5919 = vmatpush2.bf16.msra.mxu1 %v8393_v19  ;;  %5953 = vmatprep.subr.bf16.mxu0 %v8401_v11  ;;  %v8447_v19 = vld [vmem:[%s11225_s3 + $0xd8] sm:$0xff]   ;;  %v8449_v11 = vld [vmem:[%s11225_s3 + $0xd0] sm:$0xff]  }
 0x301   :  { %5978 = vmatprep.subr.bf16.mxu1 %v8404_v24  ;;  %v8450_v24 = vld [vmem:[%s11225_s3 + $0x90] sm:$0xff]  }
 0x303   :  { %v5676_v5 = vpop.f32.mrf.mxu1  ;;  %5921 = vmatmul.mubr.bf16.vlgmr.msra.gmra.mxu1 %v9827_v14  ;;  %5954 = vmatpush2.bf16.msra.mxu0 %v8399_v4  ;;  %v8416_v14 = vld [vmem:[%s11223_s1 + $0x182c] ss:$16 sps:$4 sm:$0xff]  }
 0x304   :  { %v5677_v20 = vadd.f32 %v5676_v5, %v10932_v28  ;;  %5979 = vmatpush1.bf16.msra.mxu1 %v8402_v31  ;;  %5955 = vmatprep.subr.bf16.mxu0 %v8407_v54 }
 0x305   :  { %v5678_v0 = vpop.f32.mrf.mxu1  ;;  %5980 = vmatprep.subr.bf16.mxu1 %v8410_v38  ;;  %6002 = vmatprep.mubr.bf16.mxu1 %v8479_v52  ;;  %v8422_v52 = vld [vmem:[%s11223_s1 + $0x180c] ss:$16 sps:$4 sm:$0xff]  }
 0x306   :  { %v5679_v28 = vadd.f32 %v5678_v0, %v10946_v37  ;;  %v8419_v37 = vld [vmem:[%s11223_s1 + $0x170c] ss:$16 sps:$4 sm:$0xff]   ;;  %v8453_v0 = vld [vmem:[%s11225_s3 + $0xc0] sm:$0xff]  }
 0x307   :  { %v5680_v26 = vpop.f32.mrf.mxu1  ;;  %5956 = vmatpush2.bf16.msra.mxu0 %v8405_v23  ;;  %v8451_v38 = vld [vmem:[%s11225_s3 + $0xc8] sm:$0xff]  }
 0x308   :  { %5981 = vmatpush1.bf16.msra.mxu1 %v8408_v21  ;;  %5957 = vmatprep.subr.bf16.mxu0 %v8413_v29  ;;  %v8454_v29 = vld [vmem:[%s11225_s3 + $0x80] sm:$0xff]  }
 0x309   :  { %v5681_v25 = vpop.f32.mrf.mxu1  ;;  %5982 = vmatprep.subr.bf16.mxu1 %v8416_v14 }
 0x30b   :  { %5958 = vmatpush2.bf16.msra.mxu0 %v8411_v45 }
 0x30c   :  { %5983 = vmatpush1.bf16.msra.mxu1 %v8414_v36  ;;  %5959 = vmatprep.subr.bf16.mxu0 %v8419_v37 }
 0x30d   :  { %5984 = vmatprep.subr.bf16.mxu1 %v8422_v52 }
 0x30f   :  { %5960 = vmatpush2.bf16.msra.mxu0 %v8417_v32 }
 0x310   :  { %5985 = vmatpush1.bf16.msra.mxu1 %v8420_v40  ;;  %7197 = vmatprep.subr.bf16.mxu0 %v8423_v35 }
 0x311   :  { %7219 = vmatprep.subr.bf16.mxu1 %v8439_v56 }
 0x312   :  { %v5717_v53 = vpop.f32.mrf.mxu0  ;;  %5962 = vmatmul.mubr.bf16.vlgmr.msra.gmra.mxu0 %v9849_v27  ;;  %v8428_v27 = vld [vmem:[%s11225_s3 + $0x28] sm:$0xff]  }
 0x313   :  { %7163 = vmatmul.mubr.msk.bf16.vlgmr.msra.gmra.mxu1 %vm4941_vm0, %v9913_v9  ;;  %v5718_v48 = vadd.f32 %v5717_v53, %v5677_v20  ;;  %7198 = vmatpush3.bf16.msra.mxu0 %v8424_v41  ;;  %v8452_v20 = vld [vmem:[%s11225_s3 + $0x88] sm:$0xff]  }
 0x314   :  { %6314 = vmatprep.mubr.bf16.mxu0 %v6016_v15  ;;  %v5719_v13 = vpop.f32.mrf.mxu0  ;;  %7199 = vmatprep.subr.bf16.mxu0 %v8425_v33 }
 0x315   :  { %v5720_v46 = vadd.f32 %v5719_v13, %v5679_v28  ;;  %7220 = vmatpush3.bf16.msra.mxu1 %v8440_v55 }
 0x316   :  { %v5721_v22 = vpop.f32.mrf.mxu0  ;;  %7221 = vmatprep.subr.bf16.mxu1 %v8441_v3 }
 0x317   :  { %7200 = vmatpush3.bf16.msra.mxu0 %v8426_v44 }
 0x318   :  { %v5722_v9 = vpop.f32.mrf.mxu0  ;;  %7201 = vmatprep.subr.bf16.mxu0 %v8427_v59 }
 0x319   :  { %7222 = vmatpush3.bf16.msra.mxu1 %v8442_v1  ;;  %v7164_v1 = vld [vmem:[%s11226_s4] ss:$0 sm:$0xff] }
 0x31a   :  { %7223 = vmatprep.subr.bf16.mxu1 %v8443_v34 }
 0x31b   :  { %7202 = vmatpush3.bf16.msra.mxu0 %v8428_v27 }
 0x31c   :  { %7203 = vmatprep.subr.bf16.mxu0 %v8429_v51 }
 0x31d   :  { %7224 = vmatpush3.bf16.msra.mxu1 %v8444_v10 }
 0x31e   :  { %7225 = vmatprep.subr.bf16.mxu1 %v8445_v49 }
 0x31f   :  { %7204 = vmatpush3.bf16.msra.mxu0 %v8430_v58 }
 0x320   :  { %7205 = vmatprep.subr.bf16.mxu0 %v8431_v61 }
 0x321   :  { %7226 = vmatpush3.bf16.msra.mxu1 %v8446_v16 }
 0x322   :  { %7227 = vmatprep.subr.bf16.mxu1 %v8447_v19 }
 0x323   :  { %7206 = vmatpush3.bf16.msra.mxu0 %v8432_v42 }
 0x324   :  { %7207 = vmatprep.subr.bf16.mxu0 %v8433_v57 }
 0x325   :  { %7228 = vmatpush3.bf16.msra.mxu1 %v8448_v18 }
 0x326   :  { %7229 = vmatprep.subr.bf16.mxu1 %v8449_v11 }
 0x327   :  { %7208 = vmatpush3.bf16.msra.mxu0 %v8434_v62 }
 0x328   :  { %7209 = vmatprep.subr.bf16.mxu0 %v8435_v17 }
 0x329   :  { %7230 = vmatpush3.bf16.msra.mxu1 %v8450_v24 }
 0x32a   :  { %7231 = vmatprep.subr.bf16.mxu1 %v8451_v38 }
 0x32b   :  { %7210 = vmatpush3.bf16.msra.mxu0 %v8436_v6 }
 0x32c   :  { %7211 = vmatprep.subr.bf16.mxu0 %v8437_v60 }
 0x32d   :  { %7232 = vmatpush3.bf16.msra.mxu1 %v8452_v20 }
 0x32e   :  { %7233 = vmatprep.subr.bf16.mxu1 %v8453_v0 }
 0x32f   :  { %7212 = vmatpush3.bf16.msra.mxu0 %v8438_v63 }
 0x331   :  { %7234 = vmatpush3.bf16.msra.mxu1 %v8454_v29 }
 0x332   :  { %6315 = vmatmul.mubr.bf16.vlgmr.msra.gmra.mxu0 %v6015_v43 }
 0x343   :  { %v5758_v30 = vpop.f32.mrf.mxu1 }
 0x344   :  { %v5759_v7 = vadd.f32 %v5758_v30, %v5718_v48 }
 0x345   :  { %v5760_v8 = vpop.f32.mrf.mxu1 }
 0x346   :  { %v5761_v39 = vadd.f32 %v5760_v8, %v5720_v46 }
 0x347   :  { %v5762_v12 = vpop.f32.mrf.mxu1 }
 0x349   :  { %v5763_v50 = vpop.f32.mrf.mxu1 }
 0x352   :  { %v5799_v4 = vpop.f32.mrf.mxu0 }
 0x353   :  { %v5800_v31 = vadd.f32 %v5799_v4, %v5759_v7 }
 0x354   :  { %v5801_v54 = vpop.f32.mrf.mxu0 }
 0x355   :  { %v5802_v5 = vadd.f32 %v5801_v54, %v5761_v39 }
 0x356   :  { %v5803_v23 = vpop.f32.mrf.mxu0 }
 0x358   :  { %v5804_v21 = vpop.f32.mrf.mxu0 }
 0x383   :  { %v5840_v14 = vpop.f32.mrf.mxu1 }
 0x384   :  { %v5841_v28 = vadd.f32 %v5840_v14, %v5800_v31 }
 0x385   :  { %v5842_v26 = vpop.f32.mrf.mxu1 }
 0x386   :  { %v5843_v45 = vadd.f32 %v5842_v26, %v5802_v5 }
 0x387   :  { %v5844_v36 = vpop.f32.mrf.mxu1 }
 0x389   :  { %v5845_v25 = vpop.f32.mrf.mxu1 }
 0x392   :  { %v5881_v37 = vpop.f32.mrf.mxu0 }
 0x393   :  { %v5882_v15 = vadd.f32 %v5881_v37, %v5841_v28 }
 0x394   :  { %v5883_v52 = vpop.f32.mrf.mxu0 }
 0x395   :  { %v5884_v53 = vadd.f32 %v5883_v52, %v5843_v45 }
 0x396   :  { %v5885_v32 = vpop.f32.mrf.mxu0 }
 0x398   :  { %v5886_v40 = vpop.f32.mrf.mxu0 }
 0x3c3   :  { %v5922_v35 = vpop.f32.mrf.mxu1 }
 0x3c4   :  { %v5923_v48 = vadd.f32 %v5922_v35, %v5882_v15 }
 0x3c5   :  { %v5924_v47 = vpop.f32.mrf.mxu1 }
 0x3c6   :  { %v5925_v59 = vadd.f32 %v5924_v47, %v5884_v53 }
 0x3c7   :  { %v5926_v41 = vpop.f32.mrf.mxu1 }
 0x3c9   :  { %v5927_v33 = vpop.f32.mrf.mxu1 }
 0x3d2   :  { %v5963_v44 = vpop.f32.mrf.mxu0 }
 0x3d3   :  { %v6004_v13 = vpop.f32.mrf.mxu1  ;;  %v5964_v46 = vadd.f32 %v5963_v44, %v5923_v48 }
 0x3d4   :  { %v5965_v22 = vpop.f32.mrf.mxu0 }
 0x3d5   :  { %v6006_v27 = vpop.f32.mrf.mxu1  ;;  %v6005_v9 = vadd.f32 %v6004_v13, %v5964_v46  ;;  %v5966_v51 = vadd.f32 %v5965_v22, %v5925_v59 }
 0x3d6   :  { %v5967_v56 = vpop.f32.mrf.mxu0 }
 0x3d7   :  { %v6008_v55 = vpop.f32.mrf.mxu1  ;;  %v6007_v58 = vadd.f32 %v6006_v27, %v5966_v51  ;;  %v6013_v61 = vmax.f32 %v6005_v9, 0.0 }
 0x3d8   :  { %v5968_v42 = vpop.f32.mrf.mxu0 }
 0x3d9   :  { %v6009_v57 = vpop.f32.mrf.mxu1  ;;  %v6014_v62 = vmax.f32 %v6007_v58, 0.0  ;;  %v6017_v6 = vpack.c.bf16 %v6013_v61, %v6013_v61 }
 0x3db   :  { %v6018_v17 = vpack.c.bf16 %v6014_v62, %v6014_v62 }
 0x3dd   :  { %6354 = vmatprep.mubr.bf16.mxu1 %v6018_v17 }
 0x3de   :  { %6355 = vmatmul.mubr.bf16.vlgmr.msra.gmra.mxu1 %v6017_v6 }
 0x3f2   :  { %v7213_v60 = vpop.f32.mrf.mxu0 }
 0x3f4   :  { %v7214_v63 = vpop.f32.mrf.mxu0 }
 0x3f5   :  { %v7215_v2 = vadd.f32 %v7214_v63, %v7213_v60 }
 0x3f6   :  { %v7216_v43 = vpop.f32.mrf.mxu0 }
 0x3f7   :  { %v6317_v8 = vadd.f32 %v7215_v2, %v7164_v1 }
 0x3f8   :  { %v7217_v3 = vpop.f32.mrf.mxu0 }
 0x49e   :  { %v7235_v30 = vpop.f32.mrf.mxu1 }
 0x4a0   :  { %v7236_v7 = vpop.f32.mrf.mxu1 }
 0x4a1   :  { %v7237_v34 = vadd.f32 %v7236_v7, %v7235_v30 }
 0x4a2   :  { %v7238_v39 = vpop.f32.mrf.mxu1 }
 0x4a3   :  { %v6357_v10 = vadd.f32 %v7237_v34, %v6317_v8 }
 0x4a4   :  { %v7239_v12 = vpop.f32.mrf.mxu1 }
 0x4a5   :  { %6362 = vst [vmem:[#allocation2] sm:$0x3] %v6357_v10 }
 0x4a6   :  { %8467 = shalt.err (!%p8464_p4)
}
 0x4a7   :  { %6372 = dma.vmem_to_hbm [thread:$0]  %s6370_s17, 32, %s11227_s5, [#allocation3]  }
 0x4a8   :  { %8476 = dma.done.wait [#allocation3], 32  }
 0x4a9   :  { %8477 = vsyncadd [#allocation3], 4294967264 }
 0x4aa   :  { %6376 = vsyncpa [#allocation3], 1 }

// kernel: qnetwork_forward.2
= control target key start
LH: loop header
LB: loop body
LE: loop exit
PB: predicated region body
PF: predicated region fallthrough
CT: control target
= control target key end

     0   :  { %v14900_v24 = vmov 1966171168   ;;  %v566_v26 = vlaneseq  ;;  %s14901_s22 = smov 64   ;;  %vm10896_vm0 = vcmask 523264   ;;  %vm14903_vm1 = vmmov 0   ;;  %s19495_s1 = inlined_call_operand.vmem [shape: bf16[1024,128], index: 1, kind: input, shape index: {}]   ;;  %s19496_s0 = inlined_call_operand.vmem [shape: bf16[2,11,11,256], index: 0, kind: input, shape index: {}]   ;;  %s19497_s3 = inlined_call_operand.vmem [shape: bf16[512,64], index: 3, kind: input, shape index: {}]   ;;  %s19498_s2 = inlined_call_operand.vmem [shape: f32[1,128], index: 2, kind: input, shape index: {}]   ;;  %s19499_s4 = inlined_call_operand.vmem [shape: f32[1,64], index: 4, kind: input, shape index: {}]   ;;  %s19500_s5 = inlined_call_operand.vmem [shape: bf16[576,64], index: 5, kind: input, shape index: {}]   ;;  %s19501_s6 = inlined_call_operand.vmem [shape: f32[1,64], index: 6, kind: input, shape index: {}]   ;;  %s19502_s7 = inlined_call_operand.vmem [shape: bf16[98,64], index: 7, kind: output, shape index: {}]  }
   0x1   :  { %v14721_v0 = vld [vmem:[%s19495_s1 + $0x78] sm:$0xff]   ;;  %v14725_v4 = vld [vmem:[%s19495_s1 + $0x70] sm:$0xff]   ;;  %v14729_v8 = vld [vmem:[%s19495_s1 + $0x68] sm:$0xff]   ;;  %v564_v25 = vunpack.c.l.s4 %v14900_v24  ;;  %vm13455_vm2 = vcmask 519168   ;;  %vm13468_vm3 = vcmask 516096  }
   0x2   :  { %v14722_v1 = vld [vmem:[%s19495_s1 + $0xf8] sm:$0xff]   ;;  %14006 = vmatprep.subr.bf16.mxu0 %v14721_v0  ;;  %v14726_v5 = vld [vmem:[%s19495_s1 + $0xf0] sm:$0xff]   ;;  %v14730_v9 = vld [vmem:[%s19495_s1 + $0xe8] sm:$0xff]   ;;  %v567_v32 = vshrl.u32 %v566_v26, 7 }
   0x3   :  { %v14723_v2 = vld [vmem:[%s19495_s1 + $0x38] sm:$0xff]   ;;  %14100 = vmatprep.subr.bf16.mxu1 %v14722_v1  ;;  %v14727_v6 = vld [vmem:[%s19495_s1 + $0x30] sm:$0xff]   ;;  %v14731_v10 = vld [vmem:[%s19495_s1 + $0x28] sm:$0xff]   ;;  %v565_v31 = vunpack.c.0.s8 %v564_v25 }
   0x4   :  { %v14724_v3 = vld [vmem:[%s19495_s1 + $0xb8] sm:$0xff]   ;;  %14007 = vmatpush3.bf16.msra.mxu0 %v14723_v2  ;;  %v14728_v7 = vld [vmem:[%s19495_s1 + $0xb0] sm:$0xff]   ;;  %v14732_v11 = vld [vmem:[%s19495_s1 + $0xa8] sm:$0xff]  }
   0x5   :  { %14101 = vmatpush3.bf16.msra.mxu1 %v14724_v3  ;;  %14008 = vmatprep.subr.bf16.mxu0 %v14725_v4  ;;  %v14733_v12 = vld [vmem:[%s19495_s1 + $0x60] sm:$0xff]   ;;  %v14737_v16 = vld [vmem:[%s19495_s1 + $0x58] sm:$0xff]   ;;  %v14741_v20 = vld [vmem:[%s19495_s1 + $0x50] sm:$0xff]   ;;  %v15040_v37 = vsub.s32 %v565_v31, %v567_v32 }
   0x6   :  { %14102 = vmatprep.subr.bf16.mxu1 %v14726_v5  ;;  %v14734_v13 = vld [vmem:[%s19495_s1 + $0xe0] sm:$0xff]   ;;  %v14738_v17 = vld [vmem:[%s19495_s1 + $0xd8] sm:$0xff]   ;;  %v14742_v21 = vld [vmem:[%s19495_s1 + $0xd0] sm:$0xff]  }
   0x7   :  { %v14735_v14 = vld [vmem:[%s19495_s1 + $0x20] sm:$0xff]   ;;  %v14739_v18 = vld [vmem:[%s19495_s1 + $0x18] sm:$0xff]   ;;  %v14743_v22 = vld [vmem:[%s19495_s1 + $0x10] sm:$0xff]  }
   0x8   :  { %14009 = vmatpush3.bf16.msra.mxu0 %v14727_v6  ;;  %v14736_v15 = vld [vmem:[%s19495_s1 + $0xa0] sm:$0xff]   ;;  %v14740_v19 = vld [vmem:[%s19495_s1 + $0x98] sm:$0xff]   ;;  %v14744_v23 = vld [vmem:[%s19495_s1 + $0x90] sm:$0xff]  }
   0x9   :  { %14103 = vmatpush3.bf16.msra.mxu1 %v14728_v7  ;;  %14010 = vmatprep.subr.bf16.mxu0 %v14729_v8  ;;  %v14745_v27 = vld [vmem:[%s19495_s1 + $0x48] sm:$0xff]   ;;  %v14749_v33 = vld [vmem:[%s19495_s1 + $0x40] sm:$0xff]   ;;  %v29_v40 = vld [vmem:[%s19496_s0 + $0x10] sm:$0xff] }
   0xa   :  { %14104 = vmatprep.subr.bf16.mxu1 %v14730_v9  ;;  %v14746_v28 = vld [vmem:[%s19495_s1 + $0xc8] sm:$0xff]   ;;  %v14750_v34 = vld [vmem:[%s19495_s1 + $0xc0] sm:$0xff]   ;;  %v15056_v41 = vld [vmem:[%s19496_s0 + $0x18] sm:$0x33]  ;;  %v597_v9 = vrot.slane %v29_v40, %v15040_v37 }
   0xb   :  { %v14747_v29 = vld [vmem:[%s19495_s1 + $0x8] sm:$0xff]   ;;  %v14751_v35 = vld [vmem:[%s19495_s1] sm:$0xff]   ;;  %v13476_v48 = vcombine.low %v29_v40, %v15056_v41  ;;  %v13477_v49 = vcombine.high %v29_v40, %v15056_v41  ;;  %v14759_v52 = vld [vmem:[%s19495_s1 + $0x178] sm:$0xff]  }
   0xc   :  { %14011 = vmatpush3.bf16.msra.mxu0 %v14731_v10  ;;  %v14748_v30 = vld [vmem:[%s19495_s1 + $0x88] sm:$0xff]   ;;  %v14752_v36 = vld [vmem:[%s19495_s1 + $0x80] sm:$0xff]   ;;  %v14761_v1 = vld [vmem:[%s19495_s1 + $0x1f8] sm:$0xff]  }
   0xd   :  { %14105 = vmatpush3.bf16.msra.mxu1 %v14732_v11  ;;  %14012 = vmatprep.subr.bf16.mxu0 %v14733_v12  ;;  %v27_v38 = vld [vmem:[%s19496_s0] sm:$0xff]  ;;  %v15048_v39 = vld [vmem:[%s19496_s0 + $0x8] sm:$0x33]  ;;  %v246_v57 = vshrl.u32 %v13476_v48, 16  ;;  %v248_v58 = vshll.u32 %v13476_v48, 16  ;;  %v253_v59 = vshrl.u32 %v13477_v49, 16 }
   0xe   :  { %14106 = vmatprep.subr.bf16.mxu1 %v14734_v13  ;;  %v31_v42 = vld [vmem:[%s19496_s0 + $0x20] sm:$0xff]  ;;  %v15064_v43 = vld [vmem:[%s19496_s0 + $0x28] sm:$0x33]  ;;  %v13474_v44 = vcombine.low %v27_v38, %v15048_v39  ;;  %v13475_v45 = vcombine.high %v27_v38, %v15048_v39  ;;  %v15069_v46 = vrot.slane %v27_v38, %v15040_v37  ;;  %v576_v47 = vrot.slane %v15048_v39, %v15040_v37 }
   0xf   :  { %v13478_v50 = vcombine.low %v31_v42, %v15064_v43  ;;  %v13479_v51 = vcombine.high %v31_v42, %v15064_v43  ;;  %v255_v60 = vshll.u32 %v13477_v49, 16  ;;  %v250_v2 = vrot.slane %v248_v58, 1 }
  0x10   :  { %14013 = vmatpush3.bf16.msra.mxu0 %v14735_v14  ;;  %v232_v53 = vshrl.u32 %v13474_v44, 16  ;;  %v234_v54 = vshll.u32 %v13474_v44, 16  ;;  %v239_v55 = vshrl.u32 %v13475_v45, 16  ;;  %v241_v56 = vshll.u32 %v13475_v45, 16  ;;  %v33_v14 = vld [vmem:[%s19496_s0 + $0x30] sm:$0xff] }
  0x11   :  { %14107 = vmatpush3.bf16.msra.mxu1 %v14736_v15  ;;  %14014 = vmatprep.subr.bf16.mxu0 %v14737_v16  ;;  %v260_v63 = vshrl.u32 %v13478_v50, 16  ;;  %v262_v0 = vshll.u32 %v13478_v50, 16  ;;  %v257_v3 = vrot.slane %v255_v60, 1  ;;  %v267_v4 = vshrl.u32 %v13479_v51, 16  ;;  %v15091_v15 = vld [vmem:[%s19496_s0 + $0x38] sm:$0x33] }
  0x12   :  { %14108 = vmatprep.subr.bf16.mxu1 %v14738_v17  ;;  %v236_v61 = vrot.slane %v234_v54, 1  ;;  %v243_v62 = vrot.slane %v241_v56, 1  ;;  %v269_v5 = vshll.u32 %v13479_v51, 16  ;;  %v251_v10 = vor.u32 %v250_v2, %v246_v57 }
  0x13   :  { %v264_v8 = vrot.slane %v262_v0, 1  ;;  %v258_v11 = vor.u32 %v257_v3, %v253_v59  ;;  %v682_v13 = vrot.slane %v31_v42, %v15040_v37  ;;  %v689_v58 = vrot.slane %v15064_v43, %v15040_v37 }
  0x14   :  { %14015 = vmatpush3.bf16.msra.mxu0 %v14739_v18  ;;  %v237_v6 = vor.u32 %v236_v61, %v232_v53  ;;  %v244_v7 = vor.u32 %v243_v62, %v239_v55  ;;  %v271_v12 = vrot.slane %v269_v5, 1  ;;  %v604_v53 = vrot.slane %v15056_v41, %v15040_v37  ;;  %v35_v5 = vld [vmem:[%s19496_s0 + $0x40] sm:$0xff] }
  0x15   :  { %14109 = vmatpush3.bf16.msra.mxu1 %v14740_v19  ;;  %14016 = vmatprep.subr.bf16.mxu0 %v14741_v20  ;;  %v265_v16 = vor.u32 %v264_v8, %v260_v63  ;;  %v13480_v19 = vcombine.low %v33_v14, %v15091_v15  ;;  %v743_v8 = vrot.slane %v33_v14, %v15040_v37 }
  0x16   :  { %14110 = vmatprep.subr.bf16.mxu1 %v14742_v21  ;;  %v557_v17 = vcombine.low %v237_v6, %v244_v7  ;;  %v558_v18 = vcombine.high %v237_v6, %v244_v7  ;;  %v272_v20 = vor.u32 %v271_v12, %v267_v4  ;;  %v561_v21 = vcombine.low %v251_v10, %v258_v11 }
  0x17   :  { %v274_v26 = vshrl.u32 %v13480_v19, 16 }
  0x18   :  { %14017 = vmatpush3.bf16.msra.mxu0 %v14743_v22  ;;  %v13481_v22 = vcombine.high %v33_v14, %v15091_v15  ;;  %v583_v24 = vrot.slane %v557_v17, %v15040_v37  ;;  %v590_v25 = vrot.slane %v558_v18, %v15040_v37  ;;  %v675_v57 = vcombine.high %v265_v16, %v272_v20 }
  0x19   :  { %14111 = vmatpush3.bf16.msra.mxu1 %v14744_v23  ;;  %14018 = vmatprep.subr.bf16.mxu0 %v14745_v27  ;;  %v562_v23 = vcombine.high %v251_v10, %v258_v11  ;;  %v276_v27 = vshll.u32 %v13480_v19, 16  ;;  %v15146_v10 = vld [vmem:[%s19496_s0 + $0x48] sm:$0x33] }
  0x1a   :  { %14112 = vmatprep.subr.bf16.mxu1 %v14746_v28  ;;  %v611_v28 = vrot.slane %v561_v21, %v15040_v37  ;;  %v283_v31 = vshll.u32 %v13481_v22, 16  ;;  %v619_v32 = vcombine.low %v15069_v46, %v583_v24  ;;  %v703_v0 = vrot.slane %v675_v57, %v15040_v37 }
  0x1b   :  { %v618_v54 = vrot.slane %v562_v23, %v15040_v37  ;;  %v13482_v23 = vcombine.low %v35_v5, %v15146_v10 }
  0x1c   :  { %14019 = vmatpush3.bf16.msra.mxu0 %v14747_v29  ;;  %v674_v29 = vcombine.low %v265_v16, %v272_v20  ;;  %v623_v38 = vcombine.high %v597_v9, %v611_v28  ;;  %v285_v40 = vrot.slane %v283_v31, 1  ;;  %v631_v42 = vrot.slane %v619_v32, %v15040_v37 }
  0x1d   :  { %14113 = vmatpush3.bf16.msra.mxu1 %v14748_v30  ;;  %14020 = vmatprep.subr.bf16.mxu0 %v14749_v33  ;;  %v281_v30 = vshrl.u32 %v13481_v22, 16  ;;  %v620_v33 = vcombine.high %v15069_v46, %v583_v24  ;;  %v624_v61 = vcombine.low %v604_v53, %v618_v54  ;;  %v706_v7 = vcombine.low %v689_v58, %v703_v0 }
  0x1e   :  { %14114 = vmatprep.subr.bf16.mxu1 %v14750_v34  ;;  %v621_v34 = vcombine.low %v576_v47, %v590_v25  ;;  %v696_v39 = vrot.slane %v674_v29, %v15040_v37  ;;  %v15110_v46 = vrot.slane %v623_v38, %v15040_v37  ;;  %v290_v31 = vshll.u32 %v13482_v23, 16 }
  0x1f   :  { %v645_v45 = vrot.slane %v620_v33, %v15040_v37  ;;  %v15112_v50 = vor.u32 %v285_v40, %v281_v30  ;;  %v15132_v43 = vrot.slane %v624_v61, %v15040_v37  ;;  %v15156_v14 = vrot.slane %v706_v7, %v15040_v37  ;;  %v15198_v61 = vld [vmem:[%s19496_s0 + $0x58] sm:$0x33]  ;;  %v15214_v7 = vld [vmem:[%s19496_s0 + $0x60] sm:$0xff] }
  0x20   :  { %14021 = vmatpush3.bf16.msra.mxu0 %v14751_v35  ;;  %v278_v35 = vrot.slane %v276_v27, 1  ;;  %v638_v44 = vrot.slane %v621_v34, %v15040_v37  ;;  %v704_v47 = vcombine.low %v682_v13, %v696_v39  ;;  %v705_v62 = vcombine.high %v682_v13, %v696_v39  ;;  %v14760_v34 = vld [vmem:[%s19495_s1 + $0x138] sm:$0xff]  }
  0x21   :  { %14115 = vmatpush3.bf16.msra.mxu1 %v14752_v36  ;;  %14194 = vmatprep.subr.bf16.mxu0 %v14759_v52  ;;  %v622_v36 = vcombine.low %v597_v9, %v611_v28  ;;  %v13519_v51 = vcombine.low %v631_v42, %v645_v45  ;;  %v13521_v52 = vcombine.high %v631_v42, %v645_v45  ;;  %v288_v30 = vshrl.u32 %v13482_v23, 16  ;;  %v14765_v42 = vld [vmem:[%s19495_s1 + $0x170] sm:$0xff]  }
  0x22   :  { %14288 = vmatprep.subr.bf16.mxu1 %v14761_v1  ;;  %v15104_v48 = vor.u32 %v278_v35, %v274_v26  ;;  %v15118_v55 = vrot.slane %v704_v47, %v15040_v37  ;;  %v15135_v4 = vrot.slane %v705_v62, %v15040_v37  ;;  %v13483_v27 = vcombine.high %v35_v5, %v15146_v10  ;;  %v14762_v35 = vld [vmem:[%s19495_s1 + $0x1b8] sm:$0xff]   ;;  %v14769_v47 = vld [vmem:[%s19495_s1 + $0x1f0] sm:$0xff]  }
  0x23   :  { %v15107_v49 = vrot.slane %v622_v36, %v15040_v37  ;;  %v2036_v59 = vrot.slane %v13519_v51, %v15040_v37  ;;  %v2050_v60 = vrot.slane %v13521_v52, %v15040_v37  ;;  %v14766_v62 = vld [vmem:[%s19495_s1 + $0x130] sm:$0xff]   ;;  %v750_v0 = vrot.slane %v15091_v15, %v15040_v37 }
  0x24   :  { %v735_v1 = vcombine.low %v15104_v48, %v15112_v50  ;;  %v732_v13 = vcombine.high %v15110_v46, %v15135_v4  ;;  %v13529_v16 = vcombine.low %v15118_v55, %v15135_v4  ;;  %v13531_v21 = vcombine.high %v15118_v55, %v15135_v4 }
  0x25   :  { %v13523_v56 = vcombine.low %v638_v44, %v15107_v49  ;;  %v729_v41 = vcombine.high %v15107_v49, %v15118_v55  ;;  %v2087_v2 = vcombine.high %v2036_v59, %v2050_v60  ;;  %v2086_v3 = vcombine.low %v2036_v59, %v2050_v60 }
  0x26   :  { %v757_v9 = vrot.slane %v735_v1, %v15040_v37  ;;  %v13527_v20 = vcombine.low %v732_v13, %v15132_v43  ;;  %v2186_v22 = vrot.slane %v13529_v16, %v15040_v37  ;;  %v2200_v29 = vrot.slane %v13531_v21, %v15040_v37  ;;  %v14775_v13 = vld [vmem:[%s19495_s1 + $0x168] sm:$0xff]  }
  0x27   :  { %v2064_v63 = vrot.slane %v13523_v56, %v15040_v37  ;;  %v13525_v6 = vcombine.low %v15110_v46, %v729_v41  ;;  %v2114_v11 = vrot.slane %v2087_v2, %v15040_v37  ;;  %v2100_v12 = vrot.slane %v2086_v3, %v15040_v37  ;;  %v15188_v56 = vld [vmem:[%s19496_s0 + $0x50] sm:$0xff] }
  0x28   :  { %v765_v18 = vcombine.low %v743_v8, %v757_v9  ;;  %v766_v19 = vcombine.high %v743_v8, %v757_v9  ;;  %v2172_v28 = vrot.slane %v13527_v20, %v15040_v37  ;;  %v295_v38 = vshrl.u32 %v13483_v27, 16  ;;  %v14770_v8 = vld [vmem:[%s19495_s1 + $0x1b0] sm:$0xff]   ;;  %v14777_v20 = vld [vmem:[%s19495_s1 + $0x1e8] sm:$0xff]  }
  0x29   :  { %v2078_v17 = vrot.slane %v13525_v6, %v15040_v37  ;;  %v292_v44 = vrot.slane %v290_v31, 1  ;;  %v297_v45 = vshll.u32 %v13483_v27, 16  ;;  %v804_v6 = vrot.slane %v35_v5, %v15040_v37  ;;  %v14778_v31 = vld [vmem:[%s19495_s1 + $0x1a8] sm:$0xff]  }
  0x2a   :  { %v15164_v26 = vrot.slane %v765_v18, %v15040_v37  ;;  %v2223_v39 = vcombine.high %v2172_v28, %v2186_v22  ;;  %v2222_v40 = vcombine.low %v2172_v28, %v2186_v22  ;;  %v15208_v1 = vrot.slane %v766_v19, %v15040_v37 }
  0x2b   :  { %v2091_v24 = vcombine.high %v2064_v63, %v2078_v17  ;;  %v2090_v25 = vcombine.low %v2064_v63, %v2078_v17  ;;  %v15193_v60 = vor.u32 %v292_v44, %v288_v30  ;;  %v299_v41 = vrot.slane %v297_v45, 1  ;;  %v14776_v30 = vld [vmem:[%s19495_s1 + $0x128] sm:$0xff]  }
  0x2c   :  { %v13533_v36 = vcombine.low %v15156_v14, %v15164_v26  ;;  %v2250_v58 = vrot.slane %v2223_v39, %v15040_v37  ;;  %v2236_v59 = vrot.slane %v2222_v40, %v15040_v37  ;;  %v736_v63 = vcombine.high %v15104_v48, %v15112_v50  ;;  %v15219_v48 = vld [vmem:[%s19496_s0 + $0x68] sm:$0x33] }
  0x2d   :  { %v2142_v32 = vrot.slane %v2091_v24, %v15040_v37  ;;  %v2128_v33 = vrot.slane %v2090_v25, %v15040_v37  ;;  %v300_v15 = vor.u32 %v299_v41, %v295_v38  ;;  %v13484_v5 = vcombine.low %v15188_v56, %v15198_v61  ;;  %v14789_v38 = vld [vmem:[%s19495_s1 + $0x1e0] sm:$0xff]  }
  0x2e   :  { %v2214_v57 = vrot.slane %v13533_v36, %v15040_v37  ;;  %v764_v50 = vrot.slane %v736_v63, %v15040_v37  ;;  %v13486_v18 = vcombine.low %v15214_v7, %v15219_v48  ;;  %v13487_v19 = vcombine.high %v15214_v7, %v15219_v48  ;;  %v14787_v36 = vld [vmem:[%s19495_s1 + $0x160] sm:$0xff]  }
  0x2f   :  { %v2154_v51 = vcombine.low %v2114_v11, %v2142_v32  ;;  %v2155_v52 = vcombine.high %v2114_v11, %v2142_v32  ;;  %v2150_v53 = vcombine.low %v2100_v12, %v2128_v33  ;;  %v2151_v54 = vcombine.high %v2100_v12, %v2128_v33 }
  0x30   :  { %v2227_v2 = vcombine.high %v2200_v29, %v2214_v57  ;;  %v2226_v3 = vcombine.low %v2200_v29, %v2214_v57  ;;  %v13485_v12 = vcombine.high %v15188_v56, %v15198_v61  ;;  %v767_v16 = vcombine.low %v750_v0, %v764_v50 }
  0x31   :  { %4242 = vmatprep.mubr.bf16.mxu0 %v2154_v51  ;;  %4378 = vmatprep.mubr.bf16.mxu1 %v2155_v52  ;;  %v796_v17 = vcombine.low %v15193_v60, %v300_v15  ;;  %v302_v28 = vshrl.u32 %v13484_v5, 16  ;;  %v304_v29 = vshll.u32 %v13484_v5, 16  ;;  %v323_v44 = vshrl.u32 %v13487_v19, 16 }
  0x32   :  { %4243 = vmatmul.mubr.bf16.vlgmr.msra.gmra.mxu0 %v2150_v53  ;;  %4379 = vmatmul.mubr.bf16.vlgmr.msra.gmra.mxu1 %v2151_v54  ;;  %v2278_v9 = vrot.slane %v2227_v2, %v15040_v37  ;;  %v2264_v11 = vrot.slane %v2226_v3, %v15040_v37  ;;  %v15243_v25 = vrot.slane %v767_v16, %v15040_v37  ;;  %v309_v32 = vshrl.u32 %v13485_v12, 16  ;;  %v14788_v53 = vld [vmem:[%s19495_s1 + $0x120] sm:$0xff]  }
  0x33   :  { %14195 = vmatpush3.bf16.msra.mxu0 %v14760_v34  ;;  %14289 = vmatpush3.bf16.msra.mxu1 %v14762_v35  ;;  %v818_v27 = vrot.slane %v796_v17, %v15040_v37  ;;  %v311_v33 = vshll.u32 %v13485_v12, 16  ;;  %v316_v34 = vshrl.u32 %v13486_v18, 16  ;;  %v318_v35 = vshll.u32 %v13486_v18, 16 }
  0x34   :  { %14196 = vmatprep.subr.bf16.mxu0 %v14765_v42  ;;  %14290 = vmatprep.subr.bf16.mxu1 %v14769_v47  ;;  %v2290_v21 = vcombine.low %v2250_v58, %v2278_v9  ;;  %v2291_v22 = vcombine.high %v2250_v58, %v2278_v9  ;;  %v2286_v23 = vcombine.low %v2236_v59, %v2264_v11  ;;  %v306_v42 = vrot.slane %v304_v29, 1 }
  0x35   :  { %v2287_v24 = vcombine.high %v2236_v59, %v2264_v11  ;;  %v826_v39 = vcombine.low %v804_v6, %v818_v27  ;;  %v827_v40 = vcombine.high %v804_v6, %v818_v27  ;;  %v313_v45 = vrot.slane %v311_v33, 1  ;;  %v15321_v33 = vld [vmem:[%s19496_s0 + $0x70] sm:$0xff] }
  0x36   :  { %4250 = vmatprep.mubr.bf16.mxu0 %v2290_v21  ;;  %4386 = vmatprep.mubr.bf16.mxu1 %v2291_v22  ;;  %v320_v47 = vrot.slane %v318_v35, 1  ;;  %v325_v51 = vshll.u32 %v13487_v19, 16  ;;  %v797_v52 = vcombine.high %v15193_v60, %v300_v15  ;;  %v307_v58 = vor.u32 %v306_v42, %v302_v28  ;;  %v14795_v60 = vld [vmem:[%s19495_s1 + $0x158] sm:$0xff]   ;;  %v14807_v35 = vld [vmem:[%s19495_s1 + $0x1d0] sm:$0xff]   ;;  %v15336_v42 = vld [vmem:[%s19496_s0 + $0x80] sm:$0xff] }
  0x37   :  { %14197 = vmatpush3.bf16.msra.mxu0 %v14766_v62  ;;  %14291 = vmatpush3.bf16.msra.mxu1 %v14770_v8  ;;  %v15263_v54 = vrot.slane %v826_v39, %v15040_v37  ;;  %v15266_v57 = vrot.slane %v827_v40, %v15040_v37  ;;  %v811_v59 = vrot.slane %v15146_v10, %v15040_v37  ;;  %v14790_v62 = vld [vmem:[%s19495_s1 + $0x1a0] sm:$0xff]   ;;  %v14797_v10 = vld [vmem:[%s19495_s1 + $0x1d8] sm:$0xff]  }
  0x38   :  { %14198 = vmatprep.subr.bf16.mxu0 %v14775_v13  ;;  %14292 = vmatprep.subr.bf16.mxu1 %v14777_v20  ;;  %v314_v41 = vor.u32 %v313_v45, %v309_v32  ;;  %v15276_v63 = vor.u32 %v320_v47, %v316_v34  ;;  %v327_v0 = vrot.slane %v325_v51, 1  ;;  %v825_v2 = vrot.slane %v797_v52, %v15040_v37  ;;  %v14796_v8 = vld [vmem:[%s19495_s1 + $0x118] sm:$0xff]   ;;  %v14806_v45 = vld [vmem:[%s19495_s1 + $0x110] sm:$0xff]  }
  0x39   :  { %v851_v3 = vcombine.high %v15164_v26, %v15263_v54  ;;  %v854_v6 = vcombine.high %v15208_v1, %v15266_v57  ;;  %v13539_v15 = vcombine.low %v15263_v54, %v15266_v57  ;;  %v13541_v50 = vcombine.high %v15263_v54, %v15266_v57  ;;  %v14800_v13 = vld [vmem:[%s19495_s1 + $0x198] sm:$0xff]  }
  0x3a   :  { %4251 = vmatmul.mubr.bf16.gmra.mxu0 %v2286_v23  ;;  %4387 = vmatmul.mubr.bf16.gmra.mxu1 %v2287_v24  ;;  %v15293_v5 = vor.u32 %v327_v0, %v323_v44  ;;  %v828_v9 = vcombine.low %v811_v59, %v825_v2  ;;  %v857_v11 = vcombine.low %v307_v58, %v314_v41  ;;  %v15326_v34 = vld [vmem:[%s19496_s0 + $0x78] sm:$0x33]  ;;  %v15341_v44 = vld [vmem:[%s19496_s0 + $0x88] sm:$0x33] }
  0x3b   :  { %14199 = vmatpush3.bf16.msra.mxu0 %v14776_v30  ;;  %14293 = vmatpush3.bf16.msra.mxu1 %v14778_v31  ;;  %v858_v12 = vcombine.high %v307_v58, %v314_v41  ;;  %v13535_v16 = vcombine.low %v15208_v1, %v851_v3  ;;  %v13537_v17 = vcombine.low %v854_v6, %v15243_v25  ;;  %v14805_v30 = vld [vmem:[%s19495_s1 + $0x150] sm:$0xff]  }
  0x3c   :  { %14200 = vmatprep.subr.bf16.mxu0 %v14787_v36  ;;  %14294 = vmatprep.subr.bf16.mxu1 %v14789_v38  ;;  %v2336_v18 = vrot.slane %v13539_v15, %v15040_v37  ;;  %v2350_v19 = vrot.slane %v13541_v50, %v15040_v37  ;;  %v15303_v20 = vrot.slane %v828_v9, %v15040_v37  ;;  %v14808_v58 = vld [vmem:[%s19495_s1 + $0x190] sm:$0xff]   ;;  %v14819_v9 = vld [vmem:[%s19495_s1 + $0x1c8] sm:$0xff]  }
  0x3d   :  { %v865_v21 = vrot.slane %v15188_v56, %v15040_v37  ;;  %v872_v22 = vrot.slane %v15198_v61, %v15040_v37  ;;  %v879_v23 = vrot.slane %v857_v11, %v15040_v37  ;;  %v2308_v24 = vrot.slane %v13535_v16, %v15040_v37 }
  0x3e   :  { %v2322_v27 = vrot.slane %v13537_v17, %v15040_v37  ;;  %v2363_v28 = vcombine.high %v2336_v18, %v2350_v19  ;;  %v2362_v29 = vcombine.low %v2336_v18, %v2350_v19  ;;  %v886_v31 = vrot.slane %v858_v12, %v15040_v37  ;;  %v14818_v17 = vld [vmem:[%s19495_s1 + $0x108] sm:$0xff]  }
  0x3f   :  { %14201 = vmatpush3.bf16.msra.mxu0 %v14788_v53  ;;  %14295 = vmatpush3.bf16.msra.mxu1 %v14790_v62  ;;  %v887_v56 = vcombine.low %v865_v21, %v879_v23  ;;  %v888_v32 = vcombine.high %v865_v21, %v879_v23  ;;  %v918_v61 = vcombine.low %v15276_v63, %v15293_v5  ;;  %v14820_v18 = vld [vmem:[%s19495_s1 + $0x188] sm:$0xff]  }
  0x40   :  { %14202 = vmatprep.subr.bf16.mxu0 %v14795_v60  ;;  %14296 = vmatprep.subr.bf16.mxu1 %v14797_v10  ;;  %v2359_v36 = vcombine.high %v2308_v24, %v2322_v27  ;;  %v2414_v38 = vrot.slane %v2363_v28, %v15040_v37  ;;  %v2358_v39 = vcombine.low %v2308_v24, %v2322_v27 }
  0x41   :  { %v2400_v40 = vrot.slane %v2362_v29, %v15040_v37  ;;  %v889_v47 = vcombine.low %v872_v22, %v886_v31  ;;  %v15347_v51 = vrot.slane %v887_v56, %v15040_v37  ;;  %v15350_v52 = vrot.slane %v888_v32, %v15040_v37 }
  0x42   :  { %v926_v53 = vrot.slane %v15214_v7, %v15040_v37  ;;  %v2386_v59 = vrot.slane %v2359_v36, %v15040_v37  ;;  %v2372_v62 = vrot.slane %v2358_v39, %v15040_v37  ;;  %v940_v60 = vrot.slane %v918_v61, %v15040_v37 }
  0x43   :  { %14203 = vmatpush3.bf16.msra.mxu0 %v14796_v8  ;;  %14297 = vmatpush3.bf16.msra.mxu1 %v14800_v13  ;;  %v13488_v41 = vcombine.low %v15321_v33, %v15326_v34  ;;  %v15363_v0 = vrot.slane %v889_v47, %v15040_v37  ;;  %v13543_v7 = vcombine.low %v15303_v20, %v15347_v51  ;;  %v14813_v8 = vld [vmem:[%s19495_s1 + $0x148] sm:$0xff]  }
  0x44   :  { %14204 = vmatprep.subr.bf16.mxu0 %v14805_v30  ;;  %v13489_v2 = vcombine.high %v15321_v33, %v15326_v34  ;;  %v13490_v10 = vcombine.low %v15336_v42, %v15341_v44  ;;  %14298 = vmatprep.subr.bf16.mxu1 %v14807_v35  ;;  %v2426_v3 = vcombine.low %v2386_v59, %v2414_v38 }
  0x45   :  { %v2427_v6 = vcombine.high %v2386_v59, %v2414_v38  ;;  %v2422_v15 = vcombine.low %v2372_v62, %v2400_v40  ;;  %v2423_v50 = vcombine.high %v2372_v62, %v2400_v40  ;;  %v948_v11 = vcombine.low %v926_v53, %v940_v60 }
  0x46   :  { %v949_v12 = vcombine.high %v926_v53, %v940_v60  ;;  %v15378_v13 = vrot.slane %v13543_v7, %v15040_v37  ;;  %v13491_v16 = vcombine.high %v15336_v42, %v15341_v44  ;;  %4258 = vmatprep.mubr.bf16.mxu0 %v2426_v3  ;;  %v330_v19 = vshrl.u32 %v13488_v41, 16 }
  0x47   :  { %14205 = vmatpush3.bf16.msra.mxu0 %v14806_v45  ;;  %14299 = vmatpush3.bf16.msra.mxu1 %v14808_v58  ;;  %v332_v21 = vshll.u32 %v13488_v41, 16  ;;  %v337_v22 = vshrl.u32 %v13489_v2, 16  ;;  %v339_v23 = vshll.u32 %v13489_v2, 16  ;;  %v15389_v24 = vrot.slane %v948_v11, %v15040_v37 }
  0x48   :  { %4394 = vmatprep.mubr.bf16.mxu1 %v2427_v6  ;;  %4259 = vmatmul.mubr.bf16.gmra.mxu0 %v2422_v15  ;;  %v15392_v27 = vrot.slane %v949_v12, %v15040_v37  ;;  %v344_v28 = vshrl.u32 %v13490_v10, 16  ;;  %v346_v29 = vshll.u32 %v13490_v10, 16  ;;  %v351_v56 = vshrl.u32 %v13491_v16, 16  ;;  %v14825_v10 = vld [vmem:[%s19495_s1 + $0x1c0] sm:$0xff]  }
  0x49   :  { %4395 = vmatmul.mubr.bf16.gmra.mxu1 %v2423_v50  ;;  %v334_v30 = vrot.slane %v332_v21, 1  ;;  %v341_v31 = vrot.slane %v339_v23, 1  ;;  %v353_v32 = vshll.u32 %v13491_v16, 16  ;;  %14206 = vmatprep.subr.bf16.mxu0 %v14813_v8  ;;  %v973_v61 = vcombine.high %v15347_v51, %v15389_v24  ;;  %v14826_v50 = vld [vmem:[%s19495_s1 + $0x180] sm:$0xff]  }
  0x4a   :  { %14300 = vmatprep.subr.bf16.mxu1 %v14819_v9  ;;  %v976_v35 = vcombine.high %v15350_v52, %v15392_v27  ;;  %v13549_v36 = vcombine.low %v15389_v24, %v15392_v27  ;;  %v348_v38 = vrot.slane %v346_v29, 1  ;;  %v919_v47 = vcombine.high %v15276_v63, %v15293_v5  ;;  %v14823_v63 = vld [vmem:[%s19495_s1 + $0x140] sm:$0xff]  }
  0x4b   :  { %14207 = vmatpush3.bf16.msra.mxu0 %v14818_v17  ;;  %14301 = vmatpush3.bf16.msra.mxu1 %v14820_v18  ;;  %v335_v39 = vor.u32 %v334_v30, %v330_v19  ;;  %v342_v40 = vor.u32 %v341_v31, %v337_v22  ;;  %v355_v45 = vrot.slane %v353_v32, 1  ;;  %v13545_v53 = vcombine.low %v15350_v52, %v973_v61  ;;  %v14824_v5 = vld [vmem:[%s19495_s1 + $0x100] sm:$0xff]  }
  0x4c   :  { %v13547_v58 = vcombine.low %v976_v35, %v15363_v0  ;;  %v2486_v59 = vrot.slane %v13549_v36, %v15040_v37  ;;  %v15405_v62 = vor.u32 %v348_v38, %v344_v28  ;;  %v933_v41 = vrot.slane %v15219_v48, %v15040_v37  ;;  %14208 = vmatprep.subr.bf16.mxu0 %v14823_v63  ;;  %v15457_v35 = vld [vmem:[%s19496_s0 + $0x98] sm:$0x33]  ;;  %v47_v36 = vld [vmem:[%s19496_s0 + $0xa0] sm:$0xff]  ;;  %v48_v38 = vld [vmem:[%s19496_s0 + $0xa8] sm:$0x33] }
  0x4d   :  { %v15407_v60 = vor.u32 %v355_v45, %v351_v56  ;;  %v947_v7 = vrot.slane %v919_v47, %v15040_v37  ;;  %v979_v2 = vcombine.low %v335_v39, %v342_v40  ;;  %v2458_v3 = vrot.slane %v13545_v53, %v15040_v37  ;;  %14302 = vmatprep.subr.bf16.mxu1 %v14825_v10 }
  0x4e   :  { %v2472_v6 = vrot.slane %v13547_v58, %v15040_v37  ;;  %v980_v48 = vcombine.high %v335_v39, %v342_v40  ;;  %v987_v15 = vrot.slane %v15321_v33, %v15040_v37  ;;  %v994_v9 = vrot.slane %v15326_v34, %v15040_v37 }
  0x4f   :  { %v950_v8 = vcombine.low %v933_v41, %v947_v7  ;;  %v1001_v11 = vrot.slane %v979_v2, %v15040_v37  ;;  %v1040_v12 = vcombine.low %v15405_v62, %v15407_v60  ;;  %v2495_v16 = vcombine.high %v15378_v13, %v2458_v3  ;;  %14209 = vmatpush3.bf16.msra.mxu0 %v14824_v5 }
  0x50   :  { %v2499_v17 = vcombine.high %v2472_v6, %v2486_v59  ;;  %v2494_v18 = vcombine.low %v15378_v13, %v2458_v3  ;;  %v2498_v33 = vcombine.low %v2472_v6, %v2486_v59  ;;  %v1008_v21 = vrot.slane %v980_v48, %v15040_v37  ;;  %v45_v13 = vld [vmem:[%s19496_s0 + $0x90] sm:$0xff]  ;;  %14303 = vmatpush3.bf16.msra.mxu1 %v14826_v50 }
  0x51   :  { %v15436_v19 = vrot.slane %v950_v8, %v15040_v37  ;;  %v1009_v22 = vcombine.low %v987_v15, %v1001_v11  ;;  %v1010_v34 = vcombine.high %v987_v15, %v1001_v11  ;;  %v2522_v23 = vrot.slane %v2495_v16, %v15040_v37 }
  0x52   :  { %v2550_v28 = vrot.slane %v2499_v17, %v15040_v37  ;;  %v2508_v29 = vrot.slane %v2494_v18, %v15040_v37  ;;  %v2536_v30 = vrot.slane %v2498_v33, %v15040_v37  ;;  %v1011_v31 = vcombine.low %v994_v9, %v1008_v21 }
  0x53   :  { %v15447_v56 = vrot.slane %v1009_v22, %v15040_v37  ;;  %v15450_v32 = vrot.slane %v1010_v34, %v15040_v37  ;;  %v1048_v61 = vrot.slane %v15336_v42, %v15040_v37  ;;  %v1062_v42 = vrot.slane %v1040_v12, %v15040_v37 }
  0x54   :  { %v2562_v39 = vcombine.low %v2522_v23, %v2550_v28  ;;  %v2563_v40 = vcombine.high %v2522_v23, %v2550_v28  ;;  %v2558_v45 = vcombine.low %v2508_v29, %v2536_v30  ;;  %v2559_v47 = vcombine.high %v2508_v29, %v2536_v30 }
  0x55   :  { %v15466_v53 = vrot.slane %v1011_v31, %v15040_v37  ;;  %v13551_v58 = vcombine.high %v15389_v24, %v15392_v27  ;;  %v13553_v59 = vcombine.low %v15436_v19, %v15447_v56  ;;  %v13492_v41 = vcombine.low %v45_v13, %v15457_v35 }
  0x56   :  { %4266 = vmatprep.mubr.bf16.mxu0 %v2562_v39  ;;  %4402 = vmatprep.mubr.bf16.mxu1 %v2563_v40  ;;  %v13493_v7 = vcombine.high %v45_v13, %v15457_v35  ;;  %v13514_v2 = vcombine.low %v47_v36, %v48_v38  ;;  %v1070_v63 = vcombine.low %v1048_v61, %v1062_v42 }
  0x57   :  { %4267 = vmatmul.mubr.bf16.gmra.mxu0 %v2558_v45  ;;  %4403 = vmatmul.mubr.bf16.gmra.mxu1 %v2559_v47  ;;  %v1071_v5 = vcombine.high %v1048_v61, %v1062_v42  ;;  %v2580_v10 = vrot.slane %v13551_v58, %v15040_v37  ;;  %v2594_v3 = vrot.slane %v13553_v59, %v15040_v37  ;;  %v358_v6 = vshrl.u32 %v13492_v41, 16 }
  0x58   :  { %v360_v48 = vshll.u32 %v13492_v41, 16  ;;  %v365_v15 = vshrl.u32 %v13493_v7, 16  ;;  %v15478_v50 = vrot.slane %v1070_v63, %v15040_v37  ;;  %v367_v9 = vshll.u32 %v13493_v7, 16 }
  0x59   :  { %v15481_v8 = vrot.slane %v1071_v5, %v15040_v37  ;;  %v13515_v11 = vcombine.high %v47_v36, %v48_v38  ;;  %v2631_v12 = vcombine.high %v2580_v10, %v2594_v3  ;;  %v2630_v16 = vcombine.low %v2580_v10, %v2594_v3 }
  0x5a   :  { %v362_v17 = vrot.slane %v360_v48, 1  ;;  %v528_v18 = vshrl.u32 %v13514_v2, 16  ;;  %v1095_v33 = vcombine.high %v15447_v56, %v15478_v50  ;;  %v369_v22 = vrot.slane %v367_v9, 1 }
  0x5b   :  { %v1098_v21 = vcombine.high %v15450_v32, %v15481_v8  ;;  %v530_v34 = vshll.u32 %v13514_v2, 16  ;;  %v2658_v23 = vrot.slane %v2631_v12, %v15040_v37  ;;  %v2644_v28 = vrot.slane %v2630_v16, %v15040_v37  ;;  %v15509_v2 = vld [vmem:[%s19496_s0 + $0xb0] sm:$0xff] }
  0x5c   :  { %v15489_v29 = vor.u32 %v362_v17, %v358_v6  ;;  %v535_v30 = vshrl.u32 %v13515_v11, 16  ;;  %v13555_v31 = vcombine.low %v15450_v32, %v1095_v33  ;;  %v15493_v38 = vor.u32 %v369_v22, %v365_v15  ;;  %v51_v22 = vld [vmem:[%s19496_s0 + $0xc0] sm:$0xff] }
  0x5d   :  { %v13557_v61 = vcombine.low %v1098_v21, %v15466_v53  ;;  %v532_v39 = vrot.slane %v530_v34, 1  ;;  %v537_v40 = vshll.u32 %v13515_v11, 16  ;;  %v1041_v45 = vcombine.high %v15405_v62, %v15407_v60  ;;  %v15544_v34 = vld [vmem:[%s19496_s0 + $0xc8] sm:$0x33] }
  0x5e   :  { %v1055_v47 = vrot.slane %v15341_v44, %v15040_v37  ;;  %v1109_v42 = vrot.slane %v45_v13, %v15040_v37  ;;  %v2608_v58 = vrot.slane %v13555_v31, %v15040_v37  ;;  %v1101_v7 = vcombine.low %v15489_v29, %v15493_v38  ;;  %v15514_v44 = vld [vmem:[%s19496_s0 + $0xb8] sm:$0x33] }
  0x5f   :  { %v2622_v59 = vrot.slane %v13557_v61, %v15040_v37  ;;  %v15502_v41 = vor.u32 %v532_v39, %v528_v18  ;;  %v539_v62 = vrot.slane %v537_v40, 1  ;;  %v1069_v60 = vrot.slane %v1041_v45, %v15040_v37 }
  0x60   :  { %v15518_v13 = vrot.slane %v47_v36, %v15040_v37  ;;  %v13559_v63 = vcombine.low %v15478_v50, %v15481_v8  ;;  %v1123_v3 = vrot.slane %v1101_v7, %v15040_v37  ;;  %v13561_v6 = vcombine.high %v15478_v50, %v15481_v8 }
  0x61   :  { %19610 = vst [vmem:[#allocation2_spill] sm:$0xff] %v15502_v41  ;;  %v2635_v5 = vcombine.high %v2608_v58, %v2622_v59  ;;  %v2634_v10 = vcombine.low %v2608_v58, %v2622_v59  ;;  %v15525_v48 = vor.u32 %v539_v62, %v535_v30  ;;  %v1072_v15 = vcombine.low %v1055_v47, %v1069_v60 }
  0x62   :  { %v2716_v9 = vrot.slane %v13559_v63, %v15040_v37  ;;  %v13494_v11 = vcombine.low %v15509_v2, %v15514_v44  ;;  %v1131_v16 = vcombine.low %v1109_v42, %v1123_v3  ;;  %v1132_v17 = vcombine.high %v1109_v42, %v1123_v3 }
  0x63   :  { %v2686_v36 = vrot.slane %v2635_v5, %v15040_v37  ;;  %v2672_v12 = vrot.slane %v2634_v10, %v15040_v37  ;;  %v15533_v18 = vrot.slane %v1072_v15, %v15040_v37  ;;  %v1162_v33 = vcombine.low %v15502_v41, %v15525_v48 }
  0x64   :  { %v2730_v21 = vrot.slane %v13561_v6, %v15040_v37  ;;  %v13495_v30 = vcombine.high %v15509_v2, %v15514_v44  ;;  %v15549_v45 = vrot.slane %v1131_v16, %v15040_v37  ;;  %v15552_v47 = vrot.slane %v1132_v17, %v15040_v37 }
  0x65   :  { %v2698_v31 = vcombine.low %v2658_v23, %v2686_v36  ;;  %v2699_v61 = vcombine.high %v2658_v23, %v2686_v36  ;;  %v2694_v39 = vcombine.low %v2644_v28, %v2672_v12  ;;  %v2695_v40 = vcombine.high %v2644_v28, %v2672_v12 }
  0x66   :  { %19611 = vst [vmem:[#allocation3_spill] sm:$0xff] %v15549_v45  ;;  %v1184_v42 = vrot.slane %v1162_v33, %v15040_v37  ;;  %v2767_v58 = vcombine.high %v2716_v9, %v2730_v21  ;;  %v2766_v59 = vcombine.low %v2716_v9, %v2730_v21  ;;  %v13496_v7 = vcombine.low %v51_v22, %v15544_v34 }
  0x67   :  { %4274 = vmatprep.mubr.bf16.mxu0 %v2698_v31  ;;  %4410 = vmatprep.mubr.bf16.mxu1 %v2699_v61  ;;  %v13497_v62 = vcombine.high %v51_v22, %v15544_v34  ;;  %v372_v60 = vshrl.u32 %v13494_v11, 16  ;;  %v13563_v28 = vcombine.low %v15533_v18, %v15549_v45  ;;  %v374_v5 = vshll.u32 %v13494_v11, 16 }
  0x68   :  { %4275 = vmatmul.mubr.bf16.gmra.mxu0 %v2694_v39  ;;  %4411 = vmatmul.mubr.bf16.gmra.mxu1 %v2695_v40  ;;  %v1192_v23 = vcombine.low %v15518_v13, %v1184_v42  ;;  %v15561_v63 = vrot.slane %v2767_v58, %v15040_v37  ;;  %v15564_v10 = vrot.slane %v2766_v59, %v15040_v37  ;;  %v379_v3 = vshrl.u32 %v13495_v30, 16 }
  0x69   :  { %v381_v6 = vshll.u32 %v13495_v30, 16  ;;  %v386_v15 = vshrl.u32 %v13496_v7, 16  ;;  %v2744_v36 = vrot.slane %v13563_v28, %v15040_v37  ;;  %v376_v12 = vrot.slane %v374_v5, 1 }
  0x6a   :  { %v15567_v9 = vrot.slane %v1192_v23, %v15040_v37  ;;  %v388_v16 = vshll.u32 %v13496_v7, 16  ;;  %v393_v33 = vshrl.u32 %v13497_v62, 16  ;;  %v395_v21 = vshll.u32 %v13497_v62, 16  ;;  %v15581_v62 = vld [vmem:[%s19496_s0 + $0xd0] sm:$0xff] }
  0x6b   :  { %v383_v17 = vrot.slane %v381_v6, 1  ;;  %v1102_v31 = vcombine.high %v15489_v29, %v15493_v38  ;;  %v377_v61 = vor.u32 %v376_v12, %v372_v60  ;;  %v1116_v30 = vrot.slane %v15457_v35, %v15040_v37  ;;  %v15586_v29 = vld [vmem:[%s19496_s0 + $0xd8] sm:$0x33] }
  0x6c   :  { %19612 = vst [vmem:[#allocation4_spill] sm:$0xff] %v15567_v9  ;;  %v1217_v11 = vcombine.high %v15549_v45, %v15567_v9  ;;  %v390_v39 = vrot.slane %v388_v16, 1  ;;  %v397_v58 = vrot.slane %v395_v21, 1  ;;  %v1193_v7 = vcombine.high %v15518_v13, %v1184_v42 }
  0x6d   :  { %v384_v40 = vor.u32 %v383_v17, %v379_v3  ;;  %v1130_v59 = vrot.slane %v1102_v31, %v15040_v37  ;;  %v1235_v35 = vrot.slane %v15509_v2, %v15040_v37  ;;  %v1242_v13 = vrot.slane %v15514_v44, %v15040_v37 }
  0x6e   :  { %v13565_v38 = vcombine.low %v15552_v47, %v1217_v11  ;;  %v15589_v60 = vor.u32 %v390_v39, %v386_v15  ;;  %v398_v42 = vor.u32 %v397_v58, %v393_v33  ;;  %v15596_v28 = vrot.slane %v1193_v7, %v15040_v37 }
  0x6f   :  { %v1133_v23 = vcombine.low %v1116_v30, %v1130_v59  ;;  %v1223_v5 = vcombine.low %v377_v61, %v384_v40  ;;  %v1224_v6 = vcombine.high %v377_v61, %v384_v40  ;;  %v1263_v12 = vrot.slane %v51_v22, %v15040_v37 }
  0x70   :  { %v2758_v3 = vrot.slane %v13565_v38, %v15040_v37  ;;  %v13498_v15 = vcombine.low %v15581_v62, %v15586_v29  ;;  %v1220_v2 = vcombine.high %v15552_v47, %v15596_v28  ;;  %v1227_v44 = vcombine.low %v15589_v60, %v398_v42 }
  0x71   :  { %v15603_v16 = vrot.slane %v1133_v23, %v15040_v37  ;;  %v1249_v17 = vrot.slane %v1223_v5, %v15040_v37  ;;  %v1256_v31 = vrot.slane %v1224_v6, %v15040_v37  ;;  %v13499_v22 = vcombine.high %v15581_v62, %v15586_v29 }
  0x72   :  { %v2771_v33 = vcombine.high %v2744_v36, %v2758_v3  ;;  %v2770_v21 = vcombine.low %v2744_v36, %v2758_v3  ;;  %v1277_v11 = vrot.slane %v1227_v44, %v15040_v37  ;;  %v400_v7 = vshrl.u32 %v13498_v15, 16 }
  0x73   :  { %19613 = vst [vmem:[#allocation5_spill] sm:$0xff] %v15603_v16  ;;  %v1285_v61 = vcombine.low %v1235_v35, %v1249_v17  ;;  %v1286_v39 = vcombine.high %v1235_v35, %v1249_v17  ;;  %v13567_v30 = vcombine.low %v1220_v2, %v15603_v16  ;;  %v1287_v59 = vcombine.low %v1242_v13, %v1256_v31 }
  0x74   :  { %v2822_v40 = vrot.slane %v2771_v33, %v15040_v37  ;;  %v2808_v58 = vrot.slane %v2770_v21, %v15040_v37  ;;  %v1288_v38 = vcombine.low %v1263_v12, %v1277_v11  ;;  %v1289_v23 = vcombine.high %v1263_v12, %v1277_v11 }
  0x75   :  { %v1297_v36 = vrot.slane %v1285_v61, %v15040_v37  ;;  %v1311_v5 = vrot.slane %v1286_v39, %v15040_v37  ;;  %v1304_v44 = vrot.slane %v1287_v59, %v15040_v37  ;;  %v2852_v12 = vrot.slane %v13567_v30, %v15040_v37 }
  0x76   :  { %v2834_v3 = vcombine.low %v15561_v63, %v2822_v40  ;;  %v2835_v6 = vcombine.high %v15561_v63, %v2822_v40  ;;  %v2830_v35 = vcombine.low %v15564_v10, %v2808_v58  ;;  %v2831_v2 = vcombine.high %v15564_v10, %v2808_v58 }
  0x77   :  { %v15624_v17 = vrot.slane %v1288_v38, %v15040_v37  ;;  %v13569_v13 = vcombine.low %v1297_v36, %v1311_v5  ;;  %v13571_v33 = vcombine.high %v1297_v36, %v1311_v5  ;;  %v402_v21 = vshll.u32 %v13498_v15, 16  ;;  %v15640_v36 = vld [vmem:[%s19496_s0 + $0xe0] sm:$0xff]  ;;  %v15645_v5 = vld [vmem:[%s19496_s0 + $0xe8] sm:$0x33] }
  0x78   :  { %4282 = vmatprep.mubr.bf16.mxu0 %v2834_v3  ;;  %4418 = vmatprep.mubr.bf16.mxu1 %v2835_v6  ;;  %v407_v31 = vshrl.u32 %v13499_v22, 16  ;;  %v409_v11 = vshll.u32 %v13499_v22, 16  ;;  %v1228_v58 = vcombine.high %v15589_v60, %v398_v42  ;;  %v1270_v59 = vrot.slane %v15544_v34, %v15040_v37  ;;  %v15658_v6 = vld [vmem:[%s19496_s0 + $0xf8] sm:$0x33] }
  0x79   :  { %19614 = vst [vmem:[#allocation6_spill] sm:$0xff] %v15624_v17  ;;  %4283 = vmatmul.mubr.bf16.gmra.mxu0 %v2830_v35  ;;  %4419 = vmatmul.mubr.bf16.gmra.mxu1 %v2831_v2  ;;  %v13573_v63 = vcombine.low %v1304_v44, %v15624_v17  ;;  %v2866_v10 = vrot.slane %v13569_v13, %v15040_v37  ;;  %v404_v39 = vrot.slane %v402_v21, 1 }
  0x7a   :  { %v2880_v61 = vrot.slane %v13571_v33, %v15040_v37  ;;  %v411_v40 = vrot.slane %v409_v11, 1  ;;  %v15635_v22 = vrot.slane %v1289_v23, %v15040_v37  ;;  %v1284_v34 = vrot.slane %v1228_v58, %v15040_v37  ;;  %v15653_v23 = vld [vmem:[%s19496_s0 + $0xf0] sm:$0xff] }
  0x7b   :  { %v2894_v30 = vrot.slane %v13573_v63, %v15040_v37  ;;  %v2903_v15 = vcombine.high %v2852_v12, %v2866_v10  ;;  %v2902_v38 = vcombine.low %v2852_v12, %v2866_v10  ;;  %v405_v60 = vor.u32 %v404_v39, %v400_v7 }
  0x7c   :  { %v412_v42 = vor.u32 %v411_v40, %v407_v31  ;;  %v1348_v3 = vrot.slane %v15581_v62, %v15040_v37  ;;  %v1290_v13 = vcombine.low %v1270_v59, %v1284_v34  ;;  %v13500_v62 = vcombine.low %v15640_v36, %v15645_v5 }
  0x7d   :  { %v2907_v35 = vcombine.high %v2880_v61, %v2894_v30  ;;  %v2930_v2 = vrot.slane %v2903_v15, %v15040_v37  ;;  %v2906_v7 = vcombine.low %v2880_v61, %v2894_v30  ;;  %v2916_v44 = vrot.slane %v2902_v38, %v15040_v37 }
  0x7e   :  { %v1340_v33 = vcombine.low %v405_v60, %v412_v42  ;;  %v13501_v12 = vcombine.high %v15640_v36, %v15645_v5  ;;  %v13502_v11 = vcombine.low %v15653_v23, %v15658_v6  ;;  %v13503_v63 = vcombine.high %v15653_v23, %v15658_v6 }
  0x7f   :  { %v2958_v21 = vrot.slane %v2907_v35, %v15040_v37  ;;  %v2944_v31 = vrot.slane %v2906_v7, %v15040_v37  ;;  %v15673_v10 = vrot.slane %v1290_v13, %v15040_v37  ;;  %v414_v39 = vshrl.u32 %v13500_v62, 16 }
  0x80   :  { %v1362_v61 = vrot.slane %v1340_v33, %v15040_v37  ;;  %v416_v40 = vshll.u32 %v13500_v62, 16  ;;  %v421_v7 = vshrl.u32 %v13501_v12, 16  ;;  %v423_v16 = vshll.u32 %v13501_v12, 16 }
  0x81   :  { %19615 = vst [vmem:[#allocation7_spill] sm:$0xff] %v15673_v10  ;;  %v2970_v58 = vcombine.low %v2930_v2, %v2958_v21  ;;  %v2971_v59 = vcombine.high %v2930_v2, %v2958_v21  ;;  %v2966_v30 = vcombine.low %v2916_v44, %v2944_v31  ;;  %v2967_v15 = vcombine.high %v2916_v44, %v2944_v31 }
  0x82   :  { %v1370_v38 = vcombine.low %v1348_v3, %v1362_v61  ;;  %v1371_v34 = vcombine.high %v1348_v3, %v1362_v61  ;;  %v418_v35 = vrot.slane %v416_v40, 1  ;;  %v428_v9 = vshrl.u32 %v13502_v11, 16 }
  0x83   :  { %4290 = vmatprep.mubr.bf16.mxu0 %v2970_v58  ;;  %4426 = vmatprep.mubr.bf16.mxu1 %v2971_v59  ;;  %v430_v45 = vshll.u32 %v13502_v11, 16  ;;  %v435_v41 = vshrl.u32 %v13503_v63, 16  ;;  %v437_v44 = vshll.u32 %v13503_v63, 16  ;;  %v425_v62 = vrot.slane %v423_v16, 1 }
  0x84   :  { %4291 = vmatmul.mubr.bf16.gmra.mxu0 %v2966_v30  ;;  %4427 = vmatmul.mubr.bf16.gmra.mxu1 %v2967_v15  ;;  %v15677_v13 = vrot.slane %v1370_v38, %v15040_v37  ;;  %v15680_v33 = vrot.slane %v1371_v34, %v15040_v37  ;;  %v419_v2 = vor.u32 %v418_v35, %v414_v39 }
  0x85   :  { %v432_v3 = vrot.slane %v430_v45, 1  ;;  %v1341_v21 = vcombine.high %v405_v60, %v412_v42  ;;  %v1355_v31 = vrot.slane %v15586_v29, %v15040_v37  ;;  %v426_v39 = vor.u32 %v425_v62, %v421_v7 }
  0x86   :  { %19616 = vst [vmem:[#allocation8_spill] sm:$0xff] %v15677_v13  ;;  %19617 = vst [vmem:[#allocation9_spill] sm:$0xff] %v15680_v33  ;;  %v1395_v12 = vcombine.high %v15624_v17, %v15677_v13  ;;  %v1398_v11 = vcombine.high %v15635_v22, %v15680_v33  ;;  %v13579_v61 = vcombine.low %v15677_v13, %v15680_v33  ;;  %v439_v45 = vrot.slane %v437_v44, 1 }
  0x87   :  { %v13581_v40 = vcombine.high %v15677_v13, %v15680_v33  ;;  %v15692_v63 = vor.u32 %v432_v3, %v428_v9  ;;  %v1369_v16 = vrot.slane %v1341_v21, %v15040_v37  ;;  %v1401_v15 = vcombine.low %v419_v2, %v426_v39  ;;  %v15719_v21 = vld [vmem:[%s19496_s0 + $0x108] sm:$0x33] }
  0x88   :  { %v13575_v29 = vcombine.low %v15635_v22, %v1395_v12  ;;  %v13577_v60 = vcombine.low %v1398_v11, %v15673_v10  ;;  %v3016_v42 = vrot.slane %v13579_v61, %v15040_v37  ;;  %v15699_v59 = vor.u32 %v439_v45, %v435_v41 }
  0x89   :  { %v3030_v58 = vrot.slane %v13581_v40, %v15040_v37  ;;  %v1372_v30 = vcombine.low %v1355_v31, %v1369_v16  ;;  %v1402_v38 = vcombine.high %v419_v2, %v426_v39  ;;  %v1409_v62 = vrot.slane %v15640_v36, %v15040_v37  ;;  %v15714_v2 = vld [vmem:[%s19496_s0 + $0x100] sm:$0xff] }
  0x8a   :  { %v2988_v34 = vrot.slane %v13575_v29, %v15040_v37  ;;  %v3002_v9 = vrot.slane %v13577_v60, %v15040_v37  ;;  %v1416_v3 = vrot.slane %v15645_v5, %v15040_v37  ;;  %v1423_v41 = vrot.slane %v1401_v15, %v15040_v37 }
  0x8b   :  { %v3043_v35 = vcombine.high %v3016_v42, %v3030_v58  ;;  %v3042_v7 = vcombine.low %v3016_v42, %v3030_v58  ;;  %v15704_v44 = vrot.slane %v1372_v30, %v15040_v37  ;;  %v1430_v5 = vrot.slane %v1402_v38, %v15040_v37  ;;  %v15742_v38 = vld [vmem:[%s19496_s0 + $0x110] sm:$0xff] }
  0x8c   :  { %v3039_v31 = vcombine.high %v2988_v34, %v3002_v9  ;;  %v3038_v11 = vcombine.low %v2988_v34, %v3002_v9  ;;  %v1431_v61 = vcombine.low %v1409_v62, %v1423_v41  ;;  %v1432_v40 = vcombine.high %v1409_v62, %v1423_v41 }
  0x8d   :  { %19618 = vst [vmem:[#allocation10_spill] sm:$0xff] %v15704_v44  ;;  %v3094_v12 = vrot.slane %v3043_v35, %v15040_v37  ;;  %v3080_v36 = vrot.slane %v3042_v7, %v15040_v37  ;;  %v1462_v39 = vcombine.low %v15692_v63, %v15699_v59  ;;  %v1470_v29 = vrot.slane %v15653_v23, %v15040_v37  ;;  %v15747_v23 = vld [vmem:[%s19496_s0 + $0x118] sm:$0x33] }
  0x8e   :  { %v3066_v45 = vrot.slane %v3039_v31, %v15040_v37  ;;  %v3052_v16 = vrot.slane %v3038_v11, %v15040_v37  ;;  %v13504_v60 = vcombine.low %v15714_v2, %v15719_v21  ;;  %v1433_v42 = vcombine.low %v1416_v3, %v1430_v5 }
  0x8f   :  { %v15733_v58 = vrot.slane %v1431_v61, %v15040_v37  ;;  %v15736_v30 = vrot.slane %v1432_v40, %v15040_v37  ;;  %v1484_v15 = vrot.slane %v1462_v39, %v15040_v37  ;;  %v13505_v11 = vcombine.high %v15714_v2, %v15719_v21 }
  0x90   :  { %v3106_v34 = vcombine.low %v3066_v45, %v3094_v12  ;;  %v3107_v9 = vcombine.high %v3066_v45, %v3094_v12  ;;  %v3102_v35 = vcombine.low %v3052_v16, %v3080_v36  ;;  %v3103_v7 = vcombine.high %v3052_v16, %v3080_v36 }
  0x91   :  { %19619 = vst [vmem:[#allocation11_spill] sm:$0xff] %v15733_v58  ;;  %19620 = vst [vmem:[#allocation12_spill] sm:$0xff] %v15736_v30  ;;  %v15750_v62 = vrot.slane %v1433_v42, %v15040_v37  ;;  %v1492_v3 = vcombine.low %v1470_v29, %v1484_v15  ;;  %v1493_v41 = vcombine.high %v1470_v29, %v1484_v15  ;;  %v442_v36 = vshrl.u32 %v13504_v60, 16 }
  0x92   :  { %v13583_v31 = vcombine.low %v15704_v44, %v15733_v58  ;;  %4298 = vmatprep.mubr.bf16.mxu0 %v3106_v34  ;;  %4434 = vmatprep.mubr.bf16.mxu1 %v3107_v9  ;;  %v13506_v5 = vcombine.low %v15742_v38, %v15747_v23  ;;  %v13507_v12 = vcombine.high %v15742_v38, %v15747_v23  ;;  %v444_v45 = vshll.u32 %v13504_v60, 16 }
  0x93   :  { %19621 = vst [vmem:[#allocation13_spill] sm:$0xff] %v15750_v62  ;;  %4299 = vmatmul.mubr.bf16.gmra.mxu0 %v3102_v35  ;;  %4435 = vmatmul.mubr.bf16.gmra.mxu1 %v3103_v7  ;;  %v15761_v61 = vrot.slane %v1492_v3, %v15040_v37  ;;  %v15764_v40 = vrot.slane %v1493_v41, %v15040_v37  ;;  %v449_v16 = vshrl.u32 %v13505_v11, 16  ;;  %v451_v29 = vshll.u32 %v13505_v11, 16 }
  0x94   :  { %v3124_v39 = vrot.slane %v13583_v31, %v15040_v37  ;;  %v456_v42 = vshrl.u32 %v13506_v5, 16  ;;  %v458_v15 = vshll.u32 %v13506_v5, 16  ;;  %v446_v7 = vrot.slane %v444_v45, 1 }
  0x95   :  { %19622 = vst [vmem:[#allocation14_spill] sm:$0xff] %v15761_v61  ;;  %19623 = vst [vmem:[#allocation15_spill] sm:$0xff] %v15764_v40  ;;  %v1517_v34 = vcombine.high %v15733_v58, %v15761_v61  ;;  %v1520_v9 = vcombine.high %v15736_v30, %v15764_v40  ;;  %v13589_v35 = vcombine.low %v15761_v61, %v15764_v40  ;;  %v453_v3 = vrot.slane %v451_v29, 1 }
  0x96   :  { %v460_v41 = vrot.slane %v458_v15, 1  ;;  %v463_v33 = vshrl.u32 %v13507_v12, 16  ;;  %v465_v44 = vshll.u32 %v13507_v12, 16  ;;  %v447_v5 = vor.u32 %v446_v7, %v442_v36 }
  0x97   :  { %v13585_v60 = vcombine.low %v15736_v30, %v1517_v34  ;;  %v13587_v31 = vcombine.low %v1520_v9, %v15750_v62  ;;  %v3166_v11 = vrot.slane %v13589_v35, %v15040_v37  ;;  %v454_v10 = vor.u32 %v453_v3, %v449_v16 }
  0x98   :  { %v15776_v58 = vor.u32 %v460_v41, %v456_v42  ;;  %v467_v13 = vrot.slane %v465_v44, 1  ;;  %v1463_v17 = vcombine.high %v15692_v63, %v15699_v59  ;;  %v1477_v12 = vrot.slane %v15658_v6, %v15040_v37 }
  0x99   :  { %v3138_v45 = vrot.slane %v13585_v60, %v15040_v37  ;;  %v3152_v29 = vrot.slane %v13587_v31, %v15040_v37  ;;  %v1531_v15 = vrot.slane %v15714_v2, %v15040_v37  ;;  %v1523_v16 = vcombine.low %v447_v5, %v454_v10  ;;  %v15806_v31 = vld [vmem:[%s19496_s0 + $0x128] sm:$0x33] }
  0x9a   :  { %v15786_v34 = vor.u32 %v467_v13, %v463_v33  ;;  %v1491_v36 = vrot.slane %v1463_v17, %v15040_v37  ;;  %v1524_v42 = vcombine.high %v447_v5, %v454_v10  ;;  %v1538_v7 = vrot.slane %v15719_v21, %v15040_v37  ;;  %v63_v21 = vld [vmem:[%s19496_s0 + $0x120] sm:$0xff] }
  0x9b   :  { %v3175_v44 = vcombine.high %v3124_v39, %v3138_v45  ;;  %v3179_v9 = vcombine.high %v3152_v29, %v3166_v11  ;;  %v3174_v35 = vcombine.low %v3124_v39, %v3138_v45  ;;  %v3178_v63 = vcombine.low %v3152_v29, %v3166_v11 }
  0x9c   :  { %v1494_v59 = vcombine.low %v1477_v12, %v1491_v36  ;;  %v1545_v3 = vrot.slane %v1523_v16, %v15040_v37  ;;  %v1552_v6 = vrot.slane %v1524_v42, %v15040_v37  ;;  %v1584_v16 = vcombine.low %v15776_v58, %v15786_v34  ;;  %v65_v42 = vld [vmem:[%s19496_s0 + $0x130] sm:$0xff] }
  0x9d   :  { %v3202_v2 = vrot.slane %v3175_v44, %v15040_v37  ;;  %v3230_v13 = vrot.slane %v3179_v9, %v15040_v37  ;;  %v3188_v17 = vrot.slane %v3174_v35, %v15040_v37  ;;  %v3216_v10 = vrot.slane %v3178_v63, %v15040_v37  ;;  %v15825_v44 = vld [vmem:[%s19496_s0 + $0x138] sm:$0x33] }
  0x9e   :  { %v15798_v33 = vrot.slane %v1494_v59, %v15040_v37  ;;  %v1553_v39 = vcombine.low %v1531_v15, %v1545_v3  ;;  %v1554_v41 = vcombine.high %v1531_v15, %v1545_v3  ;;  %v1555_v60 = vcombine.low %v1538_v7, %v1552_v6 }
  0x9f   :  { %v3242_v11 = vcombine.low %v3202_v2, %v3230_v13  ;;  %v3243_v5 = vcombine.high %v3202_v2, %v3230_v13  ;;  %v3238_v45 = vcombine.low %v3188_v17, %v3216_v10  ;;  %v3239_v29 = vcombine.high %v3188_v17, %v3216_v10 }
  0xa0   :  { %19624 = vst [vmem:[#allocation16_spill] sm:$0xff] %v15798_v33  ;;  %v15809_v12 = vrot.slane %v1553_v39, %v15040_v37  ;;  %v15812_v36 = vrot.slane %v1555_v60, %v15040_v37  ;;  %v15815_v15 = vrot.slane %v1554_v41, %v15040_v37  ;;  %v1592_v9 = vrot.slane %v15742_v38, %v15040_v37 }
  0xa1   :  { %4306 = vmatprep.mubr.bf16.mxu0 %v3242_v11  ;;  %4442 = vmatprep.mubr.bf16.mxu1 %v3243_v5  ;;  %v13591_v35 = vcombine.high %v15761_v61, %v15764_v40  ;;  %v13508_v63 = vcombine.low %v63_v21, %v15806_v31  ;;  %v1606_v59 = vrot.slane %v1584_v16, %v15040_v37 }
  0xa2   :  { %19625 = vst [vmem:[#allocation17_spill] sm:$0xff] %v15809_v12  ;;  %19626 = vst [vmem:[#allocation18_spill] sm:$0xff] %v15812_v36  ;;  %4307 = vmatmul.mubr.bf16.gmra.mxu0 %v3238_v45  ;;  %4443 = vmatmul.mubr.bf16.gmra.mxu1 %v3239_v29  ;;  %v13593_v7 = vcombine.low %v15798_v33, %v15809_v12  ;;  %v13509_v3 = vcombine.high %v63_v21, %v15806_v31 }
  0xa3   :  { %v3260_v6 = vrot.slane %v13591_v35, %v15040_v37  ;;  %v13510_v2 = vcombine.low %v65_v42, %v15825_v44  ;;  %v13511_v38 = vcombine.high %v65_v42, %v15825_v44  ;;  %v470_v13 = vshrl.u32 %v13508_v63, 16 }
  0xa4   :  { %v1614_v17 = vcombine.low %v1592_v9, %v1606_v59  ;;  %v1615_v10 = vcombine.high %v1592_v9, %v1606_v59  ;;  %v3274_v39 = vrot.slane %v13593_v7, %v15040_v37  ;;  %v472_v41 = vshll.u32 %v13508_v63, 16 }
  0xa5   :  { %v477_v60 = vshrl.u32 %v13509_v3, 16  ;;  %v479_v11 = vshll.u32 %v13509_v3, 16  ;;  %v484_v5 = vshrl.u32 %v13510_v2, 16  ;;  %v486_v45 = vshll.u32 %v13510_v2, 16 }
  0xa6   :  { %v15841_v29 = vrot.slane %v1614_v17, %v15040_v37  ;;  %v15844_v16 = vrot.slane %v1615_v10, %v15040_v37  ;;  %v3311_v35 = vcombine.high %v3260_v6, %v3274_v39  ;;  %v3310_v61 = vcombine.low %v3260_v6, %v3274_v39 }
  0xa7   :  { %v474_v62 = vrot.slane %v472_v41, 1  ;;  %v481_v33 = vrot.slane %v479_v11, 1  ;;  %v488_v30 = vrot.slane %v486_v45, 1  ;;  %v491_v40 = vshrl.u32 %v13511_v38, 16 }
  0xa8   :  { %19627 = vst [vmem:[#allocation19_spill] sm:$0xff] %v15841_v29  ;;  %19628 = vst [vmem:[#allocation20_spill] sm:$0xff] %v15844_v16  ;;  %v1639_v9 = vcombine.high %v15809_v12, %v15841_v29  ;;  %v1642_v63 = vcombine.high %v15815_v15, %v15844_v16  ;;  %v3338_v59 = vrot.slane %v3311_v35, %v15040_v37  ;;  %v493_v6 = vshll.u32 %v13511_v38, 16 }
  0xa9   :  { %v3324_v7 = vrot.slane %v3310_v61, %v15040_v37  ;;  %v15852_v3 = vor.u32 %v474_v62, %v470_v13  ;;  %v15854_v2 = vor.u32 %v481_v33, %v477_v60  ;;  %v15856_v17 = vor.u32 %v488_v30, %v484_v5  ;;  %v15867_v62 = vld [vmem:[%s19496_s0 + $0x140] sm:$0xff]  ;;  %v15872_v30 = vld [vmem:[%s19496_s0 + $0x148] sm:$0x33] }
  0xaa   :  { %v13595_v10 = vcombine.low %v15815_v15, %v1639_v9  ;;  %v13597_v39 = vcombine.low %v1642_v63, %v15812_v36  ;;  %v1585_v41 = vcombine.high %v15776_v58, %v15786_v34  ;;  %v1599_v11 = vrot.slane %v15747_v23, %v15040_v37 }
  0xab   :  { %v495_v61 = vrot.slane %v493_v6, 1  ;;  %v1645_v33 = vcombine.low %v15852_v3, %v15854_v2  ;;  %v1653_v38 = vrot.slane %v63_v21, %v15040_v37  ;;  %v1714_v58 = vrot.slane %v65_v42, %v15040_v37 }
  0xac   :  { %v3288_v23 = vrot.slane %v13595_v10, %v15040_v37  ;;  %v3302_v34 = vrot.slane %v13597_v39, %v15040_v37  ;;  %v1613_v13 = vrot.slane %v1585_v41, %v15040_v37  ;;  %v13599_v60 = vcombine.low %v15841_v29, %v15844_v16 }
  0xad   :  { %v496_v5 = vor.u32 %v495_v61, %v491_v40  ;;  %v1667_v45 = vrot.slane %v1645_v33, %v15040_v37  ;;  %v13601_v35 = vcombine.high %v15841_v29, %v15844_v16  ;;  %v13512_v21 = vcombine.low %v15867_v62, %v15872_v30 }
  0xae   :  { %v3315_v9 = vcombine.high %v3288_v23, %v3302_v34  ;;  %v3314_v42 = vcombine.low %v3288_v23, %v3302_v34  ;;  %v1616_v63 = vcombine.low %v1599_v11, %v1613_v13  ;;  %v3396_v6 = vrot.slane %v13599_v60, %v15040_v37 }
  0xaf   :  { %v1675_v10 = vcombine.low %v1653_v38, %v1667_v45  ;;  %v1676_v39 = vcombine.high %v1653_v38, %v1667_v45  ;;  %v1706_v41 = vcombine.low %v15856_v17, %v496_v5  ;;  %v3410_v36 = vrot.slane %v13601_v35, %v15040_v37 }
  0xb0   :  { %v3366_v40 = vrot.slane %v3315_v9, %v15040_v37  ;;  %v3352_v61 = vrot.slane %v3314_v42, %v15040_v37  ;;  %v15894_v33 = vrot.slane %v1616_v63, %v15040_v37  ;;  %v13513_v29 = vcombine.high %v15867_v62, %v15872_v30 }
  0xb1   :  { %v15899_v11 = vrot.slane %v1675_v10, %v15040_v37  ;;  %v1728_v23 = vrot.slane %v1706_v41, %v15040_v37  ;;  %v3447_v38 = vcombine.high %v3396_v6, %v3410_v36  ;;  %v15903_v35 = vrot.slane %v1676_v39, %v15040_v37 }
  0xb2   :  { %v3378_v34 = vcombine.low %v3338_v59, %v3366_v40  ;;  %v3379_v13 = vcombine.high %v3338_v59, %v3366_v40  ;;  %v3374_v60 = vcombine.low %v3324_v7, %v3352_v61  ;;  %v3375_v45 = vcombine.high %v3324_v7, %v3352_v61 }
  0xb3   :  { %19629 = vst [vmem:[#allocation21_spill] sm:$0xff] %v15899_v11  ;;  %v1736_v9 = vcombine.low %v1714_v58, %v1728_v23  ;;  %v13603_v42 = vcombine.low %v15894_v33, %v15899_v11  ;;  %v498_v63 = vshrl.u32 %v13512_v21, 16  ;;  %v500_v16 = vshll.u32 %v13512_v21, 16 }
  0xb4   :  { %4314 = vmatprep.mubr.bf16.mxu0 %v3378_v34  ;;  %4450 = vmatprep.mubr.bf16.mxu1 %v3379_v13  ;;  %v505_v10 = vshrl.u32 %v13513_v29, 16  ;;  %v507_v12 = vshll.u32 %v13513_v29, 16  ;;  %v3474_v59 = vrot.slane %v3447_v38, %v15040_v37  ;;  %v3446_v7 = vcombine.low %v3396_v6, %v3410_v36  ;;  %v69_v36 = vld [vmem:[%s19496_s0 + $0x150] sm:$0xff] }
  0xb5   :  { %4315 = vmatmul.mubr.bf16.gmra.mxu0 %v3374_v60  ;;  %4451 = vmatmul.mubr.bf16.gmra.mxu1 %v3375_v45  ;;  %v15908_v41 = vrot.slane %v1736_v9, %v15040_v37  ;;  %v502_v39 = vrot.slane %v500_v16, 1  ;;  %v1646_v61 = vcombine.high %v15852_v3, %v15854_v2  ;;  %v1660_v34 = vrot.slane %v15806_v31, %v15040_v37 }
  0xb6   :  { %v509_v40 = vrot.slane %v507_v12, 1  ;;  %v1707_v29 = vcombine.high %v15856_v17, %v496_v5  ;;  %v1721_v13 = vrot.slane %v15825_v44, %v15040_v37  ;;  %v1737_v60 = vcombine.high %v1714_v58, %v1728_v23  ;;  %v15926_v12 = vld [vmem:[%s19496_s0 + $0x158] sm:$0x33] }
  0xb7   :  { %19630 = vst [vmem:[#allocation22_spill] sm:$0xff] %v15908_v41  ;;  %v1761_v21 = vcombine.high %v15899_v11, %v15908_v41  ;;  %19631 = vst [vmem:[#allocation23_spill] sm:$0xff] %v15926_v12  ;;  %v3424_v31 = vrot.slane %v13603_v42, %v15040_v37  ;;  %v503_v16 = vor.u32 %v502_v39, %v498_v63 }
  0xb8   :  { %v510_v3 = vor.u32 %v509_v40, %v505_v10  ;;  %v1674_v2 = vrot.slane %v1646_v61, %v15040_v37  ;;  %v1735_v44 = vrot.slane %v1707_v29, %v15040_v37  ;;  %v15933_v58 = vrot.slane %v1737_v60, %v15040_v37 }
  0xb9   :  { %v13605_v17 = vcombine.low %v15903_v35, %v1761_v21  ;;  %v15937_v5 = vrot.slane %v15867_v62, %v15040_v37  ;;  %v13516_v38 = vcombine.low %v69_v36, %v15926_v12  ;;  %v13517_v45 = vcombine.high %v69_v36, %v15926_v12 }
  0xba   :  { %v1677_v6 = vcombine.low %v1660_v34, %v1674_v2  ;;  %v1767_v23 = vcombine.low %v503_v16, %v510_v3  ;;  %v1738_v42 = vcombine.low %v1721_v13, %v1735_v44  ;;  %v1764_v63 = vcombine.high %v15903_v35, %v15933_v58 }
  0xbb   :  { %v3438_v9 = vrot.slane %v13605_v17, %v15040_v37  ;;  %v13609_v10 = vcombine.low %v15908_v41, %v15933_v58  ;;  %v3460_v39 = vrot.slane %v3446_v7, %v15040_v37  ;;  %v1768_v61 = vcombine.high %v503_v16, %v510_v3 }
  0xbc   :  { %v15948_v62 = vrot.slane %v1677_v6, %v15040_v37  ;;  %v1789_v40 = vrot.slane %v1767_v23, %v15040_v37  ;;  %v15952_v29 = vrot.slane %v1738_v42, %v15040_v37  ;;  %v13611_v13 = vcombine.high %v15908_v41, %v15933_v58 }
  0xbd   :  { %v3451_v34 = vcombine.high %v3424_v31, %v3438_v9  ;;  %v3450_v21 = vcombine.low %v3424_v31, %v3438_v9  ;;  %v3546_v7 = vrot.slane %v13609_v10, %v15040_v37  ;;  %v544_v17 = vshll.u32 %v13516_v38, 16 }
  0xbe   :  { %19632 = vst [vmem:[#allocation24_spill] sm:$0xff] %v15948_v62  ;;  %v1797_v60 = vcombine.low %v15937_v5, %v1789_v40  ;;  %v13607_v2 = vcombine.low %v1764_v63, %v15948_v62  ;;  %v542_v16 = vshrl.u32 %v13516_v38, 16  ;;  %v551_v3 = vshll.u32 %v13517_v45, 16 }
  0xbf   :  { %v3502_v44 = vrot.slane %v3451_v34, %v15040_v37  ;;  %v3488_v6 = vrot.slane %v3450_v21, %v15040_v37  ;;  %v546_v9 = vrot.slane %v544_v17, 1  ;;  %v549_v42 = vshrl.u32 %v13517_v45, 16 }
  0xc0   :  { %v15962_v31 = vrot.slane %v1797_v60, %v15040_v37  ;;  %v3532_v23 = vrot.slane %v13607_v2, %v15040_v37  ;;  %v3560_v34 = vrot.slane %v13611_v13, %v15040_v37  ;;  %v553_v60 = vrot.slane %v551_v3, 1 }
  0xc1   :  { %v3514_v12 = vcombine.low %v3474_v59, %v3502_v44  ;;  %v3515_v41 = vcombine.high %v3474_v59, %v3502_v44  ;;  %v3510_v11 = vcombine.low %v3460_v39, %v3488_v6  ;;  %v3511_v63 = vcombine.high %v3460_v39, %v3488_v6 }
  0xc2   :  { %v13613_v10 = vcombine.low %v15952_v29, %v15962_v31  ;;  %v3583_v62 = vcombine.high %v3532_v23, %v3546_v7  ;;  %v3582_v21 = vcombine.low %v3532_v23, %v3546_v7  ;;  %v15968_v38 = vor.u32 %v546_v9, %v542_v16 }
  0xc3   :  { %4322 = vmatprep.mubr.bf16.mxu0 %v3514_v12  ;;  %4458 = vmatprep.mubr.bf16.mxu1 %v3515_v41  ;;  %v1782_v2 = vrot.slane %v15872_v30, %v15040_v37  ;;  %v1796_v45 = vrot.slane %v1768_v61, %v15040_v37  ;;  %v1798_v39 = vcombine.high %v15937_v5, %v1789_v40 }
  0xc4   :  { %4323 = vmatmul.mubr.bf16.gmra.mxu0 %v3510_v11  ;;  %4459 = vmatmul.mubr.bf16.gmra.mxu1 %v3511_v63  ;;  %v3574_v59 = vrot.slane %v13613_v10, %v15040_v37  ;;  %v1836_v13 = vrot.slane %v69_v36, %v15040_v37  ;;  %v3610_v7 = vrot.slane %v3583_v62, %v15040_v37 }
  0xc5   :  { %v3596_v41 = vrot.slane %v3582_v21, %v15040_v37  ;;  %v15978_v12 = vor.u32 %v553_v60, %v549_v42  ;;  %v731_v17 = vcombine.low %v15110_v46, %v15135_v4  ;;  %v13520_v11 = vcombine.low %v15107_v49, %v15110_v46 }
  0xc6   :  { %v3587_v30 = vcombine.high %v3560_v34, %v3574_v59  ;;  %v3586_v44 = vcombine.low %v3560_v34, %v3574_v59  ;;  %v13522_v61 = vcombine.high %v15107_v49, %v15110_v46  ;;  %v1799_v5 = vcombine.low %v1782_v2, %v1796_v45 }
  0xc7   :  { %v1828_v36 = vcombine.low %v15968_v38, %v15978_v12  ;;  %v13524_v62 = vcombine.low %v15132_v43, %v15118_v55  ;;  %v13526_v40 = vcombine.high %v731_v17, %v15118_v55  ;;  %v2043_v3 = vrot.slane %v13520_v11, %v15040_v37 }
  0xc8   :  { %v3638_v6 = vrot.slane %v3587_v30, %v15040_v37  ;;  %v3624_v16 = vrot.slane %v3586_v44, %v15040_v37  ;;  %v2057_v23 = vrot.slane %v13522_v61, %v15040_v37  ;;  %v730_v42 = vcombine.low %v15132_v43, %v15156_v14 }
  0xc9   :  { %v1850_v9 = vrot.slane %v1828_v36, %v15040_v37  ;;  %v2071_v49 = vrot.slane %v13524_v62, %v15040_v37  ;;  %v2085_v46 = vrot.slane %v13526_v40, %v15040_v37  ;;  %v16001_v21 = vrot.slane %v1798_v39, %v15040_v37 }
  0xca   :  { %v3650_v63 = vcombine.low %v3610_v7, %v3638_v6  ;;  %v3651_v10 = vcombine.high %v3610_v7, %v3638_v6  ;;  %v3646_v55 = vcombine.low %v3596_v41, %v3624_v16  ;;  %v3647_v34 = vcombine.high %v3596_v41, %v3624_v16 }
  0xcb   :  { %v1858_v60 = vcombine.low %v1836_v13, %v1850_v9  ;;  %v1859_v2 = vcombine.high %v1836_v13, %v1850_v9  ;;  %v16004_v45 = vrot.slane %v1799_v5, %v15040_v37  ;;  %v2089_v59 = vcombine.high %v2043_v3, %v2057_v23 }
  0xcc   :  { %4330 = vmatprep.mubr.bf16.mxu0 %v3650_v63  ;;  %4466 = vmatprep.mubr.bf16.mxu1 %v3651_v10  ;;  %v2093_v17 = vcombine.high %v2071_v49, %v2085_v46  ;;  %v13528_v39 = vcombine.high %v15135_v4, %v730_v42  ;;  %v13530_v13 = vcombine.low %v15164_v26, %v15208_v1 }
  0xcd   :  { %4331 = vmatmul.mubr.bf16.gmra.mxu0 %v3646_v55  ;;  %4467 = vmatmul.mubr.bf16.gmra.mxu1 %v3647_v34  ;;  %v16007_v43 = vrot.slane %v1858_v60, %v15040_v37  ;;  %v16010_v14 = vrot.slane %v1859_v2, %v15040_v37  ;;  %v13532_v30 = vcombine.high %v15164_v26, %v15208_v1 }
  0xce   :  { %v13534_v44 = vcombine.low %v15243_v25, %v15263_v54  ;;  %v2121_v11 = vrot.slane %v2089_v59, %v15040_v37  ;;  %v2149_v61 = vrot.slane %v2093_v17, %v15040_v37  ;;  %v2179_v36 = vrot.slane %v13528_v39, %v15040_v37 }
  0xcf   :  { %v1883_v7 = vcombine.high %v15962_v31, %v16007_v43  ;;  %v1886_v41 = vcombine.high %v16001_v21, %v16010_v14  ;;  %v2193_v62 = vrot.slane %v13530_v13, %v15040_v37  ;;  %v2207_v40 = vrot.slane %v13532_v30, %v15040_v37 }
  0xd0   :  { %v2221_v6 = vrot.slane %v13534_v44, %v15040_v37  ;;  %v852_v26 = vcombine.low %v15243_v25, %v15303_v20  ;;  %v853_v16 = vcombine.low %v15208_v1, %v15266_v57  ;;  %v2088_v63 = vcombine.low %v2043_v3, %v2057_v23 }
  0xd1   :  { %v13615_v4 = vcombine.low %v16001_v21, %v1883_v7  ;;  %v13617_v5 = vcombine.low %v1886_v41, %v16004_v45  ;;  %v2092_v10 = vcombine.low %v2071_v49, %v2085_v46  ;;  %v2225_v60 = vcombine.high %v2179_v36, %v2193_v62 }
  0xd2   :  { %v2156_v2 = vcombine.low %v2121_v11, %v2149_v61  ;;  %v2229_v59 = vcombine.high %v2207_v40, %v2221_v6  ;;  %v13536_v17 = vcombine.high %v853_v16, %v15263_v54  ;;  %v13538_v39 = vcombine.high %v15266_v57, %v852_v26 }
  0xd3   :  { %v3664_v9 = vrot.slane %v13615_v4, %v15040_v37  ;;  %v3678_v42 = vrot.slane %v13617_v5, %v15040_v37  ;;  %v13540_v1 = vcombine.low %v15347_v51, %v15350_v52  ;;  %v13542_v3 = vcombine.high %v15347_v51, %v15350_v52 }
  0xd4   :  { %v2107_v23 = vrot.slane %v2088_v63, %v15040_v37  ;;  %v2135_v49 = vrot.slane %v2092_v10, %v15040_v37  ;;  %v2157_v54 = vcombine.high %v2121_v11, %v2149_v61  ;;  %v2257_v57 = vrot.slane %v2225_v60, %v15040_v37 }
  0xd5   :  { %v3687_v55 = vcombine.high %v3664_v9, %v3678_v42  ;;  %v3686_v34 = vcombine.low %v3664_v9, %v3678_v42  ;;  %v2285_v7 = vrot.slane %v2229_v59, %v15040_v37  ;;  %v2315_v41 = vrot.slane %v13536_v17, %v15040_v37 }
  0xd6   :  { %v2329_v30 = vrot.slane %v13538_v39, %v15040_v37  ;;  %v975_v51 = vcombine.low %v15350_v52, %v15392_v27  ;;  %v2343_v44 = vrot.slane %v13540_v1, %v15040_v37  ;;  %v2357_v4 = vrot.slane %v13542_v3, %v15040_v37 }
  0xd7   :  { %v3710_v25 = vrot.slane %v3687_v55, %v15040_v37  ;;  %v3696_v20 = vrot.slane %v3686_v34, %v15040_v37  ;;  %v974_v11 = vcombine.low %v15363_v0, %v15436_v19  ;;  %v2224_v61 = vcombine.low %v2179_v36, %v2193_v62 }
  0xd8   :  { %v2228_v5 = vcombine.low %v2207_v40, %v2221_v6  ;;  %v2152_v26 = vcombine.low %v2107_v23, %v2135_v49  ;;  %v2361_v16 = vcombine.high %v2315_v41, %v2329_v30  ;;  %v13544_v9 = vcombine.low %v15363_v0, %v15389_v24 }
  0xd9   :  { %4338 = vmatprep.mubr.bf16.mxu0 %v3710_v25  ;;  %v3720_v46 = vcombine.high %v3710_v25, %v3710_v25  ;;  %v3718_v13 = vcombine.high %v3696_v20, %v3696_v20  ;;  %v13546_v52 = vcombine.high %v975_v51, %v15389_v24  ;;  %v2292_v42 = vcombine.low %v2257_v57, %v2285_v7  ;;  %v19633_v51 = vld [vmem:[#allocation2_spill] sm:$0xff] }
  0xda   :  { %4339 = vmatmul.mubr.bf16.gmra.mxu0 %v3696_v20  ;;  %v2365_v63 = vcombine.high %v2343_v44, %v2357_v4  ;;  %v13548_v10 = vcombine.high %v15392_v27, %v974_v11  ;;  %v13550_v55 = vcombine.low %v15447_v56, %v15450_v32  ;;  %v2153_v34 = vcombine.high %v2107_v23, %v2135_v49 }
  0xdb   :  { %4474 = vmatprep.mubr.bf16.mxu1 %v3720_v46  ;;  %4514 = vmatprep.mubr.bf16.mxu0 %v2156_v2  ;;  %v2293_v19 = vcombine.high %v2257_v57, %v2285_v7  ;;  %v2243_v60 = vrot.slane %v2224_v61, %v15040_v37  ;;  %v2271_v36 = vrot.slane %v2228_v5, %v15040_v37 }
  0xdc   :  { %4475 = vmatmul.mubr.bf16.gmra.mxu1 %v3718_v13  ;;  %v2393_v62 = vrot.slane %v2361_v16, %v15040_v37  ;;  %v2451_v0 = vrot.slane %v13544_v9, %v15040_v37  ;;  %v2465_v24 = vrot.slane %v13546_v52, %v15040_v37  ;;  %v1097_v40 = vcombine.low %v15450_v32, %v15481_v8  ;;  %v19634_v16 = vld [vmem:[#allocation3_spill] sm:$0xff] }
  0xdd   :  { %4650 = vmatprep.mubr.bf16.mxu1 %v2157_v54  ;;  %v2421_v27 = vrot.slane %v2365_v63, %v15040_v37  ;;  %v2479_v6 = vrot.slane %v13548_v10, %v15040_v37  ;;  %v2493_v2 = vrot.slane %v13550_v55, %v15040_v37  ;;  %v1096_v59 = vcombine.low %v15466_v53, %v15533_v18  ;;  %v19636_v63 = vld [vmem:[#allocation5_spill] sm:$0xff] }
  0xde   :  { %v2288_v17 = vcombine.low %v2243_v60, %v2271_v36  ;;  %v2360_v39 = vcombine.low %v2315_v41, %v2329_v30  ;;  %v2364_v25 = vcombine.low %v2343_v44, %v2357_v4  ;;  %v2497_v20 = vcombine.high %v2451_v0, %v2465_v24  ;;  %v14899_v4 = vld.sshfl [vmem:[%s19496_s0 + $0xa8] sm:$0x55 pattern:$0x75316420] }
  0xdf   :  { %v13552_v1 = vcombine.high %v15447_v56, %v15450_v32  ;;  %v13554_v3 = vcombine.low %v15466_v53, %v15478_v50  ;;  %v13556_v23 = vcombine.high %v1097_v40, %v15478_v50  ;;  %v2428_v49 = vcombine.low %v2393_v62, %v2421_v27 }
  0xe0   :  { %v2501_v46 = vcombine.high %v2479_v6, %v2493_v2  ;;  %v13558_v13 = vcombine.high %v15481_v8, %v1096_v59  ;;  %v2289_v54 = vcombine.high %v2243_v60, %v2271_v36  ;;  %v2429_v18 = vcombine.high %v2393_v62, %v2421_v27 }
  0xe1   :  { %v2379_v57 = vrot.slane %v2360_v39, %v15040_v37  ;;  %v2407_v7 = vrot.slane %v2364_v25, %v15040_v37  ;;  %v1219_v41 = vcombine.low %v15552_v47, %v15596_v28  ;;  %v2529_v56 = vrot.slane %v2497_v20, %v15040_v37 }
  0xe2   :  { %4515 = vmatmul.mubr.bf16.vlgmr.msra.gmra.mxu0 %v2152_v26  ;;  %v2587_v32 = vrot.slane %v13552_v1, %v15040_v37  ;;  %v2601_v53 = vrot.slane %v13554_v3, %v15040_v37  ;;  %v2615_v50 = vrot.slane %v13556_v23, %v15040_v37  ;;  %v2557_v8 = vrot.slane %v2501_v46, %v15040_v37 }
  0xe3   :  { %4522 = vmatprep.mubr.bf16.mxu0 %v2292_v42  ;;  %v2629_v30 = vrot.slane %v13558_v13, %v15040_v37  ;;  %v1163_v44 = vcombine.high %v19633_v51, %v15525_v48  ;;  %v2424_v11 = vcombine.low %v2379_v57, %v2407_v7  ;;  %v2496_v61 = vcombine.low %v2451_v0, %v2465_v24  ;;  %v19635_v42 = vld [vmem:[#allocation4_spill] sm:$0xff] }
  0xe4   :  { %4651 = vmatmul.mubr.bf16.vlgmr.msra.gmra.mxu1 %v2153_v34  ;;  %v2500_v5 = vcombine.low %v2479_v6, %v2493_v2  ;;  %v13560_v9 = vcombine.low %v19634_v16, %v15552_v47  ;;  %v13562_v52 = vcombine.high %v19634_v16, %v15552_v47  ;;  %v13564_v48 = vcombine.low %v19636_v63, %v19635_v42 }
  0xe5   :  { %4658 = vmatprep.mubr.bf16.mxu1 %v2293_v19  ;;  %v1191_v26 = vrot.slane %v1163_v44, %v15040_v37  ;;  %v13566_v10 = vcombine.high %v1219_v41, %v19635_v42  ;;  %v2564_v55 = vcombine.low %v2529_v56, %v2557_v8  ;;  %v2633_v34 = vcombine.high %v2587_v32, %v2601_v53 }
  0xe6   :  { %v2637_v19 = vcombine.high %v2615_v50, %v2629_v30  ;;  %v2425_v36 = vcombine.high %v2379_v57, %v2407_v7  ;;  %v2565_v24 = vcombine.high %v2529_v56, %v2557_v8  ;;  %v2515_v40 = vrot.slane %v2496_v61, %v15040_v37  ;;  %v19637_v7 = vld [vmem:[#allocation6_spill] sm:$0xff] }
  0xe7   :  { %v1194_v60 = vcombine.low %v14899_v4, %v1191_v26  ;;  %v2543_v27 = vrot.slane %v2500_v5, %v15040_v37  ;;  %v16112_v6 = vrot.slane %v13560_v9, %v15040_v37  ;;  %v16115_v2 = vrot.slane %v13562_v52, %v15040_v37 }
  0xe8   :  { %v16118_v59 = vrot.slane %v13564_v48, %v15040_v37  ;;  %v2665_v20 = vrot.slane %v2633_v34, %v15040_v37  ;;  %v2693_v1 = vrot.slane %v2637_v19, %v15040_v37  ;;  %v2632_v13 = vcombine.low %v2587_v32, %v2601_v53  ;;  %v19638_v53 = vld [vmem:[#allocation8_spill] sm:$0xff]  ;;  %v19641_v34 = vld [vmem:[#allocation9_spill] sm:$0xff] }
  0xe9   :  { %v1208_v47 = vrot.slane %v1194_v60, %v15040_v37  ;;  %v2560_v46 = vcombine.low %v2515_v40, %v2543_v27  ;;  %v13570_v41 = vcombine.low %v19637_v7, %v15635_v22  ;;  %v13572_v56 = vcombine.high %v19637_v7, %v15635_v22  ;;  %v19642_v60 = vld [vmem:[#allocation15_spill] sm:$0xff] }
  0xea   :  { %4523 = vmatmul.mubr.bf16.gmra.mxu0 %v2288_v17  ;;  %v16121_v17 = vrot.slane %v13566_v10, %v15040_v37  ;;  %v2700_v44 = vcombine.low %v2665_v20, %v2693_v1  ;;  %v2561_v4 = vcombine.high %v2515_v40, %v2543_v27  ;;  %v2701_v5 = vcombine.high %v2665_v20, %v2693_v1  ;;  %v19640_v10 = vld [vmem:[#allocation10_spill] sm:$0xff]  ;;  %v19644_v1 = vld [vmem:[#allocation16_spill] sm:$0xff] }
  0xeb   :  { %4530 = vmatprep.mubr.bf16.mxu0 %v2428_v49  ;;  %v1218_v3 = vcombine.low %v19636_v63, %v1208_v47  ;;  %v2651_v26 = vrot.slane %v2632_v13, %v15040_v37  ;;  %v16161_v42 = vrot.slane %v13572_v56, %v15040_v37  ;;  %v1397_v19 = vcombine.low %v15635_v22, %v19641_v34  ;;  %v14829_v22 = vld [vmem:[%s19497_s3 + $0x78] sm:$0xff]  }
  0xec   :  { %4659 = vmatmul.mubr.bf16.gmra.mxu1 %v2289_v54  ;;  %v2636_v54 = vcombine.low %v2615_v50, %v2629_v30  ;;  %v2773_v57 = vcombine.high %v16118_v59, %v16121_v17  ;;  %v19639_v50 = vld [vmem:[#allocation7_spill] sm:$0xff]  ;;  %v2768_v20 = vcombine.low %v16112_v6, %v16115_v2  ;;  %14382 = vmatprep.subr.bf16.mxu0 %v14829_v22 }
  0xed   :  { %4666 = vmatprep.mubr.bf16.mxu1 %v2429_v18  ;;  %v2769_v18 = vcombine.high %v16112_v6, %v16115_v2  ;;  %v13568_v32 = vcombine.high %v15596_v28, %v1218_v3  ;;  %v13574_v30 = vcombine.low %v19639_v50, %v19638_v53  ;;  %v16158_v28 = vrot.slane %v13570_v41, %v15040_v37  ;;  %v19645_v3 = vld [vmem:[#allocation13_spill] sm:$0xff] }
  0xee   :  { %v2679_v16 = vrot.slane %v2636_v54, %v15040_v37  ;;  %v2829_v52 = vrot.slane %v2773_v57, %v15040_v37  ;;  %v2772_v54 = vcombine.low %v16118_v59, %v16121_v17  ;;  %v14830_v6 = vld [vmem:[%s19497_s3 + $0x38] sm:$0xff]   ;;  %v13576_v56 = vcombine.high %v1397_v19, %v19638_v53 }
  0xef   :  { %v2801_v9 = vrot.slane %v2769_v18, %v15040_v37  ;;  %v16164_v63 = vrot.slane %v13568_v32, %v15040_v37  ;;  %v16167_v48 = vrot.slane %v13574_v30, %v15040_v37  ;;  %v19646_v18 = vld [vmem:[#allocation11_spill] sm:$0xff]  ;;  %14383 = vmatpush3.bf16.msra.mxu0 %v14830_v6 }
  0xf0   :  { %v2696_v47 = vcombine.low %v2651_v26, %v2679_v16  ;;  %v2697_v17 = vcombine.high %v2651_v26, %v2679_v16  ;;  %v14832_v16 = vld [vmem:[%s19497_s3 + $0xb8] sm:$0xff]   ;;  %v2815_v19 = vrot.slane %v2772_v54, %v15040_v37 }
  0xf1   :  { %v2836_v13 = vcombine.low %v2801_v9, %v2829_v52  ;;  %v2905_v2 = vcombine.high %v16164_v63, %v16158_v28  ;;  %v2909_v41 = vcombine.high %v16161_v42, %v16167_v48 }
  0xf2   :  { %v16104_v62 = vpop.f32.mrf.mxu0  ;;  %v16106_v0 = vpop.f32.mrf.mxu1  ;;  %4531 = vmatmul.mubr.bf16.gmra.mxu0 %v2424_v11 }
  0xf3   :  { %4538 = vmatprep.mubr.bf16.mxu0 %v2564_v55  ;;  %v1396_v55 = vcombine.low %v19639_v50, %v19640_v10  ;;  %v2837_v10 = vcombine.high %v2801_v9, %v2829_v52  ;;  %v2937_v9 = vrot.slane %v2905_v2, %v15040_v37  ;;  %v2965_v52 = vrot.slane %v2909_v41, %v15040_v37 }
  0xf4   :  { %v16123_v39 = vpop.f32.mrf.mxu0  ;;  %v16125_v25 = vpop.f32.mrf.mxu1  ;;  %4667 = vmatmul.mubr.bf16.gmra.mxu1 %v2425_v36  ;;  %v19643_v36 = vld [vmem:[#allocation12_spill] sm:$0xff] }
  0xf5   :  { %4674 = vmatprep.mubr.bf16.mxu1 %v2565_v24  ;;  %v1519_v24 = vcombine.low %v19643_v36, %v19642_v60  ;;  %v13580_v57 = vcombine.low %v19646_v18, %v19643_v36  ;;  %v13582_v7 = vcombine.high %v19646_v18, %v19643_v36  ;;  %v13578_v59 = vcombine.high %v19641_v34, %v1396_v55  ;;  %v19648_v55 = vld [vmem:[#allocation17_spill] sm:$0xff] }
  0xf6   :  { %v16130_v23 = vpop.f32.mrf.mxu0  ;;  %v16132_v49 = vpop.f32.mrf.mxu1  ;;  %v13590_v26 = vcombine.low %v19648_v55, %v15815_v15  ;;  %v2787_v34 = vrot.slane %v2768_v20, %v15040_v37  ;;  %v2908_v20 = vcombine.low %v16161_v42, %v16167_v48  ;;  %v2972_v48 = vcombine.low %v2937_v9, %v2965_v52 }
  0xf7   :  { %v3023_v36 = vrot.slane %v13580_v57, %v15040_v37 }
  0xf8   :  { %v16142_v8 = vpop.f32.mrf.mxu0  ;;  %v16144_v51 = vpop.f32.mrf.mxu1  ;;  %v16243_v18 = vrot.slane %v13590_v26, %v15040_v37  ;;  %v2951_v41 = vrot.slane %v2908_v20, %v15040_v37  ;;  %v13592_v26 = vcombine.high %v19648_v55, %v15815_v15 }
  0xfa   :  { %v16149_v11 = vpop.f32.mrf.mxu0  ;;  %v16151_v61 = vpop.f32.mrf.mxu1  ;;  %4539 = vmatmul.mubr.bf16.gmra.mxu0 %v2560_v46  ;;  %v1518_v46 = vcombine.low %v19645_v3, %v19644_v1  ;;  %v3009_v1 = vrot.slane %v13578_v59, %v15040_v37  ;;  %v19649_v59 = vld [vmem:[#allocation18_spill] sm:$0xff]  ;;  %v16287_v20 = vrot.slane %v13592_v26, %v15040_v37 }
  0xfb   :  { %4546 = vmatprep.mubr.bf16.mxu0 %v2700_v44  ;;  %v19647_v44 = vld [vmem:[#allocation14_spill] sm:$0xff] }
  0xfc   :  { %4675 = vmatmul.mubr.bf16.gmra.mxu1 %v2561_v4  ;;  %v16175_v40 = vpop.f32.mrf.mxu0  ;;  %v16177_v27 = vpop.f32.mrf.mxu1  ;;  %v13584_v32 = vcombine.low %v19645_v3, %v19647_v44  ;;  %v13586_v50 = vcombine.high %v1519_v24, %v19647_v44  ;;  %v13588_v53 = vcombine.high %v19642_v60, %v1518_v46  ;;  %v3037_v24 = vrot.slane %v13582_v7, %v15040_v37 }
  0xfd   :  { %4682 = vmatprep.mubr.bf16.mxu1 %v2701_v5  ;;  %v14831_v5 = vld [vmem:[%s19497_s3 + $0xf8] sm:$0xff]   ;;  %v2995_v60 = vrot.slane %v13576_v56, %v15040_v37 }
  0xfe   :  { %v16204_v30 = vpop.f32.mrf.mxu0  ;;  %v16206_v4 = vpop.f32.mrf.mxu1  ;;  %v16230_v3 = vrot.slane %v13584_v32, %v15040_v37  ;;  %v16233_v46 = vrot.slane %v13586_v50, %v15040_v37  ;;  %v16240_v54 = vrot.slane %v13588_v53, %v15040_v37  ;;  %v3045_v42 = vcombine.high %v3023_v36, %v3037_v24  ;;  %14464 = vmatprep.subr.bf16.mxu1 %v14831_v5 }
  0xff   :  { %v3041_v57 = vcombine.high %v2995_v60, %v3009_v1  ;;  %v3040_v7 = vcombine.low %v2995_v60, %v3009_v1  ;;  %v3044_v6 = vcombine.low %v3023_v36, %v3037_v24  ;;  %14465 = vmatpush3.bf16.msra.mxu1 %v14832_v16  ;;  %v2973_v50 = vcombine.high %v2937_v9, %v2965_v52  ;;  %v16260_v16 = vld [vmem:[%s19498_s2] ss:$0 sm:$0xff] }
 0x100   :  { %v16235_v22 = vpop.f32.mrf.mxu0  ;;  %v3177_v56 = vcombine.high %v16230_v3, %v16233_v46  ;;  %v3181_v5 = vcombine.high %v16240_v54, %v16243_v18  ;;  %v14024_v36 = vadd.f32 %v16123_v39, %v16104_v62  ;;  %v14118_v24 = vadd.f32 %v16125_v25, %v16106_v0 }
 0x101   :  { %v16271_v55 = vrot.slane %v3040_v7, %v15040_v37  ;;  %v16274_v52 = vrot.slane %v3044_v6, %v15040_v37  ;;  %v14027_v60 = vadd.f32 %v16142_v8, %v16130_v23 }
 0x102   :  { %4547 = vmatmul.mubr.bf16.gmra.mxu0 %v2696_v47  ;;  %v2904_v47 = vcombine.low %v16164_v63, %v16158_v28  ;;  %v2832_v28 = vcombine.low %v2787_v34, %v2815_v19  ;;  %v2833_v63 = vcombine.high %v2787_v34, %v2815_v19  ;;  %v19651_v34 = vld [vmem:[#allocation19_spill] sm:$0xff]  ;;  %v16279_v62 = vrot.slane %v3177_v56, %v15040_v37  ;;  %v14833_v56 = vld [vmem:[%s19497_s3 + $0x70] sm:$0xff]  }
 0x103   :  { %4554 = vmatprep.mubr.bf16.mxu0 %v2836_v13  ;;  %v16237_v13 = vpop.f32.mrf.mxu1  ;;  %v13594_v19 = vcombine.low %v19649_v59, %v19651_v34  ;;  %v16282_v0 = vrot.slane %v3181_v5, %v15040_v37  ;;  %v4245_v8 = vadd.f32 %v14024_v36, %v16260_v16  ;;  %v3104_v7 = vcombine.low %v16271_v55, %v16274_v52 }
 0x104   :  { %4683 = vmatmul.mubr.bf16.gmra.mxu1 %v2697_v17  ;;  %v2923_v2 = vrot.slane %v2904_v47, %v15040_v37  ;;  %v1640_v17 = vcombine.low %v19649_v59, %v15894_v33  ;;  %v3101_v33 = vrot.slane %v3045_v42, %v15040_v37  ;;  %v14121_v42 = vadd.f32 %v16144_v51, %v16132_v49 }
 0x105   :  { %4690 = vmatprep.mubr.bf16.mxu1 %v2837_v10  ;;  %v19650_v10 = vld [vmem:[#allocation20_spill] sm:$0xff]  ;;  %v16290_v23 = vrot.slane %v13594_v19, %v15040_v37  ;;  %v3244_v49 = vcombine.low %v16279_v62, %v16282_v0  ;;  %v3180_v51 = vcombine.low %v16240_v54, %v16243_v18  ;;  %14384 = vmatprep.subr.bf16.mxu0 %v14833_v56  ;;  %v19652_v18 = vld [vmem:[#allocation21_spill] sm:$0xff]  ;;  %v19655_v56 = vld [vmem:[#allocation23_spill] sm:$0xff] }
 0x106   :  { %v1641_v53 = vcombine.low %v15815_v15, %v19650_v10  ;;  %v3073_v15 = vrot.slane %v3041_v57, %v15040_v37  ;;  %v2968_v47 = vcombine.low %v2923_v2, %v2951_v41  ;;  %v13598_v25 = vcombine.high %v19650_v10, %v1640_v17 }
 0x107   :  { %v2969_v59 = vcombine.high %v2923_v2, %v2951_v41  ;;  %v3176_v17 = vcombine.low %v16230_v3, %v16233_v46  ;;  %v3313_v3 = vcombine.high %v16287_v20, %v16290_v23  ;;  %v1763_v46 = vcombine.low %v15903_v35, %v15933_v58 }
 0x108   :  { %v14034_v44 = vpop.f32.mrf.mxu0  ;;  %v13596_v39 = vcombine.high %v1641_v53, %v19651_v34  ;;  %v3109_v57 = vcombine.high %v3073_v15, %v3101_v33  ;;  %v16315_v53 = vrot.slane %v13598_v25, %v15040_v37  ;;  %v14030_v41 = vadd.f32 %v16175_v40, %v16149_v11 }
 0x109   :  { %v14128_v32 = vpop.f32.mrf.mxu1  ;;  %v14124_v54 = vadd.f32 %v16177_v27, %v16151_v61  ;;  %v13600_v26 = vcombine.low %v19652_v18, %v15903_v35  ;;  %v14834_v27 = vld [vmem:[%s19497_s3 + $0x30] sm:$0xff]  }
 0x10a   :  { %4555 = vmatmul.mubr.bf16.gmra.mxu0 %v2832_v28  ;;  %v14035_v9 = vpop.f32.mrf.mxu0  ;;  %v16312_v10 = vrot.slane %v13596_v39, %v15040_v37  ;;  %v4253_v40 = vadd.f32 %v14030_v41, %v16260_v16 }
 0x10b   :  { %4562 = vmatprep.mubr.bf16.mxu0 %v2972_v48  ;;  %v14129_v1 = vpop.f32.mrf.mxu1  ;;  %v3108_v48 = vcombine.low %v3073_v15, %v3101_v33  ;;  %v14033_v33 = vadd.f32 %v16235_v22, %v16204_v30  ;;  %v14036_v34 = vadd.f32 %v14035_v9, %v14034_v44  ;;  %v19653_v15 = vld [vmem:[#allocation22_spill] sm:$0xff]  ;;  %v14835_v30 = vld [vmem:[%s19497_s3 + $0xf0] sm:$0xff]   ;;  %14385 = vmatpush3.bf16.msra.mxu0 %v14834_v27 }
 0x10c   :  { %4691 = vmatmul.mubr.bf16.gmra.mxu1 %v2833_v63  ;;  %v14037_v28 = vpop.f32.mrf.mxu0  ;;  %v4248_v63 = vadd.f32 %v14027_v60, %v16260_v16  ;;  %v14130_v19 = vadd.f32 %v14129_v1, %v14128_v32  ;;  %v19654_v60 = vld [vmem:[#allocation24_spill] sm:$0xff]  ;;  %v14127_v32 = vadd.f32 %v16237_v13, %v16206_v4  ;;  %v16349_v1 = vadd.f32 %v14124_v54, %v4253_v40 }
 0x10d   :  { %4698 = vmatprep.mubr.bf16.mxu1 %v2973_v50  ;;  %v14131_v6 = vpop.f32.mrf.mxu1  ;;  %v16303_v50 = vadd.f32 %v14118_v24, %v4245_v8  ;;  %v13602_v24 = vcombine.high %v19652_v18, %v15903_v35  ;;  %v13604_v11 = vcombine.low %v19654_v60, %v19653_v15  ;;  %v14836_v22 = vld [vmem:[%s19497_s3 + $0xb0] sm:$0xff]   ;;  %v1829_v35 = vcombine.high %v15968_v38, %v15978_v12 }
 0x10e   :  { %v16305_v5 = vadd.f32 %v14121_v42, %v4248_v63  ;;  %v14038_v2 = vpop.f32.mrf.mxu0  ;;  %v4256_v44 = vadd.f32 %v14033_v33, %v16260_v16  ;;  %v4261_v9 = vadd.f32 %v14036_v34, %v16260_v16  ;;  %14466 = vmatprep.subr.bf16.mxu1 %v14835_v30  ;;  %v3317_v25 = vcombine.high %v16312_v10, %v16315_v53 }
 0x10f   :  { %v14132_v36 = vpop.f32.mrf.mxu1  ;;  %v14039_v61 = vadd.f32 %v14038_v2, %v14037_v28  ;;  %v13606_v28 = vcombine.high %v1763_v46, %v19653_v15  ;;  %14467 = vmatpush3.bf16.msra.mxu1 %v14836_v22  ;;  %v3105_v13 = vcombine.high %v16271_v55, %v16274_v52  ;;  %v3195_v63 = vrot.slane %v3176_v17, %v15040_v37 }
 0x110   :  { %v14133_v39 = vadd.f32 %v14132_v36, %v14131_v6  ;;  %v16355_v38 = vadd.f32 %v14127_v32, %v4256_v44  ;;  %v16357_v12 = vadd.f32 %v14130_v19, %v4261_v9  ;;  %v3223_v42 = vrot.slane %v3180_v51, %v15040_v37 }
 0x111   :  { %v3345_v6 = vrot.slane %v3313_v3, %v15040_v37  ;;  %v1857_v2 = vrot.slane %v1829_v35, %v15040_v37  ;;  %v16372_v55 = vrot.slane %v13600_v26, %v15040_v37  ;;  %v16375_v52 = vrot.slane %v13602_v24, %v15040_v37 }
 0x112   :  { %4563 = vmatmul.mubr.bf16.gmra.mxu0 %v2968_v47  ;;  %v4264_v47 = vadd.f32 %v14039_v61, %v16260_v16  ;;  %v16382_v3 = vrot.slane %v13606_v28, %v15040_v37  ;;  %v3240_v26 = vcombine.low %v3195_v63, %v3223_v42  ;;  %v3316_v34 = vcombine.low %v16312_v10, %v16315_v53 }
 0x113   :  { %4570 = vmatprep.mubr.bf16.mxu0 %v3108_v48  ;;  %v13610_v19 = vcombine.low %v15962_v31, %v16001_v21  ;;  %v13614_v10 = vcombine.low %v16004_v45, %v16007_v43  ;;  %v3241_v53 = vcombine.high %v3195_v63, %v3223_v42  ;;  %v14840_v63 = vld [vmem:[%s19497_s3 + $0xa8] sm:$0xff]  }
 0x114   :  { %4699 = vmatmul.mubr.bf16.gmra.mxu1 %v2969_v59  ;;  %v16363_v48 = vadd.f32 %v14133_v39, %v4264_v47  ;;  %v1843_v59 = vrot.slane %v19655_v56, %v15040_v37  ;;  %v3359_v44 = vrot.slane %v3316_v34, %v15040_v37  ;;  %v14837_v47 = vld [vmem:[%s19497_s3 + $0x68] sm:$0xff]   ;;  %v3448_v56 = vcombine.low %v16372_v55, %v16375_v52 }
 0x115   :  { %4706 = vmatprep.mubr.bf16.mxu1 %v3109_v57  ;;  %v3245_v57 = vcombine.high %v16279_v62, %v16282_v0  ;;  %v3373_v62 = vrot.slane %v3317_v25, %v15040_v37  ;;  %v16379_v0 = vrot.slane %v13604_v11, %v15040_v37  ;;  %v16410_v9 = vrot.slane %v13610_v19, %v15040_v37  ;;  %v14838_v39 = vld [vmem:[%s19497_s3 + $0x28] sm:$0xff]  }
 0x116   :  { %v1860_v36 = vcombine.low %v1843_v59, %v1857_v2  ;;  %14386 = vmatprep.subr.bf16.mxu0 %v14837_v47 }
 0x117   :  { %v14040_v8 = vpop.f32.mrf.mxu0  ;;  %v14134_v4 = vpop.f32.mrf.mxu1  ;;  %v3380_v61 = vcombine.low %v3345_v6, %v3373_v62  ;;  %v3381_v22 = vcombine.high %v3345_v6, %v3373_v62  ;;  %14387 = vmatpush3.bf16.msra.mxu0 %v14838_v39  ;;  %v3452_v59 = vcombine.low %v16379_v0, %v16382_v3 }
 0x119   :  { %v14041_v46 = vpop.f32.mrf.mxu0  ;;  %v14135_v41 = vpop.f32.mrf.mxu1 }
 0x11a   :  { %4571 = vmatmul.mubr.bf16.gmra.mxu0 %v3104_v7  ;;  %v14042_v17 = vadd.f32 %v14041_v46, %v14040_v8  ;;  %v14136_v51 = vadd.f32 %v14135_v41, %v14134_v4  ;;  %v1762_v7 = vcombine.low %v19654_v60, %v15952_v29  ;;  %v3449_v29 = vcombine.high %v16372_v55, %v16375_v52 }
 0x11b   :  { %4578 = vmatprep.mubr.bf16.mxu0 %v3244_v49  ;;  %v14043_v54 = vpop.f32.mrf.mxu0  ;;  %v14137_v18 = vpop.f32.mrf.mxu1  ;;  %v3312_v49 = vcombine.low %v16287_v20, %v16290_v23  ;;  %v13612_v60 = vcombine.high %v15962_v31, %v16001_v21  ;;  %v3453_v20 = vcombine.high %v16379_v0, %v16382_v3  ;;  %v1874_v31 = vrot.slane %v1860_v36, %v15040_v37 }
 0x11c   :  { %4707 = vmatmul.mubr.bf16.gmra.mxu1 %v3105_v13  ;;  %v4269_v33 = vadd.f32 %v14042_v17, %v16260_v16  ;;  %v13608_v23 = vcombine.high %v15933_v58, %v1762_v7  ;;  %v3481_v32 = vrot.slane %v3449_v29, %v15040_v37  ;;  %v3581_v4 = vrot.slane %v13614_v10, %v15040_v37  ;;  %v14839_v13 = vld [vmem:[%s19497_s3 + $0xe8] sm:$0xff]  }
 0x11d   :  { %4714 = vmatprep.mubr.bf16.mxu1 %v3245_v57  ;;  %v14044_v24 = vpop.f32.mrf.mxu0  ;;  %v14138_v15 = vpop.f32.mrf.mxu1  ;;  %v3331_v35 = vrot.slane %v3312_v49, %v15040_v37  ;;  %v3509_v25 = vrot.slane %v3453_v20, %v15040_v37  ;;  %v3567_v8 = vrot.slane %v13612_v60, %v15040_v37  ;;  %v1884_v42 = vcombine.low %v16004_v45, %v1874_v31 }
 0x11e   :  { %v16397_v11 = vadd.f32 %v14136_v51, %v4269_v33  ;;  %v14045_v40 = vadd.f32 %v14044_v24, %v14043_v54  ;;  %v14139_v30 = vadd.f32 %v14138_v15, %v14137_v18  ;;  %v3539_v28 = vrot.slane %v13608_v23, %v15040_v37  ;;  %14468 = vmatprep.subr.bf16.mxu1 %v14839_v13 }
 0x11f   :  { %v1885_v57 = vcombine.low %v16001_v21, %v16010_v14  ;;  %v3376_v6 = vcombine.low %v3331_v35, %v3359_v44  ;;  %v3516_v2 = vcombine.low %v3481_v32, %v3509_v25  ;;  %v3589_v41 = vcombine.high %v3567_v8, %v3581_v4  ;;  %14469 = vmatpush3.bf16.msra.mxu1 %v14840_v63 }
 0x120   :  { %v4272_v27 = vadd.f32 %v14045_v40, %v16260_v16  ;;  %v3585_v46 = vcombine.high %v3539_v28, %v16410_v9  ;;  %v3377_v17 = vcombine.high %v3331_v35, %v3359_v44  ;;  %v3517_v62 = vcombine.high %v3481_v32, %v3509_v25 }
 0x121   :  { %v13616_v21 = vcombine.high %v1885_v57, %v16007_v43  ;;  %v13618_v7 = vcombine.high %v16010_v14, %v1884_v42  ;;  %v3467_v55 = vrot.slane %v3448_v56, %v15040_v37  ;;  %v3495_v52 = vrot.slane %v3452_v59, %v15040_v37 }
 0x122   :  { %4579 = vmatmul.mubr.bf16.gmra.mxu0 %v3240_v26  ;;  %v16412_v58 = vadd.f32 %v14139_v30, %v4272_v27  ;;  %v3617_v54 = vrot.slane %v3585_v46, %v15040_v37  ;;  %v3645_v18 = vrot.slane %v3589_v41, %v15040_v37  ;;  %v3584_v24 = vcombine.low %v3539_v28, %v16410_v9 }
 0x123   :  { %4586 = vmatprep.mubr.bf16.mxu0 %v3380_v61  ;;  %v3671_v43 = vrot.slane %v13616_v21, %v15040_v37  ;;  %v3685_v14 = vrot.slane %v13618_v7, %v15040_v37  ;;  %v3512_v36 = vcombine.low %v3467_v55, %v3495_v52  ;;  %v3588_v15 = vcombine.low %v3567_v8, %v3581_v4 }
 0x124   :  { %4715 = vmatmul.mubr.bf16.gmra.mxu1 %v3241_v53  ;;  %v3652_v40 = vcombine.low %v3617_v54, %v3645_v18  ;;  %v3513_v23 = vcombine.high %v3467_v55, %v3495_v52  ;;  %v3653_v10 = vcombine.high %v3617_v54, %v3645_v18 }
 0x125   :  { %4722 = vmatprep.mubr.bf16.mxu1 %v3381_v22  ;;  %v3689_v53 = vcombine.high %v3671_v43, %v3685_v14  ;;  %v3603_v22 = vrot.slane %v3584_v24, %v15040_v37  ;;  %v3631_v35 = vrot.slane %v3588_v15, %v15040_v37  ;;  %v3688_v47 = vcombine.low %v3671_v43, %v3685_v14 }
 0x127   :  { %v3717_v44 = vrot.slane %v3689_v53, %v15040_v37  ;;  %v3648_v32 = vcombine.low %v3603_v22, %v3631_v35  ;;  %v3649_v9 = vcombine.high %v3603_v22, %v3631_v35  ;;  %v3703_v13 = vrot.slane %v3688_v47, %v15040_v37 }
 0x128   :  { %v14046_v51 = vpop.f32.mrf.mxu0  ;;  %v14140_v45 = vpop.f32.mrf.mxu1 }
 0x129   :  { %v3721_v39 = vcombine.high %v3717_v44, %v3717_v44  ;;  %v3719_v46 = vcombine.high %v3703_v13, %v3703_v13 }
 0x12a   :  { %4587 = vmatmul.mubr.bf16.gmra.mxu0 %v3376_v6  ;;  %v14047_v0 = vpop.f32.mrf.mxu0  ;;  %v14141_v3 = vpop.f32.mrf.mxu1 }
 0x12b   :  { %4594 = vmatprep.mubr.bf16.mxu0 %v3516_v2  ;;  %v14048_v26 = vadd.f32 %v14047_v0, %v14046_v51  ;;  %v14142_v33 = vadd.f32 %v14141_v3, %v14140_v45 }
 0x12c   :  { %4723 = vmatmul.mubr.bf16.gmra.mxu1 %v3377_v17  ;;  %v14049_v49 = vpop.f32.mrf.mxu0  ;;  %v14143_v34 = vpop.f32.mrf.mxu1 }
 0x12d   :  { %4730 = vmatprep.mubr.bf16.mxu1 %v3517_v62  ;;  %v4277_v19 = vadd.f32 %v14048_v26, %v16260_v16 }
 0x12e   :  { %v14050_v29 = vpop.f32.mrf.mxu0  ;;  %v14144_v60 = vpop.f32.mrf.mxu1 }
 0x12f   :  { %v16448_v61 = vadd.f32 %v14142_v33, %v4277_v19  ;;  %v14051_v20 = vadd.f32 %v14050_v29, %v14049_v49  ;;  %v14145_v30 = vadd.f32 %v14144_v60, %v14143_v34  ;;  %v14841_v33 = vld [vmem:[%s19497_s3 + $0x60] sm:$0xff]  }
 0x130   :  { %v14842_v49 = vld [vmem:[%s19497_s3 + $0x20] sm:$0xff]   ;;  %14388 = vmatprep.subr.bf16.mxu0 %v14841_v33  ;;  %v14852_v33 = vld [vmem:[%s19497_s3 + $0x90] sm:$0xff]  }
 0x131   :  { %v4280_v27 = vadd.f32 %v14051_v20, %v16260_v16  ;;  %v14843_v34 = vld [vmem:[%s19497_s3 + $0xe0] sm:$0xff]   ;;  %14389 = vmatpush3.bf16.msra.mxu0 %v14842_v49  ;;  %v14853_v49 = vld [vmem:[%s19497_s3 + $0x48] sm:$0xff]  }
 0x132   :  { %4595 = vmatmul.mubr.bf16.gmra.mxu0 %v3512_v36  ;;  %14470 = vmatprep.subr.bf16.mxu1 %v14843_v34  ;;  %v14844_v20 = vld [vmem:[%s19497_s3 + $0xa0] sm:$0xff]   ;;  %v14855_v34 = vld [vmem:[%s19497_s3 + $0xc8] sm:$0xff]  }
 0x133   :  { %4602 = vmatprep.mubr.bf16.mxu0 %v3652_v40  ;;  %v16453_v31 = vadd.f32 %v14145_v30, %v4280_v27  ;;  %14471 = vmatpush3.bf16.msra.mxu1 %v14844_v20 }
 0x134   :  { %4731 = vmatmul.mubr.bf16.gmra.mxu1 %v3513_v23 }
 0x135   :  { %4738 = vmatprep.mubr.bf16.mxu1 %v3653_v10 }
 0x139   :  { %v14052_v25 = vpop.f32.mrf.mxu0  ;;  %v14146_v28 = vpop.f32.mrf.mxu1 }
 0x13a   :  { %4603 = vmatmul.mubr.bf16.gmra.mxu0 %v3648_v32 }
 0x13b   :  { %4610 = vmatprep.mubr.bf16.mxu0 %v3717_v44  ;;  %v14053_v8 = vpop.f32.mrf.mxu0  ;;  %v14147_v4 = vpop.f32.mrf.mxu1 }
 0x13c   :  { %4739 = vmatmul.mubr.bf16.gmra.mxu1 %v3649_v9  ;;  %v14054_v63 = vadd.f32 %v14053_v8, %v14052_v25  ;;  %v14148_v42 = vadd.f32 %v14147_v4, %v14146_v28  ;;  %v14845_v28 = vld [vmem:[%s19497_s3 + $0x58] sm:$0xff]  }
 0x13d   :  { %4746 = vmatprep.mubr.bf16.mxu1 %v3721_v39  ;;  %v14055_v57 = vpop.f32.mrf.mxu0  ;;  %v14149_v6 = vpop.f32.mrf.mxu1  ;;  %v14847_v8 = vld [vmem:[%s19497_s3 + $0xd8] sm:$0xff]   ;;  %14390 = vmatprep.subr.bf16.mxu0 %v14845_v28  ;;  %v14858_v28 = vld [vmem:[%s19497_s3] sm:$0xff]  }
 0x13e   :  { %v4285_v56 = vadd.f32 %v14054_v63, %v16260_v16  ;;  %v14846_v4 = vld [vmem:[%s19497_s3 + $0x18] sm:$0xff]   ;;  %14472 = vmatprep.subr.bf16.mxu1 %v14847_v8  ;;  %v14860_v8 = vld [vmem:[%s19497_s3 + $0x80] sm:$0xff]  }
 0x13f   :  { %v14056_v59 = vpop.f32.mrf.mxu0  ;;  %v14150_v2 = vpop.f32.mrf.mxu1  ;;  %14391 = vmatpush3.bf16.msra.mxu0 %v14846_v4 }
 0x140   :  { %v16458_v41 = vadd.f32 %v14148_v42, %v4285_v56  ;;  %v14057_v17 = vadd.f32 %v14056_v59, %v14055_v57  ;;  %v14151_v45 = vadd.f32 %v14150_v2, %v14149_v6 }
 0x142   :  { %4611 = vmatmul.mubr.bf16.gmra.mxu0 %v3703_v13  ;;  %v4288_v51 = vadd.f32 %v14057_v17, %v16260_v16  ;;  %v14848_v13 = vld [vmem:[%s19497_s3 + $0x98] sm:$0xff]  }
 0x143   :  { %14473 = vmatpush3.bf16.msra.mxu1 %v14848_v13 }
 0x144   :  { %4747 = vmatmul.mubr.bf16.gmra.mxu1 %v3719_v46  ;;  %v16461_v62 = vadd.f32 %v14151_v45, %v4288_v51  ;;  %v14058_v21 = vpop.f32.mrf.mxu0  ;;  %v14152_v7 = vpop.f32.mrf.mxu1 }
 0x146   :  { %v14059_v55 = vpop.f32.mrf.mxu0  ;;  %v14153_v52 = vpop.f32.mrf.mxu1 }
 0x147   :  { %v14060_v0 = vadd.f32 %v14059_v55, %v14058_v21  ;;  %v14154_v3 = vadd.f32 %v14153_v52, %v14152_v7  ;;  %v14849_v52 = vld [vmem:[%s19497_s3 + $0x50] sm:$0xff]  }
 0x148   :  { %v14061_v54 = vpop.f32.mrf.mxu0  ;;  %v14155_v18 = vpop.f32.mrf.mxu1  ;;  %14392 = vmatprep.subr.bf16.mxu0 %v14849_v52 }
 0x149   :  { %v4293_v26 = vadd.f32 %v14060_v0, %v16260_v16 }
 0x14a   :  { %v14062_v43 = vpop.f32.mrf.mxu0  ;;  %v14156_v14 = vpop.f32.mrf.mxu1 }
 0x14b   :  { %v16473_v19 = vadd.f32 %v14154_v3, %v4293_v26  ;;  %v14063_v36 = vadd.f32 %v14062_v43, %v14061_v54  ;;  %v14157_v15 = vadd.f32 %v14156_v14, %v14155_v18  ;;  %v14851_v18 = vld [vmem:[%s19497_s3 + $0xd0] sm:$0xff]   ;;  %v14854_v43 = vld [vmem:[%s19497_s3 + $0x8] sm:$0xff]  }
 0x14c   :  { %v14850_v26 = vld [vmem:[%s19497_s3 + $0x10] sm:$0xff]   ;;  %14474 = vmatprep.subr.bf16.mxu1 %v14851_v18  ;;  %v14856_v14 = vld [vmem:[%s19497_s3 + $0x88] sm:$0xff]  }
 0x14d   :  { %v4296_v24 = vadd.f32 %v14063_v36, %v16260_v16  ;;  %14393 = vmatpush3.bf16.msra.mxu0 %v14850_v26  ;;  %14475 = vmatpush3.bf16.msra.mxu1 %v14852_v33 }
 0x14e   :  { %14394 = vmatprep.subr.bf16.mxu0 %v14853_v49  ;;  %14476 = vmatprep.subr.bf16.mxu1 %v14855_v34 }
 0x14f   :  { %v16476_v29 = vadd.f32 %v14157_v15, %v4296_v24 }
 0x151   :  { %14395 = vmatpush3.bf16.msra.mxu0 %v14854_v43  ;;  %14477 = vmatpush3.bf16.msra.mxu1 %v14856_v14 }
 0x153   :  { %v14064_v60 = vpop.f32.mrf.mxu0  ;;  %v14158_v40 = vpop.f32.mrf.mxu1 }
 0x155   :  { %v14065_v23 = vpop.f32.mrf.mxu0  ;;  %v14159_v10 = vpop.f32.mrf.mxu1 }
 0x156   :  { %v14066_v53 = vadd.f32 %v14065_v23, %v14064_v60  ;;  %v14160_v27 = vadd.f32 %v14159_v10, %v14158_v40 }
 0x157   :  { %v14067_v30 = vpop.f32.mrf.mxu0  ;;  %v14161_v22 = vpop.f32.mrf.mxu1 }
 0x158   :  { %v4301_v35 = vadd.f32 %v14066_v53, %v16260_v16 }
 0x159   :  { %v14068_v44 = vpop.f32.mrf.mxu0  ;;  %v14162_v32 = vpop.f32.mrf.mxu1 }
 0x15a   :  { %v16482_v9 = vadd.f32 %v14160_v27, %v4301_v35  ;;  %v14069_v47 = vadd.f32 %v14068_v44, %v14067_v30  ;;  %v14163_v25 = vadd.f32 %v14162_v32, %v14161_v22 }
 0x15c   :  { %v4304_v39 = vadd.f32 %v14069_v47, %v16260_v16 }
 0x15e   :  { %v16497_v63 = vadd.f32 %v14163_v25, %v4304_v39  ;;  %v14857_v39 = vld [vmem:[%s19497_s3 + $0x40] sm:$0xff]  }
 0x15f   :  { %v14859_v25 = vld [vmem:[%s19497_s3 + $0xc0] sm:$0xff]   ;;  %14396 = vmatprep.subr.bf16.mxu0 %v14857_v39 }
 0x160   :  { %14478 = vmatprep.subr.bf16.mxu1 %v14859_v25  ;;  %14397 = vmatpush3.bf16.msra.mxu0 %v14858_v28 }
 0x161   :  { %14479 = vmatpush3.bf16.msra.mxu1 %v14860_v8 }
 0x162   :  { %v14070_v42 = vpop.f32.mrf.mxu0  ;;  %v14164_v57 = vpop.f32.mrf.mxu1 }
 0x164   :  { %v14071_v6 = vpop.f32.mrf.mxu0  ;;  %v14165_v56 = vpop.f32.mrf.mxu1 }
 0x165   :  { %v14072_v59 = vadd.f32 %v14071_v6, %v14070_v42  ;;  %v14166_v2 = vadd.f32 %v14165_v56, %v14164_v57 }
 0x166   :  { %v14073_v46 = vpop.f32.mrf.mxu0  ;;  %v14167_v17 = vpop.f32.mrf.mxu1 }
 0x167   :  { %v4309_v51 = vadd.f32 %v14072_v59, %v16260_v16 }
 0x168   :  { %v14074_v45 = vpop.f32.mrf.mxu0  ;;  %v14168_v21 = vpop.f32.mrf.mxu1 }
 0x169   :  { %v16500_v7 = vadd.f32 %v14166_v2, %v4309_v51  ;;  %v14075_v55 = vadd.f32 %v14074_v45, %v14073_v46  ;;  %v14169_v3 = vadd.f32 %v14168_v21, %v14167_v17 }
 0x16b   :  { %v4312_v0 = vadd.f32 %v14075_v55, %v16260_v16 }
 0x16d   :  { %v16506_v54 = vadd.f32 %v14169_v3, %v4312_v0 }
 0x175   :  { %v14076_v36 = vpop.f32.mrf.mxu0  ;;  %v14170_v24 = vpop.f32.mrf.mxu1 }
 0x177   :  { %v14077_v15 = vpop.f32.mrf.mxu0  ;;  %v14171_v60 = vpop.f32.mrf.mxu1 }
 0x178   :  { %v14078_v40 = vadd.f32 %v14077_v15, %v14076_v36  ;;  %v14172_v20 = vadd.f32 %v14171_v60, %v14170_v24 }
 0x179   :  { %v14079_v23 = vpop.f32.mrf.mxu0  ;;  %v14173_v10 = vpop.f32.mrf.mxu1 }
 0x17a   :  { %v4317_v53 = vadd.f32 %v14078_v40, %v16260_v16 }
 0x17b   :  { %v14080_v27 = vpop.f32.mrf.mxu0  ;;  %v14174_v30 = vpop.f32.mrf.mxu1 }
 0x17c   :  { %v16530_v22 = vadd.f32 %v14172_v20, %v4317_v53  ;;  %v14081_v35 = vadd.f32 %v14080_v27, %v14079_v23  ;;  %v14175_v32 = vadd.f32 %v14174_v30, %v14173_v10 }
 0x17e   :  { %v4320_v44 = vadd.f32 %v14081_v35, %v16260_v16 }
 0x180   :  { %v16533_v47 = vadd.f32 %v14175_v32, %v4320_v44 }
 0x184   :  { %v14082_v4 = vpop.f32.mrf.mxu0  ;;  %v14176_v13 = vpop.f32.mrf.mxu1 }
 0x186   :  { %v14083_v42 = vpop.f32.mrf.mxu0  ;;  %v14177_v57 = vpop.f32.mrf.mxu1 }
 0x187   :  { %v14084_v6 = vadd.f32 %v14083_v42, %v14082_v4  ;;  %v14178_v56 = vadd.f32 %v14177_v57, %v14176_v13 }
 0x188   :  { %v14085_v59 = vpop.f32.mrf.mxu0  ;;  %v14179_v2 = vpop.f32.mrf.mxu1 }
 0x189   :  { %v4325_v46 = vadd.f32 %v14084_v6, %v16260_v16 }
 0x18a   :  { %v14086_v17 = vpop.f32.mrf.mxu0  ;;  %v14180_v51 = vpop.f32.mrf.mxu1 }
 0x18b   :  { %v16548_v45 = vadd.f32 %v14178_v56, %v4325_v46  ;;  %v14087_v21 = vadd.f32 %v14086_v17, %v14085_v59  ;;  %v14181_v52 = vadd.f32 %v14180_v51, %v14179_v2 }
 0x18d   :  { %19656 = vst [vmem:[#allocation2_spill] sm:$0xff] %v16548_v45  ;;  %v4328_v55 = vadd.f32 %v14087_v21, %v16260_v16  ;;  %v14088_v0 = vpop.f32.mrf.mxu0  ;;  %v14182_v3 = vpop.f32.mrf.mxu1 }
 0x18f   :  { %v16551_v18 = vadd.f32 %v14181_v52, %v4328_v55  ;;  %v14089_v26 = vpop.f32.mrf.mxu0  ;;  %v14183_v33 = vpop.f32.mrf.mxu1 }
 0x190   :  { %v14090_v49 = vadd.f32 %v14089_v26, %v14088_v0  ;;  %v14184_v34 = vadd.f32 %v14183_v33, %v14182_v3 }
 0x191   :  { %19657 = vst [vmem:[#allocation3_spill] sm:$0xff] %v16551_v18  ;;  %v14091_v43 = vpop.f32.mrf.mxu0  ;;  %v14185_v14 = vpop.f32.mrf.mxu1 }
 0x192   :  { %v4333_v36 = vadd.f32 %v14090_v49, %v16260_v16 }
 0x193   :  { %v14092_v24 = vpop.f32.mrf.mxu0  ;;  %v14186_v15 = vpop.f32.mrf.mxu1 }
 0x194   :  { %v16554_v60 = vadd.f32 %v14184_v34, %v4333_v36  ;;  %v14093_v40 = vadd.f32 %v14092_v24, %v14091_v43  ;;  %v14187_v23 = vadd.f32 %v14186_v15, %v14185_v14 }
 0x196   :  { %19658 = vst [vmem:[#allocation4_spill] sm:$0xff] %v16554_v60  ;;  %v4336_v20 = vadd.f32 %v14093_v40, %v16260_v16 }
 0x198   :  { %v16557_v10 = vadd.f32 %v14187_v23, %v4336_v20 }
 0x19a   :  { %19659 = vst [vmem:[#allocation5_spill] sm:$0xff] %v16557_v10  ;;  %v14094_v53 = vpop.f32.mrf.mxu0 }
 0x19c   :  { %v14188_v27 = vpop.f32.mrf.mxu1  ;;  %v14095_v30 = vpop.f32.mrf.mxu0 }
 0x19d   :  { %v14096_v35 = vadd.f32 %v14095_v30, %v14094_v53 }
 0x19e   :  { %v14189_v44 = vpop.f32.mrf.mxu1  ;;  %v14097_v32 = vpop.f32.mrf.mxu0 }
 0x19f   :  { %v4341_v39 = vadd.f32 %v14096_v35, %v16260_v16  ;;  %v14190_v25 = vadd.f32 %v14189_v44, %v14188_v27 }
 0x1a0   :  { %v14191_v28 = vpop.f32.mrf.mxu1  ;;  %v14098_v8 = vpop.f32.mrf.mxu0 }
 0x1a1   :  { %v16560_v4 = vadd.f32 %v14190_v25, %v4341_v39 }
 0x1a2   :  { %v14192_v13 = vpop.f32.mrf.mxu1  ;;  %v14210_v42 = vpop.f32.mrf.mxu0 }
 0x1a3   :  { %19660 = vst [vmem:[#allocation6_spill] sm:$0xff] %v16560_v4 }
 0x1a4   :  { %v14304_v57 = vpop.f32.mrf.mxu1  ;;  %v14211_v6 = vpop.f32.mrf.mxu0 }
 0x1a5   :  { %v14212_v56 = vadd.f32 %v14211_v6, %v14210_v42 }
 0x1a6   :  { %v14305_v59 = vpop.f32.mrf.mxu1  ;;  %v14213_v2 = vpop.f32.mrf.mxu0 }
 0x1a7   :  { %v4517_v46 = vadd.f32 %v14212_v56, %v16303_v50  ;;  %v14306_v17 = vadd.f32 %v14305_v59, %v14304_v57 }
 0x1a8   :  { %v14307_v51 = vpop.f32.mrf.mxu1  ;;  %v14214_v21 = vpop.f32.mrf.mxu0 }
 0x1a9   :  { %v4653_v55 = vadd.f32 %v14306_v17, %v4517_v46  ;;  %v14215_v52 = vadd.f32 %v14214_v21, %v14213_v2 }
 0x1aa   :  { %v14308_v16 = vpop.f32.mrf.mxu1  ;;  %v14216_v0 = vpop.f32.mrf.mxu0 }
 0x1ab   :  { %v4520_v3 = vadd.f32 %v14215_v52, %v16305_v5  ;;  %v14309_v26 = vadd.f32 %v14308_v16, %v14307_v51  ;;  %v4754_v24 = vmax.f32 %v4653_v55, 0.0 }
 0x1ac   :  { %v14310_v33 = vpop.f32.mrf.mxu1  ;;  %v14217_v49 = vpop.f32.mrf.mxu0 }
 0x1ad   :  { %v4656_v34 = vadd.f32 %v14309_v26, %v4520_v3  ;;  %v14218_v43 = vadd.f32 %v14217_v49, %v14216_v0 }
 0x1ae   :  { %v14311_v14 = vpop.f32.mrf.mxu1  ;;  %v14219_v36 = vpop.f32.mrf.mxu0 }
 0x1af   :  { %v4755_v15 = vmax.f32 %v4656_v34, 0.0  ;;  %v4525_v50 = vadd.f32 %v14218_v43, %v16349_v1  ;;  %v14312_v40 = vadd.f32 %v14311_v14, %v14310_v33 }
 0x1b0   :  { %v14313_v20 = vpop.f32.mrf.mxu1  ;;  %v14220_v23 = vpop.f32.mrf.mxu0 }
 0x1b1   :  { %v4779_v53 = vpack.c.bf16 %v4755_v15, %v4754_v24  ;;  %v13683_v27 = vpack.c.bf16 %v4755_v15, %v4755_v15  ;;  %v4661_v30 = vadd.f32 %v14312_v40, %v4525_v50  ;;  %v14221_v35 = vadd.f32 %v14220_v23, %v14219_v36 }
 0x1b2   :  { %v14314_v44 = vpop.f32.mrf.mxu1  ;;  %v14222_v5 = vpop.f32.mrf.mxu0 }
 0x1b3   :  { %v4812_v32 = vrot.slane %v4779_v53, %v15040_v37  ;;  %v4819_v39 = vrot.slane %v13683_v27, %v15040_v37  ;;  %v4528_v25 = vadd.f32 %v14221_v35, %v16355_v38  ;;  %v14315_v28 = vadd.f32 %v14314_v44, %v14313_v20 }
 0x1b4   :  { %v14316_v8 = vpop.f32.mrf.mxu1  ;;  %v14223_v13 = vpop.f32.mrf.mxu0  ;;  %v4756_v55 = vmax.f32 %v4661_v30, 0.0 }
 0x1b5   :  { %v4820_v42 = vcombine.high %v4812_v32, %v4812_v32  ;;  %v4821_v1 = vcombine.high %v4819_v39, %v4819_v39  ;;  %v4835_v57 = vrot.slane %v4819_v39, %v15040_v37  ;;  %v4828_v6 = vrot.slane %v4812_v32, %v15040_v37 }
 0x1b6   :  { %v4664_v56 = vadd.f32 %v14315_v28, %v4528_v25  ;;  %v14224_v59 = vadd.f32 %v14223_v13, %v14222_v5  ;;  %v14317_v2 = vpop.f32.mrf.mxu1  ;;  %v14225_v46 = vpop.f32.mrf.mxu0 }
 0x1b7   :  { %v4842_v17 = vrot.slane %v4820_v42, %v15040_v37  ;;  %v4849_v51 = vrot.slane %v4821_v1, %v15040_v37  ;;  %v4851_v21 = vcombine.high %v4835_v57, %v4835_v57  ;;  %v5439_v38 = vrot.slane %v4835_v57, %v15040_v37 }
 0x1b8   :  { %v4757_v52 = vmax.f32 %v4664_v56, 0.0  ;;  %v4533_v16 = vadd.f32 %v14224_v59, %v16357_v12  ;;  %v14318_v0 = vadd.f32 %v14317_v2, %v14316_v8  ;;  %v14319_v3 = vpop.f32.mrf.mxu1  ;;  %v14226_v26 = vpop.f32.mrf.mxu0 }
 0x1b9   :  { %v5417_v33 = vcombine.low %v4828_v6, %v4842_v17  ;;  %v13695_v49 = vcombine.high %v4828_v6, %v4842_v17  ;;  %v5456_v34 = vcombine.low %v4849_v51, %v4851_v21  ;;  %v5454_v43 = vrot.slane %v5439_v38, %v15040_v37 }
 0x1ba   :  { %v4780_v14 = vpack.c.bf16 %v4757_v52, %v4756_v55  ;;  %v13684_v36 = vpack.c.bf16 %v4757_v52, %v4757_v52  ;;  %v4669_v24 = vadd.f32 %v14318_v0, %v4533_v16  ;;  %v14320_v15 = vpop.f32.mrf.mxu1  ;;  %v14228_v50 = vpop.f32.mrf.mxu0  ;;  %v4853_v23 = vcombine.high %v4849_v51, %v4849_v51 }
 0x1bb   :  { %v5425_v40 = vrot.slane %v5417_v33, %v15040_v37  ;;  %v5432_v20 = vrot.slane %v13695_v49, %v15040_v37  ;;  %v14227_v53 = vadd.f32 %v14226_v26, %v14225_v46  ;;  %v5464_v12 = vrot.slane %v5456_v34, %v15040_v37 }
 0x1bc   :  { %v4861_v27 = vrot.slane %v4780_v14, %v15040_v37  ;;  %v4868_v30 = vrot.slane %v13684_v36, %v15040_v37  ;;  %v4758_v35 = vmax.f32 %v4669_v24, 0.0  ;;  %v14322_v44 = vpop.f32.mrf.mxu1  ;;  %v14229_v5 = vpop.f32.mrf.mxu0  ;;  %v14321_v25 = vadd.f32 %v14320_v15, %v14319_v3 }
 0x1bd   :  { %v5440_v32 = vcombine.low %v5425_v40, %v5432_v20  ;;  %v4536_v39 = vadd.f32 %v14227_v53, %v16363_v48  ;;  %v14230_v28 = vadd.f32 %v14229_v5, %v14228_v50 }
 0x1be   :  { %v4869_v8 = vcombine.high %v4861_v27, %v4861_v27  ;;  %v4870_v13 = vcombine.high %v4868_v30, %v4868_v30  ;;  %v4877_v42 = vrot.slane %v4861_v27, %v15040_v37  ;;  %v4884_v1 = vrot.slane %v4868_v30, %v15040_v37  ;;  %v14323_v57 = vpop.f32.mrf.mxu1  ;;  %v14231_v6 = vpop.f32.mrf.mxu0 }
 0x1bf   :  { %v16584_v56 = vrot.slane %v5440_v32, %v15040_v37  ;;  %v4672_v59 = vadd.f32 %v14321_v25, %v4536_v39  ;;  %v4541_v2 = vadd.f32 %v14230_v28, %v16397_v11  ;;  %v14324_v46 = vadd.f32 %v14323_v57, %v14322_v44 }
 0x1c0   :  { %v4891_v17 = vrot.slane %v4869_v8, %v15040_v37  ;;  %v4898_v48 = vrot.slane %v4870_v13, %v15040_v37  ;;  %v4900_v51 = vcombine.high %v4884_v1, %v4884_v1  ;;  %v5457_v21 = vcombine.low %v4853_v23, %v4877_v42  ;;  %v14325_v38 = vpop.f32.mrf.mxu1  ;;  %v14232_v55 = vpop.f32.mrf.mxu0 }
 0x1c1   :  { %v16590_v52 = vcombine.low %v16584_v56, %v5454_v43  ;;  %v4759_v16 = vmax.f32 %v4672_v59, 0.0  ;;  %v16592_v0 = vadd.f32 %v14324_v46, %v4541_v2  ;;  %v14233_v3 = vadd.f32 %v14232_v55, %v14231_v6 }
 0x1c2   :  { %v5471_v26 = vrot.slane %v5457_v21, %v15040_v37  ;;  %v5478_v11 = vrot.slane %v4891_v17, %v15040_v37  ;;  %v13696_v33 = vcombine.high %v4877_v42, %v4891_v17  ;;  %v5496_v49 = vcombine.low %v4884_v1, %v4898_v48  ;;  %v14326_v34 = vpop.f32.mrf.mxu1  ;;  %v16596_v14 = vpop.f32.mrf.mxu0 }
 0x1c3   :  { %v6120_v36 = vshrl.u32 %v16590_v52, 16  ;;  %v6122_v24 = vshll.u32 %v16590_v52, 16  ;;  %v5517_v43 = vrot.slane %v4900_v51, %v15040_v37  ;;  %v4781_v15 = vpack.c.bf16 %v4759_v16, %v4758_v35 }
 0x1c4   :  { %v5479_v50 = vcombine.low %v5464_v12, %v5471_v26  ;;  %v5493_v40 = vrot.slane %v5478_v11, %v15040_v37  ;;  %v5503_v20 = vrot.slane %v13696_v33, %v15040_v37  ;;  %v5510_v23 = vrot.slane %v5496_v49, %v15040_v37  ;;  %v16604_v53 = vpop.f32.mrf.mxu1  ;;  %v16606_v27 = vpop.f32.mrf.mxu0 }
 0x1c5   :  { %v6124_v30 = vrot.slane %v6122_v24, 1  ;;  %v5532_v44 = vrot.slane %v5517_v43, %v15040_v37  ;;  %v4902_v5 = vcombine.high %v4898_v48, %v4898_v48  ;;  %v13685_v32 = vpack.c.bf16 %v4759_v16, %v4759_v16 }
 0x1c6   :  { %v5486_v39 = vrot.slane %v5479_v50, %v15040_v37  ;;  %v5518_v25 = vcombine.low %v5503_v20, %v5510_v23  ;;  %v4910_v12 = vrot.slane %v4781_v15, %v15040_v37  ;;  %v4760_v35 = vmax.f32 %v16592_v0, 0.0  ;;  %v16612_v28 = vpop.f32.mrf.mxu1  ;;  %v16614_v8 = vpop.f32.mrf.mxu0 }
 0x1c7   :  { %v16616_v13 = vor.u32 %v6124_v30, %v6120_v36  ;;  %v4917_v42 = vrot.slane %v13685_v32, %v15040_v37  ;;  %v4544_v1 = vadd.f32 %v14233_v3, %v16412_v58  ;;  %v14327_v57 = vadd.f32 %v14326_v34, %v14325_v38 }
 0x1c8   :  { %v16620_v6 = vcombine.low %v5486_v39, %v5493_v40  ;;  %v5525_v59 = vrot.slane %v5518_v25, %v15040_v37  ;;  %v4918_v2 = vcombine.high %v4910_v12, %v4910_v12  ;;  %v4926_v46 = vrot.slane %v4910_v12, %v15040_v37  ;;  %v16624_v17 = vpop.f32.mrf.mxu1  ;;  %v16626_v48 = vpop.f32.mrf.mxu0 }
 0x1c9   :  { %v4919_v21 = vcombine.high %v4917_v42, %v4917_v42  ;;  %v4933_v55 = vrot.slane %v4917_v42, %v15040_v37  ;;  %v4680_v16 = vadd.f32 %v14327_v57, %v4544_v1 }
 0x1ca   :  { %v16631_v58 = vcombine.low %v5525_v59, %v5532_v44  ;;  %v6127_v38 = vshrl.u32 %v16620_v6, 16  ;;  %v6129_v0 = vshll.u32 %v16620_v6, 16  ;;  %v4940_v3 = vrot.slane %v4918_v2, %v15040_v37  ;;  %v16636_v26 = vpop.f32.mrf.mxu1  ;;  %v16638_v11 = vpop.f32.mrf.mxu0 }
 0x1cb   :  { %v4947_v33 = vrot.slane %v4919_v21, %v15040_v37  ;;  %v4948_v49 = vcombine.high %v4926_v46, %v4926_v46  ;;  %v5534_v34 = vcombine.low %v4902_v5, %v4926_v46  ;;  %v4761_v36 = vmax.f32 %v4680_v16, 0.0 }
 0x1cc   :  { %v6131_v24 = vrot.slane %v6129_v0, 1  ;;  %v6134_v43 = vshrl.u32 %v16631_v58, 16  ;;  %v6136_v15 = vshll.u32 %v16631_v58, 16  ;;  %v4950_v50 = vcombine.high %v4940_v3, %v4940_v3  ;;  %v16643_v40 = vpop.f32.mrf.mxu1  ;;  %v16645_v20 = vpop.f32.mrf.mxu0 }
 0x1cd   :  { %v5535_v23 = vcombine.low %v4940_v3, %v4948_v49  ;;  %v5542_v30 = vrot.slane %v5534_v34, %v15040_v37  ;;  %v5573_v44 = vcombine.low %v4933_v55, %v4947_v33  ;;  %v13697_v32 = vcombine.high %v4933_v55, %v4947_v33 }
 0x1ce   :  { %v16648_v25 = vor.u32 %v6131_v24, %v6127_v38  ;;  %v6138_v12 = vrot.slane %v6136_v15, 1  ;;  %v5556_v5 = vrot.slane %v4950_v50, %v15040_v37  ;;  %v4782_v42 = vpack.c.bf16 %v4761_v36, %v4760_v35  ;;  %v16651_v1 = vpop.f32.mrf.mxu1  ;;  %v16653_v57 = vpop.f32.mrf.mxu0 }
 0x1cf   :  { %v5549_v2 = vrot.slane %v5535_v23, %v15040_v37  ;;  %v5581_v46 = vrot.slane %v5573_v44, %v15040_v37  ;;  %v5588_v21 = vrot.slane %v13697_v32, %v15040_v37  ;;  %v13686_v16 = vpack.c.bf16 %v4761_v36, %v4761_v36 }
 0x1d0   :  { %v16658_v0 = vor.u32 %v6138_v12, %v6134_v43  ;;  %v13706_v55 = vcombine.low %v5486_v39, %v16648_v25  ;;  %v5571_v38 = vrot.slane %v5556_v5, %v15040_v37  ;;  %v4959_v3 = vrot.slane %v4782_v42, %v15040_v37  ;;  %v14337_v35 = vpop.f32.mrf.mxu1  ;;  %v14244_v33 = vpop.f32.mrf.mxu0 }
 0x1d1   :  { %v5557_v49 = vcombine.low %v5542_v30, %v5549_v2  ;;  %v5596_v34 = vcombine.low %v5581_v46, %v5588_v21  ;;  %v4966_v24 = vrot.slane %v13686_v16, %v15040_v37  ;;  %v14236_v15 = vadd.f32 %v16606_v27, %v16596_v14 }
 0x1d2   :  { %v16667_v50 = vrot.slane %v13706_v55, %v15040_v37  ;;  %v13707_v36 = vcombine.low %v5525_v59, %v16658_v0  ;;  %v4967_v43 = vcombine.high %v4959_v3, %v4959_v3  ;;  %v4975_v39 = vrot.slane %v4959_v3, %v15040_v37  ;;  %v14338_v23 = vpop.f32.mrf.mxu1  ;;  %v14246_v44 = vpop.f32.mrf.mxu0 }
 0x1d3   :  { %v5564_v32 = vrot.slane %v5557_v49, %v15040_v37  ;;  %v4968_v12 = vcombine.high %v4966_v24, %v4966_v24  ;;  %v4982_v30 = vrot.slane %v4966_v24, %v15040_v37  ;;  %v16674_v5 = vrot.slane %v5596_v34, %v15040_v37 }
 0x1d4   :  { %v16677_v14 = vrot.slane %v13707_v36, %v15040_v37  ;;  %v4989_v27 = vrot.slane %v4967_v43, %v15040_v37  ;;  %v4997_v42 = vcombine.high %v4975_v39, %v4975_v39  ;;  %v5595_v59 = vrot.slane %v4975_v39, %v15040_v37  ;;  %v14340_v2 = vpop.f32.mrf.mxu1  ;;  %v14247_v46 = vpop.f32.mrf.mxu0 }
 0x1d5   :  { %v16681_v21 = vcombine.low %v5564_v32, %v5571_v38  ;;  %v4996_v16 = vrot.slane %v4968_v12, %v15040_v37  ;;  %v4549_v55 = vadd.f32 %v14236_v15, %v16448_v61  ;;  %v14330_v3 = vadd.f32 %v16612_v28, %v16604_v53 }
 0x1d6   :  { %v4999_v49 = vcombine.high %v4989_v27, %v4989_v27  ;;  %v5610_v34 = vrot.slane %v5595_v59, %v15040_v37  ;;  %v5612_v24 = vcombine.low %v4989_v27, %v4997_v42  ;;  %v14239_v36 = vadd.f32 %v16626_v48, %v16614_v8  ;;  %v14341_v43 = vpop.f32.mrf.mxu1  ;;  %v16690_v39 = vpop.f32.mrf.mxu0 }
 0x1d7   :  { %v6141_v38 = vshrl.u32 %v16681_v21, 16  ;;  %v6143_v51 = vshll.u32 %v16681_v21, 16  ;;  %v5634_v12 = vrot.slane %v4996_v16, %v15040_v37  ;;  %v13698_v61 = vcombine.high %v4982_v30, %v4996_v16 }
 0x1d8   :  { %v16696_v15 = vcombine.low %v16674_v5, %v5610_v34  ;;  %v5613_v53 = vcombine.low %v4999_v49, %v4982_v30  ;;  %v5620_v28 = vrot.slane %v5612_v24, %v15040_v37  ;;  %v4685_v27 = vadd.f32 %v14330_v3, %v4549_v55  ;;  %v14343_v42 = vpop.f32.mrf.mxu1  ;;  %v14250_v59 = vpop.f32.mrf.mxu0 }
 0x1d9   :  { %v6145_v8 = vrot.slane %v6143_v51, 1  ;;  %v5649_v48 = vrot.slane %v5634_v12, %v15040_v37  ;;  %v16701_v4 = vrot.slane %v13698_v61, %v15040_v37  ;;  %v4552_v10 = vadd.f32 %v14239_v36, %v16453_v31 }
 0x1da   :  { %19661 = vst [vmem:[#allocation8_spill] sm:$0xff] %v16696_v15  ;;  %v5627_v60 = vrot.slane %v5613_v53, %v15040_v37  ;;  %v6148_v16 = vshrl.u32 %v16696_v15, 16  ;;  %v6150_v34 = vshll.u32 %v16696_v15, 16  ;;  %v4762_v30 = vmax.f32 %v4685_v27, 0.0  ;;  %v14344_v49 = vpop.f32.mrf.mxu1  ;;  %v16707_v24 = vpop.f32.mrf.mxu0 }
 0x1db   :  { %v16709_v55 = vor.u32 %v6145_v8, %v6141_v38  ;;  %v14333_v51 = vadd.f32 %v16636_v26, %v16624_v17  ;;  %v14242_v3 = vadd.f32 %v16645_v20, %v16638_v11  ;;  %v14336_v31 = vadd.f32 %v16651_v1, %v16643_v40 }
 0x1dc   :  { %v5635_v36 = vcombine.low %v5620_v28, %v5627_v60  ;;  %v6152_v12 = vrot.slane %v6150_v34, 1  ;;  %v14245_v61 = vadd.f32 %v14244_v33, %v16653_v57  ;;  %v14339_v53 = vadd.f32 %v14338_v23, %v14337_v35  ;;  %v16718_v27 = vpop.f32.mrf.mxu1  ;;  %v16720_v18 = vpop.f32.mrf.mxu0 }
 0x1dd   :  { %v13708_v38 = vcombine.low %v5564_v32, %v16709_v55  ;;  %v4688_v8 = vadd.f32 %v14333_v51, %v4552_v10  ;;  %v4557_v17 = vadd.f32 %v14242_v3, %v16458_v41  ;;  %v14248_v26 = vadd.f32 %v14247_v46, %v14246_v44 }
 0x1de   :  { %v5642_v11 = vrot.slane %v5635_v36, %v15040_v37  ;;  %v16725_v20 = vor.u32 %v6152_v12, %v6148_v16  ;;  %v4560_v60 = vadd.f32 %v14245_v61, %v16461_v62  ;;  %v14342_v40 = vadd.f32 %v14341_v43, %v14340_v2  ;;  %v16728_v1 = vpop.f32.mrf.mxu1  ;;  %v16730_v57 = vpop.f32.mrf.mxu0 }
 0x1df   :  { %v16733_v35 = vrot.slane %v13708_v38, %v15040_v37  ;;  %v4763_v33 = vmax.f32 %v4688_v8, 0.0  ;;  %v4693_v23 = vadd.f32 %v14336_v31, %v4557_v17  ;;  %v4565_v10 = vadd.f32 %v14248_v26, %v16473_v19 }
 0x1e0   :  { %19662 = vst [vmem:[#allocation7_spill] sm:$0xff] %v16725_v20  ;;  %v16736_v41 = vcombine.low %v5642_v11, %v5649_v48  ;;  %v13709_v44 = vcombine.low %v16674_v5, %v16725_v20  ;;  %v4696_v32 = vadd.f32 %v14339_v53, %v4560_v60  ;;  %v16742_v2 = vpop.f32.mrf.mxu1  ;;  %v16744_v46 = vpop.f32.mrf.mxu0  ;;  %v14251_v61 = vadd.f32 %v14250_v59, %v16690_v39 }
 0x1e1   :  { %19663 = vst [vmem:[#allocation10_spill] sm:$0xff] %v16733_v35  ;;  %v4783_v43 = vpack.c.bf16 %v4763_v33, %v4762_v30  ;;  %v13687_v28 = vpack.c.bf16 %v4763_v33, %v4763_v33  ;;  %v4764_v16 = vmax.f32 %v4693_v23, 0.0  ;;  %v16746_v34 = vadd.f32 %v14342_v40, %v4565_v10 }
 0x1e2   :  { %19664 = vst [vmem:[#allocation9_spill] sm:$0xff] %v16736_v41  ;;  %v6155_v19 = vshrl.u32 %v16736_v41, 16  ;;  %v6157_v48 = vshll.u32 %v16736_v41, 16  ;;  %v16751_v51 = vrot.slane %v13709_v44, %v15040_v37  ;;  %v4765_v5 = vmax.f32 %v4696_v32, 0.0  ;;  %v16753_v3 = vpop.f32.mrf.mxu1  ;;  %v16755_v31 = vpop.f32.mrf.mxu0 }
 0x1e3   :  { %v5008_v36 = vrot.slane %v4783_v43, %v15040_v37  ;;  %v5015_v30 = vrot.slane %v13687_v28, %v15040_v37  ;;  %v14345_v17 = vadd.f32 %v14344_v49, %v14343_v42  ;;  %v4568_v59 = vadd.f32 %v14251_v61, %v16476_v29 }
 0x1e4   :  { %19665 = vst [vmem:[#allocation15_spill] sm:$0xff] %v16751_v51  ;;  %v6159_v53 = vrot.slane %v6157_v48, 1  ;;  %v4784_v38 = vpack.c.bf16 %v4765_v5, %v4764_v16  ;;  %v13688_v8 = vpack.c.bf16 %v4765_v5, %v4765_v5  ;;  %v16761_v26 = vpop.f32.mrf.mxu1  ;;  %v16763_v60 = vpop.f32.mrf.mxu0 }
 0x1e5   :  { %v5016_v40 = vcombine.high %v5008_v36, %v5008_v36  ;;  %v5017_v33 = vcombine.high %v5015_v30, %v5015_v30  ;;  %v5024_v23 = vrot.slane %v5008_v36, %v15040_v37  ;;  %v5031_v10 = vrot.slane %v5015_v30, %v15040_v37 }
 0x1e6   :  { %v16767_v44 = vor.u32 %v6159_v53, %v6155_v19  ;;  %v5057_v32 = vrot.slane %v4784_v38, %v15040_v37  ;;  %v5064_v39 = vrot.slane %v13688_v8, %v15040_v37  ;;  %v16772_v43 = vpop.f32.mrf.mxu1  ;;  %v16774_v42 = vpop.f32.mrf.mxu0 }
 0x1e7   :  { %v5038_v49 = vrot.slane %v5016_v40, %v15040_v37  ;;  %v5045_v28 = vrot.slane %v5017_v33, %v15040_v37  ;;  %v5046_v16 = vcombine.high %v5024_v23, %v5024_v23  ;;  %v5047_v48 = vcombine.high %v5031_v10, %v5031_v10 }
 0x1e8   :  { %19666 = vst [vmem:[#allocation12_spill] sm:$0xff] %v16767_v44  ;;  %v13710_v5 = vcombine.low %v5642_v11, %v16767_v44  ;;  %v5065_v19 = vcombine.high %v5057_v32, %v5057_v32  ;;  %v5066_v36 = vcombine.high %v5064_v39, %v5064_v39  ;;  %v5073_v30 = vrot.slane %v5057_v32, %v15040_v37  ;;  %v16780_v53 = vpop.f32.mrf.mxu1  ;;  %v16782_v38 = vpop.f32.mrf.mxu0 }
 0x1e9   :  { %v5048_v29 = vcombine.high %v5038_v49, %v5038_v49  ;;  %v5049_v61 = vcombine.high %v5045_v28, %v5045_v28  ;;  %v5652_v8 = vcombine.low %v5024_v23, %v5038_v49  ;;  %v5673_v62 = vrot.slane %v5046_v16, %v15040_v37 }
 0x1ea   :  { %v16786_v40 = vrot.slane %v13710_v5, %v15040_v37  ;;  %v5691_v33 = vcombine.low %v5045_v28, %v5047_v48  ;;  %v5080_v12 = vrot.slane %v5064_v39, %v15040_v37  ;;  %v5087_v11 = vrot.slane %v5065_v19, %v15040_v37  ;;  %v16790_v41 = vpop.f32.mrf.mxu1  ;;  %v16792_v32 = vpop.f32.mrf.mxu0 }
 0x1eb   :  { %v5666_v44 = vrot.slane %v5652_v8, %v15040_v37  ;;  %v5688_v20 = vrot.slane %v5673_v62, %v15040_v37  ;;  %v5690_v15 = vcombine.low %v5048_v29, %v5031_v10  ;;  %v5712_v23 = vrot.slane %v5049_v61, %v15040_v37 }
 0x1ec   :  { %19667 = vst [vmem:[#allocation16_spill] sm:$0xff] %v16786_v40  ;;  %v5705_v49 = vrot.slane %v5691_v33, %v15040_v37  ;;  %v16799_v16 = vrot.slane %v5066_v36, %v15040_v37  ;;  %v5096_v28 = vcombine.high %v5080_v12, %v5080_v12  ;;  %v5729_v39 = vcombine.low %v5073_v30, %v5087_v11  ;;  %v16801_v48 = vpop.f32.mrf.mxu1  ;;  %v16803_v5 = vpop.f32.mrf.mxu0 }
 0x1ed   :  { %v5674_v19 = vcombine.low %v16701_v4, %v5666_v44  ;;  %v5698_v8 = vrot.slane %v5690_v15, %v15040_v37  ;;  %v5727_v62 = vrot.slane %v5712_v23, %v15040_v37  ;;  %v13699_v10 = vcombine.high %v5073_v30, %v5087_v11 }
 0x1ee   :  { %v5737_v29 = vrot.slane %v5729_v39, %v15040_v37  ;;  %v5751_v61 = vrot.slane %v5080_v12, %v15040_v37  ;;  %v16811_v36 = vcombine.low %v16799_v16, %v5096_v28  ;;  %v4704_v33 = vadd.f32 %v14345_v17, %v4568_v59  ;;  %v16813_v40 = vpop.f32.mrf.mxu1  ;;  %v16815_v45 = vpop.f32.mrf.mxu0 }
 0x1ef   :  { %v5681_v51 = vrot.slane %v5674_v19, %v15040_v37  ;;  %v5713_v4 = vcombine.low %v5698_v8, %v5705_v49  ;;  %v5744_v15 = vrot.slane %v13699_v10, %v15040_v37  ;;  %v5098_v44 = vcombine.high %v16799_v16, %v16799_v16 }
 0x1f0   :  { %v5766_v30 = vrot.slane %v5751_v61, %v15040_v37  ;;  %v6253_v12 = vrot.slane %v16811_v36, %v15040_v37  ;;  %v4767_v11 = vmax.f32 %v4704_v33, 0.0  ;;  %v14254_v17 = vadd.f32 %v16720_v18, %v16707_v24  ;;  %v16826_v59 = vpop.f32.mrf.mxu1  ;;  %v16828_v23 = vpop.f32.mrf.mxu0 }
 0x1f1   :  { %v16830_v28 = vcombine.low %v5681_v51, %v5688_v20  ;;  %v5720_v49 = vrot.slane %v5713_v4, %v15040_v37  ;;  %v5752_v39 = vcombine.low %v5737_v29, %v5744_v15  ;;  %v14348_v16 = vadd.f32 %v16728_v1, %v16718_v27 }
 0x1f2   :  { %v19669_v19 = vmax.f32 %v16746_v34, 0.0  ;;  %v13689_v10 = vpack.c.bf16 %v4767_v11, %v4767_v11  ;;  %v4573_v61 = vadd.f32 %v14254_v17, %v16482_v9  ;;  %v14257_v18 = vadd.f32 %v16744_v46, %v16730_v57  ;;  %v16840_v24 = vpop.f32.mrf.mxu1  ;;  %v16842_v36 = vpop.f32.mrf.mxu0 }
 0x1f3   :  { %19668 = vst [vmem:[#allocation13_spill] sm:$0xff] %v16830_v28  ;;  %19670 = vst [vmem:[#allocation11_spill] sm:$0xff] %v16842_v36  ;;  %v16844_v20 = vcombine.low %v5720_v49, %v5727_v62  ;;  %v6162_v29 = vshrl.u32 %v16830_v28, 16  ;;  %v6164_v33 = vshll.u32 %v16830_v28, 16  ;;  %v5759_v27 = vrot.slane %v5752_v39, %v15040_v37 }
 0x1f4   :  { %v4785_v8 = vpack.c.bf16 %v4767_v11, %v19669_v19  ;;  %v5113_v34 = vrot.slane %v13689_v10, %v15040_v37  ;;  %v16851_v9 = vadd.f32 %v14348_v16, %v4573_v61  ;;  %v4576_v57 = vadd.f32 %v14257_v18, %v16497_v63  ;;  %v16854_v46 = vpop.f32.mrf.mxu1  ;;  %v16856_v4 = vpop.f32.mrf.mxu0 }
 0x1f5   :  { %19671 = vst [vmem:[#allocation14_spill] sm:$0xff] %v16844_v20  ;;  %19672 = vst [vmem:[#allocation17_spill] sm:$0xff] %v16854_v46  ;;  %v6166_v62 = vrot.slane %v6164_v33, 1  ;;  %v6169_v15 = vshrl.u32 %v16844_v20, 16  ;;  %v6171_v11 = vshll.u32 %v16844_v20, 16  ;;  %v16860_v17 = vcombine.low %v5759_v27, %v5766_v30 }
 0x1f6   :  { %v5106_v1 = vrot.slane %v4785_v8, %v15040_v37  ;;  %19673 = vst [vmem:[#allocation18_spill] sm:$0xff] %v16856_v4  ;;  %v5115_v19 = vcombine.high %v5113_v34, %v5113_v34  ;;  %v5129_v16 = vrot.slane %v5113_v34, %v15040_v37  ;;  %v16864_v10 = vpop.f32.mrf.mxu1  ;;  %v16866_v63 = vpop.f32.mrf.mxu0 }
 0x1f7   :  { %19674 = vst [vmem:[#allocation20_spill] sm:$0xff] %v16860_v17  ;;  %19675 = vst [vmem:[#allocation19_spill] sm:$0xff] %v16864_v10  ;;  %v16868_v61 = vor.u32 %v6166_v62, %v6162_v29  ;;  %v6173_v18 = vrot.slane %v6171_v11, 1  ;;  %v6176_v33 = vshrl.u32 %v16860_v17, 16  ;;  %v6178_v28 = vshll.u32 %v16860_v17, 16 }
 0x1f8   :  { %v5114_v39 = vcombine.high %v5106_v1, %v5106_v1  ;;  %v5122_v8 = vrot.slane %v5106_v1, %v15040_v37  ;;  %19676 = vst [vmem:[#allocation21_spill] sm:$0xff] %v16866_v63  ;;  %v16874_v20 = vrot.slane %v5115_v19, %v15040_v37  ;;  %v5145_v46 = vcombine.high %v5129_v16, %v5129_v16  ;;  %v16876_v4 = vpop.f32.mrf.mxu1  ;;  %v16878_v34 = vpop.f32.mrf.mxu0 }
 0x1f9   :  { %19677 = vst [vmem:[#allocation22_spill] sm:$0xff] %v16876_v4  ;;  %v16880_v10 = vor.u32 %v6173_v18, %v6169_v15  ;;  %v13711_v29 = vcombine.low %v5681_v51, %v16868_v61  ;;  %v6180_v62 = vrot.slane %v6178_v28, 1  ;;  %v4768_v11 = vmax.f32 %v16851_v9, 0.0 }
 0x1fa   :  { %v5136_v30 = vrot.slane %v5114_v39, %v15040_v37  ;;  %v6246_v1 = vcombine.low %v5098_v44, %v5122_v8  ;;  %v5769_v36 = vcombine.low %v5129_v16, %v16874_v20  ;;  %v5790_v39 = vrot.slane %v5145_v46, %v15040_v37  ;;  %v16887_v35 = vpop.f32.mrf.mxu1  ;;  %v16889_v44 = vpop.f32.mrf.mxu0 }
 0x1fb   :  { %v16892_v4 = vrot.slane %v13711_v29, %v15040_v37  ;;  %v13712_v15 = vcombine.low %v5720_v49, %v16880_v10  ;;  %v16895_v51 = vor.u32 %v6180_v62, %v6176_v33 }
 0x1fc   :  { %v13700_v63 = vcombine.high %v5122_v8, %v5136_v30  ;;  %v6260_v19 = vrot.slane %v6246_v1, %v15040_v37  ;;  %v6267_v28 = vrot.slane %v5136_v30, %v15040_v37  ;;  %v5783_v8 = vrot.slane %v5769_v36, %v15040_v37  ;;  %v16901_v18 = vpop.f32.mrf.mxu1  ;;  %v16903_v1 = vpop.f32.mrf.mxu0 }
 0x1fd   :  { %19678 = vst [vmem:[#allocation24_spill] sm:$0xff] %v16895_v51  ;;  %v5805_v46 = vrot.slane %v5790_v39, %v15040_v37  ;;  %v16906_v29 = vrot.slane %v13712_v15, %v15040_v37  ;;  %v13713_v49 = vcombine.low %v5759_v27, %v16895_v51  ;;  %v14260_v15 = vadd.f32 %v16763_v60, %v16755_v31 }
 0x1fe   :  { %v5776_v9 = vrot.slane %v13700_v63, %v15040_v37  ;;  %v6268_v16 = vcombine.low %v6253_v12, %v6260_v19  ;;  %v6282_v30 = vrot.slane %v6267_v28, %v15040_v37  ;;  %v14351_v12 = vadd.f32 %v16753_v3, %v16742_v2  ;;  %v16919_v39 = vpop.f32.mrf.mxu1  ;;  %v16921_v19 = vpop.f32.mrf.mxu0 }
 0x1ff   :  { %v16924_v27 = vrot.slane %v13713_v49, %v15040_v37  ;;  %v14354_v28 = vadd.f32 %v16772_v43, %v16761_v26  ;;  %v4581_v31 = vadd.f32 %v14260_v15, %v16500_v7  ;;  %v13705_v60 = vcombine.low %v16584_v56, %v16616_v13 }
 0x200   :  { %v5791_v63 = vcombine.low %v5776_v9, %v5783_v8  ;;  %v16913_v36 = vrot.slane %v6268_v16, %v15040_v37  ;;  %v14263_v9 = vadd.f32 %v16782_v38, %v16774_v42  ;;  %v4712_v8 = vadd.f32 %v14351_v12, %v4576_v57  ;;  %v16938_v49 = vpop.f32.mrf.mxu1  ;;  %v16940_v33 = vpop.f32.mrf.mxu0 }
 0x201   :  { %v14357_v16 = vadd.f32 %v16790_v41, %v16780_v53  ;;  %v6340_v43 = vcombine.high %v16620_v6, %v16648_v25  ;;  %v4717_v7 = vadd.f32 %v14354_v28, %v4581_v31  ;;  %v19682_v56 = vcombine.high %v16590_v52, %v16616_v13 }
 0x202   :  { %19679 = vst [vmem:[#allocation23_spill] sm:$0xff] %v16913_v36  ;;  %v5798_v2 = vrot.slane %v5791_v63, %v15040_v37  ;;  %v16934_v3 = vcombine.low %v16913_v36, %v6282_v30  ;;  %v4584_v26 = vadd.f32 %v14263_v9, %v16506_v54  ;;  %v4769_v53 = vmax.f32 %v4712_v8, 0.0  ;;  %v16952_v57 = vpop.f32.mrf.mxu1  ;;  %v16954_v30 = vpop.f32.mrf.mxu0 }
 0x203   :  { %v16957_v54 = vrot.slane %v13705_v60, %v15040_v37  ;;  %v16963_v6 = vrot.slane %v19682_v56, %v15040_v37 }
 0x204   :  { %19680 = vst [vmem:[#allocation25_spill] sm:$0xff] %v16934_v3  ;;  %v16948_v42 = vcombine.low %v5798_v2, %v5805_v46  ;;  %v6324_v38 = vshrl.u32 %v16934_v3, 16  ;;  %v6326_v41 = vshll.u32 %v16934_v3, 16  ;;  %v4720_v63 = vadd.f32 %v14357_v16, %v4584_v26  ;;  %v16967_v9 = vpop.f32.mrf.mxu1  ;;  %v16969_v8 = vpop.f32.mrf.mxu0 }
 0x205   :  { %v4786_v15 = vpack.c.bf16 %v4769_v53, %v4768_v11  ;;  %v13690_v28 = vpack.c.bf16 %v4769_v53, %v4769_v53  ;;  %v4770_v16 = vmax.f32 %v4717_v7, 0.0  ;;  %v16972_v26 = vrot.slane %v6340_v43, %v15040_v37 }
 0x206   :  { %19681 = vst [vmem:[#allocation26_spill] sm:$0xff] %v16948_v42  ;;  %v6183_v25 = vshrl.u32 %v16948_v42, 16  ;;  %v6185_v46 = vshll.u32 %v16948_v42, 16  ;;  %v6328_v12 = vrot.slane %v6326_v41, 1  ;;  %v4771_v31 = vmax.f32 %v4720_v63, 0.0  ;;  %v16979_v41 = vpop.f32.mrf.mxu1  ;;  %v14285_v11 = vpop.f32.mrf.mxu0 }
 0x207   :  { %v5155_v13 = vrot.slane %v4786_v15, %v15040_v37  ;;  %v6369_v56 = vcombine.low %v16957_v54, %v16667_v50  ;;  %v5162_v62 = vrot.slane %v13690_v28, %v15040_v37  ;;  %v6370_v7 = vcombine.high %v16957_v54, %v16667_v50 }
 0x208   :  { %v6187_v60 = vrot.slane %v6185_v46, 1  ;;  %v16974_v52 = vor.u32 %v6328_v12, %v6324_v38  ;;  %v4787_v51 = vpack.c.bf16 %v4771_v31, %v4770_v16  ;;  %v13691_v53 = vpack.c.bf16 %v4771_v31, %v4771_v31  ;;  %v14379_v12 = vpop.f32.mrf.mxu1  ;;  %v14286_v15 = vpop.f32.mrf.mxu0 }
 0x209   :  { %v5163_v46 = vcombine.high %v5155_v13, %v5155_v13  ;;  %v5164_v17 = vcombine.high %v5162_v62, %v5162_v62  ;;  %v5171_v11 = vrot.slane %v5155_v13, %v15040_v37  ;;  %v5178_v28 = vrot.slane %v5162_v62, %v15040_v37 }
 0x20a   :  { %19683 = vst [vmem:[#allocation27_spill] sm:$0xff] %v16974_v52  ;;  %v16984_v43 = vor.u32 %v6187_v60, %v6183_v25  ;;  %v5204_v16 = vrot.slane %v4787_v51, %v15040_v37  ;;  %v5211_v60 = vrot.slane %v13691_v53, %v15040_v37  ;;  %v14380_v63 = vpop.f32.mrf.mxu1  ;;  %v19685_v13 = vcombine.high %v16874_v20, %v16874_v20 }
 0x20b   :  { %v5185_v31 = vrot.slane %v5163_v46, %v15040_v37  ;;  %v5192_v12 = vrot.slane %v5164_v17, %v15040_v37  ;;  %v5193_v15 = vcombine.high %v5171_v11, %v5171_v11 }
 0x20c   :  { %19684 = vst [vmem:[#allocation28_spill] sm:$0xff] %v16984_v43  ;;  %v13715_v54 = vcombine.low %v5798_v2, %v16984_v43  ;;  %v5807_v38 = vcombine.low %v19685_v13, %v5171_v11  ;;  %v5212_v62 = vcombine.high %v5204_v16, %v5204_v16  ;;  %v5213_v3 = vcombine.high %v5211_v60, %v5211_v60 }
 0x20d   :  { %v5195_v2 = vcombine.high %v5185_v31, %v5185_v31  ;;  %v5220_v25 = vrot.slane %v5204_v16, %v15040_v37  ;;  %v5808_v43 = vcombine.low %v5185_v31, %v5193_v15  ;;  %v5846_v53 = vcombine.low %v5178_v28, %v5192_v12 }
 0x20e   :  { %v17003_v51 = vrot.slane %v13715_v54, %v15040_v37  ;;  %v5815_v46 = vrot.slane %v5807_v38, %v15040_v37  ;;  %v13701_v63 = vcombine.high %v5178_v28, %v5192_v12  ;;  %v5227_v42 = vrot.slane %v5211_v60, %v15040_v37 }
 0x20f   :  { %v5829_v17 = vrot.slane %v5195_v2, %v15040_v37  ;;  %v5234_v20 = vrot.slane %v5212_v62, %v15040_v37  ;;  %v5241_v11 = vrot.slane %v5213_v3, %v15040_v37  ;;  %v5822_v54 = vrot.slane %v5808_v43, %v15040_v37 }
 0x210   :  { %19686 = vst [vmem:[#allocation29_spill] sm:$0xff] %v17003_v51  ;;  %v5854_v13 = vrot.slane %v5846_v53, %v15040_v37  ;;  %v5861_v51 = vrot.slane %v13701_v63, %v15040_v37  ;;  %v5242_v16 = vcombine.high %v5220_v25, %v5220_v25  ;;  %v5868_v28 = vrot.slane %v5220_v25, %v15040_v37 }
 0x211   :  { %v5844_v31 = vrot.slane %v5829_v17, %v15040_v37  ;;  %v5244_v38 = vcombine.high %v5234_v20, %v5234_v20  ;;  %v5907_v12 = vrot.slane %v5241_v11, %v15040_v37  ;;  %v5830_v15 = vcombine.low %v5815_v46, %v5822_v54 }
 0x212   :  { %v5869_v60 = vcombine.low %v5854_v13, %v5861_v51  ;;  %v5885_v2 = vcombine.low %v5234_v20, %v5242_v16  ;;  %v13702_v62 = vcombine.high %v5227_v42, %v5241_v11  ;;  %v5883_v3 = vrot.slane %v5868_v28, %v15040_v37 }
 0x213   :  { %v5886_v52 = vcombine.low %v5244_v38, %v5227_v42  ;;  %v5922_v43 = vrot.slane %v5907_v12, %v15040_v37  ;;  %v6371_v53 = vcombine.low %v16963_v6, %v16972_v26  ;;  %v5837_v63 = vrot.slane %v5830_v15, %v15040_v37 }
 0x214   :  { %v5876_v17 = vrot.slane %v5869_v60, %v15040_v37  ;;  %v5893_v25 = vrot.slane %v5885_v2, %v15040_v37  ;;  %v17025_v36 = vrot.slane %v13702_v62, %v15040_v37  ;;  %v6378_v46 = vrot.slane %v6369_v56, %v15040_v37 }
 0x215   :  { %v5900_v51 = vrot.slane %v5886_v52, %v15040_v37  ;;  %v6385_v42 = vrot.slane %v6371_v53, %v15040_v37  ;;  %v6392_v20 = vrot.slane %v6370_v7, %v15040_v37  ;;  %v17031_v11 = vcombine.low %v5837_v63, %v5844_v31 }
 0x216   :  { %v17033_v6 = vcombine.low %v5876_v17, %v5883_v3  ;;  %v6411_v54 = vcombine.low %v16667_v50, %v16677_v14  ;;  %v6412_v13 = vcombine.high %v16667_v50, %v16677_v14  ;;  %v14266_v52 = vadd.f32 %v16803_v5, %v16792_v32 }
 0x217   :  { %19687 = vst [vmem:[#allocation30_spill] sm:$0xff] %v17031_v11  ;;  %v5908_v16 = vcombine.low %v5893_v25, %v5900_v51  ;;  %v7439_v38 = vcombine.low %v6378_v46, %v6392_v20  ;;  %v13771_v28 = vcombine.high %v6378_v46, %v6392_v20  ;;  %v6190_v56 = vshrl.u32 %v17031_v11, 16 }
 0x218   :  { %v6192_v7 = vshll.u32 %v17031_v11, 16  ;;  %v6197_v31 = vshrl.u32 %v17033_v6, 16  ;;  %v6199_v12 = vshll.u32 %v17033_v6, 16  ;;  %v6420_v60 = vrot.slane %v6411_v54, %v15040_v37 }
 0x219   :  { %v5915_v15 = vrot.slane %v5908_v16, %v15040_v37  ;;  %v6434_v50 = vrot.slane %v6412_v13, %v15040_v37  ;;  %v7449_v2 = vrot.slane %v7439_v38, %v15040_v37  ;;  %v7456_v32 = vrot.slane %v13771_v28, %v15040_v37 }
 0x21a   :  { %v6194_v62 = vrot.slane %v6192_v7, 1  ;;  %v6201_v3 = vrot.slane %v6199_v12, 1  ;;  %v4589_v5 = vadd.f32 %v14266_v52, %v16530_v22  ;;  %v6435_v25 = vcombine.high %v6420_v60, %v6420_v60 }
 0x21b   :  { %v17051_v53 = vcombine.low %v5915_v15, %v5922_v43  ;;  %v17053_v51 = vcombine.high %v6434_v50, %v6434_v50  ;;  %v7135_v46 = vunpack.i.h.s16 %v6420_v60  ;;  %v7137_v54 = vunpack.i.h.s16 %v6434_v50 }
 0x21c   :  { %v17055_v20 = vor.u32 %v6194_v62, %v6190_v56  ;;  %v17057_v16 = vor.u32 %v6201_v3, %v6197_v31  ;;  %v13726_v13 = vpack.i.b16 %v6420_v60, %v6385_v42  ;;  %v7139_v12 = vunpack.i.h.s16 %v6435_v25 }
 0x21d   :  { %v6204_v38 = vshrl.u32 %v17051_v53, 16  ;;  %v6206_v7 = vshll.u32 %v17051_v53, 16  ;;  %v13727_v28 = vpack.i.b16 %v6434_v50, %v7135_v46  ;;  %v13728_v11 = vpack.i.b16 %v6435_v25, %v7137_v54 }
 0x21e   :  { %v13716_v22 = vcombine.low %v5837_v63, %v17055_v20  ;;  %v13717_v43 = vcombine.low %v5876_v17, %v17057_v16  ;;  %v6790_v52 = vcombine.high %v17033_v6, %v17057_v16  ;;  %v13729_v31 = vpack.i.b16 %v17053_v51, %v7139_v12 }
 0x21f   :  { %v6208_v56 = vrot.slane %v6206_v7, 1  ;;  %v7441_v62 = vcombine.low %v13726_v13, %v13727_v28  ;;  %v7471_v3 = vcombine.low %v7449_v2, %v7456_v32  ;;  %v7472_v50 = vcombine.high %v7449_v2, %v7456_v32 }
 0x220   :  { %v17067_v42 = vrot.slane %v13716_v22, %v15040_v37  ;;  %v17070_v60 = vrot.slane %v13717_v43, %v15040_v37  ;;  %v14360_v63 = vadd.f32 %v16813_v40, %v16801_v48  ;;  %v7442_v46 = vcombine.low %v13728_v11, %v13729_v31  ;;  %v19689_v31 = vld [vmem:[#allocation15_spill] sm:$0xff] }
 0x221   :  { %v17074_v17 = vor.u32 %v6208_v56, %v6204_v38  ;;  %v7463_v25 = vrot.slane %v7441_v62, %v15040_v37  ;;  %v7481_v54 = vrot.slane %v7471_v3, %v15040_v37  ;;  %v7488_v13 = vrot.slane %v7472_v50, %v15040_v37 }
 0x222   :  { %v4725_v7 = vadd.f32 %v14360_v63, %v4589_v5  ;;  %v14269_v12 = vadd.f32 %v16828_v23, %v16815_v45  ;;  %v14363_v28 = vadd.f32 %v16840_v24, %v16826_v59  ;;  %v7470_v48 = vrot.slane %v7442_v46, %v15040_v37  ;;  %v19688_v45 = vld [vmem:[#allocation10_spill] sm:$0xff] }
 0x223   :  { %v13718_v2 = vcombine.low %v5915_v15, %v17074_v17  ;;  %v6832_v40 = vcombine.high %v17051_v53, %v17074_v17  ;;  %v6396_v11 = vcombine.high %v16631_v58, %v16658_v0  ;;  %v6438_v5 = vcombine.high %v16681_v21, %v16709_v55 }
 0x224   :  { %v4772_v32 = vmax.f32 %v4725_v7, 0.0  ;;  %v4592_v38 = vadd.f32 %v14269_v12, %v16533_v47  ;;  %v6453_v23 = vcombine.low %v16677_v14, %v19688_v45  ;;  %v7473_v24 = vcombine.low %v7463_v25, %v7470_v48 }
 0x225   :  { %v17095_v59 = vrot.slane %v13718_v2, %v15040_v37  ;;  %v7474_v15 = vcombine.high %v7463_v25, %v7470_v48  ;;  %v6410_v22 = vrot.slane %v6396_v11, %v15040_v37  ;;  %v17099_v56 = vrot.slane %v6438_v5, %v15040_v37 }
 0x226   :  { %v4728_v43 = vadd.f32 %v14363_v28, %v4592_v38  ;;  %v6454_v47 = vcombine.high %v16677_v14, %v19688_v45  ;;  %v6462_v58 = vrot.slane %v6453_v23, %v15040_v37  ;;  %v7495_v21 = vrot.slane %v7473_v24, %v15040_v37 }
 0x227   :  { %v7502_v0 = vrot.slane %v7474_v15, %v15040_v37  ;;  %v6413_v55 = vcombine.low %v16972_v26, %v6410_v22  ;;  %v6495_v62 = vcombine.low %v19688_v45, %v19689_v31  ;;  %v6455_v50 = vcombine.low %v6410_v22, %v17099_v56 }
 0x228   :  { %v4773_v3 = vmax.f32 %v4728_v43, 0.0  ;;  %v6476_v63 = vrot.slane %v6454_v47, %v15040_v37  ;;  %v6477_v46 = vcombine.high %v6462_v58, %v6462_v58  ;;  %v7503_v14 = vcombine.low %v7481_v54, %v7495_v21 }
 0x229   :  { %v7505_v25 = vcombine.low %v7488_v13, %v7502_v0  ;;  %v7506_v7 = vcombine.high %v7488_v13, %v7502_v0  ;;  %v7504_v12 = vcombine.high %v7481_v54, %v7495_v21  ;;  %v6427_v48 = vrot.slane %v6413_v55, %v15040_v37 }
 0x22a   :  { %v4788_v28 = vpack.c.bf16 %v4773_v3, %v4772_v32  ;;  %v13692_v2 = vpack.c.bf16 %v4773_v3, %v4773_v3  ;;  %v6469_v11 = vrot.slane %v6455_v50, %v15040_v37  ;;  %v6478_v26 = vcombine.high %v6476_v63, %v6476_v63 }
 0x22b   :  { %8411 = vmatprep.mubr.bf16.mxu0 %v7505_v25  ;;  %8531 = vmatprep.mubr.bf16.mxu1 %v7506_v7  ;;  %v6496_v38 = vcombine.high %v19688_v45, %v19689_v31  ;;  %v6504_v5 = vrot.slane %v6495_v62, %v15040_v37  ;;  %v7141_v23 = vunpack.i.h.s16 %v17053_v51  ;;  %v7508_v32 = vcombine.low %v6476_v63, %v6477_v46 }
 0x22c   :  { %8412 = vmatmul.mubr.bf16.vlgmr.msra.gmra.mxu0 %v7503_v14  ;;  %8532 = vmatmul.mubr.bf16.vlgmr.msra.gmra.mxu1 %v7504_v12  ;;  %v5253_v54 = vrot.slane %v4788_v28, %v15040_v37  ;;  %v5260_v13 = vrot.slane %v13692_v2, %v15040_v37  ;;  %v6847_v6 = vcombine.low %v17070_v60, %v17095_v59 }
 0x22d   :  { %v17120_v24 = vrot.slane %v6496_v38, %v15040_v37  ;;  %v17122_v15 = vcombine.high %v6504_v5, %v6504_v5  ;;  %v7153_v22 = vunpack.i.h.s16 %v6504_v5  ;;  %v13730_v43 = vpack.i.b16 %v6427_v48, %v7141_v23 }
 0x22e   :  { %v5261_v47 = vcombine.high %v5253_v54, %v5253_v54  ;;  %v5262_v45 = vcombine.high %v5260_v13, %v5260_v13  ;;  %v5269_v0 = vrot.slane %v5253_v54, %v15040_v37  ;;  %v5276_v51 = vrot.slane %v5260_v13, %v15040_v37 }
 0x22f   :  { %v7155_v21 = vunpack.i.h.s16 %v17120_v24  ;;  %v13731_v55 = vpack.i.b16 %v6504_v5, %v6469_v11  ;;  %v13732_v62 = vpack.i.b16 %v17120_v24, %v7153_v22  ;;  %v7507_v3 = vcombine.low %v13730_v43, %v6462_v58 }
 0x230   :  { %v5283_v50 = vrot.slane %v5261_v47, %v15040_v37  ;;  %v5290_v63 = vrot.slane %v5262_v45, %v15040_v37  ;;  %v5291_v46 = vcombine.high %v5269_v0, %v5269_v0  ;;  %v5292_v25 = vcombine.high %v5276_v51, %v5276_v51 }
 0x231   :  { %v13733_v7 = vpack.i.b16 %v17122_v15, %v7155_v21  ;;  %v7509_v14 = vcombine.low %v6478_v26, %v13731_v55  ;;  %v7517_v12 = vrot.slane %v7507_v3, %v15040_v37  ;;  %v7524_v28 = vrot.slane %v7508_v32, %v15040_v37  ;;  %v19690_v3 = vld [vmem:[#allocation11_spill] sm:$0xff] }
 0x232   :  { %v5293_v2 = vcombine.high %v5283_v50, %v5283_v50  ;;  %v5294_v48 = vcombine.high %v5290_v63, %v5290_v63  ;;  %v5925_v38 = vcombine.low %v5269_v0, %v5283_v50  ;;  %v5946_v11 = vrot.slane %v5291_v46, %v15040_v37  ;;  %v19691_v50 = vld [vmem:[#allocation18_spill] sm:$0xff] }
 0x233   :  { %v5964_v5 = vcombine.low %v5290_v63, %v5292_v25  ;;  %v7510_v58 = vcombine.low %v13732_v62, %v13733_v7  ;;  %v7531_v23 = vrot.slane %v7509_v14, %v15040_v37  ;;  %v7540_v54 = vcombine.high %v7517_v12, %v7524_v28  ;;  %v19692_v7 = vld [vmem:[#allocation17_spill] sm:$0xff]  ;;  %v19693_v14 = vld [vmem:[#allocation19_spill] sm:$0xff] }
 0x234   :  { %v5939_v13 = vrot.slane %v5925_v38, %v15040_v37  ;;  %v5961_v22 = vrot.slane %v5946_v11, %v15040_v37  ;;  %v5963_v43 = vcombine.low %v5293_v2, %v5276_v51  ;;  %v5985_v26 = vrot.slane %v5294_v48, %v15040_v37 }
 0x235   :  { %v5978_v47 = vrot.slane %v5964_v5, %v15040_v37  ;;  %v7538_v32 = vrot.slane %v7510_v58, %v15040_v37  ;;  %v7556_v45 = vrot.slane %v7540_v54, %v15040_v37  ;;  %v7539_v0 = vcombine.low %v7517_v12, %v7524_v28  ;;  %v19694_v12 = vld [vmem:[#allocation2_spill] sm:$0xff] }
 0x236   :  { %v5947_v21 = vcombine.low %v17025_v36, %v5939_v13  ;;  %v5971_v55 = vrot.slane %v5963_v43, %v15040_v37  ;;  %v6000_v62 = vrot.slane %v5985_v26, %v15040_v37  ;;  %v14272_v63 = vadd.f32 %v19691_v50, %v19690_v3  ;;  %v19695_v36 = vld [vmem:[#allocation21_spill] sm:$0xff]  ;;  %v19696_v54 = vld [vmem:[#allocation22_spill] sm:$0xff] }
 0x237   :  { %v7542_v46 = vcombine.high %v7531_v23, %v7538_v32  ;;  %v7541_v51 = vcombine.low %v7531_v23, %v7538_v32  ;;  %v7549_v25 = vrot.slane %v7539_v0, %v15040_v37  ;;  %v14366_v2 = vadd.f32 %v19693_v14, %v19692_v7  ;;  %v19697_v32 = vld [vmem:[#allocation3_spill] sm:$0xff]  ;;  %v19699_v14 = vld [vmem:[#allocation8_spill] sm:$0xff] }
 0x238   :  { %v5954_v48 = vrot.slane %v5947_v21, %v15040_v37  ;;  %v5986_v38 = vcombine.low %v5971_v55, %v5978_v47  ;;  %v4597_v28 = vadd.f32 %v14272_v63, %v19694_v12  ;;  %v14275_v11 = vadd.f32 %v16878_v34, %v19695_v36 }
 0x239   :  { %v7570_v5 = vrot.slane %v7542_v46, %v15040_v37  ;;  %v7563_v58 = vrot.slane %v7541_v51, %v15040_v37  ;;  %v14369_v23 = vadd.f32 %v16887_v35, %v19696_v54  ;;  %v14278_v13 = vadd.f32 %v16903_v1, %v16889_v44  ;;  %v19698_v1 = vld [vmem:[#allocation4_spill] sm:$0xff] }
 0x23a   :  { %v17159_v43 = vcombine.low %v5954_v48, %v5961_v22  ;;  %v5993_v26 = vrot.slane %v5986_v38, %v15040_v37  ;;  %v4733_v47 = vadd.f32 %v14366_v2, %v4597_v28  ;;  %v4600_v0 = vadd.f32 %v14275_v11, %v19697_v32  ;;  %v19700_v2 = vld [vmem:[#allocation7_spill] sm:$0xff] }
 0x23b   :  { %v7573_v21 = vcombine.low %v7556_v45, %v7570_v5  ;;  %v7574_v55 = vcombine.high %v7556_v45, %v7570_v5  ;;  %v7571_v34 = vcombine.low %v7549_v25, %v7563_v58  ;;  %v7572_v3 = vcombine.high %v7549_v25, %v7563_v58 }
 0x23c   :  { %v17163_v50 = vcombine.low %v5993_v26, %v6000_v62  ;;  %v6211_v63 = vshrl.u32 %v17159_v43, 16  ;;  %v6213_v35 = vshll.u32 %v17159_v43, 16  ;;  %v4774_v46 = vmax.f32 %v4733_v47, 0.0 }
 0x23d   :  { %8419 = vmatprep.mubr.bf16.mxu0 %v7573_v21  ;;  %8539 = vmatprep.mubr.bf16.mxu1 %v7574_v55  ;;  %v4736_v44 = vadd.f32 %v14369_v23, %v4600_v0  ;;  %v4605_v22 = vadd.f32 %v14278_v13, %v19698_v1  ;;  %v14372_v51 = vadd.f32 %v16919_v39, %v16901_v18  ;;  %v7157_v7 = vunpack.i.h.s16 %v17122_v15  ;;  %v19702_v39 = vld [vmem:[#allocation12_spill] sm:$0xff]  ;;  %v19703_v15 = vld [vmem:[#allocation9_spill] sm:$0xff] }
 0x23e   :  { %v6215_v45 = vrot.slane %v6213_v35, 1  ;;  %v6218_v25 = vshrl.u32 %v17163_v50, 16  ;;  %v6220_v62 = vshll.u32 %v17163_v50, 16  ;;  %8420 = vmatmul.mubr.bf16.gmra.mxu0 %v7571_v34  ;;  %8540 = vmatmul.mubr.bf16.gmra.mxu1 %v7572_v3  ;;  %v19701_v38 = vcombine.high %v19699_v14, %v19700_v2  ;;  %v19704_v23 = vld [vmem:[#allocation16_spill] sm:$0xff] }
 0x23f   :  { %v4775_v28 = vmax.f32 %v4736_v44, 0.0  ;;  %v17177_v36 = vadd.f32 %v14372_v51, %v4605_v22  ;;  %v6520_v18 = vcombine.high %v17120_v24, %v17120_v24  ;;  %v6522_v11 = vcombine.high %v19703_v15, %v19702_v39 }
 0x240   :  { %v6494_v12 = vrot.slane %v19701_v38, %v15040_v37  ;;  %v17183_v5 = vor.u32 %v6215_v45, %v6211_v63  ;;  %v6222_v58 = vrot.slane %v6220_v62, 1  ;;  %v6537_v13 = vcombine.low %v19689_v31, %v19704_v23 }
 0x241   :  { %v4789_v47 = vpack.c.bf16 %v4775_v28, %v4774_v46  ;;  %v13693_v32 = vpack.c.bf16 %v4775_v28, %v4775_v28  ;;  %v4776_v0 = vmax.f32 %v17177_v36, 0.0  ;;  %v17190_v21 = vrot.slane %v6522_v11, %v15040_v37 }
 0x242   :  { %v6497_v54 = vcombine.low %v17099_v56, %v6494_v12  ;;  %v17192_v55 = vor.u32 %v6222_v58, %v6218_v25  ;;  %v13719_v24 = vcombine.low %v5954_v48, %v17183_v5  ;;  %v6874_v34 = vcombine.high %v17159_v43, %v17183_v5 }
 0x243   :  { %v5302_v56 = vrot.slane %v4789_v47, %v15040_v37  ;;  %v5309_v63 = vrot.slane %v13693_v32, %v15040_v37  ;;  %v6538_v35 = vcombine.high %v19689_v31, %v19704_v23  ;;  %v6539_v46 = vcombine.low %v6494_v12, %v17190_v21 }
 0x244   :  { %v6511_v3 = vrot.slane %v6497_v54, %v15040_v37  ;;  %v17204_v44 = vrot.slane %v13719_v24, %v15040_v37  ;;  %v13720_v1 = vcombine.low %v5993_v26, %v17192_v55  ;;  %v6546_v48 = vrot.slane %v6537_v13, %v15040_v37 }
 0x245   :  { %v6579_v22 = vcombine.low %v19704_v23, %v16892_v4  ;;  %v5310_v51 = vcombine.high %v5302_v56, %v5302_v56  ;;  %v5311_v45 = vcombine.high %v5309_v63, %v5309_v63  ;;  %v5318_v25 = vrot.slane %v5302_v56, %v15040_v37 }
 0x246   :  { %v5325_v62 = vrot.slane %v5309_v63, %v15040_v37  ;;  %v17213_v31 = vrot.slane %v13720_v1, %v15040_v37  ;;  %v6553_v14 = vrot.slane %v6539_v46, %v15040_v37  ;;  %v6560_v2 = vrot.slane %v6538_v35, %v15040_v37 }
 0x247   :  { %v6580_v26 = vcombine.high %v19704_v23, %v16892_v4  ;;  %v5332_v38 = vrot.slane %v5310_v51, %v15040_v37  ;;  %v17221_v12 = vrot.slane %v5311_v45, %v15040_v37  ;;  %v6588_v15 = vrot.slane %v6579_v22, %v15040_v37 }
 0x248   :  { %v5341_v28 = vcombine.high %v5325_v62, %v5325_v62  ;;  %v6024_v39 = vrot.slane %v5325_v62, %v15040_v37  ;;  %v7159_v58 = vunpack.i.h.s16 %v6520_v18  ;;  %v13734_v54 = vpack.i.b16 %v6520_v18, %v7157_v7 }
 0x249   :  { %v17226_v11 = vrot.slane %v6580_v26, %v15040_v37  ;;  %v6002_v13 = vcombine.low %v5318_v25, %v5332_v38  ;;  %v13703_v47 = vcombine.high %v5318_v25, %v5332_v38  ;;  %v7171_v24 = vunpack.i.h.s16 %v6588_v15 }
 0x24a   :  { %v6039_v32 = vrot.slane %v6024_v39, %v15040_v37  ;;  %v17230_v23 = vcombine.low %v17221_v12, %v5341_v28  ;;  %v13735_v56 = vpack.i.b16 %v6511_v3, %v7159_v58  ;;  %v13736_v63 = vpack.i.b16 %v6588_v15, %v6553_v14 }
 0x24b   :  { %v7576_v35 = vcombine.low %v6546_v48, %v6560_v2  ;;  %v6010_v46 = vrot.slane %v6002_v13, %v15040_v37  ;;  %v6017_v1 = vrot.slane %v13703_v47, %v15040_v37  ;;  %v13772_v51 = vcombine.high %v6546_v48, %v6560_v2  ;;  %v19705_v2 = vld [vmem:[#allocation5_spill] sm:$0xff] }
 0x24c   :  { %v6049_v22 = vrot.slane %v17230_v23, %v15040_v37  ;;  %v13737_v7 = vpack.i.b16 %v17226_v11, %v7171_v24  ;;  %v7575_v18 = vcombine.low %v13734_v54, %v13735_v56  ;;  %v14281_v25 = vadd.f32 %v16940_v33, %v16921_v19  ;;  %v19706_v19 = vld [vmem:[#allocation13_spill] sm:$0xff]  ;;  %v19707_v56 = vld [vmem:[#allocation6_spill] sm:$0xff] }
 0x24d   :  { %v7592_v45 = vrot.slane %v7576_v35, %v15040_v37  ;;  %v6025_v62 = vcombine.low %v6010_v46, %v6017_v1  ;;  %v7599_v3 = vrot.slane %v13772_v51, %v15040_v37  ;;  %v14375_v14 = vadd.f32 %v16952_v57, %v16938_v49 }
 0x24e   :  { %v5343_v26 = vcombine.high %v17221_v12, %v17221_v12  ;;  %v7578_v38 = vcombine.low %v13736_v63, %v13737_v7  ;;  %v7585_v48 = vrot.slane %v7575_v18, %v15040_v37  ;;  %v4608_v28 = vadd.f32 %v14281_v25, %v19705_v2 }
 0x24f   :  { %v14284_v39 = vadd.f32 %v16969_v8, %v16954_v30  ;;  %v6032_v58 = vrot.slane %v6025_v62, %v15040_v37  ;;  %v14378_v33 = vadd.f32 %v16979_v41, %v16967_v9  ;;  %v6564_v54 = vcombine.high %v19706_v19, %v16868_v61 }
 0x250   :  { %v17254_v49 = vcombine.high %v6588_v15, %v6588_v15  ;;  %v7606_v57 = vrot.slane %v7578_v38, %v15040_v37  ;;  %v7608_v12 = vcombine.high %v7585_v48, %v7592_v45  ;;  %v4744_v13 = vadd.f32 %v14375_v14, %v4608_v28  ;;  %v19708_v14 = vld [vmem:[#allocation14_spill] sm:$0xff] }
 0x251   :  { %v7607_v47 = vcombine.low %v7585_v48, %v7592_v45  ;;  %v17257_v24 = vcombine.low %v6032_v58, %v6039_v32  ;;  %v4613_v63 = vadd.f32 %v14284_v39, %v19707_v56  ;;  %v17261_v30 = vrot.slane %v6564_v54, %v15040_v37 }
 0x252   :  { %v17265_v9 = vcombine.high %v17226_v11, %v17226_v11  ;;  %v7610_v8 = vcombine.high %v7599_v3, %v7606_v57  ;;  %v7624_v61 = vrot.slane %v7608_v12, %v15040_v37  ;;  %v4777_v41 = vmax.f32 %v4744_v13, 0.0 }
 0x253   :  { %v7609_v15 = vcombine.low %v7599_v3, %v7606_v57  ;;  %v6225_v35 = vshrl.u32 %v17257_v24, 16  ;;  %v6227_v46 = vshll.u32 %v17257_v24, 16  ;;  %v7617_v32 = vrot.slane %v7607_v47, %v15040_v37 }
 0x254   :  { %v4749_v1 = vadd.f32 %v14378_v33, %v4613_v63  ;;  %v7638_v51 = vrot.slane %v7610_v8, %v15040_v37  ;;  %v4790_v7 = vpack.c.bf16 %v4777_v41, %v4776_v0  ;;  %v13694_v18 = vpack.c.bf16 %v4777_v41, %v4777_v41 }
 0x255   :  { %v7631_v45 = vrot.slane %v7609_v15, %v15040_v37  ;;  %v6229_v25 = vrot.slane %v6227_v46, 1  ;;  %v6581_v3 = vcombine.low %v17190_v21, %v17261_v30  ;;  %v6606_v38 = vcombine.high %v19708_v14, %v16880_v10 }
 0x256   :  { %v4778_v62 = vmax.f32 %v4749_v1, 0.0  ;;  %v7641_v48 = vcombine.low %v7624_v61, %v7638_v51  ;;  %v7642_v2 = vcombine.high %v7624_v61, %v7638_v51  ;;  %v5351_v28 = vrot.slane %v4790_v7, %v15040_v37 }
 0x257   :  { %v5358_v39 = vrot.slane %v13694_v18, %v15040_v37  ;;  %v17281_v33 = vor.u32 %v6229_v25, %v6225_v35  ;;  %v7639_v36 = vcombine.low %v7617_v32, %v7631_v45  ;;  %v7640_v0 = vcombine.high %v7617_v32, %v7631_v45 }
 0x258   :  { %v4791_v19 = vpack.c.bf16 %v4778_v62, %v4778_v62  ;;  %8427 = vmatprep.mubr.bf16.mxu0 %v7641_v48  ;;  %8547 = vmatprep.mubr.bf16.mxu1 %v7642_v2  ;;  %v5359_v54 = vcombine.high %v5351_v28, %v5351_v28  ;;  %v5367_v21 = vrot.slane %v5351_v28, %v15040_v37  ;;  %v7173_v12 = vunpack.i.h.s16 %v17226_v11 }
 0x259   :  { %v5360_v57 = vcombine.high %v5358_v39, %v5358_v39  ;;  %v13721_v10 = vcombine.low %v6032_v58, %v17281_v33  ;;  %v6958_v13 = vcombine.high %v17257_v24, %v17281_v33  ;;  %v5374_v47 = vrot.slane %v5358_v39, %v15040_v37  ;;  %8428 = vmatmul.mubr.bf16.gmra.mxu0 %v7639_v36 }
 0x25a   :  { %8548 = vmatmul.mubr.bf16.gmra.mxu1 %v7640_v0  ;;  %v7175_v56 = vunpack.i.h.s16 %v17254_v49  ;;  %v5381_v63 = vrot.slane %v5359_v54, %v15040_v37  ;;  %v6042_v61 = vcombine.low %v5343_v26, %v5367_v21  ;;  %v5399_v41 = vrot.slane %v4791_v19, %v15040_v37 }
 0x25b   :  { %v5388_v8 = vrot.slane %v5360_v57, %v15040_v37  ;;  %v17294_v11 = vrot.slane %v13721_v10, %v15040_v37  ;;  %v5390_v58 = vcombine.high %v5374_v47, %v5374_v47  ;;  %v6595_v15 = vrot.slane %v6581_v3, %v15040_v37 }
 0x25c   :  { %v17298_v35 = vrot.slane %v6606_v38, %v15040_v37  ;;  %v6056_v46 = vrot.slane %v6042_v61, %v15040_v37  ;;  %v6063_v32 = vrot.slane %v5381_v63, %v15040_v37  ;;  %v13704_v1 = vcombine.high %v5367_v21, %v5381_v63 }
 0x25d   :  { %v6081_v51 = vcombine.low %v5374_v47, %v5388_v8  ;;  %v6102_v7 = vrot.slane %v5390_v58, %v15040_v37  ;;  %v5392_v26 = vcombine.high %v5388_v8, %v5388_v8  ;;  %v5400_v18 = vcombine.high %v5399_v41, %v5399_v41 }
 0x25e   :  { %v5407_v45 = vrot.slane %v5399_v41, %v15040_v37  ;;  %v6064_v25 = vcombine.low %v6049_v22, %v6056_v46  ;;  %v6078_v62 = vrot.slane %v6063_v32, %v15040_v37  ;;  %v6088_v3 = vrot.slane %v13704_v1, %v15040_v37 }
 0x25f   :  { %v6095_v14 = vrot.slane %v6081_v51, %v15040_v37  ;;  %v6117_v38 = vrot.slane %v6102_v7, %v15040_v37  ;;  %v5414_v48 = vrot.slane %v5400_v18, %v15040_v37  ;;  %v6621_v0 = vcombine.low %v16892_v4, %v16906_v29 }
 0x260   :  { %v5415_v2 = vcombine.high %v5407_v45, %v5407_v45  ;;  %v6284_v28 = vcombine.low %v5392_v26, %v5407_v45  ;;  %v6071_v39 = vrot.slane %v6064_v25, %v15040_v37  ;;  %v6622_v23 = vcombine.high %v16892_v4, %v16906_v29 }
 0x261   :  { %v6103_v36 = vcombine.low %v6088_v3, %v6095_v14  ;;  %v5416_v22 = vcombine.high %v5414_v48, %v5414_v48  ;;  %v6623_v57 = vcombine.low %v17261_v30, %v17298_v35  ;;  %v6630_v47 = vrot.slane %v6621_v0, %v15040_v37 }
 0x262   :  { %v6285_v19 = vcombine.low %v5414_v48, %v5415_v2  ;;  %v6292_v54 = vrot.slane %v6284_v28, %v15040_v37  ;;  %v17320_v21 = vcombine.low %v6071_v39, %v6078_v62  ;;  %v6644_v63 = vrot.slane %v6622_v23, %v15040_v37 }
 0x263   :  { %v6110_v10 = vrot.slane %v6103_v36, %v15040_v37  ;;  %v6306_v61 = vrot.slane %v5416_v22, %v15040_v37  ;;  %v6637_v4 = vrot.slane %v6623_v57, %v15040_v37  ;;  %v6663_v41 = vcombine.low %v16906_v29, %v16924_v27  ;;  %v19710_v57 = vld [vmem:[#allocation24_spill] sm:$0xff] }
 0x264   :  { %v6299_v8 = vrot.slane %v6285_v19, %v15040_v37  ;;  %v6232_v30 = vshrl.u32 %v17320_v21, 16  ;;  %v6234_v46 = vshll.u32 %v17320_v21, 16  ;;  %v6645_v32 = vcombine.high %v6630_v47, %v6630_v47 }
 0x265   :  { %v17330_v58 = vcombine.low %v6110_v10, %v6117_v38  ;;  %v6321_v51 = vrot.slane %v6306_v61, %v15040_v37  ;;  %v6646_v7 = vcombine.high %v6644_v63, %v6644_v63  ;;  %v17336_v26 = vrot.slane %v6663_v41, %v15040_v37 }
 0x266   :  { %v6307_v1 = vcombine.low %v6292_v54, %v6299_v8  ;;  %v6236_v18 = vrot.slane %v6234_v46, 1  ;;  %v7177_v62 = vunpack.i.h.s16 %v17265_v9  ;;  %v13738_v14 = vpack.i.b16 %v17254_v49, %v7173_v12  ;;  %v19709_v54 = vld [vmem:[#allocation20_spill] sm:$0xff] }
 0x267   :  { %v6239_v45 = vshrl.u32 %v17330_v58, 16  ;;  %v6241_v25 = vshll.u32 %v17330_v58, 16  ;;  %v13739_v38 = vpack.i.b16 %v17265_v9, %v7175_v56  ;;  %v13741_v48 = vpack.i.b16 %v17336_v26, %v6637_v4 }
 0x268   :  { %v6314_v3 = vrot.slane %v6307_v1, %v15040_v37  ;;  %v17345_v2 = vor.u32 %v6236_v18, %v6232_v30  ;;  %v13740_v36 = vpack.i.b16 %v6595_v15, %v7177_v62  ;;  %v7645_v0 = vcombine.low %v6644_v63, %v6645_v32 }
 0x269   :  { %v6243_v28 = vrot.slane %v6241_v25, 1  ;;  %v7643_v22 = vcombine.low %v13738_v14, %v13739_v38  ;;  %v7646_v19 = vcombine.low %v6646_v7, %v13741_v48  ;;  %v19711_v8 = vcombine.high %v19709_v54, %v19710_v57 }
 0x26a   :  { %v17347_v23 = vcombine.low %v6314_v3, %v6321_v51  ;;  %v13722_v9 = vcombine.low %v6071_v39, %v17345_v2  ;;  %v7000_v12 = vcombine.high %v17320_v21, %v17345_v2  ;;  %v7644_v56 = vcombine.low %v13740_v36, %v6630_v47  ;;  %v19712_v36 = vld [vmem:[#allocation23_spill] sm:$0xff] }
 0x26b   :  { %v17353_v61 = vrot.slane %v19711_v8, %v15040_v37  ;;  %v17355_v49 = vor.u32 %v6243_v28, %v6239_v45  ;;  %v7653_v4 = vrot.slane %v7643_v22, %v15040_v37  ;;  %v7667_v41 = vrot.slane %v7645_v0, %v15040_v37  ;;  %v19713_v0 = vld [vmem:[#allocation27_spill] sm:$0xff] }
 0x26c   :  { %v6331_v15 = vshrl.u32 %v17347_v23, 16  ;;  %v6333_v63 = vshll.u32 %v17347_v23, 16  ;;  %v17365_v30 = vrot.slane %v13722_v9, %v15040_v37  ;;  %v7660_v32 = vrot.slane %v7644_v56, %v15040_v37 }
 0x26d   :  { %v13723_v46 = vcombine.low %v6110_v10, %v17355_v49  ;;  %v7042_v39 = vcombine.high %v17330_v58, %v17355_v49  ;;  %v7674_v47 = vrot.slane %v7646_v19, %v15040_v37  ;;  %v6664_v51 = vcombine.high %v16906_v29, %v16924_v27 }
 0x26e   :  { %v6335_v1 = vrot.slane %v6333_v63, 1  ;;  %v6665_v7 = vcombine.low %v17298_v35, %v17353_v61  ;;  %v7676_v45 = vcombine.high %v7653_v4, %v7660_v32  ;;  %v7675_v25 = vcombine.low %v7653_v4, %v7660_v32 }
 0x26f   :  { %v17377_v18 = vrot.slane %v13723_v46, %v15040_v37  ;;  %v6687_v10 = vcombine.high %v17336_v26, %v17336_v26  ;;  %v7678_v14 = vcombine.high %v7667_v41, %v7674_v47  ;;  %v7677_v38 = vcombine.low %v7667_v41, %v7674_v47 }
 0x270   :  { %v17381_v62 = vor.u32 %v6335_v1, %v6331_v15  ;;  %v6679_v48 = vrot.slane %v6665_v7, %v15040_v37  ;;  %v7692_v28 = vrot.slane %v7676_v45, %v15040_v37  ;;  %v7685_v29 = vrot.slane %v7675_v25, %v15040_v37 }
 0x271   :  { %v6686_v35 = vrot.slane %v6664_v51, %v15040_v37  ;;  %v19714_v22 = vcombine.low %v19712_v36, %v19713_v0  ;;  %v7706_v57 = vrot.slane %v7678_v14, %v15040_v37  ;;  %v7699_v8 = vrot.slane %v7677_v38, %v15040_v37 }
 0x272   :  { %v13724_v54 = vcombine.low %v6314_v3, %v17381_v62  ;;  %v7189_v9 = vunpack.i.h.s16 %v17336_v26  ;;  %v7193_v7 = vunpack.i.h.s16 %v6687_v10  ;;  %v6848_v16 = vcombine.high %v17070_v60, %v17095_v59 }
 0x273   :  { %v6697_v19 = vrot.slane %v19714_v22, %v15040_v37  ;;  %v6688_v56 = vcombine.high %v6686_v35, %v6686_v35  ;;  %v7191_v4 = vunpack.i.h.s16 %v6686_v35  ;;  %v7709_v46 = vcombine.low %v7692_v28, %v7706_v57 }
 0x274   :  { %v17398_v41 = vrot.slane %v13724_v54, %v15040_v37  ;;  %v7710_v32 = vcombine.high %v7692_v28, %v7706_v57  ;;  %v7707_v1 = vcombine.low %v7685_v29, %v7699_v8  ;;  %v7708_v47 = vcombine.high %v7685_v29, %v7699_v8  ;;  %v19717_v57 = vld [vmem:[#allocation30_spill] sm:$0xff] }
 0x275   :  { %v6705_v15 = vcombine.low %v16924_v27, %v6697_v19  ;;  %v6706_v63 = vcombine.high %v16924_v27, %v6697_v19  ;;  %8435 = vmatprep.mubr.bf16.mxu0 %v7709_v46  ;;  %v7195_v26 = vunpack.i.h.s16 %v6688_v56  ;;  %v13742_v45 = vpack.i.b16 %v6686_v35, %v7189_v9  ;;  %v19715_v27 = vld [vmem:[#allocation25_spill] sm:$0xff]  ;;  %v19718_v9 = vld [vmem:[#allocation26_spill] sm:$0xff] }
 0x276   :  { %8555 = vmatprep.mubr.bf16.mxu1 %v7710_v32  ;;  %v13743_v25 = vpack.i.b16 %v6687_v10, %v7191_v4  ;;  %v19716_v14 = vcombine.high %v19715_v27, %v19713_v0  ;;  %8436 = vmatmul.mubr.bf16.gmra.mxu0 %v7707_v1  ;;  %v13744_v28 = vpack.i.b16 %v6688_v56, %v7193_v7  ;;  %v19719_v0 = vld [vmem:[#allocation28_spill] sm:$0xff]  ;;  %v19721_v56 = vld [vmem:[#allocation29_spill] sm:$0xff] }
 0x277   :  { %v6714_v3 = vrot.slane %v6705_v15, %v15040_v37  ;;  %v6728_v51 = vrot.slane %v6706_v63, %v15040_v37  ;;  %8556 = vmatmul.mubr.bf16.gmra.mxu1 %v7708_v47  ;;  %v13745_v22 = vpack.i.b16 %v6679_v48, %v7195_v26  ;;  %v6734_v8 = vcombine.high %v19717_v57, %v17055_v20 }
 0x278   :  { %v6704_v38 = vrot.slane %v19716_v14, %v15040_v37  ;;  %v7711_v19 = vcombine.low %v13742_v45, %v13743_v25  ;;  %v19720_v15 = vcombine.high %v19718_v9, %v19719_v0  ;;  %v6763_v4 = vcombine.low %v19721_v56, %v17067_v42 }
 0x279   :  { %v7713_v36 = vcombine.low %v6714_v3, %v6728_v51  ;;  %v13773_v29 = vcombine.high %v6714_v3, %v6728_v51  ;;  %v7712_v46 = vcombine.low %v13744_v28, %v13745_v22  ;;  %v6762_v32 = vrot.slane %v6734_v8, %v15040_v37 }
 0x27a   :  { %v6707_v54 = vcombine.low %v17353_v61, %v6704_v38  ;;  %v6748_v63 = vrot.slane %v19720_v15, %v15040_v37  ;;  %v7721_v48 = vrot.slane %v7711_v19, %v15040_v37  ;;  %v6764_v47 = vcombine.high %v19721_v56, %v17067_v42 }
 0x27b   :  { %v7735_v35 = vrot.slane %v7713_v36, %v15040_v37  ;;  %v7742_v10 = vrot.slane %v13773_v29, %v15040_v37  ;;  %v6772_v3 = vrot.slane %v6763_v4, %v15040_v37  ;;  %v7728_v51 = vrot.slane %v7712_v46, %v15040_v37 }
 0x27c   :  { %v6721_v61 = vrot.slane %v6707_v54, %v15040_v37  ;;  %v6765_v7 = vcombine.low %v6748_v63, %v6762_v32  ;;  %v6805_v26 = vcombine.low %v17067_v42, %v17070_v60  ;;  %v6806_v45 = vcombine.high %v17067_v42, %v17070_v60 }
 0x27d   :  { %v7746_v20 = vcombine.high %v7735_v35, %v7742_v10  ;;  %v7745_v1 = vcombine.low %v7735_v35, %v7742_v10  ;;  %v6786_v14 = vrot.slane %v6764_v47, %v15040_v37  ;;  %v6787_v38 = vcombine.high %v6772_v3, %v6772_v3 }
 0x27e   :  { %v7744_v28 = vcombine.high %v7721_v48, %v7728_v51  ;;  %v7743_v36 = vcombine.low %v7721_v48, %v7728_v51  ;;  %v6779_v29 = vrot.slane %v6765_v7, %v15040_v37  ;;  %v6814_v22 = vrot.slane %v6805_v26, %v15040_v37 }
 0x27f   :  { %v7774_v25 = vrot.slane %v7746_v20, %v15040_v37  ;;  %v7767_v27 = vrot.slane %v7745_v1, %v15040_v37  ;;  %v6788_v19 = vcombine.high %v6786_v14, %v6786_v14  ;;  %v17434_v54 = vrot.slane %v6806_v45, %v15040_v37 }
 0x280   :  { %v7207_v57 = vunpack.i.h.s16 %v6772_v3  ;;  %v7209_v8 = vunpack.i.h.s16 %v6786_v14  ;;  %v7760_v42 = vrot.slane %v7744_v28, %v15040_v37  ;;  %v7753_v35 = vrot.slane %v7743_v36, %v15040_v37 }
 0x281   :  { %v6829_v10 = vcombine.high %v6814_v22, %v6814_v22  ;;  %v7211_v9 = vunpack.i.h.s16 %v6787_v38  ;;  %v7213_v0 = vunpack.i.h.s16 %v6788_v19  ;;  %v13746_v15 = vpack.i.b16 %v6772_v3, %v6721_v61 }
 0x282   :  { %v13747_v63 = vpack.i.b16 %v6786_v14, %v7207_v57  ;;  %v13748_v56 = vpack.i.b16 %v6787_v38, %v7209_v8  ;;  %v7777_v4 = vcombine.low %v7760_v42, %v7774_v25  ;;  %v7778_v46 = vcombine.high %v7760_v42, %v7774_v25 }
 0x283   :  { %v7775_v48 = vcombine.low %v7753_v35, %v7767_v27  ;;  %v7776_v20 = vcombine.high %v7753_v35, %v7767_v27  ;;  %v13749_v1 = vpack.i.b16 %v6788_v19, %v7211_v9  ;;  %v13750_v47 = vpack.i.b16 %v6779_v29, %v7213_v0 }
 0x284   :  { %v7779_v51 = vcombine.low %v13746_v15, %v13747_v63  ;;  %v7782_v7 = vcombine.low %v17434_v54, %v6829_v10  ;;  %8443 = vmatprep.mubr.bf16.mxu0 %v7777_v4  ;;  %8563 = vmatprep.mubr.bf16.mxu1 %v7778_v46  ;;  %v6804_v26 = vrot.slane %v6790_v52, %v15040_v37 }
 0x285   :  { %v6830_v61 = vcombine.high %v17434_v54, %v17434_v54  ;;  %v6846_v3 = vrot.slane %v6832_v40, %v15040_v37  ;;  %8444 = vmatmul.mubr.bf16.gmra.mxu0 %v7775_v48  ;;  %8564 = vmatmul.mubr.bf16.gmra.mxu1 %v7776_v20  ;;  %v7780_v45 = vcombine.low %v13748_v56, %v13749_v1 }
 0x286   :  { %v7781_v25 = vcombine.low %v13750_v47, %v6814_v22  ;;  %v7789_v27 = vrot.slane %v7779_v51, %v15040_v37  ;;  %v7810_v14 = vrot.slane %v7782_v7, %v15040_v37  ;;  %v6807_v38 = vcombine.low %v6762_v32, %v6804_v26 }
 0x287   :  { %v7796_v52 = vrot.slane %v7780_v45, %v15040_v37  ;;  %v6849_v17 = vcombine.low %v6804_v26, %v6846_v3  ;;  %v6889_v40 = vcombine.low %v17095_v59, %v17204_v44  ;;  %v6856_v36 = vrot.slane %v6847_v6, %v15040_v37 }
 0x288   :  { %v7803_v53 = vrot.slane %v7781_v25, %v15040_v37  ;;  %v6821_v28 = vrot.slane %v6807_v38, %v15040_v37  ;;  %v6870_v32 = vrot.slane %v6848_v16, %v15040_v37  ;;  %v6890_v29 = vcombine.high %v17095_v59, %v17204_v44 }
 0x289   :  { %v7812_v22 = vcombine.high %v7789_v27, %v7796_v52  ;;  %v7811_v60 = vcombine.low %v7789_v27, %v7796_v52  ;;  %v6863_v57 = vrot.slane %v6849_v17, %v15040_v37  ;;  %v6871_v8 = vcombine.high %v6856_v36, %v6856_v36 }
 0x28a   :  { %v7814_v19 = vcombine.high %v7803_v53, %v7810_v14  ;;  %v7813_v54 = vcombine.low %v7803_v53, %v7810_v14  ;;  %v6872_v42 = vcombine.high %v6870_v32, %v6870_v32  ;;  %v17466_v35 = vrot.slane %v6889_v40, %v15040_v37 }
 0x28b   :  { %v7828_v10 = vrot.slane %v7812_v22, %v15040_v37  ;;  %v7821_v0 = vrot.slane %v7811_v60, %v15040_v37  ;;  %v17473_v59 = vrot.slane %v6890_v29, %v15040_v37  ;;  %v7225_v63 = vunpack.i.h.s16 %v6856_v36 }
 0x28c   :  { %v7842_v9 = vrot.slane %v7814_v19, %v15040_v37  ;;  %v7835_v15 = vrot.slane %v7813_v54, %v15040_v37  ;;  %v7227_v56 = vunpack.i.h.s16 %v6870_v32  ;;  %v7229_v4 = vunpack.i.h.s16 %v6871_v8 }
 0x28d   :  { %v7231_v47 = vunpack.i.h.s16 %v6872_v42  ;;  %v13751_v51 = vpack.i.b16 %v6856_v36, %v6821_v28  ;;  %v13752_v7 = vpack.i.b16 %v6870_v32, %v7225_v63  ;;  %v7850_v25 = vcombine.low %v17466_v35, %v17473_v59 }
 0x28e   :  { %v7845_v46 = vcombine.low %v7828_v10, %v7842_v9  ;;  %v7846_v48 = vcombine.high %v7828_v10, %v7842_v9  ;;  %v7843_v20 = vcombine.low %v7821_v0, %v7835_v15  ;;  %v7844_v1 = vcombine.high %v7821_v0, %v7835_v15 }
 0x28f   :  { %v13753_v26 = vpack.i.b16 %v6871_v8, %v7227_v56  ;;  %v13754_v45 = vpack.i.b16 %v6872_v42, %v7229_v4  ;;  %v6888_v27 = vrot.slane %v6874_v34, %v15040_v37  ;;  %v13755_v14 = vpack.i.b16 %v6863_v57, %v7231_v47 }
 0x290   :  { %8451 = vmatprep.mubr.bf16.mxu0 %v7845_v46  ;;  %8571 = vmatprep.mubr.bf16.mxu1 %v7846_v48  ;;  %v7847_v38 = vcombine.low %v6830_v61, %v13751_v51  ;;  %v7878_v16 = vrot.slane %v7850_v25, %v15040_v37  ;;  %v6916_v53 = vcombine.high %v17163_v50, %v17192_v55 }
 0x291   :  { %8452 = vmatmul.mubr.bf16.gmra.mxu0 %v7843_v20  ;;  %8572 = vmatmul.mubr.bf16.gmra.mxu1 %v7844_v1  ;;  %v7848_v6 = vcombine.low %v13752_v7, %v13753_v26  ;;  %v6891_v52 = vcombine.low %v6846_v3, %v6888_v27  ;;  %v6931_v17 = vcombine.low %v17204_v44, %v17213_v31 }
 0x292   :  { %v7849_v40 = vcombine.low %v13754_v45, %v13755_v14  ;;  %v7857_v28 = vrot.slane %v7847_v38, %v15040_v37  ;;  %v6932_v5 = vcombine.high %v17204_v44, %v17213_v31  ;;  %v6930_v61 = vrot.slane %v6916_v53, %v15040_v37 }
 0x293   :  { %v7864_v43 = vrot.slane %v7848_v6, %v15040_v37  ;;  %v6905_v34 = vrot.slane %v6891_v52, %v15040_v37  ;;  %v6940_v3 = vrot.slane %v6931_v17, %v15040_v37  ;;  %v6973_v50 = vcombine.low %v17213_v31, %v17294_v11 }
 0x294   :  { %v7871_v55 = vrot.slane %v7849_v40, %v15040_v37  ;;  %v6954_v29 = vrot.slane %v6932_v5, %v15040_v37  ;;  %v6933_v22 = vcombine.low %v6888_v27, %v6930_v61  ;;  %v13774_v47 = vcombine.high %v17466_v35, %v17473_v59 }
 0x295   :  { %v7880_v36 = vcombine.high %v7857_v28, %v7864_v43  ;;  %v7879_v32 = vcombine.low %v7857_v28, %v7864_v43  ;;  %v6955_v19 = vcombine.high %v6940_v3, %v6940_v3  ;;  %v6982_v60 = vrot.slane %v6973_v50, %v15040_v37 }
 0x296   :  { %v7243_v44 = vunpack.i.h.s16 %v6940_v3  ;;  %v7882_v54 = vcombine.high %v7871_v55, %v7878_v16  ;;  %v7881_v8 = vcombine.low %v7871_v55, %v7878_v16  ;;  %v6947_v10 = vrot.slane %v6933_v22, %v15040_v37 }
 0x297   :  { %v7896_v57 = vrot.slane %v7880_v36, %v15040_v37  ;;  %v7889_v42 = vrot.slane %v7879_v32, %v15040_v37  ;;  %v6956_v9 = vcombine.high %v6954_v29, %v6954_v29  ;;  %v7245_v0 = vunpack.i.h.s16 %v6954_v29 }
 0x298   :  { %v7247_v15 = vunpack.i.h.s16 %v6955_v19  ;;  %v7910_v63 = vrot.slane %v7882_v54, %v15040_v37  ;;  %v7903_v56 = vrot.slane %v7881_v8, %v15040_v37  ;;  %v13756_v4 = vpack.i.b16 %v6940_v3, %v6905_v34 }
 0x299   :  { %v13757_v46 = vpack.i.b16 %v6954_v29, %v7243_v44  ;;  %v7249_v48 = vunpack.i.h.s16 %v6956_v9  ;;  %v13758_v20 = vpack.i.b16 %v6955_v19, %v7245_v0  ;;  %v7925_v38 = vrot.slane %v13774_v47, %v15040_v37 }
 0x29a   :  { %v13759_v1 = vpack.i.b16 %v6956_v9, %v7247_v15  ;;  %v7913_v51 = vcombine.low %v7896_v57, %v7910_v63  ;;  %v7914_v7 = vcombine.high %v7896_v57, %v7910_v63  ;;  %v7911_v26 = vcombine.low %v7889_v42, %v7903_v56 }
 0x29b   :  { %v7912_v45 = vcombine.high %v7889_v42, %v7903_v56  ;;  %v13760_v25 = vpack.i.b16 %v6947_v10, %v7249_v48  ;;  %v7916_v27 = vcombine.low %v13756_v4, %v13757_v46  ;;  %v6972_v6 = vrot.slane %v6958_v13, %v15040_v37 }
 0x29c   :  { %v7917_v14 = vcombine.low %v13758_v20, %v13759_v1  ;;  %8459 = vmatprep.mubr.bf16.mxu0 %v7913_v51  ;;  %8579 = vmatprep.mubr.bf16.mxu1 %v7914_v7  ;;  %v6974_v16 = vcombine.high %v17213_v31, %v17294_v11  ;;  %v6997_v35 = vcombine.high %v6982_v60, %v6982_v60 }
 0x29d   :  { %8460 = vmatmul.mubr.bf16.gmra.mxu0 %v7911_v26  ;;  %8580 = vmatmul.mubr.bf16.gmra.mxu1 %v7912_v45  ;;  %v7918_v59 = vcombine.low %v13760_v25, %v6982_v60  ;;  %v7932_v52 = vrot.slane %v7916_v27, %v15040_v37  ;;  %v6975_v17 = vcombine.low %v6930_v61, %v6972_v6 }
 0x29e   :  { %v7939_v53 = vrot.slane %v7917_v14, %v15040_v37  ;;  %v6996_v40 = vrot.slane %v6974_v16, %v15040_v37  ;;  %v7014_v24 = vrot.slane %v7000_v12, %v15040_v37  ;;  %v7015_v33 = vcombine.low %v17294_v11, %v17365_v30 }
 0x29f   :  { %v7946_v31 = vrot.slane %v7918_v59, %v15040_v37  ;;  %v7948_v13 = vcombine.high %v7925_v38, %v7932_v52  ;;  %v7947_v28 = vcombine.low %v7925_v38, %v7932_v52  ;;  %v7016_v43 = vcombine.high %v17294_v11, %v17365_v30 }
 0x2a0   :  { %v6989_v5 = vrot.slane %v6975_v17, %v15040_v37  ;;  %v6998_v34 = vcombine.high %v6996_v40, %v6996_v40  ;;  %v7017_v61 = vcombine.low %v6972_v6, %v7014_v24  ;;  %v7024_v3 = vrot.slane %v7015_v33, %v15040_v37 }
 0x2a1   :  { %v7950_v50 = vcombine.high %v7939_v53, %v7946_v31  ;;  %v7964_v21 = vrot.slane %v7948_v13, %v15040_v37  ;;  %v7949_v2 = vcombine.low %v7939_v53, %v7946_v31  ;;  %v7957_v12 = vrot.slane %v7947_v28, %v15040_v37 }
 0x2a2   :  { %v7031_v55 = vrot.slane %v7017_v61, %v15040_v37  ;;  %v7038_v36 = vrot.slane %v7016_v43, %v15040_v37  ;;  %v7039_v32 = vcombine.high %v7024_v3, %v7024_v3  ;;  %v7261_v29 = vunpack.i.h.s16 %v7024_v3 }
 0x2a3   :  { %v7978_v11 = vrot.slane %v7950_v50, %v15040_v37  ;;  %v7971_v22 = vrot.slane %v7949_v2, %v15040_v37  ;;  %v13761_v19 = vpack.i.b16 %v7024_v3, %v6989_v5  ;;  %v7983_v60 = vcombine.low %v6996_v40, %v6997_v35 }
 0x2a4   :  { %v7040_v44 = vcombine.high %v7038_v36, %v7038_v36  ;;  %v7263_v54 = vunpack.i.h.s16 %v7038_v36  ;;  %v7265_v57 = vunpack.i.h.s16 %v7039_v32  ;;  %v13762_v8 = vpack.i.b16 %v7038_v36, %v7261_v29 }
 0x2a5   :  { %v7981_v42 = vcombine.low %v7964_v21, %v7978_v11  ;;  %v7982_v10 = vcombine.high %v7964_v21, %v7978_v11  ;;  %v7979_v9 = vcombine.low %v7957_v12, %v7971_v22  ;;  %v7980_v0 = vcombine.high %v7957_v12, %v7971_v22 }
 0x2a6   :  { %v7267_v15 = vunpack.i.h.s16 %v7040_v44  ;;  %v13763_v63 = vpack.i.b16 %v7039_v32, %v7263_v54  ;;  %v13764_v56 = vpack.i.b16 %v7040_v44, %v7265_v57  ;;  %v7984_v4 = vcombine.low %v6998_v34, %v13761_v19 }
 0x2a7   :  { %8467 = vmatprep.mubr.bf16.mxu0 %v7981_v42  ;;  %8587 = vmatprep.mubr.bf16.mxu1 %v7982_v10  ;;  %v7993_v46 = vrot.slane %v7983_v60, %v15040_v37  ;;  %v7056_v48 = vrot.slane %v7042_v39, %v15040_v37  ;;  %v7057_v20 = vcombine.low %v17365_v30, %v17377_v18 }
 0x2a8   :  { %8468 = vmatmul.mubr.bf16.gmra.mxu0 %v7979_v9  ;;  %8588 = vmatmul.mubr.bf16.gmra.mxu1 %v7980_v0  ;;  %v13765_v1 = vpack.i.b16 %v7031_v55, %v7267_v15  ;;  %v7985_v47 = vcombine.low %v13762_v8, %v13763_v63  ;;  %v8000_v51 = vrot.slane %v7984_v4, %v15040_v37 }
 0x2a9   :  { %v7058_v7 = vcombine.high %v17365_v30, %v17377_v18  ;;  %v7059_v26 = vcombine.low %v7014_v24, %v7056_v48  ;;  %v7066_v45 = vrot.slane %v7057_v20, %v15040_v37  ;;  %v7099_v25 = vcombine.low %v17377_v18, %v17398_v41 }
 0x2aa   :  { %v7986_v58 = vcombine.low %v13764_v56, %v13765_v1  ;;  %v8007_v49 = vrot.slane %v7985_v47, %v15040_v37  ;;  %v8016_v39 = vcombine.high %v7993_v46, %v8000_v51  ;;  %v8015_v27 = vcombine.low %v7993_v46, %v8000_v51 }
 0x2ab   :  { %v7073_v14 = vrot.slane %v7059_v26, %v15040_v37  ;;  %v7080_v38 = vrot.slane %v7058_v7, %v15040_v37  ;;  %v7100_v6 = vcombine.high %v17377_v18, %v17398_v41  ;;  %v7108_v30 = vrot.slane %v7099_v25, %v15040_v37 }
 0x2ac   :  { %v8014_v16 = vrot.slane %v7986_v58, %v15040_v37  ;;  %v8032_v35 = vrot.slane %v8016_v39, %v15040_v37  ;;  %v8025_v59 = vrot.slane %v8015_v27, %v15040_v37  ;;  %v7084_v52 = vcombine.high %v17347_v23, %v17381_v62  ;;  %v17575_v58 = vld [vmem:[%s19499_s4] ss:$0 sm:$0xff] }
 0x2ad   :  { %v7122_v53 = vrot.slane %v7100_v6, %v15040_v37  ;;  %v7123_v17 = vcombine.high %v7108_v30, %v7108_v30  ;;  %v7279_v40 = vunpack.i.h.s16 %v7108_v30  ;;  %v13766_v24 = vpack.i.b16 %v7108_v30, %v7073_v14 }
 0x2ae   :  { %v8018_v33 = vcombine.high %v8007_v49, %v8014_v16  ;;  %v8017_v31 = vcombine.low %v8007_v49, %v8014_v16  ;;  %v8051_v13 = vcombine.low %v7066_v45, %v7080_v38  ;;  %v13775_v18 = vcombine.high %v7066_v45, %v7080_v38 }
 0x2af   :  { %v7124_v41 = vcombine.high %v7122_v53, %v7122_v53  ;;  %v7281_v28 = vunpack.i.h.s16 %v7122_v53  ;;  %v7283_v43 = vunpack.i.h.s16 %v7123_v17  ;;  %v13767_v5 = vpack.i.b16 %v7122_v53, %v7279_v40 }
 0x2b0   :  { %v8046_v34 = vrot.slane %v8018_v33, %v15040_v37  ;;  %v8039_v61 = vrot.slane %v8017_v31, %v15040_v37  ;;  %v8061_v3 = vrot.slane %v8051_v13, %v15040_v37  ;;  %v8068_v23 = vrot.slane %v13775_v18, %v15040_v37 }
 0x2b1   :  { %v13768_v62 = vpack.i.b16 %v7123_v17, %v7281_v28  ;;  %v13769_v50 = vpack.i.b16 %v7124_v41, %v7283_v43  ;;  %v8053_v21 = vcombine.low %v13766_v24, %v13767_v5  ;;  %v7098_v2 = vrot.slane %v7084_v52, %v15040_v37 }
 0x2b2   :  { %v8049_v12 = vcombine.low %v8032_v35, %v8046_v34  ;;  %v8050_v55 = vcombine.high %v8032_v35, %v8046_v34  ;;  %v8047_v36 = vcombine.low %v8025_v59, %v8039_v61  ;;  %v8048_v32 = vcombine.high %v8025_v59, %v8039_v61 }
 0x2b3   :  { %v8054_v29 = vcombine.low %v13768_v62, %v13769_v50  ;;  %v8084_v11 = vcombine.high %v8061_v3, %v8068_v23  ;;  %v8083_v22 = vcombine.low %v8061_v3, %v8068_v23  ;;  %v7101_v19 = vcombine.low %v7056_v48, %v7098_v2 }
 0x2b4   :  { %8475 = vmatprep.mubr.bf16.mxu0 %v8049_v12  ;;  %8595 = vmatprep.mubr.bf16.mxu1 %v8050_v55  ;;  %v7285_v60 = vunpack.i.h.s16 %v7124_v41  ;;  %v8075_v44 = vrot.slane %v8053_v21, %v15040_v37 }
 0x2b5   :  { %8476 = vmatmul.mubr.bf16.gmra.mxu0 %v8047_v36  ;;  %8596 = vmatmul.mubr.bf16.gmra.mxu1 %v8048_v32  ;;  %v8082_v54 = vrot.slane %v8054_v29, %v15040_v37  ;;  %v7115_v57 = vrot.slane %v7101_v19, %v15040_v37  ;;  %v8100_v9 = vrot.slane %v8084_v11, %v15040_v37 }
 0x2b6   :  { %v8093_v15 = vrot.slane %v8083_v22, %v15040_v37 }
 0x2b7   :  { %v8086_v8 = vcombine.high %v8075_v44, %v8082_v54  ;;  %v8085_v42 = vcombine.low %v8075_v44, %v8082_v54  ;;  %v13770_v10 = vpack.i.b16 %v7115_v57, %v7285_v60 }
 0x2b9   :  { %v8114_v0 = vrot.slane %v8086_v8, %v15040_v37  ;;  %v8107_v63 = vrot.slane %v8085_v42, %v15040_v37  ;;  %v8125_v56 = vrot.slane %v13770_v10, %v15040_v37 }
 0x2bb   :  { %v8117_v4 = vcombine.low %v8100_v9, %v8114_v0  ;;  %v8118_v46 = vcombine.high %v8100_v9, %v8114_v0  ;;  %v8115_v48 = vcombine.low %v8093_v15, %v8107_v63  ;;  %v8116_v20 = vcombine.high %v8093_v15, %v8107_v63 }
 0x2bc   :  { %v8126_v1 = vcombine.high %v8125_v56, %v8125_v56  ;;  %v8133_v7 = vrot.slane %v8125_v56, %v15040_v37 }
 0x2bd   :  { %8483 = vmatprep.mubr.bf16.mxu0 %v8117_v4  ;;  %8603 = vmatprep.mubr.bf16.mxu1 %v8118_v46 }
 0x2be   :  { %8484 = vmatmul.mubr.bf16.gmra.mxu0 %v8115_v48  ;;  %8604 = vmatmul.mubr.bf16.gmra.mxu1 %v8116_v20  ;;  %v8140_v47 = vrot.slane %v8126_v1, %v15040_v37  ;;  %v8141_v26 = vcombine.high %v8133_v7, %v8133_v7 }
 0x2c0   :  { %8491 = vmatprep.mubr.bf16.mxu0 %v8140_v47  ;;  %v8142_v51 = vcombine.high %v8140_v47, %v8140_v47 }
 0x2c2   :  { %8611 = vmatprep.mubr.bf16.mxu1 %v8142_v51 }
 0x2c6   :  { %8492 = vmatmul.mubr.bf16.gmra.mxu0 %v8133_v7  ;;  %8612 = vmatmul.mubr.bf16.gmra.mxu1 %v8141_v26 }
 0x2ec   :  { %v14398_v45 = vpop.f32.mrf.mxu0  ;;  %v14480_v25 = vpop.f32.mrf.mxu1 }
 0x2ee   :  { %v14399_v49 = vpop.f32.mrf.mxu0  ;;  %v14481_v39 = vpop.f32.mrf.mxu1 }
 0x2ef   :  { %v14400_v27 = vadd.f32 %v14399_v49, %v14398_v45  ;;  %v14482_v35 = vadd.f32 %v14481_v39, %v14480_v25 }
 0x2f0   :  { %v14401_v14 = vpop.f32.mrf.mxu0  ;;  %v14483_v38 = vpop.f32.mrf.mxu1 }
 0x2f1   :  { %v8414_v6 = vadd.f32 %v14400_v27, %v17575_v58 }
 0x2f2   :  { %v14402_v30 = vpop.f32.mrf.mxu0  ;;  %v14484_v16 = vpop.f32.mrf.mxu1 }
 0x2f3   :  { %v14403_v59 = vadd.f32 %v14402_v30, %v14401_v14  ;;  %v8534_v52 = vadd.f32 %v14482_v35, %v8414_v6  ;;  %v14485_v17 = vadd.f32 %v14484_v16, %v14483_v38 }
 0x2f5   :  { %v8417_v53 = vadd.f32 %v14403_v59, %v17575_v58  ;;  %v8619_v24 = vmax.f32 %v8534_v52, 0.0 }
 0x2f7   :  { %v8537_v40 = vadd.f32 %v14485_v17, %v8417_v53 }
 0x2f9   :  { %v8620_v33 = vmax.f32 %v8537_v40, 0.0 }
 0x2fb   :  { %v8640_v31 = vpack.c.bf16 %v8620_v33, %v8619_v24  ;;  %v13808_v13 = vpack.c.bf16 %v8620_v33, %v8620_v33 }
 0x2fd   :  { %v8669_v18 = vrot.slane %v8640_v31, %v15040_v37  ;;  %v8676_v41 = vrot.slane %v13808_v13, %v15040_v37 }
 0x2fe   :  { %v14404_v28 = vpop.f32.mrf.mxu0  ;;  %v14486_v43 = vpop.f32.mrf.mxu1 }
 0x2ff   :  { %v8677_v5 = vcombine.high %v8669_v18, %v8669_v18  ;;  %v8678_v34 = vcombine.high %v8676_v41, %v8676_v41  ;;  %v17582_v61 = vrot.slane %v8669_v18, %v15040_v37  ;;  %v8692_v3 = vrot.slane %v8676_v41, %v15040_v37 }
 0x300   :  { %v14405_v23 = vpop.f32.mrf.mxu0  ;;  %v14487_v62 = vpop.f32.mrf.mxu1 }
 0x301   :  { %v8699_v50 = vrot.slane %v8677_v5, %v15040_v37  ;;  %v17587_v21 = vrot.slane %v8678_v34, %v15040_v37  ;;  %v8707_v2 = vcombine.high %v17582_v61, %v17582_v61  ;;  %v17591_v12 = vcombine.high %v8692_v3, %v8692_v3 }
 0x302   :  { %v9175_v55 = vunpack.i.h.s16 %v8692_v3  ;;  %v14406_v36 = vadd.f32 %v14405_v23, %v14404_v28  ;;  %v14488_v32 = vadd.f32 %v14487_v62, %v14486_v43  ;;  %v14407_v29 = vpop.f32.mrf.mxu0  ;;  %v14489_v11 = vpop.f32.mrf.mxu1  ;;  %v9167_v19 = vunpack.i.h.s16 %v17582_v61 }
 0x303   :  { %v8709_v22 = vcombine.high %v8699_v50, %v8699_v50  ;;  %v9169_v60 = vunpack.i.h.s16 %v8699_v50  ;;  %v9171_v44 = vunpack.i.h.s16 %v8707_v2  ;;  %v17597_v42 = vcombine.high %v17587_v21, %v17587_v21 }
 0x304   :  { %v8422_v54 = vadd.f32 %v14406_v36, %v17575_v58  ;;  %v14408_v57 = vpop.f32.mrf.mxu0  ;;  %v14490_v8 = vpop.f32.mrf.mxu1  ;;  %v9177_v10 = vunpack.i.h.s16 %v17587_v21  ;;  %v9179_v9 = vunpack.i.h.s16 %v17591_v12  ;;  %v13841_v56 = vpack.i.b16 %v8699_v50, %v9167_v19 }
 0x305   :  { %v14409_v0 = vadd.f32 %v14408_v57, %v14407_v29  ;;  %v14491_v15 = vadd.f32 %v14490_v8, %v14489_v11  ;;  %v9173_v63 = vunpack.i.h.s16 %v8709_v22  ;;  %v13842_v46 = vpack.i.b16 %v8707_v2, %v9169_v60 }
 0x306   :  { %v8542_v4 = vadd.f32 %v14488_v32, %v8422_v54  ;;  %v13843_v48 = vpack.i.b16 %v8709_v22, %v9171_v44  ;;  %v9181_v20 = vunpack.i.h.s16 %v17597_v42  ;;  %v13819_v47 = vpack.i.b16 %v17591_v12, %v9177_v10 }
 0x307   :  { %v8425_v1 = vadd.f32 %v14409_v0, %v17575_v58  ;;  %v13820_v51 = vpack.i.b16 %v17597_v42, %v9179_v9  ;;  %v13818_v7 = vpack.i.b16 %v17587_v21, %v9175_v55  ;;  %v9776_v26 = vcombine.low %v13841_v56, %v13842_v46 }
 0x308   :  { %v9777_v45 = vcombine.low %v13843_v48, %v9173_v63  ;;  %v9174_v27 = vunpack.i.l.s16 %v8692_v3  ;;  %v9384_v6 = vcombine.low %v17582_v61, %v8699_v50  ;;  %v8621_v30 = vmax.f32 %v8542_v4, 0.0 }
 0x309   :  { %v8545_v25 = vadd.f32 %v14491_v15, %v8425_v1  ;;  %v9408_v49 = vcombine.low %v13818_v7, %v13819_v47  ;;  %v9409_v39 = vcombine.low %v13820_v51, %v9181_v20  ;;  %v9784_v14 = vrot.slane %v9776_v26, %v15040_v37 }
 0x30a   :  { %v9791_v38 = vrot.slane %v9777_v45, %v15040_v37  ;;  %v9172_v53 = vunpack.i.l.s16 %v8709_v22  ;;  %v10168_v17 = vcombine.low %v8699_v50, %v8707_v2  ;;  %v10169_v33 = vcombine.low %v8709_v22, %v9174_v27 }
 0x30b   :  { %v8622_v16 = vmax.f32 %v8545_v25, 0.0  ;;  %v9416_v35 = vrot.slane %v9408_v49, %v15040_v37  ;;  %v9423_v59 = vrot.slane %v9409_v39, %v15040_v37  ;;  %v9800_v5 = vcombine.low %v17587_v21, %v17591_v12 }
 0x30c   :  { %v9792_v52 = vcombine.low %v9784_v14, %v9791_v38  ;;  %v9385_v18 = vcombine.low %v8707_v2, %v9172_v53  ;;  %v10183_v43 = vrot.slane %v10169_v33, %v15040_v37  ;;  %v9392_v34 = vrot.slane %v9384_v6, %v15040_v37 }
 0x30d   :  { %v8641_v40 = vpack.c.bf16 %v8622_v16, %v8621_v30  ;;  %v13809_v24 = vpack.c.bf16 %v8622_v16, %v8622_v16  ;;  %v9424_v13 = vcombine.low %v9416_v35, %v9423_v59  ;;  %v10176_v3 = vrot.slane %v10168_v17, %v15040_v37 }
 0x30e   :  { %v9799_v31 = vrot.slane %v9792_v52, %v15040_v37  ;;  %v9399_v61 = vrot.slane %v9385_v18, %v15040_v37  ;;  %v10192_v55 = vcombine.low %v13819_v47, %v13820_v51  ;;  %v9808_v44 = vrot.slane %v9800_v5, %v15040_v37 }
 0x30f   :  { %v8718_v41 = vrot.slane %v8641_v40, %v15040_v37  ;;  %v8725_v28 = vrot.slane %v13809_v24, %v15040_v37  ;;  %v17626_v36 = vrot.slane %v9424_v13, %v15040_v37  ;;  %v17630_v21 = vcombine.low %v10176_v3, %v10183_v43 }
 0x310   :  { %10112 = vrot.lane.b32.xlu0 %v9799_v31, %s14901_s22  ;;  %v17628_v32 = vcombine.low %v9392_v34, %v9399_v61  ;;  %v10200_v56 = vrot.slane %v10192_v55, %v15040_v37 }
 0x311   :  { %v8726_v23 = vcombine.high %v8718_v41, %v8718_v41  ;;  %v8727_v62 = vcombine.high %v8725_v28, %v8725_v28  ;;  %v8734_v50 = vrot.slane %v8718_v41, %v15040_v37  ;;  %v17623_v2 = vrot.slane %v8725_v28, %v15040_v37 }
 0x313   :  { %v8748_v12 = vrot.slane %v8726_v23, %v15040_v37  ;;  %v17634_v29 = vrot.slane %v8727_v62, %v15040_v37  ;;  %v9183_v11 = vunpack.i.h.s16 %v8734_v50  ;;  %v13864_v22 = vpack.i.b16 %v8734_v50, %v9181_v20 }
 0x314   :  { %10560 = vrot.lane.b32.xlu0 %v17626_v36, %s14901_s22  ;;  %v8756_v19 = vcombine.high %v8734_v50, %v8734_v50  ;;  %v9182_v60 = vunpack.i.l.s16 %v8734_v50  ;;  %v9190_v8 = vunpack.i.l.s16 %v17623_v2  ;;  %v9191_v27 = vunpack.i.h.s16 %v17623_v2 }
 0x315   :  { %v10193_v54 = vcombine.low %v13864_v22, %v9183_v11  ;;  %v8758_v57 = vcombine.high %v8748_v12, %v8748_v12  ;;  %v9192_v10 = vunpack.i.l.s16 %v17634_v29  ;;  %v9185_v15 = vunpack.i.h.s16 %v8748_v12 }
 0x316   :  { %v9432_v9 = vcombine.low %v8748_v12, %v8756_v19  ;;  %v9801_v0 = vcombine.low %v17597_v42, %v9182_v60  ;;  %v9187_v63 = vunpack.i.h.s16 %v8756_v19  ;;  %v13871_v47 = vcombine.high %v8734_v50, %v8748_v12 }
 0x317   :  { %v10207_v4 = vrot.slane %v10193_v54, %v15040_v37  ;;  %v9433_v46 = vcombine.low %v8758_v57, %v9190_v8  ;;  %v10217_v48 = vcombine.low %v17623_v2, %v9192_v10  ;;  %v9189_v51 = vunpack.i.h.s16 %v8758_v57 }
 0x318   :  { %v9440_v20 = vrot.slane %v9432_v9, %v15040_v37  ;;  %v9815_v1 = vrot.slane %v9801_v0, %v15040_v37  ;;  %v13844_v25 = vpack.i.b16 %v8756_v19, %v9185_v15  ;;  %v13845_v49 = vpack.i.b16 %v8758_v57, %v9187_v63 }
 0x319   :  { %v14410_v7 = vpop.f32.mrf.mxu0  ;;  %v10208_v45 = vcombine.low %v10200_v56, %v10207_v4  ;;  %v9447_v42 = vrot.slane %v9433_v46, %v15040_v37  ;;  %v13846_v14 = vpack.i.b16 %v17623_v2, %v9189_v51  ;;  %v10231_v35 = vrot.slane %v10217_v48, %v15040_v37 }
 0x31a   :  { %v14492_v26 = vpop.f32.mrf.mxu1  ;;  %v9816_v39 = vcombine.low %v9808_v44, %v9815_v1  ;;  %v10224_v24 = vrot.slane %v13871_v47, %v15040_v37  ;;  %v9824_v33 = vcombine.low %v13844_v25, %v13845_v49  ;;  %v8757_v3 = vcombine.high %v17623_v2, %v17623_v2 }
 0x31b   :  { %v14411_v38 = vpop.f32.mrf.mxu0  ;;  %v17651_v30 = vrot.slane %v10208_v45, %v15040_v37  ;;  %v9448_v16 = vcombine.low %v9440_v20, %v9447_v42  ;;  %v9825_v53 = vcombine.low %v13846_v14, %v9191_v27  ;;  %v8759_v22 = vcombine.high %v17634_v29, %v17634_v29 }
 0x31c   :  { %v14493_v6 = vpop.f32.mrf.mxu1  ;;  %v14412_v59 = vadd.f32 %v14411_v38, %v14410_v7  ;;  %v17655_v52 = vrot.slane %v9816_v39, %v15040_v37  ;;  %v10232_v28 = vcombine.low %v10224_v24, %v10231_v35  ;;  %v9832_v61 = vrot.slane %v9824_v33, %v15040_v37 }
 0x31d   :  { %v14413_v17 = vpop.f32.mrf.mxu0  ;;  %10696 = vrot.lane.b32.xlu1 %v17651_v30, %s14901_s22  ;;  %v17664_v41 = vrot.slane %v9448_v16, %v15040_v37  ;;  %v9839_v43 = vrot.slane %v9825_v53, %v15040_v37  ;;  %v14494_v5 = vadd.f32 %v14493_v6, %v14492_v26  ;;  %v9193_v19 = vunpack.i.h.s16 %v17634_v29 }
 0x31e   :  { %v14495_v40 = vpop.f32.mrf.mxu1  ;;  %v8430_v31 = vadd.f32 %v14412_v59, %v17575_v58  ;;  %10114 = vrot.lane.b32.xlu0 %v17655_v52, %s14901_s22  ;;  %v17674_v55 = vrot.slane %v10232_v28, %v15040_v37  ;;  %v9195_v60 = vunpack.i.h.s16 %v8757_v3  ;;  %v9197_v56 = vunpack.i.h.s16 %v8759_v22 }
 0x31f   :  { %v14414_v13 = vpop.f32.mrf.mxu0  ;;  %v9840_v12 = vcombine.low %v9832_v61, %v9839_v43  ;;  %v13821_v9 = vpack.i.b16 %v8757_v3, %v9193_v19  ;;  %v13862_v45 = vcombine.high %v17623_v2, %v17634_v29 }
 0x320   :  { %v14496_v18 = vpop.f32.mrf.mxu1  ;;  %v14415_v34 = vadd.f32 %v14414_v13, %v14413_v17  ;;  %v8550_v23 = vadd.f32 %v14494_v5, %v8430_v31  ;;  %v13822_v0 = vpack.i.b16 %v8759_v22, %v9195_v60 }
 0x321   :  { %10562 = vrot.lane.b32.xlu1 %v17664_v41, %s14901_s22  ;;  %v14497_v50 = vadd.f32 %v14496_v18, %v14495_v40  ;;  %v17682_v57 = vrot.slane %v9840_v12, %v15040_v37  ;;  %v9856_v2 = vrot.slane %v13862_v45, %v15040_v37 }
 0x322   :  { %v8433_v62 = vadd.f32 %v14415_v34, %v17575_v58  ;;  %v8623_v44 = vmax.f32 %v8550_v23, 0.0  ;;  %v9456_v1 = vcombine.low %v13821_v9, %v13822_v0 }
 0x324   :  { %v8553_v11 = vadd.f32 %v14497_v50, %v8433_v62  ;;  %v9464_v14 = vrot.slane %v9456_v1, %v15040_v37 }
 0x325   :  { %10698 = vrot.lane.b32.xlu1 %v17674_v55, %s14901_s22 }
 0x326   :  { %v8624_v54 = vmax.f32 %v8553_v11, 0.0 }
 0x328   :  { %v8642_v8 = vpack.c.bf16 %v8624_v54, %v8623_v44  ;;  %v13810_v10 = vpack.c.bf16 %v8624_v54, %v8624_v54 }
 0x329   :  { %10116 = vrot.lane.b32.xlu1 %v17682_v57, %s14901_s22 }
 0x32a   :  { %v8767_v15 = vrot.slane %v8642_v8, %v15040_v37  ;;  %v8774_v63 = vrot.slane %v13810_v10, %v15040_v37 }
 0x32c   :  { %v8775_v4 = vcombine.high %v8767_v15, %v8767_v15  ;;  %v8776_v46 = vcombine.high %v8774_v63, %v8774_v63  ;;  %v8783_v48 = vrot.slane %v8767_v15, %v15040_v37  ;;  %v8790_v20 = vrot.slane %v8774_v63, %v15040_v37 }
 0x32e   :  { %v8797_v47 = vrot.slane %v8775_v4, %v15040_v37  ;;  %v17692_v51 = vrot.slane %v8776_v46, %v15040_v37  ;;  %v9199_v7 = vunpack.i.h.s16 %v8783_v48  ;;  %v13823_v26 = vpack.i.b16 %v8783_v48, %v9197_v56 }
 0x32f   :  { %v17696_v42 = vcombine.high %v8790_v20, %v8790_v20  ;;  %v8805_v24 = vcombine.high %v8783_v48, %v8783_v48  ;;  %v9207_v50 = vunpack.i.h.s16 %v8790_v20 }
 0x330   :  { %v9457_v25 = vcombine.low %v13823_v26, %v9199_v7  ;;  %v9200_v49 = vunpack.i.l.s16 %v8797_v47  ;;  %v8807_v39 = vcombine.high %v8797_v47, %v8797_v47  ;;  %v9201_v27 = vunpack.i.h.s16 %v8797_v47 }
 0x331   :  { %v9210_v38 = vunpack.i.l.s16 %v17696_v42  ;;  %v13865_v6 = vpack.i.b16 %v8797_v47, %v9199_v7  ;;  %v10240_v16 = vcombine.low %v13822_v0, %v13823_v26  ;;  %v9208_v17 = vunpack.i.l.s16 %v17692_v51 }
 0x332   :  { %v9471_v35 = vrot.slane %v9457_v25, %v15040_v37  ;;  %v9849_v59 = vcombine.low %v8783_v48, %v9200_v49  ;;  %v10264_v53 = vcombine.low %v8807_v39, %v8790_v20  ;;  %v13839_v5 = vcombine.high %v8783_v48, %v8797_v47 }
 0x333   :  { %v10265_v29 = vcombine.low %v17692_v51, %v9210_v38  ;;  %v10241_v40 = vcombine.low %v13865_v6, %v9201_v27  ;;  %v9481_v18 = vcombine.low %v8790_v20, %v9208_v17  ;;  %v10248_v62 = vrot.slane %v10240_v16, %v15040_v37 }
 0x334   :  { %v9472_v33 = vcombine.low %v9464_v14, %v9471_v35  ;;  %v9863_v31 = vrot.slane %v9849_v59, %v15040_v37  ;;  %v10272_v13 = vrot.slane %v10264_v53, %v15040_v37  ;;  %v9203_v22 = vunpack.i.h.s16 %v8805_v24 }
 0x335   :  { %v10279_v28 = vrot.slane %v10265_v29, %v15040_v37  ;;  %v10255_v43 = vrot.slane %v10241_v40, %v15040_v37  ;;  %v9495_v11 = vrot.slane %v9481_v18, %v15040_v37  ;;  %v9205_v8 = vunpack.i.h.s16 %v8807_v39 }
 0x336   :  { %v14416_v34 = vpop.f32.mrf.mxu0  ;;  %v17709_v3 = vrot.slane %v9472_v33, %v15040_v37  ;;  %v9864_v23 = vcombine.low %v9856_v2, %v9863_v31  ;;  %v9209_v10 = vunpack.i.h.s16 %v17692_v51  ;;  %v9488_v0 = vrot.slane %v13839_v5, %v15040_v37 }
 0x337   :  { %v14498_v61 = vpop.f32.mrf.mxu1  ;;  %v10280_v12 = vcombine.low %v10272_v13, %v10279_v28  ;;  %v10256_v54 = vcombine.low %v10248_v62, %v10255_v43  ;;  %v13847_v4 = vpack.i.b16 %v8807_v39, %v9203_v22  ;;  %v13848_v46 = vpack.i.b16 %v8790_v20, %v9205_v8 }
 0x338   :  { %v14417_v19 = vpop.f32.mrf.mxu0  ;;  %10564 = vrot.lane.b32.xlu1 %v17709_v3, %s14901_s22  ;;  %v17716_v44 = vrot.slane %v9864_v23, %v15040_v37  ;;  %v13849_v48 = vpack.i.b16 %v17692_v51, %v9207_v50  ;;  %v9496_v45 = vcombine.low %v9488_v0, %v9495_v11  ;;  %v8808_v28 = vcombine.high %v17692_v51, %v17692_v51 }
 0x339   :  { %v14499_v60 = vpop.f32.mrf.mxu1  ;;  %v14418_v9 = vadd.f32 %v14417_v19, %v14416_v34  ;;  %v17723_v56 = vrot.slane %v10280_v12, %v15040_v37  ;;  %v17730_v26 = vrot.slane %v10256_v54, %v15040_v37  ;;  %v9872_v25 = vcombine.low %v13847_v4, %v13848_v46 }
 0x33a   :  { %v14419_v15 = vpop.f32.mrf.mxu0  ;;  %10118 = vrot.lane.b32.xlu0 %v17716_v44, %s14901_s22  ;;  %v9873_v49 = vcombine.low %v13849_v48, %v9209_v10  ;;  %v14500_v27 = vadd.f32 %v14499_v60, %v14498_v61  ;;  %v17738_v35 = vrot.slane %v9496_v45, %v15040_v37  ;;  %v9211_v61 = vunpack.i.h.s16 %v17696_v42 }
 0x33b   :  { %v14501_v63 = vpop.f32.mrf.mxu1  ;;  %19722 = vst [vmem:[#allocation10_spill] sm:$0xff] %v17723_v56  ;;  %v8438_v1 = vadd.f32 %v14418_v9, %v17575_v58  ;;  %v9880_v20 = vrot.slane %v9872_v25, %v15040_v37  ;;  %v9213_v8 = vunpack.i.h.s16 %v8808_v28  ;;  %v17770_v25 = vrot.slane %v17674_v55, %v15040_v37 }
 0x33c   :  { %v14420_v47 = vpop.f32.mrf.mxu0  ;;  %10702 = vrot.lane.b32.xlu1 %v17723_v56, %s14901_s22  ;;  %v9887_v16 = vrot.slane %v9873_v49, %v15040_v37  ;;  %v13824_v42 = vpack.i.b16 %v8808_v28, %v9211_v61 }
 0x33d   :  { %v14502_v7 = vpop.f32.mrf.mxu1  ;;  %v14421_v14 = vadd.f32 %v14420_v47, %v14419_v15  ;;  %v8558_v39 = vadd.f32 %v14500_v27, %v8438_v1  ;;  %v11106_v61 = vcombine.high %v17770_v25, %v17770_v25 }
 0x33e   :  { %10700 = vrot.lane.b32.xlu0 %v17730_v26, %s14901_s22  ;;  %v14503_v6 = vadd.f32 %v14502_v7, %v14501_v63  ;;  %v9888_v53 = vcombine.low %v9880_v20, %v9887_v16 }
 0x33f   :  { %v8441_v38 = vadd.f32 %v14421_v14, %v17575_v58  ;;  %v8625_v17 = vmax.f32 %v8558_v39, 0.0 }
 0x340   :  { %v17743_v24 = vrot.slane %v9888_v53, %v15040_v37 }
 0x341   :  { %v8561_v59 = vadd.f32 %v14503_v6, %v8441_v38 }
 0x342   :  { %10566 = vrot.lane.b32.xlu0 %v17738_v35, %s14901_s22 }
 0x343   :  { %v8626_v2 = vmax.f32 %v8561_v59, 0.0 }
 0x345   :  { %v14422_v29 = vpop.f32.mrf.mxu0  ;;  %v14504_v40 = vpop.f32.mrf.mxu1  ;;  %v8643_v33 = vpack.c.bf16 %v8626_v2, %v8625_v17  ;;  %v13811_v31 = vpack.c.bf16 %v8626_v2, %v8626_v2 }
 0x346   :  { %10120 = vrot.lane.b32.xlu0 %v17743_v24, %s14901_s22 }
 0x347   :  { %v14423_v13 = vpop.f32.mrf.mxu0  ;;  %v14505_v18 = vpop.f32.mrf.mxu1  ;;  %v8816_v43 = vrot.slane %v8643_v33, %v15040_v37  ;;  %v8823_v5 = vrot.slane %v13811_v31, %v15040_v37 }
 0x348   :  { %v14424_v34 = vadd.f32 %v14423_v13, %v14422_v29  ;;  %v14506_v19 = vadd.f32 %v14505_v18, %v14504_v40 }
 0x349   :  { %v14425_v23 = vpop.f32.mrf.mxu0  ;;  %v14507_v62 = vpop.f32.mrf.mxu1  ;;  %v8824_v50 = vcombine.high %v8816_v43, %v8816_v43  ;;  %v8832_v12 = vrot.slane %v8816_v43, %v15040_v37  ;;  %v17754_v11 = vrot.slane %v8823_v5, %v15040_v37  ;;  %v8825_v22 = vcombine.high %v8823_v5, %v8823_v5 }
 0x34a   :  { %v8446_v51 = vadd.f32 %v14424_v34, %v17575_v58 }
 0x34b   :  { %v14426_v60 = vpop.f32.mrf.mxu0  ;;  %v14508_v54 = vpop.f32.mrf.mxu1  ;;  %v8846_v10 = vrot.slane %v8824_v50, %v15040_v37  ;;  %v8854_v63 = vcombine.high %v8832_v12, %v8832_v12  ;;  %v9896_v4 = vcombine.low %v8808_v28, %v8832_v12  ;;  %v9215_v46 = vunpack.i.h.s16 %v8832_v12 }
 0x34c   :  { %v14427_v9 = vadd.f32 %v14426_v60, %v14425_v23  ;;  %v14509_v0 = vadd.f32 %v14508_v54, %v14507_v62  ;;  %v8566_v15 = vadd.f32 %v14506_v19, %v8446_v51  ;;  %v17759_v47 = vpack.i.b16 %v8832_v12, %v9213_v8  ;;  %v14861_v12 = vld [vmem:[%s19500_s5 + $0x78] sm:$0xff]  }
 0x34d   :  { %v9217_v1 = vunpack.i.h.s16 %v8846_v10  ;;  %v17763_v7 = vcombine.high %v17754_v11, %v17754_v11  ;;  %v17766_v45 = vrot.slane %v8825_v22, %v15040_v37  ;;  %v9218_v49 = vunpack.i.l.s16 %v8854_v63  ;;  %v14862_v54 = vld [vmem:[%s19500_s5 + $0x38] sm:$0xff]   ;;  %14546 = vmatprep.subr.bf16.mxu0 %v14861_v12  ;;  %v14870_v12 = vld [vmem:[%s19500_s5 + $0xb0] sm:$0xff]  }
 0x34e   :  { %v8449_v48 = vadd.f32 %v14427_v9, %v17575_v58  ;;  %v17772_v27 = vpack.i.b16 %v8846_v10, %v9215_v46  ;;  %v9504_v38 = vcombine.low %v13824_v42, %v17759_v47  ;;  %v17775_v6 = vcombine.high %v8846_v10, %v8846_v10  ;;  %14547 = vmatpush3.bf16.msra.mxu0 %v14862_v54 }
 0x34f   :  { %v9226_v16 = vunpack.i.l.s16 %v17763_v7  ;;  %v8627_v59 = vmax.f32 %v8566_v15, 0.0  ;;  %v9897_v53 = vcombine.low %v8846_v10, %v9218_v49  ;;  %v9904_v33 = vrot.slane %v9896_v4, %v15040_v37  ;;  %v14863_v4 = vld [vmem:[%s19500_s5 + $0x70] sm:$0xff]  }
 0x350   :  { %v8569_v14 = vadd.f32 %v14509_v0, %v8449_v48  ;;  %v9505_v17 = vcombine.low %v17772_v27, %v9217_v1  ;;  %v9528_v31 = vcombine.low %v17775_v6, %v17754_v11  ;;  %v13866_v5 = vpack.i.b16 %v8854_v63, %v9217_v1  ;;  %v14864_v49 = vld [vmem:[%s19500_s5 + $0x30] sm:$0xff]   ;;  %14548 = vmatprep.subr.bf16.mxu0 %v14863_v4 }
 0x351   :  { %v14428_v20 = vpop.f32.mrf.mxu0  ;;  %v14510_v39 = vpop.f32.mrf.mxu1  ;;  %v9529_v13 = vcombine.low %v17766_v45, %v9226_v16  ;;  %v9911_v28 = vrot.slane %v9897_v53, %v15040_v37  ;;  %v9512_v50 = vrot.slane %v9504_v38, %v15040_v37  ;;  %v9219_v60 = vunpack.i.h.s16 %v8854_v63 }
 0x352   :  { %v17779_v2 = vmax.f32 %v8569_v14, 0.0  ;;  %v9519_v43 = vrot.slane %v9505_v17, %v15040_v37  ;;  %v9536_v42 = vrot.slane %v9528_v31, %v15040_v37  ;;  %v10288_v48 = vcombine.low %v17759_v47, %v17772_v27  ;;  %v14866_v47 = vld [vmem:[%s19500_s5 + $0xb8] sm:$0xff]   ;;  %14549 = vmatpush3.bf16.msra.mxu0 %v14864_v49  ;;  %v14871_v49 = vld [vmem:[%s19500_s5 + $0x60] sm:$0xff]  }
 0x353   :  { %v14429_v29 = vpop.f32.mrf.mxu0  ;;  %v14511_v40 = vpop.f32.mrf.mxu1  ;;  %v9912_v19 = vcombine.low %v9904_v33, %v9911_v28  ;;  %v9543_v15 = vrot.slane %v9529_v13, %v15040_v37  ;;  %v10289_v1 = vcombine.low %v13866_v5, %v9219_v60  ;;  %v17828_v53 = vrot.slane %v11106_v61, %v15040_v37 }
 0x354   :  { %v14430_v18 = vadd.f32 %v14429_v29, %v14428_v20  ;;  %v8644_v34 = vpack.c.bf16 %v17779_v2, %v8627_v59  ;;  %v14512_v51 = vadd.f32 %v14511_v40, %v14510_v39  ;;  %v9520_v0 = vcombine.low %v9512_v50, %v9519_v43  ;;  %v14865_v39 = vld [vmem:[%s19500_s5 + $0xf8] sm:$0xff]   ;;  %v14867_v29 = vld [vmem:[%s19500_s5 + $0x68] sm:$0xff]  }
 0x355   :  { %v14431_v23 = vpop.f32.mrf.mxu0  ;;  %v14513_v62 = vpop.f32.mrf.mxu1  ;;  %v17805_v63 = vrot.slane %v9912_v19, %v15040_v37  ;;  %19724 = vst [vmem:[#allocation11_spill] sm:$0xff] %v17828_v53  ;;  %v9544_v17 = vcombine.low %v9536_v42, %v9543_v15  ;;  %14604 = vmatprep.subr.bf16.mxu1 %v14865_v39  ;;  %v10296_v31 = vrot.slane %v10288_v48, %v15040_v37 }
 0x356   :  { %v8454_v22 = vadd.f32 %v14430_v18, %v17575_v58  ;;  %v8865_v8 = vrot.slane %v8644_v34, %v15040_v37  ;;  %v17834_v33 = vrot.slane %v9520_v0, %v15040_v37  ;;  %v10303_v13 = vrot.slane %v10289_v1, %v15040_v37  ;;  %v14868_v18 = vld [vmem:[%s19500_s5 + $0x28] sm:$0xff]   ;;  %14605 = vmatpush3.bf16.msra.mxu1 %v14866_v47  ;;  %v14869_v34 = vld [vmem:[%s19500_s5 + $0xf0] sm:$0xff]  }
 0x357   :  { %v14432_v10 = vpop.f32.mrf.mxu0  ;;  %v14514_v9 = vpop.f32.mrf.mxu1  ;;  %19723 = vst [vmem:[#allocation15_spill] sm:$0xff] %v17805_v63  ;;  %10122 = vrot.lane.b32.xlu1 %v17805_v63, %s14901_s22  ;;  %v17843_v28 = vrot.slane %v17770_v25, %v15040_v37  ;;  %v17858_v25 = vcombine.high %v17766_v45, %v17766_v45  ;;  %14550 = vmatprep.subr.bf16.mxu0 %v14867_v29  ;;  %v14874_v47 = vld [vmem:[%s19500_s5 + $0xa8] sm:$0xff]   ;;  %v9221_v1 = vunpack.i.h.s16 %v17775_v6 }
 0x358   :  { %v14433_v46 = vadd.f32 %v14432_v10, %v14431_v23  ;;  %v8873_v14 = vcombine.high %v8865_v8, %v8865_v8  ;;  %v8574_v20 = vadd.f32 %v14512_v51, %v8454_v22  ;;  %v14515_v16 = vadd.f32 %v14514_v9, %v14513_v62  ;;  %14606 = vmatprep.subr.bf16.mxu1 %v14869_v34 }
 0x359   :  { %v17822_v27 = vrot.slane %v8865_v8, %v15040_v37  ;;  %19725 = vst [vmem:[#allocation18_spill] sm:$0xff] %v17843_v28  ;;  %v10304_v50 = vcombine.low %v10296_v31, %v10303_v13  ;;  %v13917_v22 = vcombine.low %v17843_v28, %v17828_v53  ;;  %v17871_v8 = vrot.slane %v9544_v17, %v15040_v37 }
 0x35a   :  { %v8457_v38 = vadd.f32 %v14433_v46, %v17575_v58  ;;  %v17825_v59 = vrot.slane %v8873_v14, %v15040_v37  ;;  %v8629_v43 = vmax.f32 %v8574_v20, 0.0  ;;  %v9228_v9 = vunpack.i.l.s16 %v17858_v25  ;;  %14551 = vmatpush3.bf16.msra.mxu0 %v14868_v18  ;;  %14607 = vmatpush3.bf16.msra.mxu1 %v14870_v12 }
 0x35b   :  { %10568 = vrot.lane.b32.xlu1 %v17834_v33, %s14901_s22  ;;  %v17867_v51 = vcombine.high %v17822_v27, %v17822_v27  ;;  %19726 = vst [vmem:[#allocation17_spill] sm:$0xff] %v17871_v8  ;;  %v17874_v10 = vrot.slane %v10304_v50, %v15040_v37  ;;  %v13812_v15 = vpack.c.bf16 %v17779_v2, %v17779_v2  ;;  %v14872_v2 = vld [vmem:[%s19500_s5 + $0x20] sm:$0xff]  }
 0x35c   :  { %v8577_v40 = vadd.f32 %v14515_v16, %v8457_v38  ;;  %v17847_v5 = vcombine.high %v17825_v59, %v17825_v59  ;;  %v10596_v48 = vcombine.low %v17822_v27, %v17825_v59  ;;  %v17895_v14 = vrot.slane %v13917_v22, %v15040_v37  ;;  %v14873_v16 = vld [vmem:[%s19500_s5 + $0xe8] sm:$0xff]   ;;  %14552 = vmatprep.subr.bf16.mxu0 %v14871_v49 }
 0x35d   :  { %v14434_v23 = vpop.f32.mrf.mxu0  ;;  %v14516_v62 = vpop.f32.mrf.mxu1  ;;  %19727 = vst [vmem:[#allocation19_spill] sm:$0xff] %v17874_v10  ;;  %10704 = vrot.lane.b32.xlu0 %v17874_v10, %s14901_s22  ;;  %v17900_v39 = vrot.slane %v17723_v56, %v15040_v37  ;;  %v10312_v13 = vcombine.low %v17754_v11, %v17766_v45  ;;  %v10313_v18 = vcombine.low %v17763_v7, %v9228_v9  ;;  %v9233_v50 = vunpack.i.h.s16 %v17825_v59 }
 0x35e   :  { %v17852_v61 = vmax.f32 %v8577_v40, 0.0  ;;  %v9236_v19 = vunpack.i.l.s16 %v17847_v5  ;;  %19728 = vst [vmem:[#allocation2_spill] sm:$0xff] %v17895_v14  ;;  %14553 = vmatpush3.bf16.msra.mxu0 %v14872_v2  ;;  %v17922_v12 = vrot.slane %v13812_v15, %v15040_v37  ;;  %14608 = vmatprep.subr.bf16.mxu1 %v14873_v16  ;;  %v9237_v16 = vunpack.i.h.s16 %v17847_v5 }
 0x35f   :  { %v14435_v60 = vpop.f32.mrf.mxu0  ;;  %v14517_v54 = vpop.f32.mrf.mxu1  ;;  %10570 = vrot.lane.b32.xlu1 %v17871_v8, %s14901_s22  ;;  %14609 = vmatpush3.bf16.msra.mxu1 %v14874_v47  ;;  %v10320_v15 = vrot.slane %v10312_v13, %v15040_v37 }
 0x360   :  { %v14436_v0 = vadd.f32 %v14435_v60, %v14434_v23  ;;  %v10597_v42 = vcombine.low %v17867_v51, %v9236_v19  ;;  %v8645_v20 = vpack.c.bf16 %v17852_v61, %v8629_v43  ;;  %v17917_v43 = vrot.slane %v17730_v26, %v15040_v37 }
 0x361   :  { %v14437_v4 = vpop.f32.mrf.mxu0  ;;  %v14519_v46 = vpop.f32.mrf.mxu1  ;;  %v9231_v23 = vunpack.i.h.s16 %v17822_v27  ;;  %v14518_v22 = vadd.f32 %v14517_v54, %v14516_v62  ;;  %v10604_v19 = vrot.slane %v10596_v48, %v15040_v37  ;;  %v19564_v60 = vunpack.i.h.s16 %v17867_v51 }
 0x362   :  { %v8462_v17 = vadd.f32 %v14436_v0, %v17575_v58  ;;  %v10611_v31 = vrot.slane %v10597_v42, %v15040_v37  ;;  %v13813_v9 = vpack.c.bf16 %v17852_v61, %v17852_v61  ;;  %v8914_v0 = vrot.slane %v8645_v20, %v15040_v37 }
 0x363   :  { %v14438_v29 = vpop.f32.mrf.mxu0  ;;  %v14520_v40 = vpop.f32.mrf.mxu1  ;;  %v10327_v62 = vrot.slane %v10313_v18, %v15040_v37  ;;  %v17934_v38 = vpack.i.b16 %v17825_v59, %v9231_v23  ;;  %v17937_v61 = vpack.i.b16 %v17867_v51, %v9233_v50  ;;  %v13879_v47 = vpack.i.b16 %v17847_v5, %v19564_v60  ;;  %v14876_v5 = vld [vmem:[%s19500_s5 + $0xa0] sm:$0xff]  }
 0x364   :  { %v14439_v34 = vadd.f32 %v14438_v29, %v14437_v4  ;;  %v14521_v4 = vadd.f32 %v14520_v40, %v14519_v46  ;;  %v8582_v49 = vadd.f32 %v14518_v22, %v8462_v17  ;;  %v10612_v2 = vcombine.low %v10604_v19, %v10611_v31 }
 0x365   :  { %v10328_v20 = vcombine.low %v10320_v15, %v10327_v62  ;;  %v8922_v17 = vcombine.high %v8914_v0, %v8914_v0  ;;  %v17949_v40 = vrot.slane %v17900_v39, %v15040_v37  ;;  %v10648_v18 = vcombine.low %v17934_v38, %v17937_v61 }
 0x366   :  { %v8465_v42 = vadd.f32 %v14439_v34, %v17575_v58  ;;  %v11222_v58 = vcombine.high %v17900_v39, %v17900_v39  ;;  %v17942_v46 = vrot.slane %v10612_v2, %v15040_v37  ;;  %v14875_v34 = vld [vmem:[%s19500_s5 + $0xe0] sm:$0xff]   ;;  %v14877_v39 = vld [vmem:[%s19500_s5 + $0x58] sm:$0xff]   ;;  %v17966_v23 = vrot.slane %v17917_v43, %v15040_v37 }
 0x367   :  { %19730 = vst [vmem:[#allocation22_spill] sm:$0xff] %v17949_v40  ;;  %v8631_v50 = vmax.f32 %v8582_v49, 0.0  ;;  %v17971_v19 = vrot.slane %v10328_v20, %v15040_v37  ;;  %v14880_v2 = vld [vmem:[%s19500_s5 + $0x98] sm:$0xff]   ;;  %v8874_v49 = vcombine.high %v17922_v12, %v17922_v12  ;;  %v17985_v15 = vrot.slane %v13813_v9, %v15040_v37  ;;  %14610 = vmatprep.subr.bf16.mxu1 %v14875_v34 }
 0x368   :  { %v8585_v54 = vadd.f32 %v14521_v4, %v8465_v42  ;;  %v14440_v48 = vpop.f32.mrf.mxu0  ;;  %v14522_v29 = vpop.f32.mrf.mxu1  ;;  %19729 = vst [vmem:[#allocation21_spill] sm:$0xff] %v17942_v46  ;;  %19731 = vst [vmem:[#allocation3_spill] sm:$0xff] %v17966_v23  ;;  %10836 = vrot.lane.b32.xlu1 %v17942_v46, %s14901_s22  ;;  %v14878_v42 = vld [vmem:[%s19500_s5 + $0xd8] sm:$0xff]   ;;  %v10649_v20 = vcombine.low %v13879_v47, %v9237_v16  ;;  %v17989_v60 = vrot.slane %v8914_v0, %v15040_v37 }
 0x369   :  { %19732 = vst [vmem:[#allocation4_spill] sm:$0xff] %v17971_v19  ;;  %v14879_v4 = vld [vmem:[%s19500_s5 + $0x18] sm:$0xff]   ;;  %v17992_v59 = vrot.slane %v11222_v58, %v15040_v37  ;;  %10706 = vrot.lane.b32.xlu0 %v17971_v19, %s14901_s22  ;;  %14611 = vmatpush3.bf16.msra.mxu1 %v14876_v5  ;;  %v17997_v9 = vrot.slane %v8922_v17, %v15040_v37  ;;  %v9223_v47 = vunpack.i.h.s16 %v17754_v11 }
 0x36a   :  { %v14441_v31 = vpop.f32.mrf.mxu0  ;;  %v14523_v13 = vpop.f32.mrf.mxu1  ;;  %v8632_v22 = vmax.f32 %v8585_v54, 0.0  ;;  %v10656_v16 = vrot.slane %v10648_v18, %v15040_v37  ;;  %v10663_v6 = vrot.slane %v10649_v20, %v15040_v37  ;;  %14554 = vmatprep.subr.bf16.mxu0 %v14877_v39  ;;  %14612 = vmatprep.subr.bf16.mxu1 %v14878_v42  ;;  %v18008_v17 = vrot.slane %v8874_v49, %v15040_v37  ;;  %v18022_v39 = vld [vmem:[%s19499_s4] ss:$0 sm:$0xff] }
 0x36b   :  { %19733 = vst [vmem:[#allocation8_spill] sm:$0xff] %v17992_v59  ;;  %v14442_v8 = vadd.f32 %v14441_v31, %v14440_v48  ;;  %19734 = vst [vmem:[#allocation7_spill] sm:$0xff] %v17997_v9  ;;  %v9225_v48 = vunpack.i.h.s16 %v17766_v45  ;;  %v18005_v31 = vrot.slane %v17922_v12, %v15040_v37  ;;  %v18012_v18 = vrot.slane %v17985_v15, %v15040_v37 }
 0x36c   :  { %v14443_v62 = vpop.f32.mrf.mxu0  ;;  %v14525_v54 = vpop.f32.mrf.mxu1  ;;  %v8646_v0 = vpack.c.bf16 %v8632_v22, %v8631_v50  ;;  %v13814_v34 = vpack.c.bf16 %v8632_v22, %v8632_v22  ;;  %19736 = vst [vmem:[#allocation9_spill] sm:$0xff] %v18008_v17  ;;  %v13850_v5 = vpack.i.b16 %v17754_v11, %v9221_v1  ;;  %14555 = vmatpush3.bf16.msra.mxu0 %v14879_v4  ;;  %v9227_v11 = vunpack.i.h.s16 %v17763_v7  ;;  %v14881_v4 = vld [vmem:[%s19500_s5 + $0x50] sm:$0xff]  }
 0x36d   :  { %19735 = vst [vmem:[#allocation12_spill] sm:$0xff] %v18005_v31  ;;  %v8470_v12 = vadd.f32 %v18022_v39, %v14442_v8  ;;  %v14524_v50 = vadd.f32 %v14523_v13, %v14522_v29  ;;  %14613 = vmatpush3.bf16.msra.mxu1 %v14880_v2  ;;  %v10664_v49 = vcombine.low %v10656_v16, %v10663_v6  ;;  %v14883_v8 = vld [vmem:[%s19500_s5 + $0x10] sm:$0xff]   ;;  %v9254_v6 = vunpack.i.l.s16 %v18012_v18 }
 0x36e   :  { %v14444_v46 = vpop.f32.mrf.mxu0  ;;  %v14526_v59 = vpop.f32.mrf.mxu1  ;;  %v13851_v1 = vpack.i.b16 %v17766_v45, %v9223_v47  ;;  %v8963_v29 = vrot.slane %v8646_v0, %v15040_v37  ;;  %v13852_v13 = vpack.i.b16 %v17763_v7, %v9225_v48  ;;  %v18044_v45 = vcombine.high %v17997_v9, %v17997_v9  ;;  %v14884_v2 = vld [vmem:[%s19500_s5 + $0x90] sm:$0xff]   ;;  %14556 = vmatprep.subr.bf16.mxu0 %v14881_v4 }
 0x36f   :  { %v14445_v58 = vadd.f32 %v14444_v46, %v14443_v62  ;;  %v18017_v46 = vcombine.high %v17989_v60, %v17989_v60  ;;  %v14527_v42 = vadd.f32 %v14526_v59, %v14525_v54  ;;  %v14882_v62 = vld [vmem:[%s19500_s5 + $0xd0] sm:$0xff]   ;;  %v18039_v59 = vrot.slane %v13814_v34, %v15040_v37 }
 0x370   :  { %19738 = vst [vmem:[#allocation5_spill] sm:$0xff] %v18044_v45  ;;  %v18050_v20 = vrot.slane %v10664_v49, %v15040_v37  ;;  %v9920_v16 = vcombine.low %v13850_v5, %v13851_v1  ;;  %14614 = vmatprep.subr.bf16.mxu1 %v14882_v62  ;;  %v18055_v7 = vcombine.high %v18005_v31, %v18005_v31 }
 0x371   :  { %19737 = vst [vmem:[#allocation16_spill] sm:$0xff] %v18017_v46  ;;  %v8473_v22 = vadd.f32 %v18022_v39, %v14445_v58  ;;  %v8590_v47 = vadd.f32 %v14524_v50, %v8470_v12  ;;  %v9921_v58 = vcombine.low %v13852_v13, %v9227_v11  ;;  %14557 = vmatpush3.bf16.msra.mxu0 %v14883_v8  ;;  %v9239_v8 = vunpack.i.h.s16 %v18005_v31 }
 0x372   :  { %19739 = vst [vmem:[#allocation13_spill] sm:$0xff] %v18055_v7  ;;  %14615 = vmatpush3.bf16.msra.mxu1 %v14884_v2  ;;  %10708 = vrot.lane.b32.xlu1 %v18050_v20, %s14901_s22  ;;  %v9928_v48 = vrot.slane %v9920_v16, %v15040_v37  ;;  %v9944_v5 = vcombine.low %v17997_v9, %v18017_v46  ;;  %v19742_v9 = vunpack.i.h.s16 %v17867_v51 }
 0x373   :  { %v8593_v54 = vadd.f32 %v14527_v42, %v8473_v22  ;;  %v9945_v22 = vcombine.low %v18044_v45, %v9254_v6  ;;  %v9229_v42 = vunpack.i.h.s16 %v17858_v25  ;;  %v8923_v12 = vcombine.high %v17985_v15, %v17985_v15 }
 0x374   :  { %v19740_v50 = vcombine.high %v17917_v43, %v17917_v43  ;;  %v8971_v11 = vcombine.high %v8963_v29, %v8963_v29  ;;  %v9935_v1 = vrot.slane %v9921_v58, %v15040_v37  ;;  %v8972_v13 = vcombine.high %v18039_v59, %v18039_v59 }
 0x375   :  { %v14446_v0 = vpop.f32.mrf.mxu0  ;;  %v14528_v34 = vpop.f32.mrf.mxu1  ;;  %v18076_v25 = vmax.f32 %v8593_v54, 0.0  ;;  %v13873_v15 = vpack.i.b16 %v17822_v27, %v9229_v42  ;;  %v10848_v2 = vcombine.low %v18008_v17, %v18055_v7  ;;  %v8633_v43 = vmax.f32 %v8590_v47, 0.0 }
 0x376   :  { %v18070_v49 = vrot.slane %v19740_v50, %v15040_v37  ;;  %v9936_v16 = vcombine.low %v9928_v48, %v9935_v1  ;;  %v9959_v58 = vrot.slane %v9945_v22, %v15040_v37  ;;  %v9952_v46 = vrot.slane %v9944_v5, %v15040_v37 }
 0x377   :  { %v14447_v4 = vpop.f32.mrf.mxu0  ;;  %v14529_v62 = vpop.f32.mrf.mxu1  ;;  %v10512_v31 = vcombine.low %v13873_v15, %v17934_v38  ;;  %v10513_v54 = vcombine.low %v17937_v61, %v19742_v9  ;;  %v18089_v27 = vcombine.high %v18008_v17, %v18008_v17  ;;  %v18092_v47 = vrot.slane %v8923_v12, %v15040_v37 }
 0x378   :  { %19741 = vst [vmem:[#allocation6_spill] sm:$0xff] %v18070_v49  ;;  %v14448_v45 = vadd.f32 %v14447_v4, %v14446_v0  ;;  %v18095_v48 = vrot.slane %v8963_v29, %v15040_v37  ;;  %v18098_v0 = vrot.slane %v8971_v11, %v15040_v37  ;;  %v18101_v38 = vrot.slane %v8972_v13, %v15040_v37 }
 0x379   :  { %v14449_v6 = vpop.f32.mrf.mxu0  ;;  %v14531_v50 = vpop.f32.mrf.mxu1  ;;  %v8647_v51 = vpack.c.bf16 %v18076_v25, %v8633_v43  ;;  %v18105_v61 = vrot.slane %v9936_v16, %v15040_v37  ;;  %v9960_v9 = vcombine.low %v9952_v46, %v9959_v58  ;;  %v13815_v42 = vpack.c.bf16 %v18076_v25, %v18076_v25 }
 0x37a   :  { %v10520_v29 = vrot.slane %v10512_v31, %v15040_v37  ;;  %v10527_v12 = vrot.slane %v10513_v54, %v15040_v37  ;;  %v8478_v1 = vadd.f32 %v18022_v39, %v14448_v45  ;;  %v9241_v46 = vunpack.i.h.s16 %v18008_v17 }
 0x37b   :  { %v14450_v5 = vpop.f32.mrf.mxu0  ;;  %v14532_v22 = vpop.f32.mrf.mxu1  ;;  %19743 = vst [vmem:[#allocation14_spill] sm:$0xff] %v18105_v61  ;;  %10124 = vrot.lane.b32.xlu0 %v18105_v61, %s14901_s22  ;;  %v9967_v4 = vrot.slane %v9960_v9, %v15040_v37  ;;  %v9243_v31 = vunpack.i.h.s16 %v18055_v7  ;;  %v14530_v58 = vadd.f32 %v14529_v62, %v14528_v34  ;;  %v13883_v45 = vpack.i.b16 %v18008_v17, %v9239_v8  ;;  %v14885_v9 = vld [vmem:[%s19500_s5 + $0x48] sm:$0xff]  }
 0x37c   :  { %v14451_v11 = vadd.f32 %v14450_v5, %v14449_v6  ;;  %v14533_v13 = vadd.f32 %v14532_v22, %v14531_v50  ;;  %v10528_v16 = vcombine.low %v10520_v29, %v10527_v12  ;;  %v9245_v6 = vunpack.i.h.s16 %v18089_v27  ;;  %v14886_v34 = vld [vmem:[%s19500_s5 + $0xc8] sm:$0xff]   ;;  %14558 = vmatprep.subr.bf16.mxu0 %v14885_v9  ;;  %v14891_v9 = vld [vmem:[%s19500_s5] sm:$0xff]  }
 0x37d   :  { %10126 = vrot.lane.b32.xlu1 %v9967_v4, %s14901_s22  ;;  %v13884_v54 = vpack.i.b16 %v18055_v7, %v9241_v46  ;;  %v18128_v22 = vcombine.high %v18012_v18, %v18012_v18  ;;  %v14887_v62 = vld [vmem:[%s19500_s5 + $0x8] sm:$0xff]   ;;  %v18140_v8 = vrot.slane %v8647_v51, %v15040_v37  ;;  %v14889_v46 = vld [vmem:[%s19500_s5 + $0x40] sm:$0xff]   ;;  %v18154_v17 = vcombine.high %v18092_v47, %v18092_v47 }
 0x37e   :  { %v14452_v15 = vpop.f32.mrf.mxu0  ;;  %v18115_v43 = vpop.f32.mrf.mxu1  ;;  %v8481_v25 = vadd.f32 %v18022_v39, %v14451_v11  ;;  %v18143_v29 = vrot.slane %v10528_v16, %v15040_v37  ;;  %v13885_v11 = vpack.i.b16 %v18089_v27, %v9243_v31  ;;  %v14888_v4 = vld [vmem:[%s19500_s5 + $0x88] sm:$0xff]   ;;  %v9262_v51 = vunpack.i.l.s16 %v18095_v48  ;;  %14616 = vmatprep.subr.bf16.mxu1 %v14886_v34  ;;  %v14890_v31 = vld [vmem:[%s19500_s5 + $0xc0] sm:$0xff]   ;;  %14559 = vmatpush3.bf16.msra.mxu0 %v14887_v62 }
 0x37f   :  { %v10788_v7 = vcombine.low %v13883_v45, %v13884_v54  ;;  %v18165_v45 = vrot.slane %v10848_v2, %v15040_v37  ;;  %v8598_v54 = vadd.f32 %v14530_v58, %v8478_v1  ;;  %v9272_v14 = vunpack.i.l.s16 %v18101_v38  ;;  %14617 = vmatpush3.bf16.msra.mxu1 %v14888_v4  ;;  %v14892_v62 = vld [vmem:[%s19500_s5 + $0x80] sm:$0xff]   ;;  %14560 = vmatprep.subr.bf16.mxu0 %v14889_v46 }
 0x380   :  { %v14453_v50 = vpop.f32.mrf.mxu0  ;;  %v18124_v5 = vpop.f32.mrf.mxu1  ;;  %19744 = vst [vmem:[#allocation20_spill] sm:$0xff] %v18143_v29  ;;  %v8601_v12 = vadd.f32 %v14533_v13, %v8481_v25  ;;  %v9576_v13 = vcombine.low %v18092_v47, %v18128_v22  ;;  %10572 = vrot.lane.b32.xlu0 %v18143_v29, %s14901_s22  ;;  %v10789_v61 = vcombine.low %v13885_v11, %v9245_v6 }
 0x381   :  { %v18175_v34 = vrot.slane %v18039_v59, %v15040_v37  ;;  %v10796_v40 = vrot.slane %v10788_v7, %v15040_v37  ;;  %v9577_v2 = vcombine.low %v18154_v17, %v9262_v51  ;;  %v13863_v1 = vcombine.high %v18095_v48, %v18098_v0  ;;  %14618 = vmatprep.subr.bf16.mxu1 %v14890_v31 }
 0x382   :  { %v14455_v16 = vpop.f32.mrf.mxu0  ;;  %v18159_v25 = vpop.f32.mrf.mxu1  ;;  %v18185_v11 = vrot.slane %v13815_v42, %v15040_v37  ;;  %v9020_v59 = vcombine.high %v18140_v8, %v18140_v8  ;;  %v8636_v29 = vmax.f32 %v8601_v12, 0.0  ;;  %v10803_v7 = vrot.slane %v10789_v61, %v15040_v37  ;;  %14561 = vmatpush3.bf16.msra.mxu0 %v14891_v9 }
 0x383   :  { %v18192_v51 = vrot.slane %v17874_v10, %v15040_v37  ;;  %v9584_v4 = vrot.slane %v9576_v13, %v15040_v37  ;;  %v9591_v63 = vrot.slane %v9577_v2, %v15040_v37  ;;  %v9993_v28 = vcombine.low %v18175_v34, %v9272_v14  ;;  %14619 = vmatpush3.bf16.msra.mxu1 %v14892_v62 }
 0x384   :  { %v14456_v58 = vpop.f32.mrf.mxu0  ;;  %v14538_v6 = vpop.f32.mrf.mxu1  ;;  %v9246_v12 = vunpack.i.l.s16 %v17989_v60  ;;  %v8635_v23 = vmax.f32 %v8598_v54, 0.0  ;;  %v10804_v61 = vcombine.low %v10796_v40, %v10803_v7  ;;  %v14454_v46 = vadd.f32 %v14453_v50, %v14452_v15 }
 0x385   :  { %v9592_v53 = vcombine.low %v9584_v4, %v9591_v63  ;;  %v10000_v10 = vrot.slane %v13863_v1, %v15040_v37  ;;  %v10007_v13 = vrot.slane %v9993_v28, %v15040_v37  ;;  %v14457_v56 = vadd.f32 %v14456_v58, %v14455_v16 }
 0x386   :  { %v18197_v49 = vpop.f32.mrf.mxu0  ;;  %v18199_v42 = vpop.f32.mrf.mxu1  ;;  %v18210_v31 = vrot.slane %v18185_v11, %v15040_v37  ;;  %v18213_v54 = vrot.slane %v9020_v59, %v15040_v37  ;;  %v18217_v63 = vrot.slane %v17971_v19, %v15040_v37  ;;  %v8648_v40 = vpack.c.bf16 %v8636_v29, %v8635_v23 }
 0x387   :  { %v13816_v15 = vpack.c.bf16 %v8636_v29, %v8636_v29  ;;  %v10811_v28 = vrot.slane %v10804_v61, %v15040_v37  ;;  %v18221_v50 = vrot.slane %v9592_v53, %v15040_v37  ;;  %v10008_v16 = vcombine.low %v10000_v10, %v10007_v13 }
 0x388   :  { %v18204_v2 = vpop.f32.mrf.mxu0  ;;  %v18206_v14 = vpop.f32.mrf.mxu1  ;;  %v8486_v58 = vadd.f32 %v18022_v39, %v14454_v46  ;;  %v14536_v62 = vadd.f32 %v18124_v5, %v18115_v43  ;;  %v9257_v59 = vunpack.i.h.s16 %v18092_v47  ;;  %v9259_v7 = vunpack.i.h.s16 %v18128_v22 }
 0x389   :  { %19745 = vst [vmem:[#allocation24_spill] sm:$0xff] %v18221_v50  ;;  %10838 = vrot.lane.b32.xlu0 %v10811_v28, %s14901_s22  ;;  %10574 = vrot.lane.b32.xlu1 %v18221_v50, %s14901_s22  ;;  %v18232_v53 = vrot.slane %v10008_v16, %v15040_v37  ;;  %v8489_v10 = vadd.f32 %v18022_v39, %v14457_v56  ;;  %v9261_v23 = vunpack.i.h.s16 %v18154_v17  ;;  %v9263_v29 = vunpack.i.h.s16 %v18095_v48 }
 0x38a   :  { %v14461_v9 = vpop.f32.mrf.mxu0  ;;  %v14543_v1 = vpop.f32.mrf.mxu1  ;;  %v13853_v5 = vpack.i.b16 %v18128_v22, %v9257_v59  ;;  %v13854_v61 = vpack.i.b16 %v18154_v17, %v9259_v7  ;;  %v9264_v46 = vunpack.i.l.s16 %v18098_v0  ;;  %v13872_v13 = vcombine.high %v18012_v18, %v18092_v47 }
 0x38b   :  { %19746 = vst [vmem:[#allocation23_spill] sm:$0xff] %v18232_v53  ;;  %v9061_v28 = vrot.slane %v8648_v40, %v15040_v37  ;;  %v9068_v16 = vrot.slane %v13816_v15, %v15040_v37  ;;  %v14539_v56 = vadd.f32 %v14538_v6, %v18159_v25  ;;  %v13855_v9 = vpack.i.b16 %v18095_v48, %v9261_v23 }
 0x38c   :  { %v14462_v4 = vpop.f32.mrf.mxu0  ;;  %v14544_v43 = vpop.f32.mrf.mxu1  ;;  %v9968_v59 = vcombine.low %v13853_v5, %v13854_v61  ;;  %v10361_v17 = vcombine.low %v18095_v48, %v9264_v46  ;;  %v9021_v7 = vcombine.high %v18185_v11, %v18185_v11  ;;  %v8606_v47 = vadd.f32 %v14536_v62, %v8486_v58 }
 0x38d   :  { %10130 = vrot.lane.b32.xlu0 %v18232_v53, %s14901_s22  ;;  %v8609_v40 = vadd.f32 %v14539_v56, %v8489_v10  ;;  %v9969_v15 = vcombine.low %v13855_v9, %v9263_v29  ;;  %v18255_v25 = vcombine.low %v18089_v27, %v9246_v12  ;;  %v10368_v6 = vrot.slane %v13872_v13, %v15040_v37 }
 0x38e   :  { %v10375_v23 = vrot.slane %v10361_v17, %v15040_v37  ;;  %v18261_v4 = vcombine.high %v18210_v31, %v18210_v31  ;;  %v9069_v58 = vcombine.high %v9061_v28, %v9061_v28  ;;  %v9070_v62 = vcombine.high %v9068_v16, %v9068_v16 }
 0x38f   :  { %v18267_v10 = vcombine.high %v18213_v54, %v18213_v54  ;;  %v9976_v12 = vrot.slane %v9968_v59, %v15040_v37  ;;  %v9983_v29 = vrot.slane %v9969_v15, %v15040_v37  ;;  %v18274_v61 = vrot.slane %v18140_v8, %v15040_v37 }
 0x390   :  { %v10376_v43 = vcombine.low %v10368_v6, %v10375_v23  ;;  %v9290_v5 = vunpack.i.l.s16 %v18261_v4  ;;  %v18277_v46 = vrot.slane %v9021_v7, %v15040_v37  ;;  %v8637_v13 = vmax.f32 %v8606_v47, 0.0 }
 0x391   :  { %v8638_v56 = vmax.f32 %v8609_v40, 0.0  ;;  %v18280_v9 = vrot.slane %v9061_v28, %v15040_v37  ;;  %v18283_v17 = vrot.slane %v9068_v16, %v15040_v37  ;;  %v9984_v59 = vcombine.low %v9976_v12, %v9983_v29 }
 0x392   :  { %v18286_v15 = vrot.slane %v10376_v43, %v15040_v37  ;;  %v18289_v6 = vrot.slane %v9069_v58, %v15040_v37  ;;  %v18292_v8 = vrot.slane %v9070_v62, %v15040_v37  ;;  %v10040_v7 = vcombine.low %v18267_v10, %v18210_v31 }
 0x393   :  { %v10041_v47 = vcombine.low %v18277_v46, %v9290_v5  ;;  %v18298_v28 = vrot.slane %v9984_v59, %v15040_v37  ;;  %v9001_v16 = vcombine.high %v18095_v48, %v18095_v48  ;;  %v9003_v40 = vcombine.high %v18098_v0, %v18098_v0 }
 0x394   :  { %19747 = vst [vmem:[#allocation27_spill] sm:$0xff] %v18286_v15  ;;  %10710 = vrot.lane.b32.xlu0 %v18286_v15, %s14901_s22  ;;  %v9265_v23 = vunpack.i.h.s16 %v18098_v0  ;;  %v8649_v58 = vpack.c.bf16 %v8638_v56, %v8637_v13  ;;  %v13817_v62 = vpack.c.bf16 %v8638_v56, %v8638_v56  ;;  %v10048_v12 = vrot.slane %v10040_v7, %v15040_v37 }
 0x395   :  { %19748 = vst [vmem:[#allocation25_spill] sm:$0xff] %v18298_v28  ;;  %v10055_v29 = vrot.slane %v10041_v47, %v15040_v37  ;;  %10128 = vrot.lane.b32.xlu1 %v18298_v28, %s14901_s22  ;;  %v9267_v43 = vunpack.i.h.s16 %v9001_v16  ;;  %v9269_v5 = vunpack.i.h.s16 %v9003_v40  ;;  %v9271_v59 = vunpack.i.h.s16 %v18175_v34 }
 0x396   :  { %v13830_v1 = vpack.i.b16 %v9001_v16, %v9265_v23  ;;  %v14460_v48 = vadd.f32 %v18204_v2, %v18197_v49  ;;  %v9280_v0 = vunpack.i.l.s16 %v18213_v54  ;;  %v13840_v13 = vcombine.high %v18175_v34, %v18101_v38 }
 0x397   :  { %v10056_v11 = vcombine.low %v10048_v12, %v10055_v29  ;;  %v13831_v56 = vpack.i.b16 %v9003_v40, %v9267_v43  ;;  %v13832_v7 = vpack.i.b16 %v18175_v34, %v9269_v5  ;;  %v9273_v47 = vunpack.i.h.s16 %v18101_v38 }
 0x398   :  { %v13868_v22 = vpack.i.b16 %v18101_v38, %v9271_v59  ;;  %v18321_v53 = vrot.slane %v8649_v58, %v15040_v37  ;;  %v18324_v16 = vrot.slane %v13817_v62, %v15040_v37  ;;  %v9625_v2 = vcombine.low %v18274_v61, %v9280_v0 }
 0x399   :  { %v18327_v49 = vrot.slane %v10056_v11, %v15040_v37  ;;  %v9600_v23 = vcombine.low %v13830_v1, %v13831_v56  ;;  %v9601_v12 = vcombine.low %v13832_v7, %v9271_v59  ;;  %v10384_v40 = vcombine.low %v13831_v56, %v13832_v7 }
 0x39a   :  { %v10385_v29 = vcombine.low %v13868_v22, %v9273_v47  ;;  %v14542_v43 = vadd.f32 %v18206_v14, %v18199_v42  ;;  %v9632_v58 = vrot.slane %v13840_v13, %v15040_v37  ;;  %v9639_v62 = vrot.slane %v9625_v2, %v15040_v37 }
 0x39b   :  { %19749 = vst [vmem:[#allocation30_spill] sm:$0xff] %v18327_v49  ;;  %10134 = vrot.lane.b32.xlu1 %v18327_v49, %s14901_s22  ;;  %v9004_v11 = vcombine.high %v18101_v38, %v18101_v38  ;;  %v8494_v5 = vadd.f32 %v18022_v39, %v14460_v48  ;;  %v9608_v1 = vrot.slane %v9600_v23, %v15040_v37 }
 0x39c   :  { %v9615_v59 = vrot.slane %v9601_v12, %v15040_v37  ;;  %v10392_v22 = vrot.slane %v10384_v40, %v15040_v37  ;;  %v9118_v42 = vcombine.high %v18321_v53, %v18321_v53  ;;  %v9119_v14 = vcombine.high %v18324_v16, %v18324_v16 }
 0x39d   :  { %v9640_v0 = vcombine.low %v9632_v58, %v9639_v62  ;;  %v9050_v13 = vcombine.high %v18274_v61, %v18274_v61  ;;  %v18350_v38 = vrot.slane %v18321_v53, %v15040_v37  ;;  %v10399_v48 = vrot.slane %v10385_v29, %v15040_v37 }
 0x39e   :  { %v9616_v39 = vcombine.low %v9608_v1, %v9615_v59  ;;  %v9002_v56 = vcombine.high %v18175_v34, %v18175_v34  ;;  %v10408_v2 = vcombine.low %v9004_v11, %v18274_v61  ;;  %v9277_v23 = vunpack.i.h.s16 %v9004_v11 }
 0x39f   :  { %v18356_v7 = vrot.slane %v9640_v0, %v15040_v37  ;;  %v9282_v47 = vunpack.i.l.s16 %v9050_v13  ;;  %v10400_v40 = vcombine.low %v10392_v22, %v10399_v48  ;;  %v9279_v53 = vunpack.i.h.s16 %v18274_v61 }
 0x3a0   :  { %v18360_v12 = vrot.slane %v9616_v39, %v15040_v37  ;;  %v9275_v58 = vunpack.i.h.s16 %v9002_v56  ;;  %v9281_v34 = vunpack.i.h.s16 %v18213_v54  ;;  %v13857_v62 = vpack.i.b16 %v18274_v61, %v9277_v23 }
 0x3a1   :  { %19750 = vst [vmem:[#allocation26_spill] sm:$0xff] %v18356_v7  ;;  %10578 = vrot.lane.b32.xlu1 %v18356_v7, %s14901_s22  ;;  %v10409_v29 = vcombine.low %v18213_v54, %v9282_v47  ;;  %v9285_v1 = vunpack.i.h.s16 %v18267_v10  ;;  %v8614_v59 = vadd.f32 %v14542_v43, %v8494_v5  ;;  %v13858_v22 = vpack.i.b16 %v18213_v54, %v9279_v53 }
 0x3a2   :  { %19751 = vst [vmem:[#allocation28_spill] sm:$0xff] %v18360_v12  ;;  %10576 = vrot.lane.b32.xlu0 %v18360_v12, %s14901_s22  ;;  %v13856_v0 = vpack.i.b16 %v9004_v11, %v9275_v58  ;;  %v9287_v39 = vunpack.i.h.s16 %v18210_v31  ;;  %v10416_v48 = vrot.slane %v10408_v2, %v15040_v37  ;;  %v9289_v47 = vunpack.i.h.s16 %v18277_v46  ;;  %v18381_v11 = vpop.permute.xlu1 %10696 }
 0x3a3   :  { %v10423_v56 = vrot.slane %v10409_v29, %v15040_v37  ;;  %v13834_v49 = vpack.i.b16 %v18210_v31, %v9285_v1  ;;  %v18378_v61 = vrot.slane %v10400_v40, %v15040_v37  ;;  %v10017_v5 = vcombine.low %v13858_v22, %v9281_v34 }
 0x3a4   :  { %v10016_v43 = vcombine.low %v13856_v0, %v13857_v62  ;;  %v9291_v23 = vunpack.i.h.s16 %v18261_v4  ;;  %v13835_v58 = vpack.i.b16 %v18277_v46, %v9287_v39  ;;  %v13869_v2 = vpack.i.b16 %v18261_v4, %v9289_v47 }
 0x3a5   :  { %v10424_v54 = vcombine.low %v10416_v48, %v10423_v56  ;;  %v9283_v53 = vunpack.i.h.s16 %v9050_v13  ;;  %v8639_v29 = vmax.f32 %v8614_v59, 0.0  ;;  %v10031_v40 = vrot.slane %v10017_v5, %v15040_v37 }
 0x3a6   :  { %10712 = vrot.lane.b32.xlu0 %v18378_v61, %s14901_s22  ;;  %v10024_v31 = vrot.slane %v10016_v43, %v15040_v37  ;;  %v9053_v34 = vcombine.high %v18277_v46, %v18277_v46  ;;  %v10432_v1 = vcombine.low %v13834_v49, %v13835_v58  ;;  %v10433_v0 = vcombine.low %v13869_v2, %v9291_v23  ;;  %v18418_v23 = vpop.permute.xlu1 %10562 }
 0x3a7   :  { %v18392_v62 = vrot.slane %v10424_v54, %v15040_v37  ;;  %v13833_v22 = vpack.i.b16 %v18267_v10, %v9283_v53  ;;  %v18397_v4 = vrot.slane %v18324_v16, %v15040_v37  ;;  %v9649_v59 = vcombine.low %v13835_v58, %v9289_v47 }
 0x3a8   :  { %v10032_v13 = vcombine.low %v10024_v31, %v10031_v40  ;;  %v18401_v39 = vcombine.high %v18280_v9, %v18280_v9  ;;  %v10440_v46 = vrot.slane %v10432_v1, %v15040_v37  ;;  %v10447_v48 = vrot.slane %v10433_v0, %v15040_v37  ;;  %v18437_v31 = vpop.permute.xlu0 %10112 }
 0x3a9   :  { %19752 = vst [vmem:[#allocation29_spill] sm:$0xff] %v18392_v62  ;;  %10714 = vrot.lane.b32.xlu1 %v18392_v62, %s14901_s22  ;;  %v9648_v56 = vcombine.low %v13833_v22, %v13834_v49  ;;  %v9672_v10 = vcombine.low %v9053_v34, %v18280_v9  ;;  %v18409_v43 = vrot.slane %v9118_v42, %v15040_v37 }
 0x3aa   :  { %v18412_v16 = vrot.slane %v9119_v14, %v15040_v37  ;;  %v18415_v47 = vrot.slane %v10032_v13, %v15040_v37  ;;  %v9298_v5 = vunpack.i.l.s16 %v18401_v39  ;;  %v8650_v54 = vpack.c.bf16 %v8639_v29, %v8639_v29  ;;  %v18465_v50 = vpop.permute.xlu1 %10698 }
 0x3ab   :  { %v10448_v58 = vcombine.low %v10440_v46, %v10447_v48  ;;  %v9656_v2 = vrot.slane %v9648_v56, %v15040_v37  ;;  %v9663_v49 = vrot.slane %v9649_v59, %v15040_v37  ;;  %v18424_v42 = vcombine.high %v18350_v38, %v18350_v38 }
 0x3ac   :  { %19753 = vst [vmem:[#allocation31_spill] sm:$0xff] %v18412_v16  ;;  %19754 = vst [vmem:[#allocation32_spill] sm:$0xff] %v18415_v47  ;;  %v18428_v14 = vcombine.high %v18397_v4, %v18397_v4  ;;  %10132 = vrot.lane.b32.xlu0 %v18415_v47, %s14901_s22  ;;  %v9673_v53 = vcombine.low %v18289_v6, %v9298_v5  ;;  %v18435_v29 = vcombine.high %v18292_v8, %v18292_v8  ;;  %v18480_v47 = vpop.permute.xlu0 %10560 }
 0x3ad   :  { %v18440_v40 = vrot.slane %v10448_v58, %v15040_v37  ;;  %v9664_v1 = vcombine.low %v9656_v2, %v9663_v49  ;;  %v9680_v0 = vrot.slane %v9672_v10, %v15040_v37  ;;  %v10088_v22 = vcombine.low %v18283_v17, %v18292_v8 }
 0x3ae   :  { %19755 = vst [vmem:[#allocation33_spill] sm:$0xff] %v18428_v14  ;;  %v9687_v13 = vrot.slane %v9673_v53, %v15040_v37  ;;  %v18448_v59 = vcombine.high %v18283_v17, %v18283_v17  ;;  %v9308_v46 = vunpack.i.l.s16 %v18435_v29  ;;  %v9295_v48 = vunpack.i.h.s16 %v18280_v9 }
 0x3af   :  { %19756 = vst [vmem:[#allocation34_spill] sm:$0xff] %v18440_v40  ;;  %v9158_v56 = vrot.slane %v8650_v54, %v15040_v37  ;;  %10716 = vrot.lane.b32.xlu1 %v18440_v40, %s14901_s22  ;;  %v18456_v10 = vrot.slane %v9664_v1, %v15040_v37  ;;  %v9293_v5 = vunpack.i.h.s16 %v9053_v34  ;;  %v9297_v58 = vunpack.i.h.s16 %v18289_v6 }
 0x3b0   :  { %v18462_v49 = vcombine.high %v18412_v16, %v18412_v16  ;;  %v9688_v53 = vcombine.low %v9680_v0, %v9687_v13  ;;  %v10089_v7 = vcombine.low %v18448_v59, %v9308_v46  ;;  %v10096_v54 = vrot.slane %v10088_v22, %v15040_v37 }
 0x3b1   :  { %19757 = vst [vmem:[#allocation35_spill] sm:$0xff] %v18456_v10  ;;  %10580 = vrot.lane.b32.xlu0 %v18456_v10, %s14901_s22  ;;  %v9299_v34 = vunpack.i.h.s16 %v18401_v39  ;;  %v13859_v1 = vpack.i.b16 %v18280_v9, %v9293_v5  ;;  %v13860_v2 = vpack.i.b16 %v18289_v6, %v9295_v48  ;;  %v13861_v13 = vpack.i.b16 %v18401_v39, %v9297_v58 }
 0x3b2   :  { %v18474_v40 = vrot.slane %v9688_v53, %v15040_v37  ;;  %v10103_v0 = vrot.slane %v10089_v7, %v15040_v37  ;;  %v9101_v46 = vcombine.high %v18289_v6, %v18289_v6  ;;  %v18483_v22 = vrot.slane %v9158_v56, %v15040_v37 }
 0x3b3   :  { %v10064_v10 = vcombine.low %v13859_v1, %v13860_v2  ;;  %v10456_v5 = vcombine.low %v18280_v9, %v18289_v6  ;;  %v9303_v48 = vunpack.i.h.s16 %v18283_v17  ;;  %v10065_v53 = vcombine.low %v13861_v13, %v9299_v34  ;;  %v18500_v34 = vpop.permute.xlu1 %10116 }
 0x3b4   :  { %19758 = vst [vmem:[#allocation36_spill] sm:$0xff] %v18474_v40  ;;  %10582 = vrot.lane.b32.xlu1 %v18474_v40, %s14901_s22  ;;  %v10104_v7 = vcombine.low %v10096_v54, %v10103_v0  ;;  %v9300_v58 = vunpack.i.l.s16 %v9101_v46  ;;  %v9301_v15 = vunpack.i.h.s16 %v9101_v46  ;;  %v9305_v56 = vunpack.i.h.s16 %v18292_v8 }
 0x3b5   :  { %v10072_v62 = vrot.slane %v10064_v10, %v15040_v37  ;;  %v10464_v28 = vrot.slane %v10456_v5, %v15040_v37  ;;  %v9307_v2 = vunpack.i.h.s16 %v18448_v59  ;;  %v10079_v9 = vrot.slane %v10065_v53, %v15040_v37  ;;  %v18518_v5 = vpop.permute.xlu0 %10114 }
 0x3b6   :  { %v18495_v1 = vrot.slane %v10104_v7, %v15040_v37  ;;  %v10457_v6 = vcombine.low %v18401_v39, %v9300_v58  ;;  %v13836_v54 = vpack.i.b16 %v18283_v17, %v9301_v15  ;;  %v18503_v0 = vpack.i.b16 %v18292_v8, %v9303_v48 }
 0x3b7   :  { %v18506_v10 = vpack.i.b16 %v18448_v59, %v9305_v56  ;;  %v9150_v13 = vcombine.high %v18409_v43, %v18409_v43  ;;  %v10536_v46 = vcombine.low %v18350_v38, %v18409_v43  ;;  %v10080_v39 = vcombine.low %v10072_v62, %v10079_v9 }
 0x3b8   :  { %19759 = vst [vmem:[#allocation37_spill] sm:$0xff] %v18495_v1  ;;  %10138 = vrot.lane.b32.xlu0 %v18495_v1, %s14901_s22  ;;  %v10471_v17 = vrot.slane %v10457_v6, %v15040_v37  ;;  %v9318_v15 = vunpack.i.l.s16 %v18397_v4  ;;  %v10672_v8 = vcombine.low %v18409_v43, %v18424_v42  ;;  %v9696_v59 = vcombine.low %v13836_v54, %v18503_v0 }
 0x3b9   :  { %v9697_v48 = vcombine.low %v18506_v10, %v9307_v2  ;;  %v9316_v7 = vunpack.i.l.s16 %v9150_v13  ;;  %v10544_v53 = vrot.slane %v10536_v46, %v15040_v37  ;;  %v18524_v58 = vrot.slane %v10080_v39, %v15040_v37 }
 0x3ba   :  { %v10472_v62 = vcombine.low %v10464_v28, %v10471_v17  ;;  %v10673_v56 = vcombine.low %v9150_v13, %v9318_v15  ;;  %v10680_v9 = vrot.slane %v10672_v8, %v15040_v37  ;;  %v9704_v6 = vrot.slane %v9696_v59, %v15040_v37  ;;  %v18540_v15 = vpop.permute.xlu1 %10564  ;;  %v18542_v8 = vpop.permute.xlu0 %10118 }
 0x3bb   :  { %19760 = vst [vmem:[#allocation38_spill] sm:$0xff] %v18524_v58  ;;  %v9711_v1 = vrot.slane %v9697_v48, %v15040_v37  ;;  %v10537_v40 = vcombine.low %v18424_v42, %v9316_v7  ;;  %v9326_v54 = vunpack.i.l.s16 %v18483_v22  ;;  %10136 = vrot.lane.b32.xlu1 %v18524_v58, %s14901_s22  ;;  %v10812_v28 = vcombine.low %v18412_v16, %v18428_v14 }
 0x3bc   :  { %v18534_v46 = vrot.slane %v10472_v62, %v15040_v37  ;;  %v10687_v39 = vrot.slane %v10673_v56, %v15040_v37  ;;  %v9313_v17 = vunpack.i.h.s16 %v18409_v43  ;;  %v9315_v58 = vunpack.i.h.s16 %v18424_v42 }
 0x3bd   :  { %v9712_v59 = vcombine.low %v9704_v6, %v9711_v1  ;;  %v10551_v48 = vrot.slane %v10537_v40, %v15040_v37  ;;  %v10813_v7 = vcombine.low %v18462_v49, %v9326_v54  ;;  %v18549_v62 = vrot.slane %v18192_v51, %v15040_v37 }
 0x3be   :  { %v19761_v56 = vcombine.high %v18192_v51, %v18192_v51  ;;  %10718 = vrot.lane.b32.xlu0 %v18534_v46, %s14901_s22  ;;  %v10688_v1 = vcombine.low %v10680_v9, %v10687_v39  ;;  %v10820_v40 = vrot.slane %v10812_v28, %v15040_v37  ;;  %v9317_v16 = vunpack.i.h.s16 %v9150_v13 }
 0x3bf   :  { %v18561_v6 = vrot.slane %v9712_v59, %v15040_v37  ;;  %v10552_v54 = vcombine.low %v10544_v53, %v10551_v48  ;;  %v10827_v14 = vrot.slane %v10813_v7, %v15040_v37  ;;  %v10863_v19 = vrot.slane %v18255_v25, %v15040_v37 }
 0x3c0   :  { %v18555_v12 = vrot.slane %v19761_v56, %v15040_v37  ;;  %v19762_v51 = vcombine.high %v18217_v63, %v18217_v63  ;;  %v19763_v9 = vunpack.i.h.s16 %v18350_v38  ;;  %v13877_v28 = vpack.i.b16 %v18424_v42, %v9313_v17  ;;  %v10703_v42 = vpop.permute.xlu1 %10702  ;;  %v18588_v17 = vpop.permute.xlu0 %10700 }
 0x3c1   :  { %10584 = vrot.lane.b32.xlu1 %v18561_v6, %s14901_s22  ;;  %v18579_v53 = vrot.slane %v10552_v54, %v15040_v37  ;;  %v10828_v59 = vcombine.low %v10820_v40, %v10827_v14  ;;  %v13878_v25 = vpack.i.b16 %v9150_v13, %v9315_v58  ;;  %v9309_v48 = vunpack.i.h.s16 %v18435_v29 }
 0x3c2   :  { %v18570_v56 = vrot.slane %v19762_v51, %v15040_v37  ;;  %v13876_v39 = vpack.i.b16 %v18409_v43, %v19763_v9  ;;  %v18584_v7 = vrot.slane %v18217_v63, %v15040_v37  ;;  %v19609_v38 = vunpack.i.h.s16 %v18462_v49 }
 0x3c3   :  { %v13870_v43 = vpack.i.b16 %v18435_v29, %v9307_v2  ;;  %10586 = vrot.lane.b32.xlu0 %v18579_v53, %s14901_s22  ;;  %v18593_v14 = vrot.slane %v10688_v1, %v15040_v37  ;;  %v10621_v13 = vcombine.low %v13878_v25, %v9317_v16  ;;  %v10480_v58 = vcombine.low %v18503_v0, %v18506_v10 }
 0x3c4   :  { %v10620_v51 = vcombine.low %v13876_v39, %v13877_v28  ;;  %v18598_v63 = vcombine.low %v18165_v45, %v10863_v19  ;;  %v13923_v29 = vcombine.low %v18584_v7, %v18570_v56  ;;  %v11393_v54 = vrot.slane %v18050_v20, %v15040_v37 }
 0x3c5   :  { %v10481_v40 = vcombine.low %v13870_v43, %v9309_v48  ;;  %10722 = vrot.lane.b32.xlu1 %v18593_v14, %s14901_s22  ;;  %v10835_v16 = vrot.slane %v10828_v59, %v15040_v37  ;;  %v10635_v0 = vrot.slane %v10621_v13, %v15040_v37  ;;  %v10488_v10 = vrot.slane %v10480_v58, %v15040_v37  ;;  %v10567_v43 = vpop.permute.xlu0 %10566 }
 0x3c6   :  { %v10628_v2 = vrot.slane %v10620_v51, %v15040_v37  ;;  %v13886_v19 = vpack.i.b16 %v18483_v22, %v19609_v38  ;;  %v19764_v1 = vrot.slane %v17628_v32, %v15040_v37  ;;  %v19765_v9 = vrot.slane %v17630_v21, %v15040_v37 }
 0x3c7   :  { %v10495_v45 = vrot.slane %v10481_v40, %v15040_v37  ;;  %10842 = vrot.lane.b32.xlu0 %v10835_v16, %s14901_s22  ;;  %v10944_v25 = vsel %vm10896_vm0, %v17651_v30, %v18418_v23  ;;  %v10902_v32 = vsel %vm10896_vm0, %v17626_v36, %v18518_v5  ;;  %v10983_v21 = vsel %vm10896_vm0, %v17655_v52, %v18381_v11 }
 0x3c8   :  { %v10899_v20 = vsel %vm10896_vm0, %v19764_v1, %v18437_v31  ;;  %v10941_v39 = vsel %vm10896_vm0, %v19765_v9, %v18480_v47  ;;  %v10636_v28 = vcombine.low %v10628_v2, %v10635_v0  ;;  %v9327_v31 = vunpack.i.h.s16 %v18483_v22 }
 0x3c9   :  { %v11081_v59 = vcombine.low %v10899_v20, %v10941_v39  ;;  %v10496_v48 = vcombine.low %v10488_v10, %v10495_v45  ;;  %v10905_v47 = vsel %vm10896_vm0, %v17664_v41, %v18500_v34  ;;  %v10123_v51 = vpop.permute.xlu1 %10122  ;;  %v18639_v13 = vrot.slane %v13923_v29, %v15040_v37 }
 0x3ca   :  { %v11396_v30 = vcombine.high %v11393_v54, %v11393_v54  ;;  %v18642_v23 = vrot.slane %v10636_v28, %v15040_v37  ;;  %v11082_v36 = vcombine.low %v10983_v21, %v10905_v47  ;;  %v18645_v22 = vrot.slane %v11393_v54, %v15040_v37 }
 0x3cb   :  { %v18647_v5 = vcombine.low %v13886_v19, %v9327_v31  ;;  %v18650_v52 = vrot.slane %v10496_v48, %v15040_v37  ;;  %v11139_v11 = vcombine.low %v10902_v32, %v10944_v25  ;;  %v11089_v41 = vrot.slane %v11081_v59, %v15040_v37 }
 0x3cc   :  { %10840 = vrot.lane.b32.xlu1 %v18642_v23, %s14901_s22  ;;  %v10986_v34 = vsel %vm10896_vm0, %v17682_v57, %v18465_v50  ;;  %v11096_v58 = vrot.slane %v11082_v36, %v15040_v37  ;;  %v10908_v29 = vsel %vm10896_vm0, %v17709_v3, %v18542_v8  ;;  %v10947_v2 = vsel %vm10896_vm0, %v17674_v55, %v18540_v15 }
 0x3cd   :  { %10720 = vrot.lane.b32.xlu0 %v18650_v52, %s14901_s22  ;;  %v11140_v40 = vcombine.low %v10986_v34, %v10908_v29  ;;  %v10992_v54 = vsel %vm10896_vm0, %v17743_v24, %v10703_v42  ;;  %v18671_v57 = vsel %vm10896_vm0, %v17834_v33, %v10123_v51  ;;  %v10950_v3 = vsel %vm10896_vm0, %v17730_v26, %v10567_v43  ;;  %v10569_v24 = vpop.permute.xlu1 %10568  ;;  %v10121_v42 = vpop.permute.xlu0 %10120 }
 0x3ce   :  { %v11104_v50 = vcombine.low %v11089_v41, %v11096_v58  ;;  %v11105_v16 = vcombine.high %v11089_v41, %v11096_v58  ;;  %v11256_v0 = vcombine.low %v10992_v54, %v18671_v57  ;;  %v18677_v8 = vrot.slane %v11396_v30, %v15040_v37  ;;  %v19766_v30 = vld [vmem:[#allocation10_spill] sm:$0xff] }
 0x3cf   :  { %v11147_v55 = vrot.slane %v11139_v11, %v15040_v37  ;;  %v11154_v15 = vrot.slane %v11140_v40, %v15040_v37  ;;  %v11255_v10 = vcombine.low %v10908_v29, %v10950_v3  ;;  %v18684_v19 = vrot.slane %v18378_v61, %v15040_v37  ;;  %v19768_v11 = vld [vmem:[#allocation3_spill] sm:$0xff]  ;;  %v19769_v58 = vld [vmem:[#allocation6_spill] sm:$0xff] }
 0x3d0   :  { %v11197_v45 = vcombine.low %v10905_v47, %v10947_v2  ;;  %v11270_v1 = vrot.slane %v11256_v0, %v15040_v37  ;;  %v18688_v26 = vrot.slane %v11105_v16, %v15040_v37  ;;  %v18694_v59 = vrot.slane %v11104_v50, %v15040_v37  ;;  %v19770_v40 = vld [vmem:[#allocation18_spill] sm:$0xff] }
 0x3d1   :  { %v11162_v20 = vcombine.low %v11147_v55, %v11154_v15  ;;  %v11163_v9 = vcombine.high %v11147_v55, %v11154_v15  ;;  %v11263_v39 = vrot.slane %v11255_v10, %v15040_v37  ;;  %v10989_v25 = vsel %vm10896_vm0, %v17716_v44, %v18588_v17  ;;  %v19767_v17 = vld [vmem:[#allocation11_spill] sm:$0xff]  ;;  %v10571_v2 = vpop.permute.xlu1 %10570 }
 0x3d2   :  { %v18701_v32 = vsel %vm10896_vm0, %v17738_v35, %v10121_v42  ;;  %v11205_v43 = vrot.slane %v11197_v45, %v15040_v37  ;;  %v18710_v36 = vsel %vm10896_vm0, %v19766_v30, %v10569_v24  ;;  %v11138_v35 = vcombine.high %v18688_v26, %v19767_v17  ;;  %v10705_v24 = vpop.permute.xlu0 %10704 }
 0x3d3   :  { %v11171_v31 = vrot.slane %v11162_v20, %v15040_v37  ;;  %v11178_v48 = vrot.slane %v11163_v9, %v15040_v37  ;;  %v11278_v21 = vcombine.low %v11263_v39, %v11270_v1  ;;  %v11279_v47 = vcombine.high %v11263_v39, %v11270_v1  ;;  %v19771_v20 = vld [vmem:[#allocation19_spill] sm:$0xff] }
 0x3d4   :  { %v11198_v44 = vcombine.low %v10989_v25, %v18701_v32  ;;  %v11136_v54 = vcombine.high %v18694_v59, %v19770_v40  ;;  %v13916_v3 = vcombine.low %v18694_v59, %v18688_v26  ;;  %v10956_v9 = vsel %vm10896_vm0, %v19771_v20, %v10571_v2  ;;  %v19773_v20 = vld [vmem:[#allocation22_spill] sm:$0xff] }
 0x3d5   :  { %v11193_v41 = vcombine.low %v11171_v31, %v19768_v11  ;;  %v11194_v34 = vcombine.high %v11171_v31, %v19768_v11  ;;  %v11195_v29 = vcombine.low %v11178_v48, %v19769_v58  ;;  %v11287_v50 = vrot.slane %v11278_v21, %v15040_v37 }
 0x3d6   :  { %v11294_v16 = vrot.slane %v11279_v47, %v15040_v37  ;;  %v11212_v0 = vrot.slane %v11198_v44, %v15040_v37 }
 0x3d7   :  { %v11901_v55 = vunpack.i.h.s16 %v11193_v41  ;;  %v11903_v15 = vunpack.i.h.s16 %v11195_v29  ;;  %v18725_v10 = vpack.i.b16 %v11193_v41, %v11138_v35  ;;  %v11905_v42 = vunpack.i.h.s16 %v11194_v34 }
 0x3d8   :  { %v11310_v45 = vcombine.high %v11287_v50, %v18549_v62  ;;  %v11311_v1 = vcombine.low %v11294_v16, %v18555_v12  ;;  %v18738_v21 = vcombine.low %v11287_v50, %v18549_v62  ;;  %v11312_v47 = vcombine.high %v11294_v16, %v18555_v12  ;;  %v19772_v16 = vld [vmem:[#allocation15_spill] sm:$0xff] }
 0x3d9   :  { %v18731_v39 = vpack.i.b16 %v11195_v29, %v11901_v55  ;;  %v18733_v25 = vpack.i.b16 %v11194_v34, %v11903_v15  ;;  %v13918_v31 = vcombine.high %v19770_v40, %v18725_v10  ;;  %v11220_v17 = vcombine.low %v11205_v43, %v11212_v0 }
 0x3da   :  { %v11917_v30 = vunpack.i.h.s16 %v11311_v1  ;;  %v11919_v44 = vunpack.i.h.s16 %v11310_v45  ;;  %v11196_v35 = vcombine.high %v11178_v48, %v19769_v58  ;;  %v11221_v34 = vcombine.high %v11205_v43, %v11212_v0  ;;  %v10837_v29 = vpop.permute.xlu1 %10836 }
 0x3db   :  { %v12124_v11 = vcombine.high %v18731_v39, %v18733_v25  ;;  %v12154_v41 = vrot.slane %v13918_v31, %v15040_v37  ;;  %v18750_v62 = vrot.slane %v11220_v17, %v15040_v37  ;;  %v11371_v12 = vcombine.low %v18671_v57, %v10956_v9  ;;  %v10707_v0 = vpop.permute.xlu0 %10706 }
 0x3dc   :  { %v18745_v2 = vpack.i.b16 %v11310_v45, %v11917_v30  ;;  %v18747_v55 = vpack.i.b16 %v11312_v47, %v11919_v44  ;;  %v18753_v50 = vpack.i.b16 %v11196_v35, %v11905_v42  ;;  %v18756_v48 = vrot.slane %v11221_v34, %v15040_v37  ;;  %v19774_v42 = vld [vmem:[#allocation20_spill] sm:$0xff]  ;;  %v19775_v47 = vld [vmem:[#allocation2_spill] sm:$0xff] }
 0x3dd   :  { %v11313_v58 = vcombine.low %v18701_v32, %v18710_v36  ;;  %v18762_v43 = vsel %vm10896_vm0, %v19772_v16, %v10705_v24  ;;  %v11915_v15 = vunpack.i.h.s16 %v18738_v21  ;;  %v11251_v57 = vcombine.low %v18750_v62, %v19773_v20  ;;  %v19776_v36 = vld [vmem:[#allocation8_spill] sm:$0xff]  ;;  %v19777_v30 = vld [vmem:[#allocation14_spill] sm:$0xff]  ;;  %v19778_v16 = vld [vmem:[#allocation7_spill] sm:$0xff] }
 0x3de   :  { %v12241_v45 = vcombine.high %v18745_v2, %v18747_v55  ;;  %v11025_v9 = vsel %vm10896_vm0, %v19774_v42, %v10837_v29  ;;  %v12168_v31 = vrot.slane %v12124_v11, %v15040_v37  ;;  %v12185_v32 = vcombine.low %v19775_v47, %v12154_v41  ;;  %v19779_v29 = vld [vmem:[#allocation16_spill] sm:$0xff]  ;;  %v19780_v42 = vld [vmem:[#allocation5_spill] sm:$0xff] }
 0x3df   :  { %v11253_v24 = vcombine.low %v18756_v48, %v19776_v36  ;;  %v10998_v44 = vsel %vm10896_vm0, %v19777_v30, %v10707_v0  ;;  %v12126_v17 = vcombine.high %v18753_v50, %v11251_v57  ;;  %v11379_v35 = vrot.slane %v11371_v12, %v15040_v37 }
 0x3e0   :  { %v11372_v34 = vcombine.low %v10998_v44, %v11025_v9  ;;  %v9249_v51 = vunpack.i.h.s16 %v19778_v16  ;;  %v9251_v11 = vunpack.i.h.s16 %v19779_v29  ;;  %v9253_v41 = vunpack.i.h.s16 %v19780_v42 }
 0x3e1   :  { %v18781_v28 = vcombine.high %v11253_v24, %v19773_v20  ;;  %v19781_v47 = vunpack.i.h.s16 %v17989_v60  ;;  %v12182_v0 = vrot.slane %v12126_v17, %v15040_v37  ;;  %v9244_v9 = vunpack.i.l.s16 %v18089_v27 }
 0x3e2   :  { %v11386_v57 = vrot.slane %v11372_v34, %v15040_v37  ;;  %v18791_v12 = vpack.i.b16 %v19779_v29, %v9249_v51  ;;  %v18794_v30 = vpack.i.b16 %v11311_v1, %v11915_v15  ;;  %v18797_v24 = vrot.slane %v11313_v58, %v15040_v37  ;;  %v19782_v1 = vld [vmem:[#allocation9_spill] sm:$0xff]  ;;  %v19783_v15 = vld [vmem:[#allocation12_spill] sm:$0xff] }
 0x3e3   :  { %v13827_v38 = vpack.i.b16 %v19778_v16, %v19781_v47  ;;  %v18800_v44 = vpack.i.b16 %v19780_v42, %v9251_v11  ;;  %v10871_v60 = vrot.slane %v18598_v63, %v15040_v37  ;;  %v12188_v16 = vcombine.low %v12168_v31, %v12182_v0  ;;  %v19784_v58 = vld [vmem:[#allocation13_spill] sm:$0xff] }
 0x3e4   :  { %v11394_v17 = vcombine.low %v11379_v35, %v11386_v57  ;;  %v11395_v47 = vcombine.high %v11379_v35, %v11386_v57  ;;  %v12202_v51 = vrot.slane %v12185_v32, %v15040_v37  ;;  %v10732_v29 = vcombine.low %v19783_v15, %v19782_v1  ;;  %v10709_v31 = vpop.permute.xlu1 %10708 }
 0x3e5   :  { %v9552_v34 = vcombine.low %v13827_v38, %v18791_v12  ;;  %v9553_v27 = vcombine.low %v18800_v44, %v9253_v41  ;;  %v10733_v33 = vcombine.low %v19784_v58, %v9244_v9  ;;  %v12223_v11 = vrot.slane %v12188_v16, %v15040_v37 }
 0x3e6   :  { %v11403_v42 = vrot.slane %v11394_v17, %v15040_v37  ;;  %v18813_v63 = vrot.slane %v11395_v47, %v15040_v37  ;;  %v11451_v35 = vrot.slane %v10871_v60, %v15040_v37  ;;  %v11252_v38 = vcombine.high %v18750_v62, %v19773_v20 }
 0x3e7   :  { %v11254_v32 = vcombine.high %v18756_v48, %v19776_v36  ;;  %v9560_v0 = vrot.slane %v9552_v34, %v15040_v37  ;;  %v9567_v57 = vrot.slane %v9553_v27, %v15040_v37  ;;  %v18822_v9 = vcombine.low %v12202_v51, %v12223_v11  ;;  %v19785_v36 = vld [vmem:[#allocation21_spill] sm:$0xff] }
 0x3e8   :  { %v18825_v16 = vcombine.low %v11403_v42, %v18645_v22  ;;  %v11427_v17 = vcombine.low %v18813_v63, %v18677_v8  ;;  %v10747_v60 = vrot.slane %v10733_v33, %v15040_v37  ;;  %v18831_v47 = vrot.slane %v12241_v45, %v15040_v37 }
 0x3e9   :  { %v12257_v20 = vrot.slane %v18781_v28, %v15040_v37  ;;  %v18837_v34 = vsel %vm10896_vm0, %v19785_v36, %v10709_v31  ;;  %v10740_v51 = vrot.slane %v10732_v29, %v15040_v37  ;;  %v18841_v27 = vcombine.high %v11403_v42, %v18645_v22 }
 0x3ea   :  { %v11929_v1 = vunpack.i.h.s16 %v18825_v16  ;;  %v11931_v15 = vunpack.i.h.s16 %v11427_v17  ;;  %v11454_v58 = vcombine.high %v11451_v35, %v11451_v35  ;;  %v11428_v33 = vcombine.high %v18813_v63, %v18677_v8  ;;  %v14894_v8 = vld [vmem:[%s19500_s5 + $0x110] sm:$0xff]  }
 0x3eb   :  { %v18846_v45 = vcombine.low %v9560_v0, %v9567_v57  ;;  %v12121_v11 = vcombine.low %v11136_v54, %v18725_v10  ;;  %v12123_v29 = vcombine.low %v18731_v39, %v18733_v25  ;;  %v18859_v42 = vcombine.low %v10740_v51, %v10747_v60 }
 0x3ec   :  { %v18854_v31 = vpack.i.b16 %v11427_v17, %v11929_v1  ;;  %v18857_v22 = vpack.i.b16 %v18841_v27, %v11931_v15  ;;  %v13919_v36 = vcombine.low %v18753_v50, %v18750_v62  ;;  %v18864_v0 = vrot.slane %v11451_v35, %v15040_v37  ;;  %v19786_v35 = vld [vmem:[#allocation17_spill] sm:$0xff] }
 0x3ed   :  { %v12133_v40 = vrot.slane %v13916_v3, %v15040_v37  ;;  %v12147_v54 = vrot.slane %v12121_v11, %v15040_v37  ;;  %v12161_v10 = vrot.slane %v12123_v29, %v15040_v37  ;;  %v10125_v25 = vpop.permute.xlu0 %10124  ;;  %v9255_v62 = vunpack.i.h.s16 %v18012_v18 }
 0x3ee   :  { %v12356_v39 = vcombine.high %v18854_v31, %v18857_v22  ;;  %v12175_v57 = vrot.slane %v13919_v36, %v15040_v37  ;;  %v13867_v50 = vpack.i.b16 %v18012_v18, %v9253_v41  ;;  %v18879_v17 = vsel %vm10896_vm0, %v19786_v35, %v10125_v25 }
 0x3ef   :  { %v12183_v26 = vcombine.low %v12133_v40, %v12147_v54  ;;  %v12184_v59 = vcombine.high %v12133_v40, %v12147_v54  ;;  %v18882_v3 = vpack.i.b16 %v18738_v21, %v11254_v32  ;;  %v11933_v60 = vunpack.i.h.s16 %v18841_v27 }
 0x3f0   :  { %v11314_v51 = vcombine.low %v18762_v43, %v18879_v17  ;;  %v12186_v1 = vcombine.low %v12161_v10, %v12175_v57  ;;  %v12187_v15 = vcombine.high %v12161_v10, %v12175_v57  ;;  %v9575_v11 = vrot.slane %v18846_v45, %v15040_v37 }
 0x3f1   :  { %v18890_v18 = vrot.slane %v11454_v58, %v15040_v37  ;;  %v10336_v41 = vcombine.low %v18791_v12, %v18800_v44  ;;  %v10337_v29 = vcombine.low %v13867_v50, %v9255_v62  ;;  %v12195_v32 = vrot.slane %v12183_v26, %v15040_v37 }
 0x3f2   :  { %v11328_v21 = vrot.slane %v11314_v51, %v15040_v37  ;;  %v12216_v27 = vrot.slane %v12186_v1, %v15040_v37  ;;  %v12230_v43 = vrot.slane %v12187_v15, %v15040_v37  ;;  %v12209_v36 = vrot.slane %v12184_v59, %v15040_v37  ;;  %v10573_v54 = vpop.permute.xlu0 %10572  ;;  %v19787_v51 = vld [vmem:[#allocation4_spill] sm:$0xff] }
 0x3f3   :  { %v13920_v40 = vcombine.low %v18756_v48, %v11252_v38  ;;  %v12238_v58 = vcombine.low %v18882_v3, %v18794_v30  ;;  %v12239_v45 = vcombine.high %v18882_v3, %v18794_v30  ;;  %v10351_v25 = vrot.slane %v10337_v29, %v15040_v37 }
 0x3f4   :  { %v11336_v12 = vcombine.low %v18797_v24, %v11328_v21  ;;  %v11337_v44 = vcombine.high %v18797_v24, %v11328_v21  ;;  %v12231_v10 = vcombine.low %v12195_v32, %v12216_v27  ;;  %v10755_v57 = vrot.slane %v18859_v42, %v15040_v37  ;;  %v14893_v24 = vld [vmem:[%s19500_s5 + $0x118] sm:$0xff]  }
 0x3f5   :  { %v12232_v62 = vcombine.high %v12195_v32, %v12216_v27  ;;  %v12234_v50 = vcombine.low %v12209_v36, %v12230_v43  ;;  %v12235_v48 = vcombine.high %v12209_v36, %v12230_v43  ;;  %v10344_v26 = vrot.slane %v10336_v41, %v15040_v37  ;;  %v10127_v41 = vpop.permute.xlu1 %10126 }
 0x3f6   :  { %v11345_v38 = vrot.slane %v11336_v12, %v15040_v37  ;;  %v11352_v35 = vrot.slane %v11337_v44, %v15040_v37  ;;  %v12240_v59 = vcombine.low %v18745_v2, %v18747_v55  ;;  %v10959_v1 = vsel %vm10896_vm0, %v19787_v51, %v10573_v54  ;;  %v19788_v55 = vld [vmem:[#allocation31_spill] sm:$0xff]  ;;  %v19789_v54 = vld [vmem:[#allocation33_spill] sm:$0xff] }
 0x3f7   :  { %13157 = vmatprep.mubr.bf16.mxu0 %v12234_v50  ;;  %13245 = vmatprep.mubr.bf16.mxu1 %v12235_v48  ;;  %v12250_v42 = vrot.slane %v13920_v40, %v15040_v37  ;;  %v12264_v15 = vrot.slane %v12238_v58, %v15040_v37  ;;  %v10352_v2 = vcombine.low %v10344_v26, %v10351_v25  ;;  %v9321_v32 = vunpack.i.h.s16 %v19788_v55 }
 0x3f8   :  { %v11370_v29 = vcombine.high %v11352_v35, %v18570_v56  ;;  %v13922_v21 = vcombine.low %v11345_v38, %v11352_v35  ;;  %13158 = vmatmul.mubr.bf16.vlgmr.msra.gmra.mxu0 %v12231_v10  ;;  %13246 = vmatmul.mubr.bf16.vlgmr.msra.gmra.mxu1 %v12232_v62  ;;  %v18926_v27 = vpack.i.b16 %v11428_v33, %v11933_v60  ;;  %v14902_v58 = vmov 0.0  }
 0x3f9   :  { %v18929_v43 = vrot.slane %v12356_v39, %v15040_v37  ;;  %v12278_v36 = vrot.slane %v12240_v59, %v15040_v37  ;;  %v12301_v40 = vcombine.high %v12250_v42, %v12264_v15  ;;  %14673 = vmatprep.subr.bf16.mxu0 %v14902_v58  ;;  %v12300_v44 = vcombine.low %v12250_v42, %v12264_v15 }
 0x3fa   :  { %v13896_v56 = vpack.i.b16 %v18825_v16, %v11370_v29  ;;  %v12292_v12 = vrot.slane %v13922_v21, %v15040_v37  ;;  %14674 = vmatpush3.bf16.msra.mxu0 %v14893_v24  ;;  %v9323_v10 = vunpack.i.h.s16 %v19789_v54  ;;  %14709 = vmatprep.subr.bf16.mxu1 %v14902_v58  ;;  %v11368_v63 = vcombine.high %v11345_v38, %v18584_v7 }
 0x3fb   :  { %v18942_v33 = vsel %vm10896_vm0, %v9575_v11, %v10127_v41  ;;  %v11429_v39 = vcombine.low %v18879_v17, %v10959_v1  ;;  %v18946_v16 = vpack.i.b16 %v19789_v54, %v9321_v32  ;;  %14713 = vmatpush3.bf16.msra.mxu1 %v14893_v24  ;;  %v10839_v60 = vpop.permute.xlu0 %10838  ;;  %v10359_v25 = vrot.slane %v10352_v2, %v15040_v37  ;;  %v10575_v24 = vpop.permute.xlu1 %10574 }
 0x3fc   :  { %v12304_v62 = vcombine.high %v12278_v36, %v12292_v12  ;;  %v12303_v50 = vcombine.low %v12278_v36, %v12292_v12  ;;  %v12355_v48 = vcombine.low %v18854_v31, %v18857_v22  ;;  %14675 = vmatprep.subr.bf16.mxu0 %v14902_v58  ;;  %v11028_v38 = vsel %vm10896_vm0, %v10755_v57, %v10839_v60 }
 0x3fd   :  { %v12326_v11 = vrot.slane %v12301_v40, %v15040_v37  ;;  %v19790_v17 = vunpack.i.h.s16 %v18397_v4  ;;  %v13882_v26 = vpack.i.b16 %v18462_v49, %v9323_v10  ;;  %14710 = vmatprep.subr.bf16.mxu1 %v14902_v58  ;;  %v11430_v59 = vcombine.low %v18837_v34, %v11028_v38 }
 0x3fe   :  { %v12347_v51 = vrot.slane %v12304_v62, %v15040_v37  ;;  %v12312_v31 = vrot.slane %v12300_v44, %v15040_v37  ;;  %v12353_v22 = vcombine.low %v11368_v63, %v13896_v56  ;;  %14676 = vmatpush3.bf16.msra.mxu0 %v14894_v8  ;;  %v13924_v57 = vcombine.high %v18584_v7, %v13896_v56  ;;  %v14895_v7 = vld [vmem:[%s19500_s5 + $0x108] sm:$0xff]   ;;  %v19792_v62 = vld [vmem:[#allocation28_spill] sm:$0xff] }
 0x3ff   :  { %v13880_v35 = vpack.i.b16 %v19788_v55, %v19790_v17  ;;  %v12333_v1 = vrot.slane %v12303_v50, %v15040_v37  ;;  %v19791_v42 = vunpack.i.h.s16 %v18462_v49  ;;  %14714 = vmatpush3.bf16.msra.mxu1 %v14894_v8  ;;  %v11437_v29 = vrot.slane %v11429_v39, %v15040_v37  ;;  %14677 = vmatprep.subr.bf16.mxu0 %v14902_v58  ;;  %v10131_v55 = vpop.permute.xlu0 %10130 }
 0x400   :  { %v11444_v34 = vrot.slane %v11430_v59, %v15040_v37  ;;  %v12351_v21 = vcombine.low %v12326_v11, %v12347_v51  ;;  %v12352_v41 = vcombine.high %v12326_v11, %v12347_v51  ;;  %v10962_v2 = vsel %vm10896_vm0, %v10359_v25, %v10575_v24  ;;  %14711 = vmatprep.subr.bf16.mxu1 %v14902_v58  ;;  %v14896_v25 = vld [vmem:[%s19500_s5 + $0x100] sm:$0xff]   ;;  %v19793_v51 = vld [vmem:[#allocation25_spill] sm:$0xff] }
 0x401   :  { %v10756_v4 = vcombine.low %v13880_v35, %v18946_v16  ;;  %v10757_v15 = vcombine.low %v13882_v26, %v19791_v42  ;;  %v12348_v32 = vcombine.low %v12312_v31, %v12333_v1  ;;  %v12349_v36 = vcombine.high %v12312_v31, %v12333_v1 }
 0x402   :  { %v12381_v49 = vrot.slane %v12355_v48, %v15040_v37  ;;  %v11452_v40 = vcombine.low %v11437_v29, %v11444_v34  ;;  %v11453_v56 = vcombine.high %v11437_v29, %v11444_v34  ;;  %13165 = vmatprep.mubr.bf16.mxu0 %v12351_v21  ;;  %13253 = vmatprep.mubr.bf16.mxu1 %v12352_v41 }
 0x403   :  { %v12367_v12 = vrot.slane %v12353_v22, %v15040_v37  ;;  %v12374_v44 = vrot.slane %v13924_v57, %v15040_v37  ;;  %13166 = vmatmul.mubr.bf16.gmra.mxu0 %v12348_v32  ;;  %13254 = vmatmul.mubr.bf16.gmra.mxu1 %v12349_v36  ;;  %v10764_v54 = vrot.slane %v10756_v4, %v15040_v37 }
 0x404   :  { %v10771_v10 = vrot.slane %v10757_v15, %v15040_v37  ;;  %v11461_v8 = vrot.slane %v11452_v40, %v15040_v37  ;;  %v18982_v63 = vrot.slane %v11453_v56, %v15040_v37  ;;  %v11487_v39 = vcombine.low %v18942_v33, %v10962_v2  ;;  %14678 = vmatpush3.bf16.msra.mxu0 %v14895_v7 }
 0x405   :  { %v10872_v60 = vcombine.low %v18946_v16, %v13882_v26  ;;  %v18991_v50 = vsel %vm10896_vm0, %v19792_v62, %v10131_v55  ;;  %14715 = vmatpush3.bf16.msra.mxu1 %v14895_v7  ;;  %14679 = vmatprep.subr.bf16.mxu0 %v14902_v58  ;;  %v12271_v33 = vrot.slane %v12239_v45, %v15040_v37 }
 0x406   :  { %v18993_v48 = vcombine.low %v10764_v54, %v10771_v10  ;;  %v11483_v16 = vcombine.low %v11461_v8, %v18864_v0  ;;  %v11484_v38 = vcombine.high %v11461_v8, %v18864_v0  ;;  %v11485_v11 = vcombine.low %v18982_v63, %v18890_v18  ;;  %14712 = vmatprep.subr.bf16.mxu1 %v14902_v58  ;;  %v10711_v35 = vpop.permute.xlu0 %10710 }
 0x407   :  { %v12418_v17 = vcombine.high %v12367_v12, %v12381_v49  ;;  %v13925_v26 = vcombine.low %v18926_v27, %v11461_v8  ;;  %v10880_v59 = vrot.slane %v10872_v60, %v15040_v37  ;;  %v12302_v30 = vcombine.low %v12257_v20, %v12271_v33  ;;  %v10129_v21 = vpop.permute.xlu1 %10128 }
 0x408   :  { %v12305_v3 = vcombine.low %v18831_v47, %v18639_v13  ;;  %v12358_v45 = vcombine.high %v18926_v27, %v11483_v16  ;;  %v13927_v24 = vcombine.high %v11485_v11, %v18864_v0  ;;  %v11004_v31 = vsel %vm10896_vm0, %v19793_v51, %v10711_v35  ;;  %14680 = vmatpush3.bf16.msra.mxu0 %v14896_v25 }
 0x409   :  { %v13926_v22 = vcombine.low %v18982_v63, %v11484_v38  ;;  %v11488_v57 = vcombine.low %v11004_v31, %v18991_v50  ;;  %v12417_v1 = vcombine.low %v12367_v12, %v12381_v49  ;;  %v19794_v28 = vrot.slane %v18647_v5, %v15040_v37  ;;  %14716 = vmatpush3.bf16.msra.mxu1 %v14896_v25 }
 0x40a   :  { %v12319_v13 = vrot.slane %v12302_v30, %v15040_v37  ;;  %v12402_v47 = vrot.slane %v12358_v45, %v15040_v37  ;;  %v12416_v0 = vrot.slane %v13927_v24, %v15040_v37  ;;  %v12395_v27 = vrot.slane %v13925_v26, %v15040_v37 }
 0x40b   :  { %v19021_v20 = vcombine.low %v10880_v59, %v19794_v28  ;;  %v12409_v4 = vrot.slane %v13926_v22, %v15040_v37  ;;  %v11495_v42 = vrot.slane %v11487_v39, %v15040_v37  ;;  %v11502_v15 = vrot.slane %v11488_v57, %v15040_v37 }
 0x40c   :  { %v12340_v29 = vrot.slane %v12305_v3, %v15040_v37  ;;  %v12419_v5 = vcombine.low %v12374_v44, %v18929_v43  ;;  %v11533_v34 = vrot.slane %v18684_v19, %v15040_v37  ;;  %v12422_v2 = vcombine.low %v12402_v47, %v12416_v0  ;;  %v19796_v0 = vld [vmem:[#allocation29_spill] sm:$0xff] }
 0x40d   :  { %v12421_v41 = vcombine.high %v12395_v27, %v12409_v4  ;;  %v12420_v7 = vcombine.low %v12395_v27, %v12409_v4  ;;  %v11510_v55 = vcombine.low %v11495_v42, %v11502_v15  ;;  %v11511_v32 = vcombine.high %v11495_v42, %v11502_v15  ;;  %v10135_v60 = vpop.permute.xlu1 %10134  ;;  %v19797_v42 = vld [vmem:[#allocation27_spill] sm:$0xff] }
 0x40e   :  { %v12443_v36 = vrot.slane %v12418_v17, %v15040_v37  ;;  %v19035_v49 = vcombine.low %v12319_v13, %v12340_v29  ;;  %v12429_v56 = vrot.slane %v12417_v1, %v15040_v37  ;;  %v12457_v43 = vrot.slane %v12422_v2, %v15040_v37  ;;  %v19800_v2 = vld [vmem:[#allocation24_spill] sm:$0xff] }
 0x40f   :  { %v12464_v40 = vrot.slane %v12421_v41, %v15040_v37  ;;  %v12450_v12 = vrot.slane %v12420_v7, %v15040_v37  ;;  %v19795_v44 = vcombine.high %v18684_v19, %v18684_v19  ;;  %v11519_v10 = vrot.slane %v11510_v55, %v15040_v37  ;;  %v19799_v7 = vld [vmem:[#allocation32_spill] sm:$0xff] }
 0x410   :  { %v11526_v8 = vrot.slane %v11511_v32, %v15040_v37  ;;  %v12436_v39 = vrot.slane %v12419_v5, %v15040_v37  ;;  %v11486_v35 = vcombine.high %v18982_v63, %v18890_v18  ;;  %v11567_v27 = vrot.slane %v19796_v0, %v15040_v37 }
 0x411   :  { %v11540_v54 = vrot.slane %v19795_v44, %v15040_v37  ;;  %v12468_v25 = vcombine.low %v12443_v36, %v12464_v40  ;;  %v12469_v62 = vcombine.high %v12443_v36, %v12464_v40  ;;  %v12465_v33 = vcombine.low %v12429_v56, %v12450_v12  ;;  %v19801_v40 = vld [vmem:[#allocation34_spill] sm:$0xff]  ;;  %v19802_v44 = vld [vmem:[#allocation23_spill] sm:$0xff] }
 0x412   :  { %v12466_v16 = vcombine.high %v12429_v56, %v12450_v12  ;;  %v11541_v38 = vcombine.low %v11519_v10, %v11533_v34  ;;  %v11542_v11 = vcombine.high %v11519_v10, %v11533_v34  ;;  %v19050_v19 = vcombine.low %v12436_v39, %v12457_v43  ;;  %v19798_v34 = vld [vmem:[#allocation35_spill] sm:$0xff] }
 0x413   :  { %v11543_v17 = vcombine.low %v11526_v8, %v11540_v54  ;;  %13173 = vmatprep.mubr.bf16.mxu0 %v12468_v25  ;;  %13261 = vmatprep.mubr.bf16.mxu1 %v12469_v62  ;;  %v11544_v26 = vcombine.high %v11526_v8, %v11540_v54  ;;  %v10579_v57 = vpop.permute.xlu1 %10578  ;;  %v19072_v41 = vsel %vm10896_vm0, %v19798_v34, %v10135_v60  ;;  %v19803_v8 = vld [vmem:[#allocation26_spill] sm:$0xff] }
 0x414   :  { %v11943_v59 = vunpack.i.h.s16 %v11541_v38  ;;  %v11947_v3 = vunpack.i.h.s16 %v11542_v11  ;;  %13174 = vmatmul.mubr.bf16.gmra.mxu0 %v12465_v33  ;;  %13262 = vmatmul.mubr.bf16.gmra.mxu1 %v12466_v16  ;;  %v19052_v45 = vpack.i.b16 %v11541_v38, %v11486_v35  ;;  %v10577_v22 = vpop.permute.xlu0 %10576  ;;  %v10968_v13 = vsel %vm10896_vm0, %v18378_v61, %v10579_v57 }
 0x415   :  { %v11945_v30 = vunpack.i.h.s16 %v11543_v17  ;;  %v10965_v15 = vsel %vm10896_vm0, %v19797_v42, %v10577_v22  ;;  %v11603_v29 = vcombine.low %v18991_v50, %v10968_v13  ;;  %v10923_v55 = vsel %vm10896_vm0, %v19800_v2, %v10129_v21 }
 0x416   :  { %v13901_v24 = vpack.i.b16 %v11543_v17, %v11943_v59  ;;  %v13903_v31 = vpack.i.b16 %v11544_v26, %v11947_v3  ;;  %v11570_v36 = vcombine.high %v11567_v27, %v11567_v27  ;;  %v11625_v56 = vrot.slane %v19801_v40, %v15040_v37 }
 0x417   :  { %v13902_v51 = vpack.i.b16 %v11542_v11, %v11945_v30  ;;  %v11545_v12 = vcombine.low %v10923_v55, %v10965_v15  ;;  %v11611_v50 = vrot.slane %v11603_v29, %v15040_v37  ;;  %v11799_v21 = vrot.slane %v18593_v14, %v15040_v37 }
 0x418   :  { %v12471_v1 = vcombine.high %v19052_v45, %v13901_v24  ;;  %v10713_v47 = vpop.permute.xlu0 %10712  ;;  %v11598_v62 = vrot.slane %v11570_v36, %v15040_v37  ;;  %v11628_v33 = vcombine.high %v11625_v56, %v11625_v56  ;;  %v11649_v17 = vrot.slane %v11625_v56, %v15040_v37 }
 0x419   :  { %v12473_v18 = vcombine.high %v13902_v51, %v13903_v31  ;;  %v11007_v54 = vsel %vm10896_vm0, %v19802_v44, %v10713_v47  ;;  %v11553_v16 = vrot.slane %v11545_v12, %v15040_v37  ;;  %v11683_v35 = vrot.slane %v18534_v46, %v15040_v37 }
 0x41a   :  { %v19056_v63 = vrot.slane %v12471_v1, %v15040_v37  ;;  %v11802_v14 = vcombine.high %v11799_v21, %v11799_v21  ;;  %v11741_v30 = vrot.slane %v18650_v52, %v15040_v37  ;;  %v19102_v1 = vrot.slane %v11567_v27, %v15040_v37 }
 0x41b   :  { %v19059_v28 = vrot.slane %v12473_v18, %v15040_v37  ;;  %v10715_v5 = vpop.permute.xlu1 %10714  ;;  %v12470_v18 = vcombine.low %v19052_v45, %v13901_v24  ;;  %v12472_v13 = vcombine.low %v13902_v51, %v13903_v31  ;;  %v19118_v51 = vrot.slane %v11799_v21, %v15040_v37 }
 0x41c   :  { %v11010_v61 = vsel %vm10896_vm0, %v19799_v7, %v10715_v5  ;;  %v13929_v29 = vcombine.low %v19102_v1, %v11598_v62  ;;  %v11686_v5 = vcombine.high %v11683_v35, %v11683_v35  ;;  %v19112_v7 = vrot.slane %v11628_v33, %v15040_v37 }
 0x41d   :  { %v12536_v4 = vcombine.low %v19056_v63, %v19059_v28  ;;  %v11604_v32 = vcombine.low %v11010_v61, %v19072_v41  ;;  %v19115_v27 = vrot.slane %v11802_v14, %v15040_v37  ;;  %v11744_v61 = vcombine.high %v11741_v30, %v11741_v30 }
 0x41e   :  { %v10133_v43 = vpop.permute.xlu0 %10132  ;;  %v10895_v31 = vrot.slane %v19021_v20, %v15040_v37  ;;  %v12484_v2 = vrot.slane %v12470_v18, %v15040_v37  ;;  %v12498_v55 = vrot.slane %v12472_v13, %v15040_v37  ;;  %v19133_v44 = vrot.slane %v11683_v35, %v15040_v37 }
 0x41f   :  { %v11618_v10 = vrot.slane %v11604_v32, %v15040_v37  ;;  %v19087_v39 = vsel %vm10896_vm0, %v19803_v8, %v10133_v43  ;;  %v19136_v20 = vrot.slane %v11686_v5, %v15040_v37  ;;  %v19143_v8 = vrot.slane %v11741_v30, %v15040_v37 }
 0x420   :  { %v11546_v60 = vcombine.low %v11007_v54, %v19087_v39  ;;  %v19155_v33 = vrot.slane %v10895_v31, %v15040_v37  ;;  %v12534_v14 = vcombine.low %v12484_v2, %v12498_v55 }
 0x421   :  { %v11626_v25 = vcombine.low %v11611_v50, %v11618_v10  ;;  %v10717_v11 = vpop.permute.xlu1 %10716  ;;  %v11627_v26 = vcombine.high %v11611_v50, %v11618_v10  ;;  %v19130_v50 = vrot.slane %v13929_v29, %v15040_v37  ;;  %v13935_v10 = vcombine.low %v19118_v51, %v19115_v27 }
 0x422   :  { %v11560_v38 = vrot.slane %v11546_v60, %v15040_v37 }
 0x423   :  { %v11635_v59 = vrot.slane %v11626_v25, %v15040_v37  ;;  %v10581_v57 = vpop.permute.xlu0 %10580  ;;  %v19109_v34 = vrot.slane %v11627_v26, %v15040_v37  ;;  %v12535_v26 = vcombine.high %v12484_v2, %v12498_v55 }
 0x424   :  { %v11568_v3 = vcombine.low %v11553_v16, %v11560_v38  ;;  %v11569_v22 = vcombine.high %v11553_v16, %v11560_v38  ;;  %v10971_v12 = vsel %vm10896_vm0, %v19796_v0, %v10581_v57  ;;  %v19146_v0 = vrot.slane %v11744_v61, %v15040_v37  ;;  %v19805_v57 = vld [vmem:[#allocation36_spill] sm:$0xff] }
 0x425   :  { %v11657_v47 = vcombine.low %v11635_v59, %v11649_v17  ;;  %v11659_v54 = vcombine.low %v19109_v34, %v19112_v7  ;;  %v11661_v60 = vcombine.low %v19087_v39, %v10971_v12  ;;  %v11658_v5 = vcombine.high %v11635_v59, %v11649_v17 }
 0x426   :  { %v11577_v42 = vrot.slane %v11568_v3, %v15040_v37  ;;  %v11584_v15 = vrot.slane %v11569_v22, %v15040_v37  ;;  %v10583_v24 = vpop.permute.xlu1 %10582  ;;  %v19804_v22 = vld [vmem:[#allocation30_spill] sm:$0xff]  ;;  %v12560_v59 = vrot.slane %v12535_v26, %v15040_v37 }
 0x427   :  { %v10974_v25 = vsel %vm10896_vm0, %v19801_v40, %v10583_v24  ;;  %v11957_v30 = vunpack.i.h.s16 %v11657_v47  ;;  %v11959_v3 = vunpack.i.h.s16 %v11659_v54  ;;  %v11013_v39 = vsel %vm10896_vm0, %v19804_v22, %v10717_v11 }
 0x428   :  { %v11602_v45 = vcombine.high %v11584_v15, %v11598_v62  ;;  %v11600_v32 = vcombine.high %v11577_v42, %v19102_v1  ;;  %v13928_v56 = vcombine.low %v11577_v42, %v11584_v15  ;;  %v10779_v62 = vrot.slane %v18993_v48, %v15040_v37 }
 0x429   :  { %v11719_v18 = vcombine.low %v19072_v41, %v10974_v25  ;;  %v11669_v61 = vrot.slane %v11661_v60, %v15040_v37  ;;  %v19175_v55 = vpack.i.b16 %v11659_v54, %v11957_v30  ;;  %v11860_v25 = vcombine.high %v19155_v33, %v19155_v33 }
 0x42a   :  { %v19125_v36 = vpack.i.b16 %v11657_v47, %v11602_v45  ;;  %v10139_v43 = vpop.permute.xlu0 %10138  ;;  %v12512_v38 = vrot.slane %v13928_v56, %v15040_v37  ;;  %v19806_v45 = vld [vmem:[#allocation38_spill] sm:$0xff]  ;;  %v12546_v56 = vrot.slane %v12534_v14, %v15040_v37 }
 0x42b   :  { %v10938_v47 = vsel %vm10896_vm0, %v18561_v6, %v10139_v43  ;;  %v11727_v6 = vrot.slane %v11719_v18, %v15040_v37  ;;  %v11660_v18 = vcombine.high %v19109_v34, %v19112_v7 }
 0x42c   :  { %v12476_v21 = vcombine.low %v11600_v32, %v19125_v36  ;;  %v19177_v32 = vpack.i.b16 %v11658_v5, %v11959_v3 }
 0x42d   :  { %v10137_v16 = vpop.permute.xlu1 %10136 }
 0x42e   :  { %v12526_v35 = vrot.slane %v12476_v21, %v15040_v37  ;;  %v19163_v40 = vsel %vm10896_vm0, %v19805_v57, %v10137_v16 }
 0x42f   :  { %v11662_v13 = vcombine.low %v11013_v39, %v19163_v40 }
 0x430   :  { %v10719_v42 = vpop.permute.xlu0 %10718  ;;  %v12538_v15 = vcombine.high %v12512_v38, %v12526_v35  ;;  %v12537_v29 = vcombine.low %v12512_v38, %v12526_v35  ;;  %v11961_v35 = vunpack.i.h.s16 %v11658_v5 }
 0x431   :  { %v11016_v11 = vsel %vm10896_vm0, %v19806_v45, %v10719_v42  ;;  %v11676_v24 = vrot.slane %v11662_v13, %v15040_v37  ;;  %v13930_v13 = vcombine.high %v19102_v1, %v19125_v36  ;;  %v11881_v42 = vrot.slane %v19155_v33, %v15040_v37 }
 0x432   :  { %v11720_v31 = vcombine.low %v11016_v11, %v10938_v47  ;;  %v12581_v2 = vrot.slane %v12538_v15, %v15040_v37  ;;  %v12567_v41 = vrot.slane %v12537_v29, %v15040_v37  ;;  %v12587_v15 = vcombine.low %v19175_v55, %v19177_v32 }
 0x433   :  { %v10585_v17 = vpop.permute.xlu1 %10584  ;;  %v11684_v12 = vcombine.low %v11669_v61, %v11676_v24  ;;  %v11685_v43 = vcombine.high %v11669_v61, %v11676_v24  ;;  %v19205_v34 = vpack.i.b16 %v11660_v18, %v11961_v35  ;;  %v12533_v24 = vrot.slane %v13930_v13, %v15040_v37 }
 0x434   :  { %v11734_v21 = vrot.slane %v11720_v31, %v15040_v37  ;;  %v12585_v16 = vcombine.low %v12560_v59, %v12581_v2  ;;  %v12586_v54 = vcombine.high %v12560_v59, %v12581_v2  ;;  %v12582_v38 = vcombine.low %v12546_v56, %v12567_v41 }
 0x435   :  { %v10587_v60 = vpop.permute.xlu0 %10586  ;;  %v19186_v30 = vrot.slane %v11684_v12, %v15040_v37  ;;  %v19189_v14 = vrot.slane %v11685_v43, %v15040_v37  ;;  %v12583_v57 = vcombine.high %v12546_v56, %v12567_v41  ;;  %v10977_v7 = vsel %vm10896_vm0, %v18534_v46, %v10585_v17 }
 0x436   :  { %v11742_v26 = vcombine.low %v11727_v6, %v11734_v21  ;;  %v11743_v3 = vcombine.high %v11727_v6, %v11734_v21  ;;  %v10980_v22 = vsel %vm10896_vm0, %v18650_v52, %v10587_v60  ;;  %13181 = vmatprep.mubr.bf16.mxu0 %v12585_v16  ;;  %13269 = vmatprep.mubr.bf16.mxu1 %v12586_v54 }
 0x437   :  { %v10723_v39 = vpop.permute.xlu1 %10722  ;;  %13182 = vmatmul.mubr.bf16.gmra.mxu0 %v12582_v38  ;;  %v11835_v5 = vcombine.low %v10938_v47, %v10980_v22  ;;  %13270 = vmatmul.mubr.bf16.gmra.mxu1 %v12583_v57  ;;  %v11716_v1 = vcombine.high %v19186_v30, %v19133_v44  ;;  %v11718_v33 = vcombine.high %v19189_v14, %v19136_v20 }
 0x438   :  { %v11751_v29 = vrot.slane %v11742_v26, %v15040_v37  ;;  %v11758_v52 = vrot.slane %v11743_v3, %v15040_v37  ;;  %v11022_v61 = vsel %vm10896_vm0, %v18642_v23, %v10723_v39  ;;  %v19222_v31 = vrot.slane %v11860_v25, %v15040_v37  ;;  %v19807_v25 = vld [vmem:[#allocation37_spill] sm:$0xff] }
 0x439   :  { %v10843_v45 = vpop.permute.xlu0 %10842  ;;  %v12601_v2 = vrot.slane %v12587_v15, %v15040_v37  ;;  %v11843_v41 = vrot.slane %v11835_v5, %v15040_v37  ;;  %v13931_v59 = vcombine.low %v19205_v34, %v19186_v30  ;;  %v13932_v16 = vcombine.low %v19189_v14, %v11716_v1 }
 0x43a   :  { %v11034_v36 = vsel %vm10896_vm0, %v10779_v62, %v10843_v45  ;;  %v11773_v23 = vcombine.low %v11751_v29, %v19143_v8  ;;  %v11774_v47 = vcombine.high %v11751_v29, %v19143_v8  ;;  %v11775_v11 = vcombine.low %v11758_v52, %v19146_v0 }
 0x43b   :  { %v11836_v46 = vcombine.low %v11022_v61, %v11034_v36  ;;  %v11777_v62 = vcombine.low %v19163_v40, %v10977_v7  ;;  %v12539_v26 = vcombine.low %v19130_v50, %v12533_v24  ;;  %v11776_v3 = vcombine.high %v11758_v52, %v19146_v0 }
 0x43c   :  { %v11971_v48 = vunpack.i.h.s16 %v11773_v23  ;;  %v11973_v8 = vunpack.i.h.s16 %v11775_v11  ;;  %v11975_v56 = vunpack.i.h.s16 %v11774_v47  ;;  %v19232_v21 = vpack.i.b16 %v11773_v23, %v11718_v33 }
 0x43d   :  { %v11850_v6 = vrot.slane %v11836_v46, %v15040_v37  ;;  %v11785_v22 = vrot.slane %v11777_v62, %v15040_v37  ;;  %v12615_v39 = vrot.slane %v13931_v59, %v15040_v37  ;;  %v12629_v5 = vrot.slane %v13932_v16, %v15040_v37 }
 0x43e   :  { %v10841_v17 = vpop.permute.xlu1 %10840  ;;  %v19234_v60 = vpack.i.b16 %v11775_v11, %v11971_v48  ;;  %v13910_v57 = vpack.i.b16 %v11774_v47, %v11973_v8  ;;  %v13911_v29 = vpack.i.b16 %v11776_v3, %v11975_v56  ;;  %v19256_v23 = vrot.slane %v12536_v4, %v15040_v37 }
 0x43f   :  { %v11031_v12 = vsel %vm10896_vm0, %v18579_v53, %v10841_v17  ;;  %v10721_v43 = vpop.permute.xlu0 %10720  ;;  %v11858_v54 = vcombine.low %v11843_v41, %v11850_v6  ;;  %v11859_v38 = vcombine.high %v11843_v41, %v11850_v6  ;;  %v12652_v0 = vcombine.high %v12601_v2, %v12615_v39 }
 0x440   :  { %v11019_v40 = vsel %vm10896_vm0, %v19807_v25, %v10721_v43  ;;  %v12593_v53 = vcombine.low %v19232_v21, %v19234_v60  ;;  %v12651_v24 = vcombine.low %v12601_v2, %v12615_v39  ;;  %v19259_v46 = vrot.slane %v12539_v26, %v15040_v37 }
 0x441   :  { %v11778_v35 = vcombine.low %v11019_v40, %v11031_v12  ;;  %v11867_v18 = vrot.slane %v11858_v54, %v15040_v37  ;;  %v11874_v13 = vrot.slane %v11859_v38, %v15040_v37  ;;  %v12677_v59 = vrot.slane %v12652_v0, %v15040_v37 }
 0x442   :  { %v12643_v50 = vrot.slane %v12593_v53, %v15040_v37  ;;  %v12663_v8 = vrot.slane %v12651_v24, %v15040_v37  ;;  %v12704_v40 = vcombine.low %v13910_v57, %v13911_v29  ;;  %v11717_v24 = vcombine.low %v19189_v14, %v19136_v20 }
 0x443   :  { %v11792_v15 = vrot.slane %v11778_v35, %v15040_v37  ;;  %v11889_v52 = vcombine.low %v11867_v18, %v11881_v42  ;;  %v11890_v61 = vcombine.high %v11867_v18, %v11881_v42  ;;  %v11891_v45 = vcombine.low %v11874_v13, %v19222_v31 }
 0x444   :  { %v11892_v1 = vcombine.high %v11874_v13, %v19222_v31  ;;  %v12655_v33 = vcombine.high %v12629_v5, %v12643_v50  ;;  %v12705_v42 = vcombine.high %v13910_v57, %v13911_v29  ;;  %v12654_v63 = vcombine.low %v12629_v5, %v12643_v50 }
 0x445   :  { %v11800_v7 = vcombine.low %v11785_v22, %v11792_v15  ;;  %v11801_v36 = vcombine.high %v11785_v22, %v11792_v15  ;;  %v11985_v47 = vunpack.i.h.s16 %v11889_v52  ;;  %v11987_v11 = vunpack.i.h.s16 %v11891_v45 }
 0x446   :  { %v12698_v62 = vrot.slane %v12655_v33, %v15040_v37  ;;  %v12684_v43 = vrot.slane %v12654_v63, %v15040_v37  ;;  %v12725_v38 = vrot.slane %v12705_v42, %v15040_v37  ;;  %v11989_v3 = vunpack.i.h.s16 %v11890_v61 }
 0x447   :  { %v11809_v48 = vrot.slane %v11800_v7, %v15040_v37  ;;  %v11816_v31 = vrot.slane %v11801_v36, %v15040_v37  ;;  %v13913_v41 = vpack.i.b16 %v11891_v45, %v11985_v47  ;;  %v13914_v17 = vpack.i.b16 %v11890_v61, %v11987_v11 }
 0x448   :  { %v12702_v6 = vcombine.low %v12677_v59, %v12698_v62  ;;  %v12703_v12 = vcombine.high %v12677_v59, %v12698_v62  ;;  %v12699_v35 = vcombine.low %v12663_v8, %v12684_v43  ;;  %v12700_v26 = vcombine.high %v12663_v8, %v12684_v43 }
 0x449   :  { %v11832_v28 = vcombine.high %v11809_v48, %v19118_v51  ;;  %v11834_v4 = vcombine.high %v11816_v31, %v19115_v27  ;;  %v13934_v2 = vcombine.low %v11809_v48, %v11816_v31  ;;  %v12711_v56 = vcombine.high %v13913_v41, %v13914_v17 }
 0x44a   :  { %v12710_v16 = vcombine.low %v13913_v41, %v13914_v17  ;;  %13189 = vmatprep.mubr.bf16.mxu0 %v12702_v6  ;;  %13277 = vmatprep.mubr.bf16.mxu1 %v12703_v12  ;;  %v12739_v22 = vrot.slane %v13935_v10, %v15040_v37  ;;  %v12718_v57 = vrot.slane %v12704_v40, %v15040_v37 }
 0x44b   :  { %v13912_v25 = vpack.i.b16 %v11889_v52, %v11834_v4  ;;  %v12732_v54 = vrot.slane %v13934_v2, %v15040_v37  ;;  %13190 = vmatmul.mubr.bf16.gmra.mxu0 %v12699_v35  ;;  %13278 = vmatmul.mubr.bf16.gmra.mxu1 %v12700_v26  ;;  %v19278_v13 = vpack.i.b16 %v11892_v1, %v11989_v3 }
 0x44c   :  { %v12760_v18 = vrot.slane %v12710_v16, %v15040_v37  ;;  %v12584_v15 = vcombine.low %v19256_v23, %v19259_v46  ;;  %v12770_v0 = vcombine.low %v12725_v38, %v12739_v22  ;;  %v11715_v45 = vcombine.low %v19186_v30, %v19133_v44 }
 0x44d   :  { %v13936_v53 = vcombine.high %v19118_v51, %v13912_v25  ;;  %v12708_v39 = vcombine.low %v11832_v28, %v13912_v25  ;;  %v12769_v27 = vcombine.high %v12718_v57, %v12732_v54  ;;  %v12768_v10 = vcombine.low %v12718_v57, %v12732_v54 }
 0x44e   :  { %v12767_v51 = vrot.slane %v12711_v56, %v15040_v37  ;;  %v12828_v50 = vrot.slane %v19278_v13, %v15040_v37  ;;  %v12787_v48 = vrot.slane %v12770_v0, %v15040_v37  ;;  %v12594_v59 = vcombine.high %v19232_v21, %v19234_v60 }
 0x44f   :  { %v12753_v29 = vrot.slane %v13936_v53, %v15040_v37  ;;  %v12746_v5 = vrot.slane %v12708_v39, %v15040_v37  ;;  %v12794_v36 = vrot.slane %v12769_v27, %v15040_v37  ;;  %v12780_v47 = vrot.slane %v12768_v10, %v15040_v37 }
 0x450   :  { %v12836_v1 = vcombine.high %v12828_v50, %v12828_v50  ;;  %v12590_v4 = vcombine.high %v19205_v34, %v11715_v45  ;;  %v13933_v20 = vcombine.high %v11717_v24, %v19133_v44  ;;  %v12588_v14 = vcombine.high %v19175_v55, %v19177_v32 }
 0x451   :  { %v12772_v52 = vcombine.high %v12746_v5, %v12760_v18  ;;  %v12771_v61 = vcombine.low %v12746_v5, %v12760_v18  ;;  %v12773_v7 = vcombine.low %v12753_v29, %v12767_v51  ;;  %v12650_v2 = vrot.slane %v12594_v59, %v15040_v37 }
 0x452   :  { %v12857_v42 = vrot.slane %v12836_v1, %v15040_v37  ;;  %v12843_v8 = vrot.slane %v12828_v50, %v15040_v37  ;;  %v12622_v21 = vrot.slane %v12590_v4, %v15040_v37  ;;  %v12636_v60 = vrot.slane %v13933_v20, %v15040_v37 }
 0x453   :  { %v12815_v33 = vrot.slane %v12772_v52, %v15040_v37  ;;  %v12801_v11 = vrot.slane %v12771_v61, %v15040_v37  ;;  %v12808_v31 = vrot.slane %v12773_v7, %v15040_v37  ;;  %v12608_v56 = vrot.slane %v12588_v14, %v15040_v37 }
 0x454   :  { %v12859_v28 = vcombine.high %v12857_v42, %v12857_v42  ;;  %v12656_v34 = vcombine.low %v12636_v60, %v12650_v2  ;;  %v12858_v6 = vcombine.high %v12843_v8, %v12843_v8  ;;  %v12821_v43 = vcombine.high %v19278_v13, %v19278_v13  ;;  %v19397_v2 = vld [vmem:[%s19501_s6] ss:$0 sm:$0xff] }
 0x455   :  { %v12819_v30 = vcombine.low %v12794_v36, %v12815_v33  ;;  %v12820_v62 = vcombine.high %v12794_v36, %v12815_v33  ;;  %v12816_v41 = vcombine.low %v12780_v47, %v12801_v11  ;;  %v12817_v17 = vcombine.high %v12780_v47, %v12801_v11 }
 0x456   :  { %v12818_v63 = vcombine.low %v12787_v48, %v12808_v31  ;;  %v12653_v44 = vcombine.low %v12608_v56, %v12622_v21  ;;  %v12691_v55 = vrot.slane %v12656_v34, %v15040_v37 }
 0x457   :  { %13197 = vmatprep.mubr.bf16.mxu0 %v12819_v30  ;;  %13285 = vmatprep.mubr.bf16.mxu1 %v12820_v62 }
 0x458   :  { %13198 = vmatmul.mubr.bf16.gmra.mxu0 %v12816_v41  ;;  %13286 = vmatmul.mubr.bf16.gmra.mxu1 %v12817_v17  ;;  %v12670_v32 = vrot.slane %v12653_v44, %v15040_v37 }
 0x459   :  { %13205 = vmatprep.mubr.bf16.mxu0 %v12857_v42  ;;  %13293 = vmatprep.mubr.bf16.mxu1 %v12859_v28 }
 0x45a   :  { %v12701_v12 = vcombine.low %v12670_v32, %v12691_v55 }
 0x460   :  { %13206 = vmatmul.mubr.bf16.gmra.mxu0 %v12843_v8  ;;  %13294 = vmatmul.mubr.bf16.gmra.mxu1 %v12858_v6 }
 0x461   :  { %14681 = vmatprep.mubr.msk.bf16.mxu0 %vm14903_vm1, %v14902_v58  ;;  %14697 = vmatprep.mubr.msk.bf16.mxu1 %vm14903_vm1, %v14902_v58 }
 0x468   :  { %14682 = vmatmul.mubr.msk.bf16.vlgmr.msra.gmra.mxu0 %vm10896_vm0, %v18822_v9  ;;  %14698 = vmatmul.mubr.msk.bf16.vlgmr.msra.gmra.mxu1 %vm10896_vm0, %v12701_v12  ;;  %v12835_v9 = vrot.slane %v12821_v43, %v15040_v37 }
 0x469   :  { %14685 = vmatprep.mubr.msk.bf16.mxu0 %vm14903_vm1, %v14902_v58  ;;  %14701 = vmatprep.mubr.msk.bf16.mxu1 %vm14903_vm1, %v14902_v58 }
 0x46a   :  { %v12850_v25 = vrot.slane %v12835_v9, %v15040_v37 }
 0x470   :  { %14686 = vmatmul.mubr.msk.bf16.gmra.mxu0 %vm10896_vm0, %v19035_v49  ;;  %14702 = vmatmul.mubr.msk.bf16.gmra.mxu1 %vm10896_vm0, %v12818_v63 }
 0x471   :  { %14689 = vmatprep.mubr.msk.bf16.mxu0 %vm14903_vm1, %v14902_v58  ;;  %14705 = vmatprep.mubr.msk.bf16.mxu1 %vm14903_vm1, %v14902_v58 }
 0x478   :  { %14690 = vmatmul.mubr.msk.bf16.gmra.mxu0 %vm10896_vm0, %v19050_v19  ;;  %14706 = vmatmul.mubr.msk.bf16.gmra.mxu1 %vm10896_vm0, %v12850_v25 }
 0x479   :  { %14693 = vmatprep.mubr.msk.bf16.mxu0 %vm14903_vm1, %v14902_v58 }
 0x480   :  { %14694 = vmatmul.mubr.msk.bf16.gmra.mxu0 %vm10896_vm0, %v12584_v15 }
 0x4b8   :  { %v14562_v49 = vpop.f32.mrf.mxu0  ;;  %v14620_v40 = vpop.f32.mrf.mxu1 }
 0x4ba   :  { %v14563_v16 = vpop.f32.mrf.mxu0  ;;  %v14621_v54 = vpop.f32.mrf.mxu1 }
 0x4bb   :  { %v14564_v20 = vadd.f32 %v14563_v16, %v14562_v49  ;;  %v14622_v43 = vadd.f32 %v14621_v54, %v14620_v40 }
 0x4bc   :  { %v14565_v38 = vpop.f32.mrf.mxu0  ;;  %v19342_v35 = vpop.f32.mrf.mxu1 }
 0x4bd   :  { %v13160_v6 = vadd.f32 %v14564_v20, %v19397_v2 }
 0x4be   :  { %v14566_v37 = vpop.f32.mrf.mxu0  ;;  %v19344_v26 = vpop.f32.mrf.mxu1 }
 0x4bf   :  { %v14567_v60 = vadd.f32 %v14566_v37, %v14565_v38  ;;  %v13248_v37 = vadd.f32 %v14622_v43, %v13160_v6  ;;  %v14625_v20 = vadd.f32 %v19344_v26, %v19342_v35 }
 0x4c1   :  { %v13163_v25 = vadd.f32 %v14567_v60, %v19397_v2 }
 0x4c3   :  { %v14568_v19 = vpop.f32.mrf.mxu0  ;;  %v19346_v3 = vpop.f32.mrf.mxu1 }
 0x4c5   :  { %v14569_v22 = vpop.f32.mrf.mxu0  ;;  %v19348_v58 = vpop.f32.mrf.mxu1 }
 0x4c6   :  { %v14570_v49 = vadd.f32 %v14569_v22, %v14568_v19  ;;  %v14628_v35 = vadd.f32 %v19348_v58, %v19346_v3 }
 0x4c7   :  { %v19350_v53 = vpop.f32.mrf.mxu0  ;;  %v19352_v23 = vpop.f32.mrf.mxu1 }
 0x4c8   :  { %v13168_v40 = vadd.f32 %v14570_v49, %v19397_v2 }
 0x4c9   :  { %v19354_v46 = vpop.f32.mrf.mxu0  ;;  %v19356_v39 = vpop.f32.mrf.mxu1 }
 0x4ca   :  { %v14573_v54 = vadd.f32 %v19354_v46, %v19350_v53 }
 0x4cc   :  { %v13171_v46 = vadd.f32 %v14573_v54, %v19397_v2 }
 0x4d4   :  { %v19358_v57 = vpop.f32.mrf.mxu0  ;;  %v19360_v18 = vpop.f32.mrf.mxu1 }
 0x4d6   :  { %v19362_v13 = vpop.f32.mrf.mxu0  ;;  %v19364_v15 = vpop.f32.mrf.mxu1 }
 0x4d8   :  { %v19366_v29 = vpop.f32.mrf.mxu0  ;;  %v19368_v5 = vpop.f32.mrf.mxu1 }
 0x4da   :  { %v19370_v27 = vpop.f32.mrf.mxu0  ;;  %v19372_v10 = vpop.f32.mrf.mxu1 }
 0x4f7   :  { %v19374_v51 = vpop.f32.mrf.mxu0  ;;  %v19376_v50 = vpop.f32.mrf.mxu1 }
 0x4f9   :  { %v19378_v0 = vpop.f32.mrf.mxu0  ;;  %v19380_v52 = vpop.f32.mrf.mxu1 }
 0x4fb   :  { %v19382_v61 = vpop.f32.mrf.mxu0  ;;  %v19384_v45 = vpop.f32.mrf.mxu1 }
 0x4fc   :  { %19808 = vst [vmem:[#allocation10_spill] sm:$0xff] %v19384_v45 }
 0x4fd   :  { %v19386_v1 = vpop.f32.mrf.mxu0  ;;  %v19388_v7 = vpop.f32.mrf.mxu1 }
 0x4fe   :  { %19809 = vst [vmem:[#allocation11_spill] sm:$0xff] %v19388_v7 }
 0x50b   :  { %v14586_v36 = vpop.f32.mrf.mxu0  ;;  %v14644_v33 = vpop.f32.mrf.mxu1 }
 0x50d   :  { %v14587_v47 = vpop.f32.mrf.mxu0  ;;  %v14645_v11 = vpop.f32.mrf.mxu1 }
 0x50e   :  { %v14588_v14 = vadd.f32 %v14587_v47, %v14586_v36  ;;  %v14646_v9 = vadd.f32 %v14645_v11, %v14644_v33  ;;  %v13251_v11 = vadd.f32 %v14625_v20, %v13163_v25 }
 0x50f   :  { %v14589_v24 = vpop.f32.mrf.mxu0  ;;  %v14647_v42 = vpop.f32.mrf.mxu1 }
 0x510   :  { %v13192_v44 = vadd.f32 %v14588_v14, %v19397_v2 }
 0x511   :  { %v14590_v48 = vpop.f32.mrf.mxu0  ;;  %v14648_v31 = vpop.f32.mrf.mxu1 }
 0x512   :  { %v14591_v55 = vadd.f32 %v14590_v48, %v14589_v24  ;;  %v13280_v7 = vadd.f32 %v14646_v9, %v13192_v44  ;;  %v14649_v24 = vadd.f32 %v14648_v31, %v14647_v42 }
 0x514   :  { %v13195_v38 = vadd.f32 %v14591_v55, %v19397_v2  ;;  %v14576_v55 = vadd.f32 %v19362_v13, %v19358_v57  ;;  %v14631_v57 = vadd.f32 %v19356_v39, %v19352_v23 }
 0x516   :  { %v13283_v6 = vadd.f32 %v14649_v24, %v13195_v38  ;;  %v13259_v20 = vadd.f32 %v14631_v57, %v13171_v46  ;;  %v14640_v46 = vadd.f32 %v19380_v52, %v19376_v50  ;;  %v19810_v50 = vld [vmem:[#allocation10_spill] sm:$0xff]  ;;  %v19811_v52 = vld [vmem:[#allocation11_spill] sm:$0xff] }
 0x518   :  { %v14592_v30 = vpop.f32.mrf.mxu0  ;;  %v14650_v62 = vpop.f32.mrf.mxu1 }
 0x51a   :  { %v14593_v41 = vpop.f32.mrf.mxu0  ;;  %v14651_v17 = vpop.f32.mrf.mxu1 }
 0x51b   :  { %v14594_v16 = vadd.f32 %v14593_v41, %v14592_v30  ;;  %v14652_v26 = vadd.f32 %v14651_v17, %v14650_v62 }
 0x51c   :  { %v14595_v59 = vpop.f32.mrf.mxu0  ;;  %v19390_v63 = vpop.f32.mrf.mxu1 }
 0x51d   :  { %v13200_v19 = vadd.f32 %v14594_v16, %v19397_v2 }
 0x51e   :  { %v14596_v28 = vpop.f32.mrf.mxu0  ;;  %v19392_v4 = vpop.f32.mrf.mxu1 }
 0x51f   :  { %v14597_v30 = vadd.f32 %v14596_v28, %v14595_v59  ;;  %v13288_v43 = vadd.f32 %v14652_v26, %v13200_v19  ;;  %v14655_v13 = vadd.f32 %v19392_v4, %v19390_v63 }
 0x520   :  { %v14598_v8 = vpop.f32.mrf.mxu0  ;;  %v19399_v21 = vpop.f32.mrf.mxu1 }
 0x521   :  { %v13203_v9 = vadd.f32 %v14597_v30, %v19397_v2  ;;  %v14582_v30 = vadd.f32 %v19378_v0, %v19374_v51 }
 0x522   :  { %v14599_v56 = vpop.f32.mrf.mxu0  ;;  %v19401_v34 = vpop.f32.mrf.mxu1 }
 0x523   :  { %v14600_v3 = vadd.f32 %v14599_v56, %v14598_v8  ;;  %v13291_v63 = vadd.f32 %v14655_v13, %v13203_v9 }
 0x524   :  { %v14601_v32 = vpop.f32.mrf.mxu0  ;;  %v14659_v12 = vpop.f32.mrf.mxu1 }
 0x525   :  { %v13256_v12 = vadd.f32 %v14628_v35, %v13168_v40 }
 0x526   :  { %v14602_v36 = vpop.f32.mrf.mxu0  ;;  %v14660_v47 = vpop.f32.mrf.mxu1 }
 0x527   :  { %v13176_v36 = vadd.f32 %v14576_v55, %v19397_v2  ;;  %v14579_v47 = vadd.f32 %v19370_v27, %v19366_v29  ;;  %v14634_v29 = vadd.f32 %v19364_v15, %v19360_v18  ;;  %v14658_v27 = vadd.f32 %v19401_v34, %v19399_v21 }
 0x528   :  { %v13335_v45 = vpop.f32.mrf.mxu0  ;;  %v13367_v14 = vpop.f32.mrf.mxu1  ;;  %v14637_v34 = vadd.f32 %v19372_v10, %v19368_v5 }
 0x529   :  { %v13336_v48 = vadd.f32 %v13335_v45, %v13248_v37  ;;  %v13368_v32 = vadd.f32 %v13367_v14, %v13280_v7  ;;  %v13208_v14 = vadd.f32 %v14600_v3, %v19397_v2  ;;  %v13179_v19 = vadd.f32 %v14579_v47, %v19397_v2 }
 0x52a   :  { %v14683_v22 = vpop.f32.mrf.mxu0  ;;  %v14699_v33 = vpop.f32.mrf.mxu1 }
 0x52b   :  { %v13389_v41 = vmax.f32 %v13336_v48, 0.0  ;;  %v13397_v60 = vmax.f32 %v13368_v32, 0.0  ;;  %v13296_v21 = vadd.f32 %v14658_v27, %v13208_v14 }
 0x52c   :  { %v13338_v45 = vpop.f32.mrf.mxu0  ;;  %v13370_v7 = vpop.f32.mrf.mxu1 }
 0x52d   :  { %v13993_v42 = vpack.c.bf16 %v13389_v41, %v13389_v41  ;;  %v14001_v31 = vpack.c.bf16 %v13397_v60, %v13397_v60  ;;  %v13339_v44 = vadd.f32 %v13338_v45, %v13251_v11  ;;  %v13371_v53 = vadd.f32 %v13370_v7, %v13283_v6 }
 0x52e   :  { %v14684_v59 = vpop.f32.mrf.mxu0  ;;  %v14700_v28 = vpop.f32.mrf.mxu1  ;;  %v13264_v11 = vadd.f32 %v14634_v29, %v13176_v36  ;;  %v13267_v7 = vadd.f32 %v14637_v34, %v13179_v19 }
 0x52f   :  { %13456 = vst.msk [vmem:[%s19502_s7] sm:$0xf] %vm13455_vm2, %v13993_v42  ;;  %13464 = vst.msk [vmem:[%s19502_s7 + $0x20] sm:$0xf] %vm13455_vm2, %v14001_v31  ;;  %v13390_v58 = vmax.f32 %v13339_v44, 0.0  ;;  %v13398_v62 = vmax.f32 %v13371_v53, 0.0  ;;  %v13184_v42 = vadd.f32 %v14582_v30, %v19397_v2  ;;  %v14585_v31 = vadd.f32 %v19386_v1, %v19382_v61 }
 0x530   :  { %v13343_v17 = vpop.f32.mrf.mxu0  ;;  %v13375_v8 = vpop.f32.mrf.mxu1 }
 0x531   :  { %v13994_v56 = vpack.c.bf16 %v13390_v58, %v13390_v58  ;;  %v14002_v25 = vpack.c.bf16 %v13398_v62, %v13398_v62  ;;  %v13344_v49 = vadd.f32 %v13343_v17, %v13256_v12  ;;  %v13376_v16 = vadd.f32 %v13375_v8, %v13288_v43 }
 0x532   :  { %v14687_v38 = vpop.f32.mrf.mxu0  ;;  %v14703_v37 = vpop.f32.mrf.mxu1  ;;  %v13187_v12 = vadd.f32 %v14585_v31, %v19397_v2  ;;  %v13272_v9 = vadd.f32 %v14640_v46, %v13184_v42  ;;  %v14643_v58 = vadd.f32 %v19811_v52, %v19810_v50 }
 0x533   :  { %13457 = vst.msk [vmem:[%s19502_s7 + $0x4] sm:$0xf] %vm13455_vm2, %v13994_v56  ;;  %13465 = vst.msk [vmem:[%s19502_s7 + $0x24] sm:$0xf] %vm13455_vm2, %v14002_v25  ;;  %v13391_v23 = vmax.f32 %v13344_v49, 0.0  ;;  %v13399_v39 = vmax.f32 %v13376_v16, 0.0 }
 0x534   :  { %v13346_v4 = vpop.f32.mrf.mxu0  ;;  %v13378_v24 = vpop.f32.mrf.mxu1  ;;  %v13275_v17 = vadd.f32 %v14643_v58, %v13187_v12 }
 0x535   :  { %v13995_v48 = vpack.c.bf16 %v13391_v23, %v13391_v23  ;;  %v14003_v32 = vpack.c.bf16 %v13399_v39, %v13399_v39  ;;  %v13347_v40 = vadd.f32 %v13346_v4, %v13259_v20  ;;  %v13379_v54 = vadd.f32 %v13378_v24, %v13291_v63 }
 0x536   :  { %v14688_v22 = vpop.f32.mrf.mxu0  ;;  %v14704_v33 = vpop.f32.mrf.mxu1 }
 0x537   :  { %13458 = vst.msk [vmem:[%s19502_s7 + $0x8] sm:$0xf] %vm13455_vm2, %v13995_v48  ;;  %13466 = vst.msk [vmem:[%s19502_s7 + $0x28] sm:$0xf] %vm13455_vm2, %v14003_v32  ;;  %v13392_v18 = vmax.f32 %v13347_v40, 0.0  ;;  %v13400_v15 = vmax.f32 %v13379_v54, 0.0 }
 0x538   :  { %v13351_v41 = vpop.f32.mrf.mxu0  ;;  %v13383_v60 = vpop.f32.mrf.mxu1 }
 0x539   :  { %v13996_v6 = vpack.c.bf16 %v13392_v18, %v13392_v18  ;;  %v14004_v51 = vpack.c.bf16 %v13400_v15, %v13400_v15  ;;  %v13352_v0 = vadd.f32 %v13351_v41, %v13264_v11  ;;  %v13384_v35 = vadd.f32 %v13383_v60, %v13296_v21 }
 0x53a   :  { %v14691_v26 = vpop.f32.mrf.mxu0  ;;  %v14707_v45 = vpop.f32.mrf.mxu1 }
 0x53b   :  { %13459 = vst.msk [vmem:[%s19502_s7 + $0xc] sm:$0xf] %vm13455_vm2, %v13996_v6  ;;  %13467 = vst.msk [vmem:[%s19502_s7 + $0x2c] sm:$0xf] %vm13455_vm2, %v14004_v51  ;;  %v13393_v5 = vmax.f32 %v13352_v0, 0.0  ;;  %v13401_v10 = vmax.f32 %v13384_v35, 0.0 }
 0x53c   :  { %v13354_v44 = vpop.f32.mrf.mxu0  ;;  %v13386_v53 = vpop.f32.mrf.mxu1 }
 0x53d   :  { %v13997_v55 = vpack.c.bf16 %v13393_v5, %v13393_v5  ;;  %v14005_v61 = vpack.c.bf16 %v13401_v10, %v13401_v10  ;;  %v13355_v1 = vadd.f32 %v13354_v44, %v13267_v7 }
 0x53e   :  { %v14692_v59 = vpop.f32.mrf.mxu0  ;;  %v14708_v28 = vpop.f32.mrf.mxu1 }
 0x53f   :  { %13460 = vst.msk [vmem:[%s19502_s7 + $0x10] sm:$0xf] %vm13455_vm2, %v13997_v55  ;;  %v13394_v43 = vmax.f32 %v13355_v1, 0.0 }
 0x540   :  { %13469 = vst.msk [vmem:[%s19502_s7 + $0x30] sm:$0x1] %vm13468_vm3, %v14005_v61  ;;  %v13359_v3 = vpop.f32.mrf.mxu0 }
 0x541   :  { %v13998_v62 = vpack.c.bf16 %v13394_v43, %v13394_v43  ;;  %v13360_v57 = vadd.f32 %v13359_v3, %v13272_v9 }
 0x542   :  { %v14695_v13 = vpop.f32.mrf.mxu0 }
 0x543   :  { %13461 = vst.msk [vmem:[%s19502_s7 + $0x14] sm:$0xf] %vm13455_vm2, %v13998_v62  ;;  %v13395_v2 = vmax.f32 %v13360_v57, 0.0 }
 0x544   :  { %v13362_v8 = vpop.f32.mrf.mxu0 }
 0x545   :  { %v13999_v56 = vpack.c.bf16 %v13395_v2, %v13395_v2  ;;  %v13363_v25 = vadd.f32 %v13362_v8, %v13275_v17 }
 0x546   :  { %v14696_v49 = vpop.f32.mrf.mxu0 }
 0x547   :  { %13462 = vst.msk [vmem:[%s19502_s7 + $0x18] sm:$0xf] %vm13455_vm2, %v13999_v56  ;;  %v13396_v16 = vmax.f32 %v13363_v25, 0.0 }
 0x549   :  { %v14000_v36 = vpack.c.bf16 %v13396_v16, %v13396_v16 }
 0x54b   :  { %13463 = vst.msk [vmem:[%s19502_s7 + $0x1c] sm:$0xf] %vm13455_vm2, %v14000_v36 }

</bundles_post_ra>
